<compile_context>
chip_gen: v6e
topology: v6e:2x2x1
jax: 0.10.0
libtpu: 0.0.40
codegen_flags: <defaults>
</compile_context>

<pallas_src>
import functools

import jax
import jax.numpy as jnp
from jax.experimental import pallas as pl
from jax.experimental.pallas import tpu as pltpu


def _round_up(x, m):
    return ((x + m - 1) // m) * m


def _qnet_kernel(x_ref, w1_ref, b1_ref, w2_ref, s2_ref, b2_ref, w3_ref, b3_ref,
                 o_ref, acc_ref):
    k = pl.program_id(1)

    @pl.when(k == 0)
    def _():
        acc_ref[...] = jnp.zeros_like(acc_ref)

    # fc1 for this hidden-dim block: h1_blk = relu(x @ W1[:, blk] + b1[blk])  (f32)
    h1 = jnp.dot(x_ref[...], w1_ref[...], preferred_element_type=jnp.float32)
    h1 = jnp.maximum(h1 + b1_ref[...], 0.0)

    # fc2 partial reduction into the resident f32 accumulator.
    # W2 is stored int8 (per-output-channel symmetric quant); int8 -> bf16 is exact,
    # the f32 scale is applied once in the epilogue.
    acc_ref[...] += jnp.dot(h1.astype(jnp.bfloat16),
                            w2_ref[...].astype(jnp.bfloat16),
                            preferred_element_type=jnp.float32)

    # Epilogue at the last reduction step: dequant scale + bias2 + ReLU, then fc3 + bias3.
    @pl.when(k == pl.num_programs(1) - 1)
    def _():
        h2 = jnp.maximum(acc_ref[...] * s2_ref[...] + b2_ref[...], 0.0)
        out = jnp.dot(h2.astype(jnp.bfloat16), w3_ref[...],
                      preferred_element_type=jnp.float32) + b3_ref[...]
        o_ref[...] = out.astype(o_ref.dtype)


@functools.partial(jax.jit, static_argnames=("n_out", "tk"))
def qnet_forward(x, w1, b1, w2q, s2, b2, w3, b3, *, n_out, tk):
    """Fused 3-layer MLP forward. Params already padded/quantized (see QNetworkPallas)."""
    M, K = x.shape
    Kp1, H1p = w1.shape
    H1p2, H2p = w2q.shape
    H2p2, Np3 = w3.shape
    assert H1p == H1p2 and H2p == H2p2 and H1p % tk == 0 and K <= Kp1

    # Batch tile: cover the whole (padded) batch when it fits so W2 streams exactly
    # once; fall back to 256-row tiles only for very large batches.
    Mp = _round_up(M, 16)
    tm = Mp if Mp <= 256 else 256
    Mp = _round_up(Mp, tm)

    # Only the tiny activation is padded / cast per call (weights were padded at init).
    x_p = jnp.pad(x, ((0, Mp - M), (0, Kp1 - K))).astype(jnp.bfloat16)

    grid = (Mp // tm, H1p // tk)
    n_i = grid[0]

    bytes_accessed = int(
        x_p.size * 2 + Mp * Np3 * 4
        + n_i * (w1.size * 2 + b1.size * 4 + w2q.size * 1)
        + s2.size * 4 + b2.size * 4 + w3.size * 2 + b3.size * 4)
    flops = int(2 * Mp * (Kp1 * H1p + H1p * H2p + H2p * Np3))

    out = pl.pallas_call(
        _qnet_kernel,
        out_shape=jax.ShapeDtypeStruct((Mp, Np3), jnp.float32),
        grid_spec=pltpu.PrefetchScalarGridSpec(
            num_scalar_prefetch=0,
            grid=grid,
            in_specs=[
                pl.BlockSpec((tm, Kp1), lambda i, k: (i, 0)),    # x (resident per i)
                pl.BlockSpec((Kp1, tk), lambda i, k: (0, k)),    # W1 column block
                pl.BlockSpec((1, tk), lambda i, k: (0, k)),      # b1 block
                pl.BlockSpec((tk, H2p), lambda i, k: (k, 0)),    # W2 row block (int8, dominant DMA)
                pl.BlockSpec((1, H2p), lambda i, k: (0, 0)),     # W2 dequant scale
                pl.BlockSpec((1, H2p), lambda i, k: (0, 0)),     # b2
                pl.BlockSpec((H2p, Np3), lambda i, k: (0, 0)),   # W3
                pl.BlockSpec((1, Np3), lambda i, k: (0, 0)),     # b3
            ],
            out_specs=pl.BlockSpec((tm, Np3), lambda i, k: (i, 0)),
            scratch_shapes=[pltpu.VMEM((tm, H2p), jnp.float32)],
        ),
        compiler_params=pltpu.CompilerParams(
            dimension_semantics=("parallel", "arbitrary"),
            vmem_limit_bytes=32 * 1024 * 1024),
        cost_estimate=pl.CostEstimate(flops=flops, transcendentals=0,
                                      bytes_accessed=bytes_accessed),
    )(x_p, w1, b1, w2q, s2, b2, w3, b3)

    return out[:M, :n_out]


class QNetworkPallas:
    """Mirrors QNetwork: fc1(in->10000) -> relu -> fc2(10000->1000) -> relu -> fc3(1000->actions)."""

    HIDDEN1 = 10000
    HIDDEN2 = 1000
    TK = 2560  # hidden-dim block per grid step (10000 pads to 10240 = 4 * 2560)

    def __init__(self, input_size, action_size, key, param_dtype=jnp.bfloat16):
        self.input_size = input_size
        self.action_size = action_size
        self.param_dtype = param_dtype

        # Padded sizes — padding/quantization happens ONCE here, never in the forward path.
        self.kp1 = _round_up(input_size, 16)
        self.h1p = _round_up(self.HIDDEN1, self.TK)   # 10240
        self.h2p = _round_up(self.HIDDEN2, 128)       # 1024
        self.np3 = _round_up(action_size, 128)        # lane-dense output block

        def init_linear(key, fan_in, fan_out, pad_in, pad_out):
            # PyTorch nn.Linear default init: U(-1/sqrt(fan_in), 1/sqrt(fan_in)).
            kw, kb = jax.random.split(key)
            bound = 1.0 / float(fan_in) ** 0.5
            w = jax.random.uniform(kw, (fan_in, fan_out), jnp.float32, -bound, bound)
            b = jax.random.uniform(kb, (fan_out,), jnp.float32, -bound, bound)
            w_p = jnp.pad(w, ((0, pad_in - fan_in), (0, pad_out - fan_out)))
            b_p = jnp.pad(b, (0, pad_out - fan_out)).reshape(1, pad_out)
            return w_p, b_p

        k1, k2, k3 = jax.random.split(key, 3)
        w1, self.b1 = init_linear(k1, input_size, self.HIDDEN1, self.kp1, self.h1p)
        w2, self.b2 = init_linear(k2, self.HIDDEN1, self.HIDDEN2, self.h1p, self.h2p)
        w3, self.b3 = init_linear(k3, self.HIDDEN2, action_size, self.h2p, self.np3)

        # Small weights in bf16 (MXU-native); the dominant W2 in int8 with
        # per-output-channel scale (dequant fused into the bias2 epilogue).
        self.w1 = w1.astype(param_dtype)
        self.w3 = w3.astype(param_dtype)
        s2 = jnp.maximum(jnp.max(jnp.abs(w2), axis=0, keepdims=True), 1e-8) / 127.0
        self.w2_q = jnp.clip(jnp.round(w2 / s2), -127, 127).astype(jnp.int8)
        self.s2 = s2.astype(jnp.float32)
        # Biases stay f32 (f32 epilogues also keep v5e's no-bf16 VPU happy).

    def __call__(self, state):
        return qnet_forward(state, self.w1, self.b1, self.w2_q, self.s2, self.b2,
                            self.w3, self.b3, n_out=self.action_size, tk=self.TK)

    def reference(self, state):
        """Pure-JAX reference mirroring the kernel's precision/quantization choices."""
        f32 = jnp.float32
        x = jnp.pad(state, ((0, 0), (0, self.kp1 - state.shape[1]))).astype(jnp.bfloat16)
        h1 = jnp.maximum(
            jnp.dot(x, self.w1, preferred_element_type=f32) + self.b1, 0.0)
        acc = jnp.dot(h1.astype(jnp.bfloat16), self.w2_q.astype(jnp.bfloat16),
                      preferred_element_type=f32)
        h2 = jnp.maximum(acc * self.s2 + self.b2, 0.0)
        out = jnp.dot(h2.astype(jnp.bfloat16), self.w3,
                      preferred_element_type=f32) + self.b3
        return out[:, :self.action_size]


if __name__ == "__main__":
    # Small, env-consistent sizes: input = multi_discrete_size + multi_binary_size,
    # action = prod(action_space.nvec).
    batch = 4
    input_size = 32
    action_size = 12

    key = jax.random.PRNGKey(0)
    key_params, key_x = jax.random.split(key)

    net = QNetworkPallas(input_size, action_size, key_params)
    state = jax.random.normal(key_x, (batch, input_size), jnp.float32)

    q_values = jax.block_until_ready(net(state))

    ref = net.reference(state)
    assert q_values.shape == (batch, action_size)
    assert jnp.allclose(q_values, ref, atol=1e-2, rtol=1e-2), float(
        jnp.max(jnp.abs(q_values - ref))
    )

    print("KERNEL_OK")
</pallas_src>

<mosaic_0001>
module attributes {stable_mosaic.version = 11 : i64} {
  func.func @_qnet_kernel(%arg0: i32, %arg1: i32, %arg2: memref<16x32xbf16, #tpu.memory_space<vmem>>, %arg3: memref<32x2560xbf16, #tpu.memory_space<vmem>>, %arg4: memref<1x2560xf32, #tpu.memory_space<vmem>>, %arg5: memref<2560x1024xi8, #tpu.memory_space<vmem>>, %arg6: memref<1x1024xf32, #tpu.memory_space<vmem>>, %arg7: memref<1x1024xf32, #tpu.memory_space<vmem>>, %arg8: memref<1024x128xbf16, #tpu.memory_space<vmem>>, %arg9: memref<1x128xf32, #tpu.memory_space<vmem>>, %arg10: memref<16x128xf32, #tpu.memory_space<vmem>>, %arg11: memref<16x1024xf32, #tpu.memory_space<vmem>>) attributes {dimension_semantics = [#tpu.dimension_semantics<parallel>, #tpu.dimension_semantics<arbitrary>], iteration_bounds = array<i64: 1, 4>, scalar_prefetch = 0 : i64, scratch_operands = 1 : i64, tpu.core_type = #tpu.core_type<tc>, window_params = [{transform_indices = @transform_0, window_bounds = array<i64: 16, 32>}, {transform_indices = @transform_1, window_bounds = array<i64: 32, 2560>}, {transform_indices = @transform_2, window_bounds = array<i64: 1, 2560>}, {transform_indices = @transform_3, window_bounds = array<i64: 2560, 1024>}, {pipeline_mode = #tpu.pipeline_mode<synchronous>, transform_indices = @transform_4, window_bounds = array<i64: 1, 1024>}, {pipeline_mode = #tpu.pipeline_mode<synchronous>, transform_indices = @transform_5, window_bounds = array<i64: 1, 1024>}, {pipeline_mode = #tpu.pipeline_mode<synchronous>, transform_indices = @transform_6, window_bounds = array<i64: 1024, 128>}, {pipeline_mode = #tpu.pipeline_mode<synchronous>, transform_indices = @transform_7, window_bounds = array<i64: 1, 128>}, {transform_indices = @transform_8, window_bounds = array<i64: 16, 128>}]} {
    %c0_i32 = arith.constant 0 : i32
    %0 = arith.cmpi eq, %arg1, %c0_i32 : i32
    %1 = arith.extui %0 : i1 to i32
    %c0_i32_0 = arith.constant 0 : i32
    %2 = arith.cmpi ne, %1, %c0_i32_0 : i32
    scf.if %2 {
      %cst_15 = arith.constant 0.000000e+00 : f32
      %21 = vector.broadcast %cst_15 : f32 to vector<16x1024xf32>
      %c0_16 = arith.constant 0 : index
      %c0_17 = arith.constant 0 : index
      %22 = vector.load %arg11[%c0_16, %c0_17] : memref<16x1024xf32, #tpu.memory_space<vmem>>, vector<16x1024xf32>
      tpu.vector_store %arg11[%c0_16, %c0_17], %21 {strides = array<i32>} : memref<16x1024xf32, #tpu.memory_space<vmem>>, vector<16x1024xf32>,
    } else {
    }
    %c0 = arith.constant 0 : index
    %c0_1 = arith.constant 0 : index
    %3 = vector.load %arg2[%c0, %c0_1] : memref<16x32xbf16, #tpu.memory_space<vmem>>, vector<16x32xbf16>
    %c0_2 = arith.constant 0 : index
    %c0_3 = arith.constant 0 : index
    %4 = vector.load %arg3[%c0_2, %c0_3] : memref<32x2560xbf16, #tpu.memory_space<vmem>>, vector<32x2560xbf16>
    %cst = arith.constant dense<0.000000e+00> : vector<16x2560xf32>
    %5 = tpu.matmul %3, %4, %cst {dimension_numbers = #tpu.dot_dimension_numbers<[1], [0], [0], [1], [0, 0, 1, 1], [], []>} : vector<16x32xbf16>, vector<32x2560xbf16>, vector<16x2560xf32> -> vector<16x2560xf32>
    %c0_4 = arith.constant 0 : index
    %c0_5 = arith.constant 0 : index
    %6 = vector.load %arg4[%c0_4, %c0_5] : memref<1x2560xf32, #tpu.memory_space<vmem>>, vector<1x2560xf32>
    %7 = vector.broadcast %6 : vector<1x2560xf32> to vector<16x2560xf32>
    %8 = arith.addf %5, %7 : vector<16x2560xf32>
    %cst_6 = arith.constant 0.000000e+00 : f32
    %9 = vector.broadcast %cst_6 : f32 to vector<16x2560xf32>
    %10 = arith.maximumf %8, %9 : vector<16x2560xf32>
    %c0_7 = arith.constant 0 : index
    %c0_8 = arith.constant 0 : index
    %11 = vector.load %arg11[%c0_7, %c0_8] : memref<16x1024xf32, #tpu.memory_space<vmem>>, vector<16x1024xf32>
    %12 = arith.truncf %10 : vector<16x2560xf32> to vector<16x2560xbf16>
    %c0_9 = arith.constant 0 : index
    %c0_10 = arith.constant 0 : index
    %13 = vector.load %arg5[%c0_9, %c0_10] : memref<2560x1024xi8, #tpu.memory_space<vmem>>, vector<2560x1024xi8>
    %14 = arith.sitofp %13 : vector<2560x1024xi8> to vector<2560x1024xbf16>
    %cst_11 = arith.constant dense<0.000000e+00> : vector<16x1024xf32>
    %15 = tpu.matmul %12, %14, %cst_11 {dimension_numbers = #tpu.dot_dimension_numbers<[1], [0], [0], [1], [0, 0, 1, 1], [], []>} : vector<16x2560xbf16>, vector<2560x1024xbf16>, vector<16x1024xf32> -> vector<16x1024xf32>
    %16 = arith.addf %11, %15 : vector<16x1024xf32>
    %c0_12 = arith.constant 0 : index
    %c0_13 = arith.constant 0 : index
    %17 = vector.load %arg11[%c0_12, %c0_13] : memref<16x1024xf32, #tpu.memory_space<vmem>>, vector<16x1024xf32>
    tpu.vector_store %arg11[%c0_12, %c0_13], %16 {strides = array<i32>} : memref<16x1024xf32, #tpu.memory_space<vmem>>, vector<16x1024xf32>,
    %c3_i32 = arith.constant 3 : i32
    %18 = arith.cmpi eq, %arg1, %c3_i32 : i32
    %19 = arith.extui %18 : i1 to i32
    %c0_i32_14 = arith.constant 0 : i32
    %20 = arith.cmpi ne, %19, %c0_i32_14 : i32
    scf.if %20 {
      %c0_15 = arith.constant 0 : index
      %c0_16 = arith.constant 0 : index
      %21 = vector.load %arg11[%c0_15, %c0_16] : memref<16x1024xf32, #tpu.memory_space<vmem>>, vector<16x1024xf32>
      %c0_17 = arith.constant 0 : index
      %c0_18 = arith.constant 0 : index
      %22 = vector.load %arg6[%c0_17, %c0_18] : memref<1x1024xf32, #tpu.memory_space<vmem>>, vector<1x1024xf32>
      %23 = vector.broadcast %22 : vector<1x1024xf32> to vector<16x1024xf32>
      %24 = arith.mulf %21, %23 : vector<16x1024xf32>
      %c0_19 = arith.constant 0 : index
      %c0_20 = arith.constant 0 : index
      %25 = vector.load %arg7[%c0_19, %c0_20] : memref<1x1024xf32, #tpu.memory_space<vmem>>, vector<1x1024xf32>
      %26 = vector.broadcast %25 : vector<1x1024xf32> to vector<16x1024xf32>
      %27 = arith.addf %24, %26 : vector<16x1024xf32>
      %cst_21 = arith.constant 0.000000e+00 : f32
      %28 = vector.broadcast %cst_21 : f32 to vector<16x1024xf32>
      %29 = arith.maximumf %27, %28 : vector<16x1024xf32>
      %30 = arith.truncf %29 : vector<16x1024xf32> to vector<16x1024xbf16>
      %c0_22 = arith.constant 0 : index
      %c0_23 = arith.constant 0 : index
      %31 = vector.load %arg8[%c0_22, %c0_23] : memref<1024x128xbf16, #tpu.memory_space<vmem>>, vector<1024x128xbf16>
      %cst_24 = arith.constant dense<0.000000e+00> : vector<16x128xf32>
      %32 = tpu.matmul %30, %31, %cst_24 {dimension_numbers = #tpu.dot_dimension_numbers<[1], [0], [0], [1], [0, 0, 1, 1], [], []>} : vector<16x1024xbf16>, vector<1024x128xbf16>, vector<16x128xf32> -> vector<16x128xf32>
      %c0_25 = arith.constant 0 : index
      %c0_26 = arith.constant 0 : index
      %33 = vector.load %arg9[%c0_25, %c0_26] : memref<1x128xf32, #tpu.memory_space<vmem>>, vector<1x128xf32>
      %34 = vector.broadcast %33 : vector<1x128xf32> to vector<16x128xf32>
      %35 = arith.addf %32, %34 : vector<16x128xf32>
      %c0_27 = arith.constant 0 : index
      %c0_28 = arith.constant 0 : index
      %36 = vector.load %arg10[%c0_27, %c0_28] : memref<16x128xf32, #tpu.memory_space<vmem>>, vector<16x128xf32>
      tpu.vector_store %arg10[%c0_27, %c0_28], %35 {strides = array<i32>} : memref<16x128xf32, #tpu.memory_space<vmem>>, vector<16x128xf32>,
    } else {
    }
    return
  }
  func.func @transform_0(%arg0: i32, %arg1: i32) -> (i32, i32) {
    %c0_i32 = arith.constant 0 : i32
    %c0_i32_0 = arith.constant 0 : i32
    return %arg0, %c0_i32 : i32, i32
  }
  func.func @transform_1(%arg0: i32, %arg1: i32) -> (i32, i32) {
    %c0_i32 = arith.constant 0 : i32
    %c0_i32_0 = arith.constant 0 : i32
    return %c0_i32, %arg1 : i32, i32
  }
  func.func @transform_2(%arg0: i32, %arg1: i32) -> (i32, i32) {
    %c0_i32 = arith.constant 0 : i32
    %c0_i32_0 = arith.constant 0 : i32
    return %c0_i32, %arg1 : i32, i32
  }
  func.func @transform_3(%arg0: i32, %arg1: i32) -> (i32, i32) {
    %c0_i32 = arith.constant 0 : i32
    %c0_i32_0 = arith.constant 0 : i32
    return %arg1, %c0_i32 : i32, i32
  }
  func.func @transform_4(%arg0: i32, %arg1: i32) -> (i32, i32) {
    %c0_i32 = arith.constant 0 : i32
    %c0_i32_0 = arith.constant 0 : i32
    %c0_i32_1 = arith.constant 0 : i32
    return %c0_i32, %c0_i32_0 : i32, i32
  }
  func.func @transform_5(%arg0: i32, %arg1: i32) -> (i32, i32) {
    %c0_i32 = arith.constant 0 : i32
    %c0_i32_0 = arith.constant 0 : i32
    %c0_i32_1 = arith.constant 0 : i32
    return %c0_i32, %c0_i32_0 : i32, i32
  }
  func.func @transform_6(%arg0: i32, %arg1: i32) -> (i32, i32) {
    %c0_i32 = arith.constant 0 : i32
    %c0_i32_0 = arith.constant 0 : i32
    %c0_i32_1 = arith.constant 0 : i32
    return %c0_i32, %c0_i32_0 : i32, i32
  }
  func.func @transform_7(%arg0: i32, %arg1: i32) -> (i32, i32) {
    %c0_i32 = arith.constant 0 : i32
    %c0_i32_0 = arith.constant 0 : i32
    %c0_i32_1 = arith.constant 0 : i32
    return %c0_i32, %c0_i32_0 : i32, i32
  }
  func.func @transform_8(%arg0: i32, %arg1: i32) -> (i32, i32) {
    %c0_i32 = arith.constant 0 : i32
    %c0_i32_0 = arith.constant 0 : i32
    return %arg0, %c0_i32 : i32, i32
  }
}

</mosaic_0001>

<bundles_post_ra>
// kernel: qnet_forward.1
= control target key start
LH: loop header
LB: loop body
LE: loop exit
PB: predicated region body
PF: predicated region fallthrough
CT: control target
= control target key end

     0   :  { %s8241_s0 = inlined_call_operand.vmem [shape: bf16[16,32], index: 0, kind: input, shape index: {}]   ;;  %s8242_s1 = inlined_call_operand.hbm [shape: bf16[32,10240], index: 1, kind: input, shape index: {}]   ;;  %s8243_s2 = inlined_call_operand.hbm [shape: f32[1,10240], index: 2, kind: input, shape index: {}]   ;;  %s8244_s3 = inlined_call_operand.hbm [shape: s8[10240,1024], index: 3, kind: input, shape index: {}]   ;;  %s8245_s4 = inlined_call_operand.hbm [shape: f32[1,1024], index: 4, kind: input, shape index: {}]   ;;  %s8246_s5 = inlined_call_operand.hbm [shape: f32[1,1024], index: 5, kind: input, shape index: {}]   ;;  %s8247_s6 = inlined_call_operand.hbm [shape: bf16[1024,128], index: 6, kind: input, shape index: {}]   ;;  %s8248_s7 = inlined_call_operand.hbm [shape: f32[1,128], index: 7, kind: input, shape index: {}]   ;;  %s8249_s8 = inlined_call_operand.vmem [shape: f32[16,128], index: 8, kind: output, shape index: {}]  }
   0x1   :  { %8267 = sst [smem:[#allocation23_spill]] %s8241_s0 }
   0x2   :  { %8268 = sst [smem:[#allocation24_spill]] %s8242_s1 }
   0x3   :  { %8269 = sst [smem:[#allocation25_spill]] %s8243_s2 }
   0x4   :  { %8270 = sst [smem:[#allocation26_spill]] %s8245_s4 }
   0x5   :  { %8271 = sst [smem:[#allocation27_spill]] %s8246_s5 }
   0x6   :  { %8272 = sst [smem:[#allocation28_spill]] %s8247_s6 }
   0x7   :  { %8273 = sst [smem:[#allocation29_spill]] %s8249_s8 }
   0x8   :  { %13 = vsyncpa [#allocation4], 0 }
   0x9   :  { %15 = vsyncpa [#allocation4 + $0x1], 0 }
   0xa   :  { %16 = vsyncpa [#allocation6], 0 }
   0xb   :  { %18 = vsyncpa [#allocation6 + $0x1], 0 }
   0xc   :  { %19 = vsyncpa [#allocation9], 0 }
   0xd   :  { %20 = vsyncpa [#allocation12], 0  ;;  %s6851_s27 = smov 0   ;;  %s6853_s28 = smov 0  }
   0xe   :  { %s6855_s29 = smov 0   ;;  %s6857_s30 = smov 0  }
   0xf   :  { %s6859_s9 = smov 0   ;;  %s6861_s10 = smov 0  }
  0x10 LB: > { %s8253_s11 = sadd.s32 4294967295, %s6789_s10   ;;  %p6063_p0 = scmp.ge.s32.totalorder %s6789_s10, 1  ;;  %s6789_s10 = sphi %s6861_s10, %s26_s10   ;;  %s6785_s9 = sphi %s6859_s9, %s8310_s9   ;;  %s6781_s30 = sphi %s6857_s30, %s8309_s30   ;;  %s6777_s29 = sphi %s6855_s29, %s8308_s29   ;;  %s6773_s28 = sphi %s6853_s28, %s8307_s28   ;;  %s6769_s27 = sphi %s6851_s27, %s8306_s27  }
  0x11   : > { %p6885_p1 = scmp.eq.s32.totalorder %s8253_s11, 0  ;;  %p257_p2 = scmp.lt.s32.totalorder %s6789_s10, 5 }
  0x12   : > { %s6791_s14 = smov [#allocation8]   ;;  %s6792_s16 = smov [#allocation11]  }
  0x13   : > { %s8274_s12 = scalar_select %p6885_p1, 1, 0 }
  0x14   : > { %p6890_p3 = pnand %p6063_p0, %p257_p2  ;;  %s279_s15 = sshll.u32 %s6791_s14, 4  ;;  %s280_s15 = int_to_ptr.vmem [resolvable:$true] %s279_s15 }
  0x15   : > { %s300_s17 = sshll.u32 %s6792_s16, 4  ;;  %s6550_s19 = scalar_lea.vmem %s280_s15, 128  ;;  %s301_s17 = int_to_ptr.vmem [resolvable:$true] %s300_s17 }
  0x16   : > { %s8275_s13 = scalar_select %p6890_p3, 1, 0 }
  0x17   : > { %p6322_p4 = pneg %p6890_p3  ;;  %p6551_p7 = scmp.ne.s32.totalorder %s280_s15, %s6550_s19 }
  0x18   : > { %p6558_p10 = scmp.lt.s32.totalorder %s280_s15, %s280_s15  ;;  %p6559_p11 = scmp.lt.s32.totalorder %s6550_s19, %s6550_s19 }
  0x19   : > { %p6898_p5 = pnand %p6322_p4, %p6885_p1 }
  0x1a   : > { %p6560_p12 = por %p6559_p11, %p6558_p10 }
  0x1b   : > { %p6541_p6 = pneg %p6898_p5 }
  0x1d   : > { %p6553_p8 = pnand %p6551_p7, %p6541_p6 }
  0x1f   : > { %p6554_p9 = pneg %p6553_p8 }
  0x21   : > { %p6561_p13 = pnand %p6560_p12, %p6554_p9 }
  0x23   : > { %6564 = shalt.err (!%p6561_p13)
}
  0x24   : > { %s8277_s4 = sld [smem:[#allocation26_spill]]  ;;  %s6576_s22 = scalar_lea.vmem %s301_s17, 8192 }
  0x25   : > { %p6577_p0 = scmp.ne.s32.totalorder %s301_s17, %s6576_s22  ;;  %p6584_p7 = scmp.lt.s32.totalorder %s301_s17, %s301_s17 }
  0x26   : > { %p6585_p8 = scmp.lt.s32.totalorder %s6576_s22, %s6576_s22 }
  0x27   : > { %p6579_p2 = pnand %p6577_p0, %p6541_p6 }
  0x28   : > { %p6586_p3 = por %p6585_p8, %p6584_p7 }
  0x29   : > { %p6580_p4 = pneg %p6579_p2 }
  0x2a   : > { %6325 = dma.hbm_to_vmem [thread:$0]  (!%p6898_p5), %s8277_s4, 128, %s280_s15, [#allocation9]  }
  0x2b   : > { %p6587_p1 = pnand %p6586_p3, %p6580_p4 }
  0x2d   : > { %6590 = shalt.err (!%p6587_p1)
}
  0x2e   : > { %s8254_s23 = smov 64   ;;  %s6794_s24 = smov 4  }
  0x2f   : > { %s8278_s6 = sld [smem:[#allocation28_spill]]  ;;  %s35_s14 = sadd.s32 1, %s6785_s9 }
  0x30   : > { %s71_s15 = sadd.s32 1, %s6777_s29  ;;  %p36_p1 = scmp.ge.s32.totalorder %s35_s14, 4 }
  0x31   : > { %p78_p3 = scmp.ne.s32.totalorder %s6777_s29, %s6773_s28  ;;  %p79_p9 = scmp.eq.s32.totalorder %s6789_s10, 0 }
  0x32   : > { %p84_p10 = scmp.ne.s32.totalorder %s6773_s28, %s6769_s27  ;;  %s8312_s14 = smov (%p36_p1, %s35_s14), 0 }
  0x33   : > { %8279 = sst [smem:[#allocation18_spill]] %s8312_s14  ;;  %p80_p11 = por %p79_p9, %p78_p3 }
  0x34   : > { %p8280_p12 = scmp.ne.s32.totalorder %s8274_s12, 0  ;;  %s68_s19 = ssub.s32 %s6785_s9, %s8312_s14 }
  0x35   : > { %6331 = dma.hbm_to_vmem [thread:$0]  (!%p6898_p5), %s8278_s6, 8192, %s301_s17, [#allocation12], %s8254_s23, %s8254_s23, %s6794_s24  }
  0x36   : > { %p6933_p13 = por %p8280_p12, %p84_p10  ;;  %p6349_p0 = scmp.lt.s32.totalorder %s6789_s10, 4 }
  0x37   : > { %p69_p2 = scmp.eq.s32.totalorder %s68_s19, 0  ;;  %s6941_s17 = sand.u32 1, %s6777_s29  }
  0x38   : > { %s8281_s16 = scalar_select %p6933_p13, 1, 0 }
  0x39   : > { %p6944_p4 = pnand %p6349_p0, %p80_p11  ;;  %s346_s22 = sand.u32 1, %s6789_s10  }
  0x3a   : > { %s6949_s21 = scalar_select %p69_p2, %s6777_s29, %s71_s15  }
  0x3b   : > { %s6295_s24 = smul.u32 20, %s6941_s17  ;;  %s8283_s2 = sld [smem:[#allocation25_spill]] }
  0x3c   : > { %s6202_s25 = smul.u32 320, %s6785_s9  ;;  %s6795_s20 = smov [#allocation10]  }
  0x3d   : > { %s350_s4 = scalar_lea.vmem [#allocation5], %s6295_s24  ;;  %s290_s14 = sshll.u32 %s6795_s20, 4  ;;  %s291_s14 = int_to_ptr.vmem [resolvable:$true] %s290_s14 }
  0x3e   : > { %s358_s6 = sshll.u32 %s350_s4, 4  ;;  %s6958_s8 = scalar_lea.sflag [#allocation6], %s346_s22  ;;  %s359_s6 = int_to_ptr.vmem [resolvable:$true] %s358_s6 }
  0x3f   : > { %p8257_p7 = pneg %p6944_p4  ;;  %s6604_s0 = scalar_lea.vmem %s359_s6, 320 }
  0x40   : > { %p6605_p8 = scmp.ne.s32.totalorder %s359_s6, %s6604_s0  ;;  %s6796_s15 = smov [#allocation5]  }
  0x41   : > { %s356_s23 = scalar_lea.hbm %s8283_s2, %s6202_s25  ;;  %s6609_s26 = sshll.u32 %s6796_s15, 4  ;;  %s6610_s26 = int_to_ptr.vmem [resolvable:$false] %s6609_s26 }
  0x42   : > { %p6607_p1 = pnand %p6605_p8, %p8257_p7  ;;  %s6611_s11 = scalar_lea.vmem %s6610_s26, 640 }
  0x43   : > { %p6612_p9 = scmp.lt.s32.totalorder %s359_s6, %s6610_s26  ;;  %p6613_p10 = scmp.lt.s32.totalorder %s6611_s11, %s6604_s0 }
  0x44   : > { %p6608_p3 = pneg %p6607_p1 }
  0x45   : > { %p6614_p11 = por %p6613_p10, %p6612_p9 }
  0x47   : > { %p6615_p12 = pnand %p6614_p11, %p6608_p3 }
  0x49   : > { %6618 = shalt.err (!%p6615_p12)
}
  0x4a   : > { %6341 = dma.hbm_to_vmem [thread:$0]  (!%p6944_p4), %s356_s23, 320, %s359_s6, %s6958_s8  }
  0x4b   : > { %s6630_s4 = scalar_lea.vmem %s291_s14, 128  ;;  %p6638_p1 = scmp.lt.s32.totalorder %s291_s14, %s291_s14 }
  0x4c   : > { %p6631_p0 = scmp.ne.s32.totalorder %s291_s14, %s6630_s4  ;;  %p6639_p7 = scmp.lt.s32.totalorder %s6630_s4, %s6630_s4 }
  0x4e   : > { %p6633_p2 = pnand %p6631_p0, %p6541_p6  ;;  %p6640_p13 = por %p6639_p7, %p6638_p1 }
  0x50   : > { %p6634_p8 = pneg %p6633_p2 }
  0x52   : > { %p6641_p9 = pnand %p6640_p13, %p6634_p8 }
  0x54   : > { %6644 = shalt.err (!%p6641_p9)
}
  0x55   : > { %s8284_s5 = sld [smem:[#allocation27_spill]]  ;;  %s6797_s6 = smov [#allocation13]  }
  0x56   : > { %s314_s23 = sshll.u32 %s6797_s6, 4  ;;  %s315_s23 = int_to_ptr.vmem [resolvable:$true] %s314_s23 }
  0x57   : > { %s6656_s22 = scalar_lea.vmem %s315_s23, 16  ;;  %s6663_s24 = scalar_lea.vmem %s315_s23, 32 }
  0x58   : > { %p6657_p3 = scmp.ne.s32.totalorder %s315_s23, %s6656_s22  ;;  %p6664_p7 = scmp.lt.s32.totalorder %s315_s23, %s315_s23 }
  0x59   : > { %p6665_p13 = scmp.lt.s32.totalorder %s6663_s24, %s6656_s22 }
  0x5a   : > { %p6659_p10 = pnand %p6657_p3, %p6541_p6 }
  0x5b   : > { %6328 = dma.hbm_to_vmem [thread:$0]  (!%p6898_p5), %s8284_s5, 128, %s291_s14, [#allocation9]  }
  0x5c   : > { %p6660_p11 = pneg %p6659_p10  ;;  %p6666_p12 = por %p6665_p13, %p6664_p7 }
  0x5e   : > { %p6667_p0 = pnand %p6666_p12, %p6660_p11 }
  0x60   : > { %6670 = shalt.err (!%p6667_p0)
}
  0x61   : > { %6334 = dma.hbm_to_vmem [thread:$0]  (!%p6898_p5), %s8248_s7, 16, %s315_s23, [#allocation12]  }
  0x62   : > { %s6201_s14 = smul.u32 1280, %s6785_s9  ;;  %s8286_s1 = sld [smem:[#allocation24_spill]] }
  0x63   : > { %s8285_s19 = smul.u32 320, %s6941_s17  ;;  %s326_s6 = scalar_lea.sflag [#allocation4], %s6941_s17 }
  0x64   : > { %p8287_p2 = pneg %p6944_p4  ;;  %s6798_s18 = smov [#allocation3]  }
  0x65   : > { %s329_s15 = scalar_lea.vmem [#allocation3], %s8285_s19  ;;  %s6689_s24 = sshll.u32 %s6798_s18, 4  ;;  %s6690_s24 = int_to_ptr.vmem [resolvable:$false] %s6689_s24 }
  0x66   : > { %s336_s11 = sshll.u32 %s329_s15, 4  ;;  %s6691_s23 = scalar_lea.vmem %s6690_s24, 10240  ;;  %s337_s11 = int_to_ptr.vmem [resolvable:$true] %s336_s11 }
  0x67   : > { %s6684_s22 = scalar_lea.vmem %s337_s11, 5120  ;;  %p6692_p5 = scmp.lt.s32.totalorder %s337_s11, %s6690_s24 }
  0x68   : > { %s335_s20 = scalar_lea.hbm %s8286_s1, %s6201_s14  ;;  %p6685_p6 = scmp.ne.s32.totalorder %s337_s11, %s6684_s22 }
  0x69   : > { %p6693_p9 = scmp.lt.s32.totalorder %s6691_s23, %s6684_s22 }
  0x6a   : > { %p6687_p8 = pnand %p6685_p6, %p8287_p2 }
  0x6b   : > { %p6694_p3 = por %p6693_p9, %p6692_p5 }
  0x6c   : > { %p6688_p1 = pneg %p6687_p8 }
  0x6e   : > { %p6695_p10 = pnand %p6694_p3, %p6688_p1 }
  0x70   : > { %6698 = shalt.err (!%p6695_p10)
}
  0x71   : > { %s6799_s25 = smov 5120   ;;  %s6800_s26 = smov 1280  }
  0x72   : > { %s6801_s14 = smov 80   ;;  %s6205_s19 = smul.u32 81920, %s6785_s9 }
  0x73   : > { %6338 = dma.hbm_to_vmem [thread:$0]  (!%p6944_p4), %s335_s20, 5120, %s337_s11, %s326_s6, %s6799_s25, %s6800_s26, %s6801_s14  }
  0x74   : > { %s8288_s15 = smul.u32 5120, %s6941_s17  ;;  %s376_s22 = scalar_lea.hbm %s8244_s3, %s6205_s19 }
  0x75   : > { %p8289_p7 = pmov %p8287_p2  ;;  %s6802_s1 = smov [#allocation7]  }
  0x76   : > { %s369_s4 = scalar_lea.vmem [#allocation7], %s8288_s15  ;;  %s6717_s2 = sshll.u32 %s6802_s1, 4  ;;  %s6718_s2 = int_to_ptr.vmem [resolvable:$false] %s6717_s2 }
  0x77   : > { %s377_s0 = sshll.u32 %s369_s4, 4  ;;  %s6719_s5 = scalar_lea.vmem %s6718_s2, 163840  ;;  %s378_s0 = int_to_ptr.vmem [resolvable:$true] %s377_s0 }
  0x78   : > { %s6712_s23 = scalar_lea.vmem %s378_s0, 81920  ;;  %p6720_p0 = scmp.lt.s32.totalorder %s378_s0, %s6718_s2 }
  0x79   : > { %p6713_p11 = scmp.ne.s32.totalorder %s378_s0, %s6712_s23  ;;  %p6721_p6 = scmp.lt.s32.totalorder %s6719_s5, %s6712_s23 }
  0x7b   : > { %p6715_p13 = pnand %p6713_p11, %p8289_p7  ;;  %p6722_p2 = por %p6721_p6, %p6720_p0 }
  0x7d   : > { %p6716_p12 = pneg %p6715_p13 }
  0x7f   : > { %p6723_p8 = pnand %p6722_p2, %p6716_p12 }
  0x81   : > { %6726 = shalt.err (!%p6723_p8)
}
  0x82   : > { %s6803_s17 = smov 1024   ;;  %s8290_s11 = smov 64  }
  0x83   : > { %6344 = dma.hbm_to_vmem [thread:$0]  (!%p6944_p4), %s376_s22, 81920, %s378_s0, %s6958_s8, %s6803_s17, %s6803_s17, %s8290_s11  }
  0x84   : > { %p8291_p1 = scmp.ne.s32.totalorder %s8275_s13, 0 }
  0x86   : > { %389 = sbr.rel (%p8291_p1) target bundleno = 2080 (0x820), region = 52 }
  0x8b   : > { %s391_s20 = sand.u32 1, %s6773_s28   ;;  %p8292_p5 = scmp.ne.s32.totalorder %s8281_s16, 0 }
  0x8c   : > { %s6297_s1 = smul.u32 320, %s391_s20  ;;  %s392_s6 = scalar_lea.sflag [#allocation4], %s391_s20 }
  0x8e   : > { %s7012_s25 = scalar_lea.vmem [#allocation3], %s6297_s1 }
  0x8f   : > { %6752 = dma.done.wait (%p8292_p5), %s392_s6, 5120  }
  0x90   : > { %6754 = vsyncadd (%p8292_p5), %s392_s6, 4294962176  ;;  %s8293_s2 = sadd.s32 4294967295, %s6789_s10   ;;  %s6298_s8 = smul.u32 20, %s391_s20 }
  0x91   : > { %s400_s5 = sand.u32 1, %s8293_s2  }
  0x92   : > { %s401_s27 = scalar_lea.sflag [#allocation6], %s400_s5  ;;  %s7020_s13 = scalar_lea.vmem [#allocation5], %s6298_s8 }
  0x93   : > { %6756 = dma.done.wait (%p8292_p5), %s401_s27, 82240  }
  0x94   : > { %6758 = vsyncadd (%p8292_p5), %s401_s27, 4294885056  ;;  %s6299_s26 = smul.u32 5120, %s391_s20  ;;  %p8294_p4 = scmp.ne.s32.totalorder %s8274_s12, 0 }
  0x96   : > { %s7026_s14 = scalar_lea.vmem [#allocation7], %s6299_s26 }
  0x97   : > { %6760 = dma.done.wait (%p8294_p4), [#allocation9], 256  }
  0x98   : > { %6762 = vsyncadd (%p8294_p4), [#allocation9], 4294967040 }
  0x99   : > { %6764 = dma.done.wait (%p8294_p4), [#allocation12], 8208  }
  0x9a   : > { %6766 = vsyncadd (%p8294_p4), [#allocation12], 4294959088  ;;  %p6079_p9 = scmp.ne.s32.totalorder %s6781_s30, 0 }
  0x9c   : > { %496 = sbr.rel (%p6079_p9) target bundleno = 170 (0xaa), region = 84 }
  0xa1   : > { %v6804_v0 = vmov 0.0  }
  0xa2   : > { %497 = vst [vmem:[#allocation2 + $0x30] sm:$0xff] %v6804_v0  ;;  %498 = vst [vmem:[#allocation2] sm:$0xff] %v6804_v0 }
  0xa3   : > { %499 = vst [vmem:[#allocation2 + $0x58] sm:$0xff] %v6804_v0  ;;  %500 = vst [vmem:[#allocation2 + $0x18] sm:$0xff] %v6804_v0 }
  0xa4   : > { %501 = vst [vmem:[#allocation2 + $0x50] sm:$0xff] %v6804_v0  ;;  %502 = vst [vmem:[#allocation2 + $0x68] sm:$0xff] %v6804_v0 }
  0xa5   : > { %503 = vst [vmem:[#allocation2 + $0x8] sm:$0xff] %v6804_v0  ;;  %504 = vst [vmem:[#allocation2 + $0x48] sm:$0xff] %v6804_v0 }
  0xa6   : > { %505 = vst [vmem:[#allocation2 + $0x40] sm:$0xff] %v6804_v0  ;;  %506 = vst [vmem:[#allocation2 + $0x20] sm:$0xff] %v6804_v0 }
  0xa7   : > { %507 = vst [vmem:[#allocation2 + $0x10] sm:$0xff] %v6804_v0  ;;  %508 = vst [vmem:[#allocation2 + $0x38] sm:$0xff] %v6804_v0 }
  0xa8   : > { %509 = vst [vmem:[#allocation2 + $0x60] sm:$0xff] %v6804_v0  ;;  %510 = vst [vmem:[#allocation2 + $0x70] sm:$0xff] %v6804_v0 }
  0xa9   : > { %511 = vst [vmem:[#allocation2 + $0x78] sm:$0xff] %v6804_v0  ;;  %512 = vst [vmem:[#allocation2 + $0x28] sm:$0xff] %v6804_v0 }
  0xaa PF: > { %v6414_v1 = vld [vmem:[%s7012_s25 + $0xa4] ss:$80 sps:$4 sm:$0xff]   ;;  %v6416_v2 = vld [vmem:[%s7012_s25 + $0xac] ss:$80 sps:$4 sm:$0xff]   ;;  %v6805_v3 = vmov 0   ;;  %s8295_s19 = sld [smem:[#allocation23_spill]] }
  0xab   : > { %902 = vmatprep.mubr.bf16.mxu0 %v6805_v3  ;;  %945 = vmatprep.mubr.bf16.mxu1 %v6805_v3  ;;  %v6418_v4 = vld [vmem:[%s7012_s25 + $0xa0] ss:$80 sps:$4 sm:$0xff]   ;;  %v6419_v5 = vld [vmem:[%s7012_s25 + $0xa8] ss:$80 sps:$4 sm:$0xff]   ;;  %v6420_v6 = vld [vmem:[%s7012_s25 + $0x4] ss:$80 sps:$4 sm:$0xff]  }
  0xac   : > { %882 = vmatprep.subr.bf16.mxu0 %v6414_v1  ;;  %925 = vmatprep.subr.bf16.mxu1 %v6416_v2  ;;  %v6422_v7 = vld [vmem:[%s7012_s25 + $0xc] ss:$80 sps:$4 sm:$0xff]   ;;  %v6424_v8 = vld [vmem:[%s7012_s25] ss:$80 sps:$4 sm:$0xff]   ;;  %v6425_v9 = vld [vmem:[%s7012_s25 + $0x8] ss:$80 sps:$4 sm:$0xff]  }
  0xad   : > { %883 = vmatpush1.bf16.msra.mxu0 %v6418_v4  ;;  %926 = vmatpush1.bf16.msra.mxu1 %v6419_v5  ;;  %v6427_v11 = vld [vmem:[%s7012_s25 + $0xb0] ss:$80 sps:$4 sm:$0xff]   ;;  %v6429_v12 = vld [vmem:[%s7012_s25 + $0xb4] ss:$80 sps:$4 sm:$0xff]   ;;  %vm866_vm0 = vcmask 261120   ;;  %v1400_v47 = vld [vmem:[%s7026_s14 + $0xc0] sm:$0xff] }
  0xae   : > { %884 = vmatprep.subr.bf16.mxu0 %v6420_v6  ;;  %927 = vmatprep.subr.bf16.mxu1 %v6422_v7  ;;  %v6430_v13 = vld [vmem:[%s7012_s25 + $0xb8] ss:$80 sps:$4 sm:$0xff]   ;;  %v6432_v14 = vld [vmem:[%s7012_s25 + $0xbc] ss:$80 sps:$4 sm:$0xff]   ;;  %v6435_v15 = vld [vmem:[%s7012_s25 + $0x14] ss:$80 sps:$4 sm:$0xff]   ;;  %v2072_v49 = vunpack.c.h.s8.bf16 %v1400_v47  ;;  %v2064_v55 = vunpack.c.l.s8.bf16 %v1400_v47 }
  0xaf   : > { %v6438_v16 = vld [vmem:[%s7012_s25 + $0x1c] ss:$80 sps:$4 sm:$0xff]   ;;  %v6433_v17 = vld [vmem:[%s7012_s25 + $0x10] ss:$80 sps:$4 sm:$0xff]   ;;  %v6436_v18 = vld [vmem:[%s7012_s25 + $0x18] ss:$80 sps:$4 sm:$0xff]  }
  0xb0   : > { %v7050_v10 = vld [vmem:[%s8295_s19] sm:$0xff]   ;;  %v6444_v20 = vld [vmem:[%s7012_s25 + $0xcc] ss:$80 sps:$4 sm:$0xff]   ;;  %v6442_v22 = vld [vmem:[%s7012_s25 + $0xc8] ss:$80 sps:$4 sm:$0xff]   ;;  %p6131_p3 = scmp.ne.s32.totalorder %s6781_s30, 3 }
  0xb1   : > { %885 = vmatpush1.bf16.msra.mxu0 %v6424_v8  ;;  %928 = vmatpush1.bf16.msra.mxu1 %v6425_v9  ;;  %v6441_v19 = vld [vmem:[%s7012_s25 + $0xc4] ss:$80 sps:$4 sm:$0xff]   ;;  %v6439_v21 = vld [vmem:[%s7012_s25 + $0xc0] ss:$80 sps:$4 sm:$0xff]   ;;  %v6450_v24 = vld [vmem:[%s7012_s25 + $0x2c] ss:$80 sps:$4 sm:$0xff]  }
  0xb2   : > { %968 = vmatprep.subr.bf16.mxu0 %v6429_v12  ;;  %1011 = vmatprep.subr.bf16.mxu1 %v6432_v14  ;;  %v6447_v23 = vld [vmem:[%s7012_s25 + $0x24] ss:$80 sps:$4 sm:$0xff]   ;;  %v6445_v25 = vld [vmem:[%s7012_s25 + $0x20] ss:$80 sps:$4 sm:$0xff]   ;;  %v6448_v26 = vld [vmem:[%s7012_s25 + $0x28] ss:$80 sps:$4 sm:$0xff]  }
  0xb3   : > { %v6453_v27 = vld [vmem:[%s7012_s25 + $0xd4] ss:$80 sps:$4 sm:$0xff]   ;;  %v6456_v28 = vld [vmem:[%s7012_s25 + $0xdc] ss:$80 sps:$4 sm:$0xff]   ;;  %v6451_v29 = vld [vmem:[%s7012_s25 + $0xd0] ss:$80 sps:$4 sm:$0xff]  }
  0xb4   : > { %6121 = vmatmul.mubr.msk.bf16.vlgmr.msra.gmra.mxu0 %vm866_vm0, %v7050_v10  ;;  %6122 = vmatmul.mubr.msk.bf16.vlgmr.msra.gmra.mxu1 %vm866_vm0, %v7050_v10  ;;  %v6454_v30 = vld [vmem:[%s7012_s25 + $0xd8] ss:$80 sps:$4 sm:$0xff]   ;;  %v6459_v31 = vld [vmem:[%s7012_s25 + $0x34] ss:$80 sps:$4 sm:$0xff]   ;;  %v6462_v32 = vld [vmem:[%s7012_s25 + $0x3c] ss:$80 sps:$4 sm:$0xff]  }
  0xb5   : > { %969 = vmatpush1.bf16.msra.mxu0 %v6427_v11  ;;  %1012 = vmatpush1.bf16.msra.mxu1 %v6430_v13  ;;  %v6457_v33 = vld [vmem:[%s7012_s25 + $0x30] ss:$80 sps:$4 sm:$0xff]   ;;  %v6460_v34 = vld [vmem:[%s7012_s25 + $0x38] ss:$80 sps:$4 sm:$0xff]   ;;  %v6465_v35 = vld [vmem:[%s7012_s25 + $0xe4] ss:$80 sps:$4 sm:$0xff]  }
  0xb6   : > { %970 = vmatprep.subr.bf16.mxu0 %v6435_v15  ;;  %1013 = vmatprep.subr.bf16.mxu1 %v6438_v16  ;;  %v6468_v36 = vld [vmem:[%s7012_s25 + $0xec] ss:$80 sps:$4 sm:$0xff]   ;;  %v6463_v37 = vld [vmem:[%s7012_s25 + $0xe0] ss:$80 sps:$4 sm:$0xff]   ;;  %v6466_v38 = vld [vmem:[%s7012_s25 + $0xe8] ss:$80 sps:$4 sm:$0xff]  }
  0xb7   : > { %988 = vmatprep.mubr.bf16.mxu0 %v6805_v3  ;;  %1031 = vmatprep.mubr.bf16.mxu1 %v6805_v3  ;;  %v6471_v39 = vld [vmem:[%s7012_s25 + $0x44] ss:$80 sps:$4 sm:$0xff]   ;;  %v6474_v40 = vld [vmem:[%s7012_s25 + $0x4c] ss:$80 sps:$4 sm:$0xff]   ;;  %v6469_v43 = vld [vmem:[%s7012_s25 + $0x40] ss:$80 sps:$4 sm:$0xff]  }
  0xb8   : > { %v1401_v41 = vld [vmem:[%s7026_s14 + $0xc8] sm:$0xff]  ;;  %v6472_v44 = vld [vmem:[%s7012_s25 + $0x48] ss:$80 sps:$4 sm:$0xff]   ;;  %s8304_s4 = sld [smem:[#allocation29_spill]] (!%p6131_p3) }
  0xb9   : > { %971 = vmatpush1.bf16.msra.mxu0 %v6433_v17  ;;  %1014 = vmatpush1.bf16.msra.mxu1 %v6436_v18  ;;  %v1465_v42 = vld [vmem:[%s7026_s14 + $0x2c8] sm:$0xff]  ;;  %v2073_v45 = vunpack.c.h.s8.bf16 %v1401_v41  ;;  %v1464_v48 = vld [vmem:[%s7026_s14 + $0x2c0] sm:$0xff]  ;;  %v2065_v51 = vunpack.c.l.s8.bf16 %v1401_v41 }
  0xba   : > { %1054 = vmatprep.subr.bf16.mxu0 %v6441_v19  ;;  %1097 = vmatprep.subr.bf16.mxu1 %v6444_v20  ;;  %v2201_v46 = vunpack.c.h.s8.bf16 %v1465_v42  ;;  %v2200_v50 = vunpack.c.h.s8.bf16 %v1464_v48  ;;  %v2193_v52 = vunpack.c.l.s8.bf16 %v1465_v42  ;;  %v1393_v53 = vld [vmem:[%s7026_s14 + $0x88] sm:$0xff]  ;;  %v2192_v56 = vunpack.c.l.s8.bf16 %v1464_v48  ;;  %v1392_v59 = vld [vmem:[%s7026_s14 + $0x80] sm:$0xff] }
  0xbb   : > { %v1457_v54 = vld [vmem:[%s7026_s14 + $0x288] sm:$0xff]  ;;  %v2057_v57 = vunpack.c.h.s8.bf16 %v1393_v53  ;;  %v1456_v60 = vld [vmem:[%s7026_s14 + $0x280] sm:$0xff]  ;;  %v2056_v61 = vunpack.c.h.s8.bf16 %v1392_v59  ;;  %v2049_v63 = vunpack.c.l.s8.bf16 %v1393_v53 }
  0xbc   : > { %6123 = vmatmul.mubr.msk.bf16.vlgmr.msra.gmra.mxu0 %vm866_vm0, %v7050_v10  ;;  %6124 = vmatmul.mubr.msk.bf16.vlgmr.msra.gmra.mxu1 %vm866_vm0, %v7050_v10  ;;  %v2185_v58 = vunpack.c.h.s8.bf16 %v1457_v54  ;;  %v2184_v62 = vunpack.c.h.s8.bf16 %v1456_v60  ;;  %v2177_v0 = vunpack.c.l.s8.bf16 %v1457_v54  ;;  %v1385_v1 = vld [vmem:[%s7026_s14 + $0x48] sm:$0xff]  ;;  %v2176_v4 = vunpack.c.l.s8.bf16 %v1456_v60  ;;  %v1384_v7 = vld [vmem:[%s7026_s14 + $0x40] sm:$0xff] }
  0xbd   : > { %1055 = vmatpush1.bf16.msra.mxu0 %v6439_v21  ;;  %1098 = vmatpush1.bf16.msra.mxu1 %v6442_v22  ;;  %v1449_v2 = vld [vmem:[%s7026_s14 + $0x248] sm:$0xff]  ;;  %v2041_v5 = vunpack.c.h.s8.bf16 %v1385_v1  ;;  %v1448_v8 = vld [vmem:[%s7026_s14 + $0x240] sm:$0xff]  ;;  %v2040_v9 = vunpack.c.h.s8.bf16 %v1384_v7  ;;  %v2033_v11 = vunpack.c.l.s8.bf16 %v1385_v1  ;;  %v2032_v15 = vunpack.c.l.s8.bf16 %v1384_v7 }
  0xbe   : > { %1056 = vmatprep.subr.bf16.mxu0 %v6447_v23  ;;  %1099 = vmatprep.subr.bf16.mxu1 %v6450_v24  ;;  %v2169_v6 = vunpack.c.h.s8.bf16 %v1449_v2  ;;  %v2161_v12 = vunpack.c.l.s8.bf16 %v1449_v2  ;;  %v1377_v13 = vld [vmem:[%s7026_s14 + $0x8] sm:$0xff]  ;;  %v2160_v16 = vunpack.c.l.s8.bf16 %v1448_v8  ;;  %v1376_v19 = vld [vmem:[%s7026_s14] sm:$0xff] }
  0xbf   : > { %1074 = vmatprep.mubr.bf16.mxu0 %v6805_v3  ;;  %1117 = vmatprep.mubr.bf16.mxu1 %v6805_v3  ;;  %v1441_v14 = vld [vmem:[%s7026_s14 + $0x208] sm:$0xff]  ;;  %v2025_v17 = vunpack.c.h.s8.bf16 %v1377_v13  ;;  %v1440_v20 = vld [vmem:[%s7026_s14 + $0x200] sm:$0xff]  ;;  %v2024_v21 = vunpack.c.h.s8.bf16 %v1376_v19  ;;  %v2017_v23 = vunpack.c.l.s8.bf16 %v1377_v13 }
  0xc0   : > { %v2153_v18 = vunpack.c.h.s8.bf16 %v1441_v14  ;;  %v2152_v22 = vunpack.c.h.s8.bf16 %v1440_v20  ;;  %v2145_v24 = vunpack.c.l.s8.bf16 %v1441_v14 }
  0xc1   : > { %1057 = vmatpush1.bf16.msra.mxu0 %v6445_v25  ;;  %1100 = vmatpush1.bf16.msra.mxu1 %v6448_v26  ;;  %v1433_v25 = vld [vmem:[%s7026_s14 + $0x1c8] sm:$0xff] }
  0xc2   : > { %1140 = vmatprep.subr.bf16.mxu0 %v6453_v27  ;;  %1183 = vmatprep.subr.bf16.mxu1 %v6456_v28  ;;  %v1497_v26 = vld [vmem:[%s7026_s14 + $0x3c8] sm:$0xff]  ;;  %v2016_v27 = vunpack.c.l.s8.bf16 %v1376_v19  ;;  %v2144_v28 = vunpack.c.l.s8.bf16 %v1440_v20 }
  0xc4   : > { %6125 = vmatmul.mubr.msk.bf16.vlgmr.msra.gmra.mxu0 %vm866_vm0, %v7050_v10  ;;  %6126 = vmatmul.mubr.msk.bf16.vlgmr.msra.gmra.mxu1 %vm866_vm0, %v7050_v10 }
  0xc5   : > { %1141 = vmatpush1.bf16.msra.mxu0 %v6451_v29  ;;  %1184 = vmatpush1.bf16.msra.mxu1 %v6454_v30  ;;  %v2137_v29 = vunpack.c.h.s8.bf16 %v1433_v25  ;;  %v2265_v30 = vunpack.c.h.s8.bf16 %v1497_v26 }
  0xc6   : > { %1142 = vmatprep.subr.bf16.mxu0 %v6459_v31  ;;  %1185 = vmatprep.subr.bf16.mxu1 %v6462_v32  ;;  %v1432_v31 = vld [vmem:[%s7026_s14 + $0x1c0] sm:$0xff] }
  0xc7   : > { %1160 = vmatprep.mubr.bf16.mxu0 %v6805_v3  ;;  %1203 = vmatprep.mubr.bf16.mxu1 %v6805_v3  ;;  %v1496_v32 = vld [vmem:[%s7026_s14 + $0x3c0] sm:$0xff] }
  0xc9   : > { %1143 = vmatpush1.bf16.msra.mxu0 %v6457_v33  ;;  %1186 = vmatpush1.bf16.msra.mxu1 %v6460_v34  ;;  %v2136_v33 = vunpack.c.h.s8.bf16 %v1432_v31  ;;  %v2264_v34 = vunpack.c.h.s8.bf16 %v1496_v32 }
  0xca   : > { %1226 = vmatprep.subr.bf16.mxu0 %v6465_v35  ;;  %1269 = vmatprep.subr.bf16.mxu1 %v6468_v36  ;;  %v2129_v35 = vunpack.c.l.s8.bf16 %v1433_v25  ;;  %v2257_v36 = vunpack.c.l.s8.bf16 %v1497_v26 }
  0xcc   : > { %6127 = vmatmul.mubr.msk.bf16.vlgmr.msra.gmra.mxu0 %vm866_vm0, %v7050_v10  ;;  %6128 = vmatmul.mubr.msk.bf16.vlgmr.msra.gmra.mxu1 %vm866_vm0, %v7050_v10 }
  0xcd   : > { %1227 = vmatpush1.bf16.msra.mxu0 %v6463_v37  ;;  %1270 = vmatpush1.bf16.msra.mxu1 %v6466_v38  ;;  %v1425_v37 = vld [vmem:[%s7026_s14 + $0x188] sm:$0xff] }
  0xce   : > { %1228 = vmatprep.subr.bf16.mxu0 %v6471_v39  ;;  %1271 = vmatprep.subr.bf16.mxu1 %v6474_v40  ;;  %v1489_v38 = vld [vmem:[%s7026_s14 + $0x388] sm:$0xff]  ;;  %v2128_v39 = vunpack.c.l.s8.bf16 %v1432_v31  ;;  %v2256_v40 = vunpack.c.l.s8.bf16 %v1496_v32  ;;  %v2121_v41 = vunpack.c.h.s8.bf16 %v1425_v37  ;;  %v2113_v47 = vunpack.c.l.s8.bf16 %v1425_v37 }
  0xcf   : > { %1246 = vmatprep.mubr.bf16.mxu0 %v6805_v3  ;;  %1289 = vmatprep.mubr.bf16.mxu1 %v6805_v3  ;;  %v2048_v3 = vunpack.c.l.s8.bf16 %v1392_v59  ;;  %v2249_v42 = vunpack.c.h.s8.bf16 %v1489_v38  ;;  %v2241_v48 = vunpack.c.l.s8.bf16 %v1489_v38 }
  0xd1   : > { %1229 = vmatpush1.bf16.msra.mxu0 %v6469_v43  ;;  %1272 = vmatpush1.bf16.msra.mxu1 %v6472_v44  ;;  %v1424_v43 = vld [vmem:[%s7026_s14 + $0x180] sm:$0xff] }
  0xd2   : > { %3296 = vmatprep.subr.bf16.mxu0 %v2073_v45  ;;  %3339 = vmatprep.subr.bf16.mxu1 %v2201_v46  ;;  %v1488_v44 = vld [vmem:[%s7026_s14 + $0x380] sm:$0xff]  ;;  %v2120_v45 = vunpack.c.h.s8.bf16 %v1424_v43 }
  0xd3   : > { %v2248_v46 = vunpack.c.h.s8.bf16 %v1488_v44 }
  0xd4   : > { %6129 = vmatmul.mubr.msk.bf16.vlgmr.msra.gmra.mxu0 %vm866_vm0, %v7050_v10  ;;  %6130 = vmatmul.mubr.msk.bf16.vlgmr.msra.gmra.mxu1 %vm866_vm0, %v7050_v10  ;;  %v2168_v10 = vunpack.c.h.s8.bf16 %v1448_v8 }
  0xd5   : > { %3297 = vmatpush1.bf16.msra.mxu0 %v2072_v49  ;;  %3340 = vmatpush1.bf16.msra.mxu1 %v2200_v50  ;;  %v1417_v49 = vld [vmem:[%s7026_s14 + $0x148] sm:$0xff] }
  0xd6   : > { %3298 = vmatprep.subr.bf16.mxu0 %v2065_v51  ;;  %3341 = vmatprep.subr.bf16.mxu1 %v2193_v52  ;;  %v1481_v50 = vld [vmem:[%s7026_s14 + $0x348] sm:$0xff]  ;;  %v2112_v51 = vunpack.c.l.s8.bf16 %v1424_v43  ;;  %v2240_v52 = vunpack.c.l.s8.bf16 %v1488_v44  ;;  %v2105_v53 = vunpack.c.h.s8.bf16 %v1417_v49  ;;  %v2097_v59 = vunpack.c.l.s8.bf16 %v1417_v49  ;;  %v1528_v44 = vld [vmem:[%s7026_s14 + $0x4c0] sm:$0xff] }
  0xd7   : > { %v2233_v54 = vunpack.c.h.s8.bf16 %v1481_v50  ;;  %v2225_v60 = vunpack.c.l.s8.bf16 %v1481_v50 }
  0xd9   : > { %3299 = vmatpush1.bf16.msra.mxu0 %v2064_v55  ;;  %3342 = vmatpush1.bf16.msra.mxu1 %v2192_v56  ;;  %v1416_v55 = vld [vmem:[%s7026_s14 + $0x140] sm:$0xff] }
  0xda   : > { %3300 = vmatprep.subr.bf16.mxu0 %v2057_v57  ;;  %3343 = vmatprep.subr.bf16.mxu1 %v2185_v58  ;;  %v1480_v56 = vld [vmem:[%s7026_s14 + $0x340] sm:$0xff]  ;;  %v2104_v57 = vunpack.c.h.s8.bf16 %v1416_v55 }
  0xdb   : > { %v2232_v58 = vunpack.c.h.s8.bf16 %v1480_v56 }
  0xdd   : > { %3301 = vmatpush1.bf16.msra.mxu0 %v2056_v61  ;;  %3344 = vmatpush1.bf16.msra.mxu1 %v2184_v62  ;;  %v1409_v61 = vld [vmem:[%s7026_s14 + $0x108] sm:$0xff] }
  0xde   : > { %3302 = vmatprep.subr.bf16.mxu0 %v2049_v63  ;;  %3345 = vmatprep.subr.bf16.mxu1 %v2177_v0  ;;  %v1473_v62 = vld [vmem:[%s7026_s14 + $0x308] sm:$0xff]  ;;  %v2096_v63 = vunpack.c.l.s8.bf16 %v1416_v55  ;;  %v2224_v0 = vunpack.c.l.s8.bf16 %v1480_v56  ;;  %v2089_v1 = vunpack.c.h.s8.bf16 %v1409_v61  ;;  %v2081_v7 = vunpack.c.l.s8.bf16 %v1409_v61 }
  0xdf   : > { %v2217_v2 = vunpack.c.h.s8.bf16 %v1473_v62  ;;  %v2209_v8 = vunpack.c.l.s8.bf16 %v1473_v62 }
  0xe1   : > { %3303 = vmatpush1.bf16.msra.mxu0 %v2048_v3  ;;  %3346 = vmatpush1.bf16.msra.mxu1 %v2176_v4  ;;  %v1408_v3 = vld [vmem:[%s7026_s14 + $0x100] sm:$0xff] }
  0xe2   : > { %3304 = vmatprep.subr.bf16.mxu0 %v2041_v5  ;;  %3347 = vmatprep.subr.bf16.mxu1 %v2169_v6  ;;  %v1472_v4 = vld [vmem:[%s7026_s14 + $0x300] sm:$0xff]  ;;  %v2088_v5 = vunpack.c.h.s8.bf16 %v1408_v3 }
  0xe3   : > { %v2216_v6 = vunpack.c.h.s8.bf16 %v1472_v4 }
  0xe5   : > { %3305 = vmatpush1.bf16.msra.mxu0 %v2040_v9  ;;  %3348 = vmatpush1.bf16.msra.mxu1 %v2168_v10  ;;  %v7145_v9 = vld [vmem:[%s7026_s14 + $0x4c8] sm:$0xff] }
  0xe6   : > { %3306 = vmatprep.subr.bf16.mxu0 %v2033_v11  ;;  %3349 = vmatprep.subr.bf16.mxu1 %v2161_v12  ;;  %v7148_v10 = vld [vmem:[%s7026_s14 + $0x6c8] sm:$0xff]  ;;  %v2080_v11 = vunpack.c.l.s8.bf16 %v1408_v3  ;;  %v2208_v12 = vunpack.c.l.s8.bf16 %v1472_v4  ;;  %v2329_v13 = vunpack.c.h.s8.bf16 %v7145_v9  ;;  %v2321_v4 = vunpack.c.l.s8.bf16 %v7145_v9 }
  0xe7   : > { %v2457_v14 = vunpack.c.h.s8.bf16 %v7148_v10 }
  0xe9   : > { %3307 = vmatpush1.bf16.msra.mxu0 %v2032_v15  ;;  %3350 = vmatpush1.bf16.msra.mxu1 %v2160_v16  ;;  %v561_v15 = vlaneseq }
  0xea   : > { %3308 = vmatprep.subr.bf16.mxu0 %v2025_v17  ;;  %3351 = vmatprep.subr.bf16.mxu1 %v2153_v18 }
  0xeb   : > { %v7152_v16 = vshrl.u32 %v561_v15, 7 }
  0xed   : > { %3309 = vmatpush1.bf16.msra.mxu0 %v2024_v21  ;;  %3352 = vmatpush1.bf16.msra.mxu1 %v2152_v22  ;;  %v7155_v17 = vsub.s32 1, %v7152_v16  ;;  %v7158_v18 = vsub.s32 3, %v7152_v16  ;;  %v7161_v19 = vsub.s32 0, %v7152_v16  ;;  %v7164_v20 = vsub.s32 2, %v7152_v16  ;;  %v7167_v21 = vld [vmem:[%s7020_s13] sm:$0xff] }
  0xee   : > { %3310 = vmatprep.subr.bf16.mxu0 %v2017_v23  ;;  %3353 = vmatprep.subr.bf16.mxu1 %v2145_v24  ;;  %v7181_v31 = vsub.s32 7, %v7152_v16 }
  0xef   : > { %v568_v24 = vrot.slane %v7167_v21, %v7155_v17  ;;  %v576_v25 = vrot.slane %v7167_v21, %v7158_v18  ;;  %v564_v26 = vrot.slane %v7167_v21, %v7161_v19 }
  0xf0   : > { %8297 = vst [vmem:[#allocation20_spill] sm:$0xff] %v7181_v31 }
  0xf1   : > { %3311 = vmatpush1.bf16.msra.mxu0 %v2016_v27  ;;  %3354 = vmatpush1.bf16.msra.mxu1 %v2144_v28  ;;  %v572_v27 = vrot.slane %v7167_v21, %v7164_v20 }
  0xf2   : > { %3312 = vmatprep.subr.bf16.mxu0 %v2137_v29  ;;  %3355 = vmatprep.subr.bf16.mxu1 %v2265_v30  ;;  %v7178_v30 = vsub.s32 5, %v7152_v16 }
  0xf4   : > { %8296 = vst [vmem:[#allocation19_spill] sm:$0xff] %v7178_v30 }
  0xf5   : > { %3313 = vmatpush2.bf16.msra.mxu0 %v2136_v33  ;;  %3356 = vmatpush2.bf16.msra.mxu1 %v2264_v34 }
  0xf6   : > { %3314 = vmatprep.subr.bf16.mxu0 %v2129_v35  ;;  %3357 = vmatprep.subr.bf16.mxu1 %v2257_v36 }
  0xf9   : > { %3315 = vmatpush2.bf16.msra.mxu0 %v2128_v39  ;;  %3358 = vmatpush2.bf16.msra.mxu1 %v2256_v40 }
  0xfa   : > { %3316 = vmatprep.subr.bf16.mxu0 %v2121_v41  ;;  %3359 = vmatprep.subr.bf16.mxu1 %v2249_v42 }
  0xfd   : > { %3317 = vmatpush2.bf16.msra.mxu0 %v2120_v45  ;;  %3360 = vmatpush2.bf16.msra.mxu1 %v2248_v46  ;;  %v1592_v45 = vld [vmem:[%s7026_s14 + $0x6c0] sm:$0xff]  ;;  %v584_v46 = vrot.slane %v7167_v21, %v7178_v30 }
  0xfe   : > { %3318 = vmatprep.subr.bf16.mxu0 %v2113_v47  ;;  %3361 = vmatprep.subr.bf16.mxu1 %v2241_v48  ;;  %v592_v47 = vrot.slane %v7167_v21, %v7181_v31  ;;  %v2448_v9 = vunpack.c.l.s8.bf16 %v1592_v45 }
 0x101   : > { %3319 = vmatpush2.bf16.msra.mxu0 %v2112_v51  ;;  %3362 = vmatpush2.bf16.msra.mxu1 %v2240_v52 }
 0x102   : > { %3320 = vmatprep.subr.bf16.mxu0 %v2105_v53  ;;  %3363 = vmatprep.subr.bf16.mxu1 %v2233_v54 }
 0x105   : > { %3321 = vmatpush2.bf16.msra.mxu0 %v2104_v57  ;;  %3364 = vmatpush2.bf16.msra.mxu1 %v2232_v58  ;;  %v2328_v58 = vunpack.c.h.s8.bf16 %v1528_v44 }
 0x106   : > { %3322 = vmatprep.subr.bf16.mxu0 %v2097_v59  ;;  %3365 = vmatprep.subr.bf16.mxu1 %v2225_v60  ;;  %v2456_v59 = vunpack.c.h.s8.bf16 %v1592_v45 }
 0x109   : > { %3323 = vmatpush2.bf16.msra.mxu0 %v2096_v63  ;;  %3366 = vmatpush2.bf16.msra.mxu1 %v2224_v0 }
 0x10a   : > { %3324 = vmatprep.subr.bf16.mxu0 %v2089_v1  ;;  %3367 = vmatprep.subr.bf16.mxu1 %v2217_v2 }
 0x10d   : > { %3325 = vmatpush2.bf16.msra.mxu0 %v2088_v5  ;;  %3368 = vmatpush2.bf16.msra.mxu1 %v2216_v6  ;;  %v2449_v5 = vunpack.c.l.s8.bf16 %v7148_v10 }
 0x10e   : > { %3326 = vmatprep.subr.bf16.mxu0 %v2081_v7  ;;  %3369 = vmatprep.subr.bf16.mxu1 %v2209_v8  ;;  %v1521_v8 = vld [vmem:[%s7026_s14 + $0x488] sm:$0xff] }
 0x111   : > { %3327 = vmatpush2.bf16.msra.mxu0 %v2080_v11  ;;  %3370 = vmatpush2.bf16.msra.mxu1 %v2208_v12  ;;  %v1585_v11 = vld [vmem:[%s7026_s14 + $0x688] sm:$0xff]  ;;  %v2320_v12 = vunpack.c.l.s8.bf16 %v1528_v44 }
 0x112   : > { %3382 = vmatprep.subr.bf16.mxu0 %v2329_v13  ;;  %3425 = vmatprep.subr.bf16.mxu1 %v2457_v14 }
 0x174   : > { %v904_v22 = vpop.f32.mrf.mxu0  ;;  %v947_v23 = vpop.f32.mrf.mxu1 }
 0x175   : > { %v905_v38 = vadd.f32 %v904_v22, %v564_v26  ;;  %v948_v39 = vadd.f32 %v947_v23, %v572_v27 }
 0x176   : > { %v906_v28 = vpop.f32.mrf.mxu0  ;;  %v949_v29 = vpop.f32.mrf.mxu1 }
 0x177   : > { %v907_v34 = vadd.f32 %v906_v28, %v568_v24  ;;  %v950_v35 = vadd.f32 %v949_v29, %v576_v25  ;;  %v1300_v56 = vmax.f32 %v905_v38, 0.0  ;;  %v1302_v57 = vmax.f32 %v948_v39, 0.0 }
 0x178   : > { %v908_v32 = vpop.f32.mrf.mxu0  ;;  %v951_v33 = vpop.f32.mrf.mxu1 }
 0x179   : > { %v909_v36 = vadd.f32 %v908_v32, %v564_v26  ;;  %v952_v37 = vadd.f32 %v951_v33, %v572_v27  ;;  %v1301_v52 = vmax.f32 %v907_v34, 0.0  ;;  %v1303_v53 = vmax.f32 %v950_v35, 0.0  ;;  %v1520_v26 = vld [vmem:[%s7026_s14 + $0x480] sm:$0xff] }
 0x17a   : > { %v910_v40 = vpop.f32.mrf.mxu0  ;;  %v953_v41 = vpop.f32.mrf.mxu1  ;;  %v1584_v27 = vld [vmem:[%s7026_s14 + $0x680] sm:$0xff] }
 0x17b   : > { %v911_v42 = vadd.f32 %v910_v40, %v568_v24  ;;  %v954_v43 = vadd.f32 %v953_v41, %v576_v25  ;;  %v1320_v48 = vmax.f32 %v909_v36, 0.0  ;;  %v1322_v49 = vmax.f32 %v952_v37, 0.0 }
 0x17c   : > { %v7189_v50 = vpop.f32.mrf.mxu0  ;;  %v7191_v51 = vpop.f32.mrf.mxu1  ;;  %v2313_v24 = vunpack.c.h.s8.bf16 %v1521_v8  ;;  %v2441_v25 = vunpack.c.h.s8.bf16 %v1585_v11  ;;  %v2312_v36 = vunpack.c.h.s8.bf16 %v1520_v26  ;;  %v2440_v37 = vunpack.c.h.s8.bf16 %v1584_v27 }
 0x17d   : > { %v1321_v54 = vmax.f32 %v911_v42, 0.0  ;;  %v1323_v55 = vmax.f32 %v954_v43, 0.0  ;;  %v7197_v2 = vpack.c.bf16 %v1320_v48, %v1300_v56  ;;  %v7199_v3 = vpack.c.bf16 %v1322_v49, %v1302_v57  ;;  %v7242_v48 = vld [vmem:[%s7020_s13 + $0x8] sm:$0xff] }
 0x17e   : > { %v992_v60 = vpop.f32.mrf.mxu0  ;;  %v1035_v61 = vpop.f32.mrf.mxu1  ;;  %v2305_v40 = vunpack.c.l.s8.bf16 %v1521_v8  ;;  %v2433_v41 = vunpack.c.l.s8.bf16 %v1585_v11  ;;  %v7228_v42 = vsub.s32 4, %v7152_v16  ;;  %v7231_v43 = vsub.s32 6, %v7152_v16 }
 0x17f   : > { %v7193_v62 = vpack.c.bf16 %v1321_v54, %v1301_v52  ;;  %v7195_v63 = vpack.c.bf16 %v1323_v55, %v1303_v53  ;;  %v993_v0 = vadd.f32 %v992_v60, %v584_v46  ;;  %v1036_v1 = vadd.f32 %v1035_v61, %v592_v47 }
 0x180   : > { %v7203_v6 = vpop.f32.mrf.mxu0  ;;  %v7205_v7 = vpop.f32.mrf.mxu1  ;;  %8298 = vst [vmem:[#allocation21_spill] sm:$0xff] %v7228_v42  ;;  %8299 = vst [vmem:[#allocation22_spill] sm:$0xff] %v7231_v43  ;;  %v612_v16 = vrot.slane %v7242_v48, %v7228_v42  ;;  %v620_v53 = vrot.slane %v7242_v48, %v7231_v43  ;;  %v2304_v54 = vunpack.c.l.s8.bf16 %v1520_v26  ;;  %v2432_v55 = vunpack.c.l.s8.bf16 %v1584_v27 }
 0x181   : > { %3328 = vmatprep.mubr.bf16.mxu0 %v7193_v62  ;;  %3371 = vmatprep.mubr.bf16.mxu1 %v7195_v63  ;;  %v1305_v14 = vmax.f32 %v993_v0, 0.0  ;;  %v1307_v15 = vmax.f32 %v1036_v1, 0.0 }
 0x182   : > { %3329 = vmatmul.mubr.bf16.vlgmr.msra.gmra.mxu0 %v7197_v2  ;;  %3372 = vmatmul.mubr.bf16.vlgmr.msra.gmra.mxu1 %v7199_v3  ;;  %v996_v13 = vpop.f32.mrf.mxu0  ;;  %v1039_v10 = vpop.f32.mrf.mxu1 }
 0x183   : > { %3383 = vmatpush1.bf16.msra.mxu0 %v2328_v58  ;;  %3426 = vmatpush1.bf16.msra.mxu1 %v2456_v59  ;;  %v997_v22 = vadd.f32 %v996_v13, %v584_v46  ;;  %v1040_v23 = vadd.f32 %v1039_v10, %v592_v47  ;;  %v1513_v46 = vld [vmem:[%s7026_s14 + $0x448] sm:$0xff]  ;;  %v1512_v58 = vld [vmem:[%s7026_s14 + $0x440] sm:$0xff] }
 0x184   : > { %3384 = vmatprep.subr.bf16.mxu0 %v2321_v4  ;;  %3427 = vmatprep.subr.bf16.mxu1 %v2449_v5  ;;  %v7215_v28 = vpop.f32.mrf.mxu0  ;;  %v7217_v29 = vpop.f32.mrf.mxu1  ;;  %v1577_v47 = vld [vmem:[%s7026_s14 + $0x648] sm:$0xff]  ;;  %v2297_v56 = vunpack.c.h.s8.bf16 %v1513_v46  ;;  %v1576_v59 = vld [vmem:[%s7026_s14 + $0x640] sm:$0xff]  ;;  %v2296_v8 = vunpack.c.h.s8.bf16 %v1512_v58 }
 0x185   : > { %v1325_v32 = vmax.f32 %v997_v22, 0.0  ;;  %v1327_v33 = vmax.f32 %v1040_v23, 0.0  ;;  %v2425_v57 = vunpack.c.h.s8.bf16 %v1577_v47  ;;  %v2424_v11 = vunpack.c.h.s8.bf16 %v1576_v59  ;;  %v1569_v22 = vld [vmem:[%s7026_s14 + $0x608] sm:$0xff] }
 0x186   : > { %v7219_v34 = vpop.f32.mrf.mxu0  ;;  %v7221_v35 = vpop.f32.mrf.mxu1  ;;  %v2417_v13 = vunpack.c.l.s8.bf16 %v1577_v47 }
 0x187   : > { %3385 = vmatpush1.bf16.msra.mxu0 %v2320_v12  ;;  %3428 = vmatpush1.bf16.msra.mxu1 %v2448_v9  ;;  %v7223_v38 = vpack.c.bf16 %v1325_v32, %v1305_v14  ;;  %v7225_v39 = vpack.c.bf16 %v1327_v33, %v1307_v15  ;;  %v7259_v12 = vld [vmem:[%s7020_s13 + $0x10] sm:$0xf]  ;;  %v2289_v9 = vunpack.c.l.s8.bf16 %v1513_v46 }
 0x188   : > { %3386 = vmatprep.subr.bf16.mxu0 %v2313_v24  ;;  %3429 = vmatprep.subr.bf16.mxu1 %v2441_v25  ;;  %v7233_v44 = vpop.f32.mrf.mxu0  ;;  %v7235_v45 = vpop.f32.mrf.mxu1  ;;  %v1505_v15 = vld [vmem:[%s7026_s14 + $0x408] sm:$0xff]  ;;  %v628_v33 = vrot.slane %v7259_v12, %v7161_v19 }
 0x189   : > { %3414 = vmatprep.mubr.bf16.mxu0 %v7223_v38  ;;  %3457 = vmatprep.mubr.bf16.mxu1 %v7225_v39  ;;  %v2281_v47 = vunpack.c.h.s8.bf16 %v1505_v15 }
 0x18a   : > { %v7244_v49 = vpop.f32.mrf.mxu0  ;;  %v7246_v52 = vpop.f32.mrf.mxu1 }
 0x18b   : > { %3387 = vmatpush1.bf16.msra.mxu0 %v2312_v36  ;;  %3430 = vmatpush1.bf16.msra.mxu1 %v2440_v37  ;;  %v636_v36 = vrot.slane %v7259_v12, %v7164_v20  ;;  %v2288_v37 = vunpack.c.l.s8.bf16 %v1512_v58 }
 0x18c   : > { %3388 = vmatprep.subr.bf16.mxu0 %v2305_v40  ;;  %3431 = vmatprep.subr.bf16.mxu1 %v2433_v41  ;;  %v1162_v60 = vpop.f32.mrf.mxu0  ;;  %v1205_v61 = vpop.f32.mrf.mxu1  ;;  %v2416_v40 = vunpack.c.l.s8.bf16 %v1576_v59 }
 0x18d   : > { %v1163_v0 = vadd.f32 %v1162_v60, %v612_v16  ;;  %v1206_v4 = vadd.f32 %v1205_v61, %v620_v53 }
 0x18e   : > { %v7254_v1 = vpop.f32.mrf.mxu0  ;;  %v7256_v5 = vpop.f32.mrf.mxu1 }
 0x18f   : > { %3389 = vmatpush1.bf16.msra.mxu0 %v2304_v54  ;;  %3432 = vmatpush1.bf16.msra.mxu1 %v2432_v55  ;;  %v1312_v23 = vmax.f32 %v1163_v0, 0.0  ;;  %v1314_v24 = vmax.f32 %v1206_v4, 0.0  ;;  %v1568_v54 = vld [vmem:[%s7026_s14 + $0x600] sm:$0xff] }
 0x190   : > { %3390 = vmatprep.subr.bf16.mxu0 %v2297_v56  ;;  %3433 = vmatprep.subr.bf16.mxu1 %v2425_v57  ;;  %v1166_v10 = vpop.f32.mrf.mxu0  ;;  %v1209_v14 = vpop.f32.mrf.mxu1 }
 0x191   : > { %v1167_v25 = vadd.f32 %v1166_v10, %v612_v16  ;;  %v1210_v26 = vadd.f32 %v1209_v14, %v620_v53  ;;  %v2409_v16 = vunpack.c.h.s8.bf16 %v1569_v22  ;;  %v1504_v53 = vld [vmem:[%s7026_s14 + $0x400] sm:$0xff]  ;;  %v1561_v14 = vld [vmem:[%s7026_s14 + $0x5c8] sm:$0xff] }
 0x192   : > { %v7263_v27 = vpop.f32.mrf.mxu0  ;;  %v7265_v32 = vpop.f32.mrf.mxu1  ;;  %v2280_v4 = vunpack.c.h.s8.bf16 %v1504_v53 }
 0x193   : > { %3391 = vmatpush1.bf16.msra.mxu0 %v2296_v8  ;;  %3434 = vmatpush1.bf16.msra.mxu1 %v2424_v11  ;;  %v1332_v41 = vmax.f32 %v1167_v25, 0.0  ;;  %v1334_v46 = vmax.f32 %v1210_v26, 0.0  ;;  %v2408_v8 = vunpack.c.h.s8.bf16 %v1568_v54  ;;  %v2273_v11 = vunpack.c.l.s8.bf16 %v1505_v15 }
 0x194   : > { %3392 = vmatprep.subr.bf16.mxu0 %v2289_v9  ;;  %3435 = vmatprep.subr.bf16.mxu1 %v2417_v13  ;;  %v1248_v55 = vpop.f32.mrf.mxu0  ;;  %v1291_v56 = vpop.f32.mrf.mxu1  ;;  %v2401_v9 = vunpack.c.l.s8.bf16 %v1569_v22  ;;  %v2393_v15 = vunpack.c.h.s8.bf16 %v1561_v14 }
 0x195   : > { %v7273_v57 = vpack.c.bf16 %v1332_v41, %v1312_v23  ;;  %v7275_v60 = vpack.c.bf16 %v1334_v46, %v1314_v24  ;;  %v1249_v61 = vadd.f32 %v1248_v55, %v628_v33  ;;  %v1292_v58 = vadd.f32 %v1291_v56, %v636_v36  ;;  %v1625_v23 = vld [vmem:[%s7026_s14 + $0x7c8] sm:$0xff] }
 0x196   : > { %v7277_v0 = vpop.f32.mrf.mxu0  ;;  %v7279_v59 = vpop.f32.mrf.mxu1  ;;  %v2521_v22 = vunpack.c.h.s8.bf16 %v1625_v23 }
 0x197   : > { %3393 = vmatpush1.bf16.msra.mxu0 %v2288_v37  ;;  %3436 = vmatpush1.bf16.msra.mxu1 %v2416_v40  ;;  %v1316_v24 = vmax.f32 %v1249_v61, 0.0  ;;  %v1318_v25 = vmax.f32 %v1292_v58, 0.0  ;;  %v2272_v37 = vunpack.c.l.s8.bf16 %v1504_v53  ;;  %v2400_v40 = vunpack.c.l.s8.bf16 %v1568_v54  ;;  %v1553_v58 = vld [vmem:[%s7026_s14 + $0x588] sm:$0xff] }
 0x198   : > { %3394 = vmatprep.subr.bf16.mxu0 %v2281_v47  ;;  %3437 = vmatprep.subr.bf16.mxu1 %v2409_v16  ;;  %v1252_v13 = vpop.f32.mrf.mxu0  ;;  %v1295_v10 = vpop.f32.mrf.mxu1  ;;  %v1560_v47 = vld [vmem:[%s7026_s14 + $0x5c0] sm:$0xff]  ;;  %v2385_v53 = vunpack.c.l.s8.bf16 %v1561_v14  ;;  %v2513_v54 = vunpack.c.l.s8.bf16 %v1625_v23  ;;  %v2369_v23 = vunpack.c.l.s8.bf16 %v1553_v58 }
 0x199   : > { %v1253_v26 = vadd.f32 %v1252_v13, %v628_v33  ;;  %v1296_v41 = vadd.f32 %v1295_v10, %v636_v36  ;;  %v1624_v16 = vld [vmem:[%s7026_s14 + $0x7c0] sm:$0xff]  ;;  %v2392_v33 = vunpack.c.h.s8.bf16 %v1560_v47 }
 0x19a   : > { %v2520_v36 = vunpack.c.h.s8.bf16 %v1624_v16  ;;  %v1552_v10 = vld [vmem:[%s7026_s14 + $0x580] sm:$0xff] }
 0x19b   : > { %3395 = vmatpush1.bf16.msra.mxu0 %v2280_v4  ;;  %3438 = vmatpush1.bf16.msra.mxu1 %v2408_v8  ;;  %v1336_v46 = vmax.f32 %v1253_v26, 0.0  ;;  %v1338_v55 = vmax.f32 %v1296_v41, 0.0  ;;  %v1617_v4 = vld [vmem:[%s7026_s14 + $0x788] sm:$0xff]  ;;  %v2384_v8 = vunpack.c.l.s8.bf16 %v1560_v47  ;;  %v1608_v47 = vld [vmem:[%s7026_s14 + $0x740] sm:$0xff] }
 0x19c   : > { %3396 = vmatprep.subr.bf16.mxu0 %v2273_v11  ;;  %3439 = vmatprep.subr.bf16.mxu1 %v2401_v9  ;;  %v2512_v11 = vunpack.c.l.s8.bf16 %v1624_v16  ;;  %v2377_v9 = vunpack.c.h.s8.bf16 %v1553_v58  ;;  %v2505_v13 = vunpack.c.h.s8.bf16 %v1617_v4  ;;  %v2497_v26 = vunpack.c.l.s8.bf16 %v1617_v4  ;;  %v1545_v41 = vld [vmem:[%s7026_s14 + $0x548] sm:$0xff] }
 0x19d   : > { %v7285_v56 = vpack.c.bf16 %v1336_v46, %v1316_v24  ;;  %v7287_v61 = vpack.c.bf16 %v1338_v55, %v1318_v25  ;;  %v1616_v24 = vld [vmem:[%s7026_s14 + $0x780] sm:$0xff]  ;;  %v2376_v25 = vunpack.c.h.s8.bf16 %v1552_v10  ;;  %v2361_v55 = vunpack.c.h.s8.bf16 %v1545_v41  ;;  %v1601_v58 = vld [vmem:[%s7026_s14 + $0x708] sm:$0xff] }
 0x19e   : > { %v2504_v14 = vunpack.c.h.s8.bf16 %v1616_v24  ;;  %v2496_v46 = vunpack.c.l.s8.bf16 %v1616_v24  ;;  %v580_v4 = vrot.slane %v7167_v21, %v7228_v42  ;;  %v1536_v24 = vld [vmem:[%s7026_s14 + $0x500] sm:$0xff] }
 0x19f   : > { %3397 = vmatpush1.bf16.msra.mxu0 %v2272_v37  ;;  %3440 = vmatpush1.bf16.msra.mxu1 %v2400_v40  ;;  %v1609_v37 = vld [vmem:[%s7026_s14 + $0x748] sm:$0xff]  ;;  %v2368_v40 = vunpack.c.l.s8.bf16 %v1552_v10  ;;  %v2473_v10 = vunpack.c.h.s8.bf16 %v1601_v58 }
 0x1a0   : > { %3398 = vmatprep.subr.bf16.mxu0 %v2393_v15  ;;  %3441 = vmatprep.subr.bf16.mxu1 %v2521_v22  ;;  %v2489_v15 = vunpack.c.h.s8.bf16 %v1609_v37  ;;  %v1544_v22 = vld [vmem:[%s7026_s14 + $0x540] sm:$0xff] }
 0x1a1   : > { %v2360_v16 = vunpack.c.h.s8.bf16 %v1544_v22 }
 0x1a3   : > { %3399 = vmatpush2.bf16.msra.mxu0 %v2392_v33  ;;  %3442 = vmatpush2.bf16.msra.mxu1 %v2520_v36  ;;  %v2488_v33 = vunpack.c.h.s8.bf16 %v1608_v47  ;;  %v2353_v36 = vunpack.c.l.s8.bf16 %v1545_v41  ;;  %v2344_v41 = vunpack.c.h.s8.bf16 %v1536_v24 }
 0x1a4   : > { %3400 = vmatprep.subr.bf16.mxu0 %v2385_v53  ;;  %3443 = vmatprep.subr.bf16.mxu1 %v2513_v54  ;;  %v2481_v53 = vunpack.c.l.s8.bf16 %v1609_v37  ;;  %v1537_v54 = vld [vmem:[%s7026_s14 + $0x508] sm:$0xff] }
 0x1a5   : > { %v2337_v37 = vunpack.c.l.s8.bf16 %v1537_v54 }
 0x1a7   : > { %3401 = vmatpush2.bf16.msra.mxu0 %v2384_v8  ;;  %3444 = vmatpush2.bf16.msra.mxu1 %v2512_v11  ;;  %v2352_v8 = vunpack.c.l.s8.bf16 %v1544_v22  ;;  %v2480_v11 = vunpack.c.l.s8.bf16 %v1608_v47  ;;  %v1657_v22 = vld [vmem:[%s7026_s14 + $0x8c8] sm:$0xff] }
 0x1a8   : > { %3402 = vmatprep.subr.bf16.mxu0 %v2377_v9  ;;  %3445 = vmatprep.subr.bf16.mxu1 %v2505_v13  ;;  %v588_v9 = vrot.slane %v7167_v21, %v7231_v43  ;;  %v2345_v13 = vunpack.c.h.s8.bf16 %v1537_v54  ;;  %v1721_v47 = vld [vmem:[%s7026_s14 + $0xac8] sm:$0xff]  ;;  %v1674_v43 = vld [vmem:[%s7026_s14 + $0x950] sm:$0xff] }
 0x1a9   : > { %v2618_v42 = vunpack.c.h.s8.bf16 %v1674_v43 }
 0x1ab   : > { %3403 = vmatpush2.bf16.msra.mxu0 %v2376_v25  ;;  %3446 = vmatpush2.bf16.msra.mxu1 %v2504_v14  ;;  %v1600_v25 = vld [vmem:[%s7026_s14 + $0x700] sm:$0xff]  ;;  %v600_v14 = vrot.slane %v7242_v48, %v7155_v17 }
 0x1ac   : > { %3404 = vmatprep.subr.bf16.mxu0 %v2369_v23  ;;  %3447 = vmatprep.subr.bf16.mxu1 %v2497_v26  ;;  %v608_v23 = vrot.slane %v7242_v48, %v7158_v18  ;;  %v991_v26 = vadd.f32 %v7189_v50, %v580_v4  ;;  %v2472_v21 = vunpack.c.h.s8.bf16 %v1600_v25 }
 0x1ae   : > { %v1122_v50 = vadd.f32 %v7221_v35, %v608_v23  ;;  %v1304_v54 = vmax.f32 %v991_v26, 0.0  ;;  %v1720_v35 = vld [vmem:[%s7026_s14 + $0xac0] sm:$0xff]  ;;  %v1649_v26 = vld [vmem:[%s7026_s14 + $0x888] sm:$0xff] }
 0x1af   : > { %3405 = vmatpush2.bf16.msra.mxu0 %v2368_v40  ;;  %3448 = vmatpush2.bf16.msra.mxu1 %v2496_v46  ;;  %v1034_v40 = vadd.f32 %v7191_v51, %v588_v9  ;;  %v995_v46 = vadd.f32 %v7203_v6, %v580_v4  ;;  %v2336_v51 = vunpack.c.l.s8.bf16 %v1536_v24  ;;  %v2464_v6 = vunpack.c.l.s8.bf16 %v1600_v25 }
 0x1b0   : > { %3406 = vmatprep.subr.bf16.mxu0 %v2361_v55  ;;  %3449 = vmatprep.subr.bf16.mxu1 %v2489_v15  ;;  %v1038_v55 = vadd.f32 %v7205_v7, %v588_v9  ;;  %v2465_v15 = vunpack.c.l.s8.bf16 %v1601_v58  ;;  %v2585_v7 = vunpack.c.h.s8.bf16 %v1657_v22 }
 0x1b1   : > { %v1306_v58 = vmax.f32 %v1034_v40, 0.0  ;;  %v1324_v4 = vmax.f32 %v995_v46, 0.0  ;;  %v2704_v46 = vunpack.c.l.s8.bf16 %v1720_v35 }
 0x1b3   : > { %3407 = vmatpush2.bf16.msra.mxu0 %v2360_v16  ;;  %3450 = vmatpush2.bf16.msra.mxu1 %v2488_v33  ;;  %v1079_v16 = vadd.f32 %v7219_v34, %v600_v14  ;;  %v1083_v33 = vadd.f32 %v7244_v49, %v600_v14  ;;  %v1656_v34 = vld [vmem:[%s7026_s14 + $0x8c0] sm:$0xff]  ;;  %v1311_v49 = vmax.f32 %v1122_v50, 0.0  ;;  %v7321_v24 = vpack.c.bf16 %v1324_v4, %v1304_v54 }
 0x1b4   : > { %3408 = vmatprep.subr.bf16.mxu0 %v2353_v36  ;;  %3451 = vmatprep.subr.bf16.mxu1 %v2481_v53  ;;  %v1126_v36 = vadd.f32 %v7246_v52, %v608_v23  ;;  %v2713_v53 = vunpack.c.h.s8.bf16 %v1721_v47  ;;  %v2577_v14 = vunpack.c.l.s8.bf16 %v1657_v22  ;;  %v2705_v23 = vunpack.c.l.s8.bf16 %v1721_v47  ;;  %v1648_v22 = vld [vmem:[%s7026_s14 + $0x880] sm:$0xff] }
 0x1b5   : > { %v1329_v9 = vmax.f32 %v1083_v33, 0.0  ;;  %v2576_v40 = vunpack.c.l.s8.bf16 %v1656_v34  ;;  %v1712_v47 = vld [vmem:[%s7026_s14 + $0xa80] sm:$0xff]  ;;  %v2561_v33 = vunpack.c.l.s8.bf16 %v1649_v26 }
 0x1b6   : > { %v1331_v52 = vmax.f32 %v1126_v36, 0.0  ;;  %v2696_v50 = vunpack.c.h.s8.bf16 %v1712_v47  ;;  %v1640_v4 = vld [vmem:[%s7026_s14 + $0x840] sm:$0xff] }
 0x1b7   : > { %3409 = vmatpush2.bf16.msra.mxu0 %v2352_v8  ;;  %3452 = vmatpush2.bf16.msra.mxu1 %v2480_v11  ;;  %v1326_v8 = vmax.f32 %v1038_v55, 0.0  ;;  %v1309_v11 = vmax.f32 %v1079_v16, 0.0  ;;  %v2569_v55 = vunpack.c.h.s8.bf16 %v1649_v26  ;;  %v2568_v16 = vunpack.c.h.s8.bf16 %v1648_v22  ;;  %v1632_v26 = vld [vmem:[%s7026_s14 + $0x800] sm:$0xff] }
 0x1b8   : > { %3410 = vmatprep.subr.bf16.mxu0 %v2345_v13  ;;  %3453 = vmatprep.subr.bf16.mxu1 %v2473_v10  ;;  %v2584_v13 = vunpack.c.h.s8.bf16 %v1656_v34  ;;  %v2712_v10 = vunpack.c.h.s8.bf16 %v1720_v35  ;;  %v2552_v34 = vunpack.c.h.s8.bf16 %v1640_v4 }
 0x1b9   : > { %v7323_v25 = vpack.c.bf16 %v1326_v8, %v1306_v58  ;;  %v1704_v8 = vld [vmem:[%s7026_s14 + $0xa40] sm:$0xff] }
 0x1ba   : > { %v2680_v35 = vunpack.c.h.s8.bf16 %v1704_v8 }
 0x1bb   : > { %3411 = vmatpush2.bf16.msra.mxu0 %v2344_v41  ;;  %3454 = vmatpush2.bf16.msra.mxu1 %v2472_v21  ;;  %v1713_v41 = vld [vmem:[%s7026_s14 + $0xa88] sm:$0xff]  ;;  %v7327_v21 = vpack.c.bf16 %v1329_v9, %v1309_v11 }
 0x1bc   : > { %3412 = vmatprep.subr.bf16.mxu0 %v2337_v37  ;;  %3455 = vmatprep.subr.bf16.mxu1 %v2465_v15  ;;  %v7329_v37 = vpack.c.bf16 %v1331_v52, %v1311_v49  ;;  %v2697_v15 = vunpack.c.h.s8.bf16 %v1713_v41  ;;  %v2689_v36 = vunpack.c.l.s8.bf16 %v1713_v41  ;;  %v1633_v9 = vld [vmem:[%s7026_s14 + $0x808] sm:$0xff]  ;;  %v1696_v41 = vld [vmem:[%s7026_s14 + $0xa00] sm:$0xff] }
 0x1bd   : > { %v1697_v52 = vld [vmem:[%s7026_s14 + $0xa08] sm:$0xff] }
 0x1bf   : > { %3413 = vmatpush2.bf16.msra.mxu0 %v2336_v51  ;;  %3456 = vmatpush2.bf16.msra.mxu1 %v2464_v6  ;;  %v1641_v51 = vld [vmem:[%s7026_s14 + $0x848] sm:$0xff] }
 0x1c0   : > { %3468 = vmatprep.subr.bf16.mxu0 %v2585_v7  ;;  %3511 = vmatprep.subr.bf16.mxu1 %v2713_v53  ;;  %v1705_v6 = vld [vmem:[%s7026_s14 + $0xa48] sm:$0xff]  ;;  %v2560_v7 = vunpack.c.l.s8.bf16 %v1648_v22  ;;  %v2688_v53 = vunpack.c.l.s8.bf16 %v1712_v47  ;;  %v2553_v54 = vunpack.c.h.s8.bf16 %v1641_v51  ;;  %v2545_v11 = vunpack.c.l.s8.bf16 %v1641_v51  ;;  %v1688_v51 = vld [vmem:[%s7026_s14 + $0x9c0] sm:$0xff] }
 0x1c1   : > { %v2681_v58 = vunpack.c.h.s8.bf16 %v1705_v6  ;;  %v2673_v49 = vunpack.c.l.s8.bf16 %v1705_v6  ;;  %v1689_v22 = vld [vmem:[%s7026_s14 + $0x9c8] sm:$0xff]  ;;  %v1752_v6 = vld [vmem:[%s7026_s14 + $0xbc0] sm:$0xff] }
 0x1c2   : > { %3415 = vmatmul.mubr.bf16.vlgmr.msra.gmra.mxu0 %v7321_v24  ;;  %3458 = vmatmul.mubr.bf16.vlgmr.msra.gmra.mxu1 %v7323_v25  ;;  %v1753_v47 = vld [vmem:[%s7026_s14 + $0xbc8] sm:$0xff] }
 0x1c3   : > { %3469 = vmatpush1.bf16.msra.mxu0 %v2584_v13  ;;  %3512 = vmatpush1.bf16.msra.mxu1 %v2712_v10  ;;  %v2544_v13 = vunpack.c.l.s8.bf16 %v1640_v4  ;;  %v2672_v10 = vunpack.c.l.s8.bf16 %v1704_v8  ;;  %v1681_v4 = vld [vmem:[%s7026_s14 + $0x988] sm:$0xff] }
 0x1c4   : > { %3470 = vmatprep.subr.bf16.mxu0 %v2577_v14  ;;  %3513 = vmatprep.subr.bf16.mxu1 %v2705_v23  ;;  %v2537_v14 = vunpack.c.h.s8.bf16 %v1633_v9  ;;  %v2665_v23 = vunpack.c.h.s8.bf16 %v1697_v52  ;;  %v1745_v8 = vld [vmem:[%s7026_s14 + $0xb88] sm:$0xff] }
 0x1c5   : > { %3500 = vmatprep.mubr.bf16.mxu0 %v7327_v21  ;;  %3543 = vmatprep.mubr.bf16.mxu1 %v7329_v37 }
 0x1c7   : > { %3471 = vmatpush1.bf16.msra.mxu0 %v2576_v40  ;;  %3514 = vmatpush1.bf16.msra.mxu1 %v2704_v46  ;;  %v2536_v40 = vunpack.c.h.s8.bf16 %v1632_v26  ;;  %v2664_v46 = vunpack.c.h.s8.bf16 %v1696_v41 }
 0x1c8   : > { %3472 = vmatprep.subr.bf16.mxu0 %v2569_v55  ;;  %3515 = vmatprep.subr.bf16.mxu1 %v2697_v15  ;;  %v2529_v55 = vunpack.c.l.s8.bf16 %v1633_v9  ;;  %v2657_v15 = vunpack.c.l.s8.bf16 %v1697_v52  ;;  %v1680_v9 = vld [vmem:[%s7026_s14 + $0x980] sm:$0xff] }
 0x1c9   : > { %v1744_v52 = vld [vmem:[%s7026_s14 + $0xb80] sm:$0xff] }
 0x1cb   : > { %3473 = vmatpush1.bf16.msra.mxu0 %v2568_v16  ;;  %3516 = vmatpush1.bf16.msra.mxu1 %v2696_v50  ;;  %v2528_v16 = vunpack.c.l.s8.bf16 %v1632_v26  ;;  %v2656_v50 = vunpack.c.l.s8.bf16 %v1696_v41  ;;  %v1673_v26 = vld [vmem:[%s7026_s14 + $0x948] sm:$0xff] }
 0x1cc   : > { %3474 = vmatprep.subr.bf16.mxu0 %v2561_v33  ;;  %3517 = vmatprep.subr.bf16.mxu1 %v2689_v36  ;;  %v2649_v33 = vunpack.c.h.s8.bf16 %v1689_v22  ;;  %v2777_v36 = vunpack.c.h.s8.bf16 %v1753_v47  ;;  %v1737_v41 = vld [vmem:[%s7026_s14 + $0xb48] sm:$0xff] }
 0x1cf   : > { %3475 = vmatpush1.bf16.msra.mxu0 %v2560_v7  ;;  %3518 = vmatpush1.bf16.msra.mxu1 %v2688_v53  ;;  %v2648_v7 = vunpack.c.h.s8.bf16 %v1688_v51  ;;  %v2776_v53 = vunpack.c.h.s8.bf16 %v1752_v6 }
 0x1d0   : > { %3476 = vmatprep.subr.bf16.mxu0 %v2553_v54  ;;  %3519 = vmatprep.subr.bf16.mxu1 %v2681_v58  ;;  %v2641_v54 = vunpack.c.l.s8.bf16 %v1689_v22  ;;  %v2769_v58 = vunpack.c.l.s8.bf16 %v1753_v47  ;;  %v1672_v22 = vld [vmem:[%s7026_s14 + $0x940] sm:$0xff] }
 0x1d1   : > { %v1736_v47 = vld [vmem:[%s7026_s14 + $0xb40] sm:$0xff] }
 0x1d3   : > { %3477 = vmatpush1.bf16.msra.mxu0 %v2552_v34  ;;  %3520 = vmatpush1.bf16.msra.mxu1 %v2680_v35  ;;  %v2640_v34 = vunpack.c.l.s8.bf16 %v1688_v51  ;;  %v2768_v35 = vunpack.c.l.s8.bf16 %v1752_v6  ;;  %v1665_v51 = vld [vmem:[%s7026_s14 + $0x908] sm:$0xff] }
 0x1d4   : > { %3478 = vmatprep.subr.bf16.mxu0 %v2545_v11  ;;  %3521 = vmatprep.subr.bf16.mxu1 %v2673_v49  ;;  %v2633_v11 = vunpack.c.h.s8.bf16 %v1681_v4  ;;  %v2761_v49 = vunpack.c.h.s8.bf16 %v1745_v8  ;;  %v1729_v6 = vld [vmem:[%s7026_s14 + $0xb08] sm:$0xff] }
 0x1d7   : > { %3479 = vmatpush1.bf16.msra.mxu0 %v2544_v13  ;;  %3522 = vmatpush1.bf16.msra.mxu1 %v2672_v10  ;;  %v2632_v13 = vunpack.c.h.s8.bf16 %v1680_v9  ;;  %v2760_v10 = vunpack.c.h.s8.bf16 %v1744_v52 }
 0x1d8   : > { %3480 = vmatprep.subr.bf16.mxu0 %v2537_v14  ;;  %3523 = vmatprep.subr.bf16.mxu1 %v2665_v23  ;;  %v2625_v14 = vunpack.c.l.s8.bf16 %v1681_v4  ;;  %v2753_v23 = vunpack.c.l.s8.bf16 %v1745_v8  ;;  %v2736_v4 = vunpack.c.l.s8.bf16 %v1736_v47  ;;  %v1664_v8 = vld [vmem:[%s7026_s14 + $0x900] sm:$0xff] }
 0x1db   : > { %3481 = vmatpush1.bf16.msra.mxu0 %v2536_v40  ;;  %3524 = vmatpush1.bf16.msra.mxu1 %v2664_v46  ;;  %v2624_v40 = vunpack.c.l.s8.bf16 %v1680_v9  ;;  %v2752_v46 = vunpack.c.l.s8.bf16 %v1744_v52 }
 0x1dc   : > { %3482 = vmatprep.subr.bf16.mxu0 %v2529_v55  ;;  %3525 = vmatprep.subr.bf16.mxu1 %v2657_v15  ;;  %v2617_v55 = vunpack.c.h.s8.bf16 %v1673_v26  ;;  %v2745_v15 = vunpack.c.h.s8.bf16 %v1737_v41 }
 0x1df   : > { %3483 = vmatpush1.bf16.msra.mxu0 %v2528_v16  ;;  %3526 = vmatpush1.bf16.msra.mxu1 %v2656_v50  ;;  %v2616_v16 = vunpack.c.h.s8.bf16 %v1672_v22  ;;  %v2744_v50 = vunpack.c.h.s8.bf16 %v1736_v47 }
 0x1e0   : > { %3484 = vmatprep.subr.bf16.mxu0 %v2649_v33  ;;  %3527 = vmatprep.subr.bf16.mxu1 %v2777_v36  ;;  %v2609_v33 = vunpack.c.l.s8.bf16 %v1673_v26  ;;  %v2737_v36 = vunpack.c.l.s8.bf16 %v1737_v41  ;;  %v2593_v41 = vunpack.c.l.s8.bf16 %v1665_v51 }
 0x1e3   : > { %3485 = vmatpush2.bf16.msra.mxu0 %v2648_v7  ;;  %3528 = vmatpush2.bf16.msra.mxu1 %v2776_v53  ;;  %v596_v7 = vrot.slane %v7242_v48, %v7161_v19  ;;  %v604_v53 = vrot.slane %v7242_v48, %v7164_v20 }
 0x1e4   : > { %3486 = vmatprep.subr.bf16.mxu0 %v2641_v54  ;;  %3529 = vmatprep.subr.bf16.mxu1 %v2769_v58  ;;  %v616_v54 = vrot.slane %v7242_v48, %v7178_v30  ;;  %v2608_v58 = vunpack.c.l.s8.bf16 %v1672_v22  ;;  %v1731_v30 = vld [vmem:[%s7026_s14 + $0xb18] sm:$0xff] }
 0x1e5   : > { %v1077_v9 = vadd.f32 %v7215_v28, %v596_v7  ;;  %v1120_v52 = vadd.f32 %v7217_v29, %v604_v53  ;;  %v2721_v29 = vunpack.c.l.s8.bf16 %v1729_v6 }
 0x1e6   : > { %v1169_v26 = vadd.f32 %v7263_v27, %v616_v54 }
 0x1e7   : > { %3487 = vmatpush2.bf16.msra.mxu0 %v2640_v34  ;;  %3530 = vmatpush2.bf16.msra.mxu1 %v2768_v35  ;;  %v1728_v34 = vld [vmem:[%s7026_s14 + $0xb00] sm:$0xff]  ;;  %v624_v35 = vrot.slane %v7242_v48, %v7181_v31  ;;  %v1124_v48 = vadd.f32 %v7235_v45, %v604_v53  ;;  %v1308_v47 = vmax.f32 %v1077_v9, 0.0  ;;  %v1310_v27 = vmax.f32 %v1120_v52, 0.0 }
 0x1e8   : > { %3488 = vmatprep.subr.bf16.mxu0 %v2633_v11  ;;  %3531 = vmatprep.subr.bf16.mxu1 %v2761_v49  ;;  %v2601_v11 = vunpack.c.h.s8.bf16 %v1665_v51  ;;  %v2729_v49 = vunpack.c.h.s8.bf16 %v1729_v6  ;;  %v1848_v51 = vld [vmem:[%s7026_s14 + $0xec0] sm:$0xff] }
 0x1e9   : > { %v1212_v28 = vadd.f32 %v7265_v32, %v624_v35  ;;  %v1784_v32 = vld [vmem:[%s7026_s14 + $0xcc0] sm:$0xff]  ;;  %v2960_v9 = vunpack.c.l.s8.bf16 %v1848_v51 }
 0x1eb   : > { %3489 = vmatpush2.bf16.msra.mxu0 %v2632_v13  ;;  %3532 = vmatpush2.bf16.msra.mxu1 %v2760_v10  ;;  %v2600_v13 = vunpack.c.h.s8.bf16 %v1664_v8  ;;  %v2728_v10 = vunpack.c.h.s8.bf16 %v1728_v34 }
 0x1ec   : > { %3490 = vmatprep.subr.bf16.mxu0 %v2625_v14  ;;  %3533 = vmatprep.subr.bf16.mxu1 %v2753_v23  ;;  %v1081_v14 = vadd.f32 %v7233_v44, %v596_v7  ;;  %v1165_v23 = vadd.f32 %v7254_v1, %v616_v54  ;;  %v2720_v44 = vunpack.c.l.s8.bf16 %v1728_v34  ;;  %v2840_v7 = vunpack.c.h.s8.bf16 %v1784_v32 }
 0x1ee   : > { %v1328_v45 = vmax.f32 %v1081_v14, 0.0  ;;  %v1840_v14 = vld [vmem:[%s7026_s14 + $0xe80] sm:$0xff] }
 0x1ef   : > { %3491 = vmatpush2.bf16.msra.mxu0 %v2624_v40  ;;  %3534 = vmatpush2.bf16.msra.mxu1 %v2752_v46  ;;  %v1785_v40 = vld [vmem:[%s7026_s14 + $0xcc8] sm:$0xff] }
 0x1f0   : > { %3492 = vmatprep.subr.bf16.mxu0 %v2617_v55  ;;  %3535 = vmatprep.subr.bf16.mxu1 %v2745_v15  ;;  %v1849_v46 = vld [vmem:[%s7026_s14 + $0xec8] sm:$0xff]  ;;  %v1208_v55 = vadd.f32 %v7256_v5, %v624_v35  ;;  %v2592_v15 = vunpack.c.l.s8.bf16 %v1664_v8  ;;  %v2841_v1 = vunpack.c.h.s8.bf16 %v1785_v40  ;;  %v7383_v53 = vpack.c.bf16 %v1328_v45, %v1308_v47 }
 0x1f1   : > { %v2969_v22 = vunpack.c.h.s8.bf16 %v1849_v46  ;;  %v2833_v8 = vunpack.c.l.s8.bf16 %v1785_v40  ;;  %v2961_v34 = vunpack.c.l.s8.bf16 %v1849_v46  ;;  %v1777_v35 = vld [vmem:[%s7026_s14 + $0xc88] sm:$0xff] }
 0x1f2   : > { %v1315_v5 = vmax.f32 %v1208_v55, 0.0  ;;  %v2825_v52 = vunpack.c.h.s8.bf16 %v1777_v35  ;;  %v1769_v46 = vld [vmem:[%s7026_s14 + $0xc48] sm:$0xff] }
 0x1f3   : > { %3493 = vmatpush2.bf16.msra.mxu0 %v2616_v16  ;;  %3536 = vmatpush2.bf16.msra.mxu1 %v2744_v50  ;;  %v1313_v16 = vmax.f32 %v1165_v23, 0.0  ;;  %v1333_v50 = vmax.f32 %v1169_v26, 0.0  ;;  %v2952_v26 = vunpack.c.h.s8.bf16 %v1840_v14  ;;  %v1825_v45 = vld [vmem:[%s7026_s14 + $0xe08] sm:$0xff] }
 0x1f4   : > { %3494 = vmatprep.subr.bf16.mxu0 %v2609_v33  ;;  %3537 = vmatprep.subr.bf16.mxu1 %v2737_v36  ;;  %v1330_v33 = vmax.f32 %v1124_v48, 0.0  ;;  %v1335_v36 = vmax.f32 %v1212_v28, 0.0  ;;  %v1833_v48 = vld [vmem:[%s7026_s14 + $0xe48] sm:$0xff]  ;;  %v2944_v28 = vunpack.c.l.s8.bf16 %v1840_v14 }
 0x1f5   : > { %v7381_v6 = vpack.c.bf16 %v1333_v50, %v1313_v16  ;;  %v2929_v16 = vunpack.c.l.s8.bf16 %v1833_v48  ;;  %v1761_v50 = vld [vmem:[%s7026_s14 + $0xc08] sm:$0xff] }
 0x1f6   : > { %v7385_v54 = vpack.c.bf16 %v1330_v33, %v1310_v27  ;;  %v2801_v27 = vunpack.c.l.s8.bf16 %v1769_v46 }
 0x1f7   : > { %3495 = vmatpush2.bf16.msra.mxu0 %v2608_v58  ;;  %3538 = vmatpush2.bf16.msra.mxu1 %v2736_v4  ;;  %v7387_v58 = vpack.c.bf16 %v1335_v36, %v1315_v5  ;;  %v2968_v4 = vunpack.c.h.s8.bf16 %v1848_v51  ;;  %v2793_v36 = vunpack.c.h.s8.bf16 %v1761_v50  ;;  %v2921_v51 = vunpack.c.h.s8.bf16 %v1825_v45 }
 0x1f8   : > { %3496 = vmatprep.subr.bf16.mxu0 %v2601_v11  ;;  %3539 = vmatprep.subr.bf16.mxu1 %v2729_v49  ;;  %v1841_v11 = vld [vmem:[%s7026_s14 + $0xe88] sm:$0xff]  ;;  %v2832_v49 = vunpack.c.l.s8.bf16 %v1784_v32  ;;  %v1760_v32 = vld [vmem:[%s7026_s14 + $0xc00] sm:$0xff] }
 0x1f9   : > { %v2945_v40 = vunpack.c.l.s8.bf16 %v1841_v11 }
 0x1fb   : > { %3497 = vmatpush2.bf16.msra.mxu0 %v2600_v13  ;;  %3540 = vmatpush2.bf16.msra.mxu1 %v2728_v10  ;;  %v1776_v13 = vld [vmem:[%s7026_s14 + $0xc80] sm:$0xff]  ;;  %v2953_v10 = vunpack.c.h.s8.bf16 %v1841_v11  ;;  %v1817_v11 = vld [vmem:[%s7026_s14 + $0xdc8] sm:$0xff] }
 0x1fc   : > { %3498 = vmatprep.subr.bf16.mxu0 %v2593_v41  ;;  %3541 = vmatprep.subr.bf16.mxu1 %v2721_v29  ;;  %v2824_v23 = vunpack.c.h.s8.bf16 %v1776_v13  ;;  %v2817_v41 = vunpack.c.l.s8.bf16 %v1777_v35  ;;  %v2816_v55 = vunpack.c.l.s8.bf16 %v1776_v13  ;;  %v2809_v29 = vunpack.c.h.s8.bf16 %v1769_v46 }
 0x1fd   : > { %v2913_v35 = vunpack.c.l.s8.bf16 %v1825_v45  ;;  %v2905_v13 = vunpack.c.h.s8.bf16 %v1817_v11  ;;  %v1801_v45 = vld [vmem:[%s7026_s14 + $0xd48] sm:$0xff] }
 0x1ff   : > { %3499 = vmatpush2.bf16.msra.mxu0 %v2592_v15  ;;  %3542 = vmatpush2.bf16.msra.mxu1 %v2720_v44  ;;  %v1768_v15 = vld [vmem:[%s7026_s14 + $0xc40] sm:$0xff]  ;;  %v2937_v44 = vunpack.c.h.s8.bf16 %v1833_v48  ;;  %v1809_v48 = vld [vmem:[%s7026_s14 + $0xd88] sm:$0xff] }
 0x200   : > { %3554 = vmatprep.subr.bf16.mxu0 %v2841_v1  ;;  %3597 = vmatprep.subr.bf16.mxu1 %v2969_v22  ;;  %v1832_v1 = vld [vmem:[%s7026_s14 + $0xe40] sm:$0xff]  ;;  %v2808_v22 = vunpack.c.h.s8.bf16 %v1768_v15  ;;  %v2800_v33 = vunpack.c.l.s8.bf16 %v1768_v15  ;;  %v2889_v15 = vunpack.c.h.s8.bf16 %v1809_v48 }
 0x201   : > { %v2936_v47 = vunpack.c.h.s8.bf16 %v1832_v1  ;;  %v2928_v5 = vunpack.c.l.s8.bf16 %v1832_v1 }
 0x202   : > { %3501 = vmatmul.mubr.bf16.vlgmr.msra.gmra.mxu0 %v7383_v53  ;;  %3544 = vmatmul.mubr.bf16.vlgmr.msra.gmra.mxu1 %v7385_v54 }
 0x203   : > { %3555 = vmatpush1.bf16.msra.mxu0 %v2840_v7  ;;  %3586 = vmatprep.mubr.bf16.mxu0 %v7381_v6  ;;  %v1824_v7 = vld [vmem:[%s7026_s14 + $0xe00] sm:$0xff] }
 0x204   : > { %3598 = vmatpush1.bf16.msra.mxu1 %v2968_v4  ;;  %3629 = vmatprep.mubr.bf16.mxu1 %v7387_v58  ;;  %v2792_v4 = vunpack.c.h.s8.bf16 %v1760_v32 }
 0x205   : > { %3556 = vmatprep.subr.bf16.mxu0 %v2833_v8  ;;  %3599 = vmatprep.subr.bf16.mxu1 %v2961_v34  ;;  %v2920_v8 = vunpack.c.h.s8.bf16 %v1824_v7  ;;  %v2785_v34 = vunpack.c.l.s8.bf16 %v1761_v50 }
 0x207   : > { %3557 = vmatpush1.bf16.msra.mxu0 %v2832_v49  ;;  %v1881_v49 = vld [vmem:[%s7026_s14 + $0xfc8] sm:$0xff] }
 0x208   : > { %3600 = vmatpush1.bf16.msra.mxu1 %v2960_v9  ;;  %3558 = vmatprep.subr.bf16.mxu0 %v2825_v52  ;;  %v2784_v9 = vunpack.c.l.s8.bf16 %v1760_v32  ;;  %v2912_v52 = vunpack.c.l.s8.bf16 %v1824_v7  ;;  %v3033_v14 = vunpack.c.h.s8.bf16 %v1881_v49  ;;  %v3025_v46 = vunpack.c.l.s8.bf16 %v1881_v49  ;;  %v1793_v49 = vld [vmem:[%s7026_s14 + $0xd08] sm:$0xff] }
 0x209   : > { %3601 = vmatprep.subr.bf16.mxu1 %v2953_v10  ;;  %v1816_v10 = vld [vmem:[%s7026_s14 + $0xdc0] sm:$0xff]  ;;  %v2873_v32 = vunpack.c.h.s8.bf16 %v1801_v45 }
 0x20b   : > { %3559 = vmatpush1.bf16.msra.mxu0 %v2824_v23  ;;  %v1880_v23 = vld [vmem:[%s7026_s14 + $0xfc0] sm:$0xff] }
 0x20c   : > { %3602 = vmatpush1.bf16.msra.mxu1 %v2952_v26  ;;  %3560 = vmatprep.subr.bf16.mxu0 %v2817_v41  ;;  %v2904_v26 = vunpack.c.h.s8.bf16 %v1816_v10  ;;  %v3032_v41 = vunpack.c.h.s8.bf16 %v1880_v23 }
 0x20d   : > { %3603 = vmatprep.subr.bf16.mxu1 %v2945_v40  ;;  %v2897_v40 = vunpack.c.l.s8.bf16 %v1817_v11 }
 0x20f   : > { %3561 = vmatpush1.bf16.msra.mxu0 %v2816_v55  ;;  %v1873_v55 = vld [vmem:[%s7026_s14 + $0xf88] sm:$0xff] }
 0x210   : > { %3604 = vmatpush1.bf16.msra.mxu1 %v2944_v28  ;;  %3562 = vmatprep.subr.bf16.mxu0 %v2809_v29  ;;  %v2896_v28 = vunpack.c.l.s8.bf16 %v1816_v10  ;;  %v3024_v29 = vunpack.c.l.s8.bf16 %v1880_v23  ;;  %v3017_v1 = vunpack.c.h.s8.bf16 %v1873_v55  ;;  %v3009_v50 = vunpack.c.l.s8.bf16 %v1873_v55  ;;  %v1297_v55 = vpop.f32.mrf.mxu1 }
 0x211   : > { %3605 = vmatprep.subr.bf16.mxu1 %v2937_v44  ;;  %v1808_v44 = vld [vmem:[%s7026_s14 + $0xd80] sm:$0xff]  ;;  %v2857_v10 = vunpack.c.h.s8.bf16 %v1793_v49 }
 0x213   : > { %3563 = vmatpush1.bf16.msra.mxu0 %v2808_v22  ;;  %v1872_v22 = vld [vmem:[%s7026_s14 + $0xf80] sm:$0xff] }
 0x214   : > { %3606 = vmatpush1.bf16.msra.mxu1 %v2936_v47  ;;  %3564 = vmatprep.subr.bf16.mxu0 %v2801_v27  ;;  %v2888_v47 = vunpack.c.h.s8.bf16 %v1808_v44  ;;  %v3016_v27 = vunpack.c.h.s8.bf16 %v1872_v22 }
 0x215   : > { %3607 = vmatprep.subr.bf16.mxu1 %v2929_v16  ;;  %v2881_v16 = vunpack.c.l.s8.bf16 %v1809_v48 }
 0x217   : > { %3565 = vmatpush1.bf16.msra.mxu0 %v2800_v33  ;;  %v1865_v33 = vld [vmem:[%s7026_s14 + $0xf48] sm:$0xff] }
 0x218   : > { %3608 = vmatpush1.bf16.msra.mxu1 %v2928_v5  ;;  %3566 = vmatprep.subr.bf16.mxu0 %v2793_v36  ;;  %v2880_v5 = vunpack.c.l.s8.bf16 %v1808_v44  ;;  %v3008_v36 = vunpack.c.l.s8.bf16 %v1872_v22  ;;  %v3001_v7 = vunpack.c.h.s8.bf16 %v1865_v33  ;;  %v2993_v11 = vunpack.c.l.s8.bf16 %v1865_v33  ;;  %v1913_v44 = vld [vmem:[%s7026_s14 + $0x10c8] sm:$0xff]  ;;  %v1912_v33 = vld [vmem:[%s7026_s14 + $0x10c0] sm:$0xff] }
 0x219   : > { %3609 = vmatprep.subr.bf16.mxu1 %v2921_v51  ;;  %v1800_v51 = vld [vmem:[%s7026_s14 + $0xd40] sm:$0xff] }
 0x21b   : > { %3567 = vmatpush1.bf16.msra.mxu0 %v2792_v4  ;;  %v1864_v4 = vld [vmem:[%s7026_s14 + $0xf40] sm:$0xff] }
 0x21c   : > { %3610 = vmatpush1.bf16.msra.mxu1 %v2920_v8  ;;  %3568 = vmatprep.subr.bf16.mxu0 %v2785_v34  ;;  %v2872_v8 = vunpack.c.h.s8.bf16 %v1800_v51  ;;  %v3000_v34 = vunpack.c.h.s8.bf16 %v1864_v4 }
 0x21d   : > { %3611 = vmatprep.subr.bf16.mxu1 %v2913_v35  ;;  %v2865_v35 = vunpack.c.l.s8.bf16 %v1801_v45  ;;  %v3097_v45 = vunpack.c.h.s8.bf16 %v1913_v44 }
 0x21f   : > { %3569 = vmatpush1.bf16.msra.mxu0 %v2784_v9  ;;  %v1857_v9 = vld [vmem:[%s7026_s14 + $0xf08] sm:$0xff] }
 0x220   : > { %3612 = vmatpush1.bf16.msra.mxu1 %v2912_v52  ;;  %3570 = vmatprep.subr.bf16.mxu0 %v2905_v13  ;;  %v2864_v52 = vunpack.c.l.s8.bf16 %v1800_v51  ;;  %v2992_v13 = vunpack.c.l.s8.bf16 %v1864_v4  ;;  %v2985_v23 = vunpack.c.h.s8.bf16 %v1857_v9  ;;  %v3096_v4 = vunpack.c.h.s8.bf16 %v1912_v33 }
 0x221   : > { %3613 = vmatprep.subr.bf16.mxu1 %v3033_v14  ;;  %v1792_v14 = vld [vmem:[%s7026_s14 + $0xd00] sm:$0xff] }
 0x222   : > { %v2856_v48 = vunpack.c.h.s8.bf16 %v1792_v14 }
 0x223   : > { %3571 = vmatpush2.bf16.msra.mxu0 %v2904_v26  ;;  %v1856_v26 = vld [vmem:[%s7026_s14 + $0xf00] sm:$0xff] }
 0x224   : > { %3614 = vmatpush2.bf16.msra.mxu1 %v3032_v41  ;;  %3572 = vmatprep.subr.bf16.mxu0 %v2897_v40  ;;  %v632_v41 = vrot.slane %v7259_v12, %v7155_v17  ;;  %v640_v40 = vrot.slane %v7259_v12, %v7158_v18 }
 0x225   : > { %3615 = vmatprep.subr.bf16.mxu1 %v3025_v46  ;;  %v1254_v46 = vpop.f32.mrf.mxu0 }
 0x226   : > { %v1255_v22 = vadd.f32 %v1254_v46, %v632_v41  ;;  %v1298_v12 = vadd.f32 %v1297_v55, %v640_v40  ;;  %v1897_v55 = vld [vmem:[%s7026_s14 + $0x1048] sm:$0xff] }
 0x227   : > { %3573 = vmatpush2.bf16.msra.mxu0 %v2896_v28  ;;  %v2984_v28 = vunpack.c.h.s8.bf16 %v1856_v26 }
 0x228   : > { %3616 = vmatpush2.bf16.msra.mxu1 %v3024_v29  ;;  %3574 = vmatprep.subr.bf16.mxu0 %v2889_v15  ;;  %v2849_v29 = vunpack.c.l.s8.bf16 %v1793_v49  ;;  %v2977_v15 = vunpack.c.l.s8.bf16 %v1857_v9  ;;  %v1337_v51 = vmax.f32 %v1255_v22, 0.0  ;;  %v1969_v49 = vld [vmem:[%s7026_s14 + $0x1288] sm:$0xff] }
 0x229   : > { %3617 = vmatprep.subr.bf16.mxu1 %v3017_v1  ;;  %v1251_v1 = vadd.f32 %v7277_v0, %v632_v41 }
 0x22b   : > { %3575 = vmatpush2.bf16.msra.mxu0 %v2888_v47  ;;  %v1977_v47 = vld [vmem:[%s7026_s14 + $0x12c8] sm:$0xff] }
 0x22c   : > { %3618 = vmatpush2.bf16.msra.mxu1 %v3016_v27  ;;  %3576 = vmatprep.subr.bf16.mxu0 %v2881_v16  ;;  %v1294_v27 = vadd.f32 %v7279_v59, %v640_v40  ;;  %v2848_v16 = vunpack.c.l.s8.bf16 %v1792_v14  ;;  %v1904_v14 = vld [vmem:[%s7026_s14 + $0x1080] sm:$0xff] }
 0x22d   : > { %3619 = vmatprep.subr.bf16.mxu1 %v3009_v50  ;;  %v2976_v50 = vunpack.c.l.s8.bf16 %v1856_v26  ;;  %v1968_v26 = vld [vmem:[%s7026_s14 + $0x1280] sm:$0xff]  ;;  %v3080_v41 = vunpack.c.h.s8.bf16 %v1904_v14 }
 0x22e   : > { %v1319_v0 = vmax.f32 %v1294_v27, 0.0  ;;  %v3208_v40 = vunpack.c.h.s8.bf16 %v1968_v26 }
 0x22f   : > { %3577 = vmatpush2.bf16.msra.mxu0 %v2880_v5  ;;  %v3225_v5 = vunpack.c.h.s8.bf16 %v1977_v47 }
 0x230   : > { %3620 = vmatpush2.bf16.msra.mxu1 %v3008_v36  ;;  %3578 = vmatprep.subr.bf16.mxu0 %v2873_v32  ;;  %v1976_v36 = vld [vmem:[%s7026_s14 + $0x12c0] sm:$0xff]  ;;  %v1317_v32 = vmax.f32 %v1251_v1, 0.0 }
 0x231   : > { %3621 = vmatprep.subr.bf16.mxu1 %v3001_v7  ;;  %v1339_v7 = vmax.f32 %v1298_v12, 0.0  ;;  %v3224_v59 = vunpack.c.h.s8.bf16 %v1976_v36  ;;  %v1896_v1 = vld [vmem:[%s7026_s14 + $0x1040] sm:$0xff] }
 0x232   : > { %v3064_v27 = vunpack.c.h.s8.bf16 %v1896_v1 }
 0x233   : > { %3579 = vmatpush2.bf16.msra.mxu0 %v2872_v8  ;;  %v3089_v8 = vunpack.c.l.s8.bf16 %v1913_v44  ;;  %v7436_v9 = vpack.c.bf16 %v1339_v7, %v1319_v0  ;;  %v3065_v44 = vunpack.c.h.s8.bf16 %v1897_v55  ;;  %v1952_v7 = vld [vmem:[%s7026_s14 + $0x1200] sm:$0xff] }
 0x234   : > { %3622 = vmatpush2.bf16.msra.mxu1 %v3000_v34  ;;  %3580 = vmatprep.subr.bf16.mxu0 %v2865_v35  ;;  %v1905_v34 = vld [vmem:[%s7026_s14 + $0x1088] sm:$0xff]  ;;  %v7432_v35 = vpack.c.bf16 %v1337_v51, %v1317_v32  ;;  %v1888_v51 = vld [vmem:[%s7026_s14 + $0x1000] sm:$0xff] }
 0x235   : > { %3623 = vmatprep.subr.bf16.mxu1 %v2993_v11  ;;  %v3217_v11 = vunpack.c.l.s8.bf16 %v1977_v47  ;;  %v3073_v46 = vunpack.c.l.s8.bf16 %v1905_v34  ;;  %v1960_v47 = vld [vmem:[%s7026_s14 + $0x1240] sm:$0xff] }
 0x236   : > { %v3192_v12 = vunpack.c.h.s8.bf16 %v1960_v47 }
 0x237   : > { %3581 = vmatpush2.bf16.msra.mxu0 %v2864_v52  ;;  %v3088_v52 = vunpack.c.l.s8.bf16 %v1912_v33  ;;  %v1953_v33 = vld [vmem:[%s7026_s14 + $0x1208] sm:$0xff] }
 0x238   : > { %3624 = vmatpush2.bf16.msra.mxu1 %v2992_v13  ;;  %3582 = vmatprep.subr.bf16.mxu0 %v2857_v10  ;;  %v3216_v13 = vunpack.c.l.s8.bf16 %v1976_v36  ;;  %v3081_v10 = vunpack.c.h.s8.bf16 %v1905_v34  ;;  %v3184_v36 = vunpack.c.l.s8.bf16 %v1960_v47  ;;  %v3177_v0 = vunpack.c.h.s8.bf16 %v1953_v33  ;;  %v2000_v47 = vld [vmem:[%s7026_s14 + $0x1380] sm:$0xff] }
 0x239   : > { %3625 = vmatprep.subr.bf16.mxu1 %v2985_v23  ;;  %v3209_v23 = vunpack.c.h.s8.bf16 %v1969_v49  ;;  %v3169_v34 = vunpack.c.l.s8.bf16 %v1953_v33  ;;  %v1993_v33 = vld [vmem:[%s7026_s14 + $0x1348] sm:$0xff] }
 0x23b   : > { %3583 = vmatpush2.bf16.msra.mxu0 %v2856_v48  ;;  %v3201_v48 = vunpack.c.l.s8.bf16 %v1969_v49  ;;  %v2009_v49 = vld [vmem:[%s7026_s14 + $0x13c8] sm:$0xff] }
 0x23c   : > { %3626 = vmatpush2.bf16.msra.mxu1 %v2984_v28  ;;  %3584 = vmatprep.subr.bf16.mxu0 %v2849_v29  ;;  %v1961_v28 = vld [vmem:[%s7026_s14 + $0x1248] sm:$0xff]  ;;  %v3072_v29 = vunpack.c.l.s8.bf16 %v1904_v14  ;;  %v1944_v14 = vld [vmem:[%s7026_s14 + $0x11c0] sm:$0xff] }
 0x23d   : > { %3627 = vmatprep.subr.bf16.mxu1 %v2977_v15  ;;  %v3200_v15 = vunpack.c.l.s8.bf16 %v1968_v26  ;;  %v3193_v22 = vunpack.c.h.s8.bf16 %v1961_v28  ;;  %v2008_v26 = vld [vmem:[%s7026_s14 + $0x13c0] sm:$0xff] }
 0x23f   : > { %3585 = vmatpush2.bf16.msra.mxu0 %v2848_v16  ;;  %v3057_v16 = vunpack.c.l.s8.bf16 %v1897_v55  ;;  %v1937_v55 = vld [vmem:[%s7026_s14 + $0x1188] sm:$0xff] }
 0x240   : > { %3628 = vmatpush2.bf16.msra.mxu1 %v2976_v50  ;;  %3640 = vmatprep.subr.bf16.mxu0 %v3097_v45  ;;  %v3185_v50 = vunpack.c.l.s8.bf16 %v1961_v28  ;;  %v1889_v45 = vld [vmem:[%s7026_s14 + $0x1008] sm:$0xff] }
 0x241   : > { %3683 = vmatprep.subr.bf16.mxu1 %v3225_v5  ;;  %v3056_v5 = vunpack.c.l.s8.bf16 %v1896_v1  ;;  %v3049_v32 = vunpack.c.h.s8.bf16 %v1889_v45  ;;  %v2001_v28 = vld [vmem:[%s7026_s14 + $0x1388] sm:$0xff]  ;;  %v1936_v1 = vld [vmem:[%s7026_s14 + $0x1180] sm:$0xff] }
 0x242   : > { %3587 = vmatmul.mubr.bf16.vlgmr.msra.gmra.mxu0 %v7273_v57 }
 0x243   : > { %3630 = vmatmul.mubr.bf16.vlgmr.msra.gmra.mxu1 %v7275_v60  ;;  %3641 = vmatpush1.bf16.msra.mxu0 %v3096_v4  ;;  %v3048_v4 = vunpack.c.h.s8.bf16 %v1888_v51 }
 0x244   : > { %3672 = vmatprep.mubr.bf16.mxu0 %v7432_v35  ;;  %3684 = vmatpush1.bf16.msra.mxu1 %v3224_v59  ;;  %v3176_v59 = vunpack.c.h.s8.bf16 %v1952_v7 }
 0x245   : > { %3715 = vmatprep.mubr.bf16.mxu1 %v7436_v9  ;;  %3642 = vmatprep.subr.bf16.mxu0 %v3089_v8  ;;  %v3041_v8 = vunpack.c.l.s8.bf16 %v1889_v45  ;;  %v1929_v45 = vld [vmem:[%s7026_s14 + $0x1148] sm:$0xff] }
 0x246   : > { %3685 = vmatprep.subr.bf16.mxu1 %v3217_v11  ;;  %v1945_v11 = vld [vmem:[%s7026_s14 + $0x11c8] sm:$0xff] }
 0x247   : > { %3643 = vmatpush1.bf16.msra.mxu0 %v3088_v52  ;;  %v3040_v52 = vunpack.c.l.s8.bf16 %v1888_v51  ;;  %v1928_v51 = vld [vmem:[%s7026_s14 + $0x1140] sm:$0xff] }
 0x248   : > { %3686 = vmatpush1.bf16.msra.mxu1 %v3216_v13  ;;  %3644 = vmatprep.subr.bf16.mxu0 %v3081_v10  ;;  %v3168_v13 = vunpack.c.l.s8.bf16 %v1952_v7  ;;  %v3161_v10 = vunpack.c.h.s8.bf16 %v1945_v11  ;;  %v1992_v7 = vld [vmem:[%s7026_s14 + $0x1340] sm:$0xff] }
 0x249   : > { %3687 = vmatprep.subr.bf16.mxu1 %v3209_v23  ;;  %v3289_v23 = vunpack.c.h.s8.bf16 %v2009_v49 }
 0x24b   : > { %3645 = vmatpush1.bf16.msra.mxu0 %v3080_v41  ;;  %v3160_v41 = vunpack.c.h.s8.bf16 %v1944_v14 }
 0x24c   : > { %3688 = vmatpush1.bf16.msra.mxu1 %v3208_v40  ;;  %3646 = vmatprep.subr.bf16.mxu0 %v3073_v46  ;;  %v3288_v40 = vunpack.c.h.s8.bf16 %v2008_v26  ;;  %v3153_v46 = vunpack.c.l.s8.bf16 %v1945_v11  ;;  %v1921_v11 = vld [vmem:[%s7026_s14 + $0x1108] sm:$0xff] }
 0x24d   : > { %3689 = vmatprep.subr.bf16.mxu1 %v3201_v48  ;;  %v3281_v48 = vunpack.c.l.s8.bf16 %v2009_v49  ;;  %v1985_v49 = vld [vmem:[%s7026_s14 + $0x1308] sm:$0xff] }
 0x24f   : > { %3647 = vmatpush1.bf16.msra.mxu0 %v3072_v29  ;;  %v3152_v29 = vunpack.c.l.s8.bf16 %v1944_v14  ;;  %v1920_v14 = vld [vmem:[%s7026_s14 + $0x1100] sm:$0xff] }
 0x250   : > { %3690 = vmatpush1.bf16.msra.mxu1 %v3200_v15  ;;  %3648 = vmatprep.subr.bf16.mxu0 %v3065_v44  ;;  %v3280_v15 = vunpack.c.l.s8.bf16 %v2008_v26  ;;  %v3145_v44 = vunpack.c.h.s8.bf16 %v1937_v55  ;;  %v1984_v26 = vld [vmem:[%s7026_s14 + $0x1300] sm:$0xff] }
 0x251   : > { %3691 = vmatprep.subr.bf16.mxu1 %v3193_v22  ;;  %v3273_v22 = vunpack.c.h.s8.bf16 %v2001_v28 }
 0x253   : > { %3649 = vmatpush1.bf16.msra.mxu0 %v3064_v27  ;;  %v3144_v27 = vunpack.c.h.s8.bf16 %v1936_v1 }
 0x254   : > { %3692 = vmatpush1.bf16.msra.mxu1 %v3192_v12  ;;  %3650 = vmatprep.subr.bf16.mxu0 %v3057_v16  ;;  %v3272_v12 = vunpack.c.h.s8.bf16 %v2000_v47  ;;  %v3137_v16 = vunpack.c.l.s8.bf16 %v1937_v55  ;;  %v1403_v55 = vld [vmem:[%s7026_s14 + $0xd8] sm:$0xff] }
 0x255   : > { %3693 = vmatprep.subr.bf16.mxu1 %v3185_v50  ;;  %v3265_v50 = vunpack.c.l.s8.bf16 %v2001_v28  ;;  %v1467_v28 = vld [vmem:[%s7026_s14 + $0x2d8] sm:$0xff] }
 0x257   : > { %3651 = vmatpush1.bf16.msra.mxu0 %v3056_v5  ;;  %v3136_v5 = vunpack.c.l.s8.bf16 %v1936_v1  ;;  %v1402_v1 = vld [vmem:[%s7026_s14 + $0xd0] sm:$0xff] }
 0x258   : > { %3694 = vmatpush1.bf16.msra.mxu1 %v3184_v36  ;;  %3652 = vmatprep.subr.bf16.mxu0 %v3049_v32  ;;  %v3264_v36 = vunpack.c.l.s8.bf16 %v2000_v47  ;;  %v3129_v32 = vunpack.c.h.s8.bf16 %v1929_v45  ;;  %v1466_v47 = vld [vmem:[%s7026_s14 + $0x2d0] sm:$0xff] }
 0x259   : > { %3695 = vmatprep.subr.bf16.mxu1 %v3177_v0  ;;  %v3257_v0 = vunpack.c.h.s8.bf16 %v1993_v33 }
 0x25b   : > { %3653 = vmatpush1.bf16.msra.mxu0 %v3048_v4  ;;  %v3128_v4 = vunpack.c.h.s8.bf16 %v1928_v51 }
 0x25c   : > { %3696 = vmatpush1.bf16.msra.mxu1 %v3176_v59  ;;  %3654 = vmatprep.subr.bf16.mxu0 %v3041_v8  ;;  %v3256_v59 = vunpack.c.h.s8.bf16 %v1992_v7  ;;  %v3121_v8 = vunpack.c.l.s8.bf16 %v1929_v45  ;;  %v2195_v45 = vunpack.c.l.s8.bf16 %v1467_v28 }
 0x25d   : > { %3697 = vmatprep.subr.bf16.mxu1 %v3169_v34  ;;  %v3249_v34 = vunpack.c.l.s8.bf16 %v1993_v33  ;;  %v1459_v33 = vld [vmem:[%s7026_s14 + $0x298] sm:$0xff] }
 0x25f   : > { %3655 = vmatpush1.bf16.msra.mxu0 %v3040_v52  ;;  %v3120_v52 = vunpack.c.l.s8.bf16 %v1928_v51  ;;  %v1394_v51 = vld [vmem:[%s7026_s14 + $0x90] sm:$0xff] }
 0x260   : > { %3698 = vmatpush1.bf16.msra.mxu1 %v3168_v13  ;;  %3656 = vmatprep.subr.bf16.mxu0 %v3161_v10  ;;  %v3248_v13 = vunpack.c.l.s8.bf16 %v1992_v7  ;;  %v3113_v10 = vunpack.c.h.s8.bf16 %v1921_v11  ;;  %v1458_v7 = vld [vmem:[%s7026_s14 + $0x290] sm:$0xff] }
 0x261   : > { %3699 = vmatprep.subr.bf16.mxu1 %v3289_v23  ;;  %v3241_v23 = vunpack.c.h.s8.bf16 %v1985_v49 }
 0x263   : > { %3657 = vmatpush2.bf16.msra.mxu0 %v3160_v41  ;;  %v3112_v41 = vunpack.c.h.s8.bf16 %v1920_v14 }
 0x264   : > { %3700 = vmatpush2.bf16.msra.mxu1 %v3288_v40  ;;  %3658 = vmatprep.subr.bf16.mxu0 %v3153_v46  ;;  %v3240_v40 = vunpack.c.h.s8.bf16 %v1984_v26  ;;  %v3105_v46 = vunpack.c.l.s8.bf16 %v1921_v11  ;;  %v1387_v11 = vld [vmem:[%s7026_s14 + $0x58] sm:$0xff] }
 0x265   : > { %3701 = vmatprep.subr.bf16.mxu1 %v3281_v48  ;;  %v3233_v48 = vunpack.c.l.s8.bf16 %v1985_v49  ;;  %v1451_v49 = vld [vmem:[%s7026_s14 + $0x258] sm:$0xff] }
 0x267   : > { %3659 = vmatpush2.bf16.msra.mxu0 %v3152_v29  ;;  %v3104_v29 = vunpack.c.l.s8.bf16 %v1920_v14  ;;  %v1386_v14 = vld [vmem:[%s7026_s14 + $0x50] sm:$0xff] }
 0x268   : > { %3702 = vmatpush2.bf16.msra.mxu1 %v3280_v15  ;;  %3660 = vmatprep.subr.bf16.mxu0 %v3145_v44  ;;  %v3232_v15 = vunpack.c.l.s8.bf16 %v1984_v26  ;;  %v2075_v44 = vunpack.c.h.s8.bf16 %v1403_v55  ;;  %v1450_v26 = vld [vmem:[%s7026_s14 + $0x250] sm:$0xff] }
 0x269   : > { %3703 = vmatprep.subr.bf16.mxu1 %v3273_v22  ;;  %v2203_v22 = vunpack.c.h.s8.bf16 %v1467_v28  ;;  %v1443_v28 = vld [vmem:[%s7026_s14 + $0x218] sm:$0xff] }
 0x26b   : > { %3661 = vmatpush2.bf16.msra.mxu0 %v3144_v27  ;;  %v2074_v27 = vunpack.c.h.s8.bf16 %v1402_v1 }
 0x26c   : > { %3704 = vmatpush2.bf16.msra.mxu1 %v3272_v12  ;;  %3662 = vmatprep.subr.bf16.mxu0 %v3137_v16  ;;  %v2202_v12 = vunpack.c.h.s8.bf16 %v1466_v47  ;;  %v2067_v16 = vunpack.c.l.s8.bf16 %v1403_v55  ;;  %v1379_v55 = vld [vmem:[%s7026_s14 + $0x18] sm:$0xff] }
 0x26d   : > { %3705 = vmatprep.subr.bf16.mxu1 %v3265_v50  ;;  %v1395_v50 = vld [vmem:[%s7026_s14 + $0x98] sm:$0xff] }
 0x26f   : > { %3663 = vmatpush2.bf16.msra.mxu0 %v3136_v5  ;;  %v2066_v5 = vunpack.c.l.s8.bf16 %v1402_v1  ;;  %v1378_v1 = vld [vmem:[%s7026_s14 + $0x10] sm:$0xff] }
 0x270   : > { %3706 = vmatpush2.bf16.msra.mxu1 %v3264_v36  ;;  %3664 = vmatprep.subr.bf16.mxu0 %v3129_v32  ;;  %v2194_v36 = vunpack.c.l.s8.bf16 %v1466_v47  ;;  %v2059_v32 = vunpack.c.h.s8.bf16 %v1395_v50  ;;  %v1442_v47 = vld [vmem:[%s7026_s14 + $0x210] sm:$0xff] }
 0x271   : > { %3707 = vmatprep.subr.bf16.mxu1 %v3257_v0  ;;  %v2187_v0 = vunpack.c.h.s8.bf16 %v1459_v33 }
 0x273   : > { %3665 = vmatpush2.bf16.msra.mxu0 %v3128_v4  ;;  %v2058_v4 = vunpack.c.h.s8.bf16 %v1394_v51 }
 0x274   : > { %3708 = vmatpush2.bf16.msra.mxu1 %v3256_v59  ;;  %3666 = vmatprep.subr.bf16.mxu0 %v3121_v8  ;;  %v2186_v59 = vunpack.c.h.s8.bf16 %v1458_v7  ;;  %v2051_v8 = vunpack.c.l.s8.bf16 %v1395_v50  ;;  %v2147_v50 = vunpack.c.l.s8.bf16 %v1443_v28 }
 0x275   : > { %3709 = vmatprep.subr.bf16.mxu1 %v3249_v34  ;;  %v2179_v34 = vunpack.c.l.s8.bf16 %v1459_v33  ;;  %v1499_v33 = vld [vmem:[%s7026_s14 + $0x3d8] sm:$0xff] }
 0x277   : > { %3667 = vmatpush2.bf16.msra.mxu0 %v3120_v52  ;;  %v2050_v52 = vunpack.c.l.s8.bf16 %v1394_v51  ;;  %v1434_v51 = vld [vmem:[%s7026_s14 + $0x1d0] sm:$0xff] }
 0x278   : > { %3710 = vmatpush2.bf16.msra.mxu1 %v3248_v13  ;;  %3668 = vmatprep.subr.bf16.mxu0 %v3113_v10  ;;  %v2178_v13 = vunpack.c.l.s8.bf16 %v1458_v7  ;;  %v2043_v10 = vunpack.c.h.s8.bf16 %v1387_v11  ;;  %v1498_v7 = vld [vmem:[%s7026_s14 + $0x3d0] sm:$0xff] }
 0x279   : > { %3711 = vmatprep.subr.bf16.mxu1 %v3241_v23  ;;  %v2171_v23 = vunpack.c.h.s8.bf16 %v1451_v49 }
 0x27b   : > { %3669 = vmatpush2.bf16.msra.mxu0 %v3112_v41  ;;  %v2042_v41 = vunpack.c.h.s8.bf16 %v1386_v14 }
 0x27c   : > { %3712 = vmatpush2.bf16.msra.mxu1 %v3240_v40  ;;  %3670 = vmatprep.subr.bf16.mxu0 %v3105_v46  ;;  %v2170_v40 = vunpack.c.h.s8.bf16 %v1450_v26  ;;  %v2035_v46 = vunpack.c.l.s8.bf16 %v1387_v11  ;;  %v1427_v11 = vld [vmem:[%s7026_s14 + $0x198] sm:$0xff] }
 0x27d   : > { %3713 = vmatprep.subr.bf16.mxu1 %v3233_v48  ;;  %v2163_v48 = vunpack.c.l.s8.bf16 %v1451_v49  ;;  %v1491_v49 = vld [vmem:[%s7026_s14 + $0x398] sm:$0xff] }
 0x27f   : > { %3671 = vmatpush2.bf16.msra.mxu0 %v3104_v29  ;;  %v2034_v29 = vunpack.c.l.s8.bf16 %v1386_v14  ;;  %v1426_v14 = vld [vmem:[%s7026_s14 + $0x190] sm:$0xff] }
 0x280   : > { %3714 = vmatpush2.bf16.msra.mxu1 %v3232_v15  ;;  %3726 = vmatprep.subr.bf16.mxu0 %v2075_v44  ;;  %v2162_v15 = vunpack.c.l.s8.bf16 %v1450_v26  ;;  %v2027_v44 = vunpack.c.h.s8.bf16 %v1379_v55  ;;  %v1490_v26 = vld [vmem:[%s7026_s14 + $0x390] sm:$0xff] }
 0x281   : > { %3769 = vmatprep.subr.bf16.mxu1 %v2203_v22  ;;  %v2155_v22 = vunpack.c.h.s8.bf16 %v1443_v28  ;;  %v1483_v28 = vld [vmem:[%s7026_s14 + $0x358] sm:$0xff] }
 0x282   : > { %3673 = vmatmul.mubr.bf16.vlgmr.msra.gmra.mxu0 %v7285_v56 }
 0x283   : > { %3716 = vmatmul.mubr.bf16.vlgmr.msra.gmra.mxu1 %v7287_v61  ;;  %3727 = vmatpush1.bf16.msra.mxu0 %v2074_v27  ;;  %v2026_v27 = vunpack.c.h.s8.bf16 %v1378_v1 }
 0x284   : > { %3758 = vmatprep.mubr.bf16.mxu0 %v7193_v62  ;;  %3770 = vmatpush1.bf16.msra.mxu1 %v2202_v12  ;;  %v2154_v12 = vunpack.c.h.s8.bf16 %v1442_v47 }
 0x285   : > { %3801 = vmatprep.mubr.bf16.mxu1 %v7195_v63  ;;  %3728 = vmatprep.subr.bf16.mxu0 %v2067_v16  ;;  %v2019_v16 = vunpack.c.l.s8.bf16 %v1379_v55  ;;  %v1419_v55 = vld [vmem:[%s7026_s14 + $0x158] sm:$0xff] }
 0x286   : > { %3771 = vmatprep.subr.bf16.mxu1 %v2195_v45  ;;  %v1435_v45 = vld [vmem:[%s7026_s14 + $0x1d8] sm:$0xff] }
 0x287   : > { %3729 = vmatpush1.bf16.msra.mxu0 %v2066_v5  ;;  %v2018_v5 = vunpack.c.l.s8.bf16 %v1378_v1  ;;  %v1418_v1 = vld [vmem:[%s7026_s14 + $0x150] sm:$0xff] }
 0x288   : > { %3772 = vmatpush1.bf16.msra.mxu1 %v2194_v36  ;;  %3730 = vmatprep.subr.bf16.mxu0 %v2059_v32  ;;  %v2146_v36 = vunpack.c.l.s8.bf16 %v1442_v47  ;;  %v2139_v32 = vunpack.c.h.s8.bf16 %v1435_v45  ;;  %v1482_v47 = vld [vmem:[%s7026_s14 + $0x350] sm:$0xff] }
 0x289   : > { %3773 = vmatprep.subr.bf16.mxu1 %v2187_v0  ;;  %v2267_v0 = vunpack.c.h.s8.bf16 %v1499_v33 }
 0x28b   : > { %3731 = vmatpush1.bf16.msra.mxu0 %v2058_v4  ;;  %v2138_v4 = vunpack.c.h.s8.bf16 %v1434_v51 }
 0x28c   : > { %3774 = vmatpush1.bf16.msra.mxu1 %v2186_v59  ;;  %3732 = vmatprep.subr.bf16.mxu0 %v2051_v8  ;;  %v2266_v59 = vunpack.c.h.s8.bf16 %v1498_v7  ;;  %v2131_v8 = vunpack.c.l.s8.bf16 %v1435_v45  ;;  %v1411_v45 = vld [vmem:[%s7026_s14 + $0x118] sm:$0xff] }
 0x28d   : > { %3775 = vmatprep.subr.bf16.mxu1 %v2179_v34  ;;  %v2259_v34 = vunpack.c.l.s8.bf16 %v1499_v33  ;;  %v1475_v33 = vld [vmem:[%s7026_s14 + $0x318] sm:$0xff] }
 0x28f   : > { %3733 = vmatpush1.bf16.msra.mxu0 %v2050_v52  ;;  %v2130_v52 = vunpack.c.l.s8.bf16 %v1434_v51  ;;  %v1410_v51 = vld [vmem:[%s7026_s14 + $0x110] sm:$0xff] }
 0x290   : > { %3776 = vmatpush1.bf16.msra.mxu1 %v2178_v13  ;;  %3734 = vmatprep.subr.bf16.mxu0 %v2043_v10  ;;  %v2258_v13 = vunpack.c.l.s8.bf16 %v1498_v7  ;;  %v2123_v10 = vunpack.c.h.s8.bf16 %v1427_v11  ;;  %v1474_v7 = vld [vmem:[%s7026_s14 + $0x310] sm:$0xff] }
 0x291   : > { %3777 = vmatprep.subr.bf16.mxu1 %v2171_v23  ;;  %v2251_v23 = vunpack.c.h.s8.bf16 %v1491_v49 }
 0x293   : > { %3735 = vmatpush1.bf16.msra.mxu0 %v2042_v41  ;;  %v2122_v41 = vunpack.c.h.s8.bf16 %v1426_v14 }
 0x294   : > { %3778 = vmatpush1.bf16.msra.mxu1 %v2170_v40  ;;  %3736 = vmatprep.subr.bf16.mxu0 %v2035_v46  ;;  %v2250_v40 = vunpack.c.h.s8.bf16 %v1490_v26  ;;  %v2115_v46 = vunpack.c.l.s8.bf16 %v1427_v11  ;;  %v1531_v11 = vld [vmem:[%s7026_s14 + $0x4d8] sm:$0xff] }
 0x295   : > { %3779 = vmatprep.subr.bf16.mxu1 %v2163_v48  ;;  %v2243_v48 = vunpack.c.l.s8.bf16 %v1491_v49  ;;  %v1595_v49 = vld [vmem:[%s7026_s14 + $0x6d8] sm:$0xff] }
 0x297   : > { %3737 = vmatpush1.bf16.msra.mxu0 %v2034_v29  ;;  %v2114_v29 = vunpack.c.l.s8.bf16 %v1426_v14  ;;  %v1530_v14 = vld [vmem:[%s7026_s14 + $0x4d0] sm:$0xff] }
 0x298   : > { %3780 = vmatpush1.bf16.msra.mxu1 %v2162_v15  ;;  %3738 = vmatprep.subr.bf16.mxu0 %v2027_v44  ;;  %v2242_v15 = vunpack.c.l.s8.bf16 %v1490_v26  ;;  %v2107_v44 = vunpack.c.h.s8.bf16 %v1419_v55  ;;  %v1594_v26 = vld [vmem:[%s7026_s14 + $0x6d0] sm:$0xff] }
 0x299   : > { %3781 = vmatprep.subr.bf16.mxu1 %v2155_v22  ;;  %v2235_v22 = vunpack.c.h.s8.bf16 %v1483_v28 }
 0x29b   : > { %3739 = vmatpush1.bf16.msra.mxu0 %v2026_v27  ;;  %v2106_v27 = vunpack.c.h.s8.bf16 %v1418_v1 }
 0x29c   : > { %3782 = vmatpush1.bf16.msra.mxu1 %v2154_v12  ;;  %3740 = vmatprep.subr.bf16.mxu0 %v2019_v16  ;;  %v2234_v12 = vunpack.c.h.s8.bf16 %v1482_v47  ;;  %v2099_v16 = vunpack.c.l.s8.bf16 %v1419_v55  ;;  %v2451_v55 = vunpack.c.l.s8.bf16 %v1595_v49 }
 0x29d   : > { %3783 = vmatprep.subr.bf16.mxu1 %v2147_v50  ;;  %v2227_v50 = vunpack.c.l.s8.bf16 %v1483_v28  ;;  %v1587_v28 = vld [vmem:[%s7026_s14 + $0x698] sm:$0xff] }
 0x29f   : > { %3741 = vmatpush1.bf16.msra.mxu0 %v2018_v5  ;;  %v2098_v5 = vunpack.c.l.s8.bf16 %v1418_v1  ;;  %v1522_v1 = vld [vmem:[%s7026_s14 + $0x490] sm:$0xff] }
 0x2a0   : > { %3784 = vmatpush1.bf16.msra.mxu1 %v2146_v36  ;;  %3742 = vmatprep.subr.bf16.mxu0 %v2139_v32  ;;  %v2226_v36 = vunpack.c.l.s8.bf16 %v1482_v47  ;;  %v2091_v32 = vunpack.c.h.s8.bf16 %v1411_v45  ;;  %v1586_v47 = vld [vmem:[%s7026_s14 + $0x690] sm:$0xff] }
 0x2a1   : > { %3785 = vmatprep.subr.bf16.mxu1 %v2267_v0  ;;  %v2219_v0 = vunpack.c.h.s8.bf16 %v1475_v33 }
 0x2a3   : > { %3743 = vmatpush2.bf16.msra.mxu0 %v2138_v4  ;;  %v2090_v4 = vunpack.c.h.s8.bf16 %v1410_v51 }
 0x2a4   : > { %3786 = vmatpush2.bf16.msra.mxu1 %v2266_v59  ;;  %3744 = vmatprep.subr.bf16.mxu0 %v2131_v8  ;;  %v2218_v59 = vunpack.c.h.s8.bf16 %v1474_v7  ;;  %v2083_v8 = vunpack.c.l.s8.bf16 %v1411_v45  ;;  %v1515_v45 = vld [vmem:[%s7026_s14 + $0x458] sm:$0xff] }
 0x2a5   : > { %3787 = vmatprep.subr.bf16.mxu1 %v2259_v34  ;;  %v2211_v34 = vunpack.c.l.s8.bf16 %v1475_v33  ;;  %v1579_v33 = vld [vmem:[%s7026_s14 + $0x658] sm:$0xff] }
 0x2a7   : > { %3745 = vmatpush2.bf16.msra.mxu0 %v2130_v52  ;;  %v2082_v52 = vunpack.c.l.s8.bf16 %v1410_v51  ;;  %v1514_v51 = vld [vmem:[%s7026_s14 + $0x450] sm:$0xff] }
 0x2a8   : > { %3788 = vmatpush2.bf16.msra.mxu1 %v2258_v13  ;;  %3746 = vmatprep.subr.bf16.mxu0 %v2123_v10  ;;  %v2210_v13 = vunpack.c.l.s8.bf16 %v1474_v7  ;;  %v2331_v10 = vunpack.c.h.s8.bf16 %v1531_v11  ;;  %v1578_v7 = vld [vmem:[%s7026_s14 + $0x650] sm:$0xff] }
 0x2a9   : > { %3789 = vmatprep.subr.bf16.mxu1 %v2251_v23  ;;  %v2459_v23 = vunpack.c.h.s8.bf16 %v1595_v49  ;;  %v1571_v49 = vld [vmem:[%s7026_s14 + $0x618] sm:$0xff] }
 0x2ab   : > { %3747 = vmatpush2.bf16.msra.mxu0 %v2122_v41  ;;  %v2330_v41 = vunpack.c.h.s8.bf16 %v1530_v14 }
 0x2ac   : > { %3790 = vmatpush2.bf16.msra.mxu1 %v2250_v40  ;;  %3748 = vmatprep.subr.bf16.mxu0 %v2115_v46  ;;  %v2458_v40 = vunpack.c.h.s8.bf16 %v1594_v26  ;;  %v2323_v46 = vunpack.c.l.s8.bf16 %v1531_v11  ;;  %v1507_v11 = vld [vmem:[%s7026_s14 + $0x418] sm:$0xff] }
 0x2ad   : > { %3791 = vmatprep.subr.bf16.mxu1 %v2243_v48  ;;  %v1523_v48 = vld [vmem:[%s7026_s14 + $0x498] sm:$0xff] }
 0x2af   : > { %3749 = vmatpush2.bf16.msra.mxu0 %v2114_v29  ;;  %v2322_v29 = vunpack.c.l.s8.bf16 %v1530_v14  ;;  %v1506_v14 = vld [vmem:[%s7026_s14 + $0x410] sm:$0xff] }
 0x2b0   : > { %3792 = vmatpush2.bf16.msra.mxu1 %v2242_v15  ;;  %3750 = vmatprep.subr.bf16.mxu0 %v2107_v44  ;;  %v2450_v15 = vunpack.c.l.s8.bf16 %v1594_v26  ;;  %v2315_v44 = vunpack.c.h.s8.bf16 %v1523_v48  ;;  %v1570_v26 = vld [vmem:[%s7026_s14 + $0x610] sm:$0xff] }
 0x2b1   : > { %3793 = vmatprep.subr.bf16.mxu1 %v2235_v22  ;;  %v2443_v22 = vunpack.c.h.s8.bf16 %v1587_v28 }
 0x2b3   : > { %3751 = vmatpush2.bf16.msra.mxu0 %v2106_v27  ;;  %v2314_v27 = vunpack.c.h.s8.bf16 %v1522_v1 }
 0x2b4   : > { %3794 = vmatpush2.bf16.msra.mxu1 %v2234_v12  ;;  %3752 = vmatprep.subr.bf16.mxu0 %v2099_v16  ;;  %v2442_v12 = vunpack.c.h.s8.bf16 %v1586_v47  ;;  %v2307_v16 = vunpack.c.l.s8.bf16 %v1523_v48  ;;  %v2403_v48 = vunpack.c.l.s8.bf16 %v1571_v49 }
 0x2b5   : > { %3795 = vmatprep.subr.bf16.mxu1 %v2227_v50  ;;  %v2435_v50 = vunpack.c.l.s8.bf16 %v1587_v28  ;;  %v1627_v28 = vld [vmem:[%s7026_s14 + $0x7d8] sm:$0xff] }
 0x2b7   : > { %3753 = vmatpush2.bf16.msra.mxu0 %v2098_v5  ;;  %v2306_v5 = vunpack.c.l.s8.bf16 %v1522_v1  ;;  %v1562_v1 = vld [vmem:[%s7026_s14 + $0x5d0] sm:$0xff] }
 0x2b8   : > { %3796 = vmatpush2.bf16.msra.mxu1 %v2226_v36  ;;  %3754 = vmatprep.subr.bf16.mxu0 %v2091_v32  ;;  %v2434_v36 = vunpack.c.l.s8.bf16 %v1586_v47  ;;  %v2299_v32 = vunpack.c.h.s8.bf16 %v1515_v45  ;;  %v1626_v47 = vld [vmem:[%s7026_s14 + $0x7d0] sm:$0xff] }
 0x2b9   : > { %3797 = vmatprep.subr.bf16.mxu1 %v2219_v0  ;;  %v2427_v0 = vunpack.c.h.s8.bf16 %v1579_v33 }
 0x2bb   : > { %3755 = vmatpush2.bf16.msra.mxu0 %v2090_v4  ;;  %v2298_v4 = vunpack.c.h.s8.bf16 %v1514_v51 }
 0x2bc   : > { %3798 = vmatpush2.bf16.msra.mxu1 %v2218_v59  ;;  %3756 = vmatprep.subr.bf16.mxu0 %v2083_v8  ;;  %v2426_v59 = vunpack.c.h.s8.bf16 %v1578_v7  ;;  %v2291_v8 = vunpack.c.l.s8.bf16 %v1515_v45  ;;  %v1555_v45 = vld [vmem:[%s7026_s14 + $0x598] sm:$0xff] }
 0x2bd   : > { %3799 = vmatprep.subr.bf16.mxu1 %v2211_v34  ;;  %v2419_v34 = vunpack.c.l.s8.bf16 %v1579_v33  ;;  %v1619_v33 = vld [vmem:[%s7026_s14 + $0x798] sm:$0xff] }
 0x2bf   : > { %3757 = vmatpush2.bf16.msra.mxu0 %v2082_v52  ;;  %v2290_v52 = vunpack.c.l.s8.bf16 %v1514_v51  ;;  %v1554_v51 = vld [vmem:[%s7026_s14 + $0x590] sm:$0xff] }
 0x2c0   : > { %3800 = vmatpush2.bf16.msra.mxu1 %v2210_v13  ;;  %3812 = vmatprep.subr.bf16.mxu0 %v2331_v10  ;;  %v2418_v13 = vunpack.c.l.s8.bf16 %v1578_v7  ;;  %v2283_v10 = vunpack.c.h.s8.bf16 %v1507_v11  ;;  %v1618_v7 = vld [vmem:[%s7026_s14 + $0x790] sm:$0xff] }
 0x2c1   : > { %3855 = vmatprep.subr.bf16.mxu1 %v2459_v23  ;;  %v2411_v23 = vunpack.c.h.s8.bf16 %v1571_v49  ;;  %v1611_v49 = vld [vmem:[%s7026_s14 + $0x758] sm:$0xff] }
 0x2c2   : > { %3759 = vmatmul.mubr.bf16.vlgmr.msra.gmra.mxu0 %v7197_v2 }
 0x2c3   : > { %3802 = vmatmul.mubr.bf16.vlgmr.msra.gmra.mxu1 %v7199_v3  ;;  %3813 = vmatpush1.bf16.msra.mxu0 %v2330_v41  ;;  %v2282_v41 = vunpack.c.h.s8.bf16 %v1506_v14 }
 0x2c4   : > { %3844 = vmatprep.mubr.bf16.mxu0 %v7223_v38  ;;  %3856 = vmatpush1.bf16.msra.mxu1 %v2458_v40  ;;  %v2410_v40 = vunpack.c.h.s8.bf16 %v1570_v26 }
 0x2c5   : > { %3887 = vmatprep.mubr.bf16.mxu1 %v7225_v39  ;;  %3814 = vmatprep.subr.bf16.mxu0 %v2323_v46  ;;  %v2275_v46 = vunpack.c.l.s8.bf16 %v1507_v11  ;;  %v1547_v11 = vld [vmem:[%s7026_s14 + $0x558] sm:$0xff] }
 0x2c6   : > { %3857 = vmatprep.subr.bf16.mxu1 %v2451_v55  ;;  %v1563_v55 = vld [vmem:[%s7026_s14 + $0x5d8] sm:$0xff] }
 0x2c7   : > { %3815 = vmatpush1.bf16.msra.mxu0 %v2322_v29  ;;  %v2274_v29 = vunpack.c.l.s8.bf16 %v1506_v14  ;;  %v1546_v14 = vld [vmem:[%s7026_s14 + $0x550] sm:$0xff] }
 0x2c8   : > { %3858 = vmatpush1.bf16.msra.mxu1 %v2450_v15  ;;  %3816 = vmatprep.subr.bf16.mxu0 %v2315_v44  ;;  %v2402_v15 = vunpack.c.l.s8.bf16 %v1570_v26  ;;  %v2395_v44 = vunpack.c.h.s8.bf16 %v1563_v55  ;;  %v1610_v26 = vld [vmem:[%s7026_s14 + $0x750] sm:$0xff] }
 0x2c9   : > { %3859 = vmatprep.subr.bf16.mxu1 %v2443_v22  ;;  %v2523_v22 = vunpack.c.h.s8.bf16 %v1627_v28 }
 0x2cb   : > { %3817 = vmatpush1.bf16.msra.mxu0 %v2314_v27  ;;  %v2394_v27 = vunpack.c.h.s8.bf16 %v1562_v1 }
 0x2cc   : > { %3860 = vmatpush1.bf16.msra.mxu1 %v2442_v12  ;;  %3818 = vmatprep.subr.bf16.mxu0 %v2307_v16  ;;  %v2522_v12 = vunpack.c.h.s8.bf16 %v1626_v47  ;;  %v2387_v16 = vunpack.c.l.s8.bf16 %v1563_v55  ;;  %v1539_v55 = vld [vmem:[%s7026_s14 + $0x518] sm:$0xff] }
 0x2cd   : > { %3861 = vmatprep.subr.bf16.mxu1 %v2435_v50  ;;  %v2515_v50 = vunpack.c.l.s8.bf16 %v1627_v28  ;;  %v1603_v28 = vld [vmem:[%s7026_s14 + $0x718] sm:$0xff] }
 0x2cf   : > { %3819 = vmatpush1.bf16.msra.mxu0 %v2306_v5  ;;  %v2386_v5 = vunpack.c.l.s8.bf16 %v1562_v1  ;;  %v1538_v1 = vld [vmem:[%s7026_s14 + $0x510] sm:$0xff] }
 0x2d0   : > { %3862 = vmatpush1.bf16.msra.mxu1 %v2434_v36  ;;  %3820 = vmatprep.subr.bf16.mxu0 %v2299_v32  ;;  %v2514_v36 = vunpack.c.l.s8.bf16 %v1626_v47  ;;  %v2379_v32 = vunpack.c.h.s8.bf16 %v1555_v45  ;;  %v1602_v47 = vld [vmem:[%s7026_s14 + $0x710] sm:$0xff] }
 0x2d1   : > { %3863 = vmatprep.subr.bf16.mxu1 %v2427_v0  ;;  %v2507_v0 = vunpack.c.h.s8.bf16 %v1619_v33 }
 0x2d3   : > { %3821 = vmatpush1.bf16.msra.mxu0 %v2298_v4  ;;  %v2378_v4 = vunpack.c.h.s8.bf16 %v1554_v51 }
 0x2d4   : > { %3864 = vmatpush1.bf16.msra.mxu1 %v2426_v59  ;;  %3822 = vmatprep.subr.bf16.mxu0 %v2291_v8  ;;  %v2506_v59 = vunpack.c.h.s8.bf16 %v1618_v7  ;;  %v2371_v8 = vunpack.c.l.s8.bf16 %v1555_v45  ;;  %v1659_v45 = vld [vmem:[%s7026_s14 + $0x8d8] sm:$0xff] }
 0x2d5   : > { %3865 = vmatprep.subr.bf16.mxu1 %v2419_v34  ;;  %v2499_v34 = vunpack.c.l.s8.bf16 %v1619_v33  ;;  %v1723_v33 = vld [vmem:[%s7026_s14 + $0xad8] sm:$0xff] }
 0x2d7   : > { %3823 = vmatpush1.bf16.msra.mxu0 %v2290_v52  ;;  %v2370_v52 = vunpack.c.l.s8.bf16 %v1554_v51  ;;  %v1658_v51 = vld [vmem:[%s7026_s14 + $0x8d0] sm:$0xff] }
 0x2d8   : > { %3866 = vmatpush1.bf16.msra.mxu1 %v2418_v13  ;;  %3824 = vmatprep.subr.bf16.mxu0 %v2283_v10  ;;  %v2498_v13 = vunpack.c.l.s8.bf16 %v1618_v7  ;;  %v2363_v10 = vunpack.c.h.s8.bf16 %v1547_v11  ;;  %v1722_v7 = vld [vmem:[%s7026_s14 + $0xad0] sm:$0xff] }
 0x2d9   : > { %3867 = vmatprep.subr.bf16.mxu1 %v2411_v23  ;;  %v2491_v23 = vunpack.c.h.s8.bf16 %v1611_v49 }
 0x2db   : > { %3825 = vmatpush1.bf16.msra.mxu0 %v2282_v41  ;;  %v2362_v41 = vunpack.c.h.s8.bf16 %v1546_v14 }
 0x2dc   : > { %3868 = vmatpush1.bf16.msra.mxu1 %v2410_v40  ;;  %3826 = vmatprep.subr.bf16.mxu0 %v2275_v46  ;;  %v2490_v40 = vunpack.c.h.s8.bf16 %v1610_v26  ;;  %v2355_v46 = vunpack.c.l.s8.bf16 %v1547_v11  ;;  %v2707_v11 = vunpack.c.l.s8.bf16 %v1723_v33 }
 0x2dd   : > { %3869 = vmatprep.subr.bf16.mxu1 %v2403_v48  ;;  %v2483_v48 = vunpack.c.l.s8.bf16 %v1611_v49  ;;  %v1715_v49 = vld [vmem:[%s7026_s14 + $0xa98] sm:$0xff] }
 0x2df   : > { %3827 = vmatpush1.bf16.msra.mxu0 %v2274_v29  ;;  %v2354_v29 = vunpack.c.l.s8.bf16 %v1546_v14  ;;  %v1650_v14 = vld [vmem:[%s7026_s14 + $0x890] sm:$0xff] }
 0x2e0   : > { %3870 = vmatpush1.bf16.msra.mxu1 %v2402_v15  ;;  %3828 = vmatprep.subr.bf16.mxu0 %v2395_v44  ;;  %v2482_v15 = vunpack.c.l.s8.bf16 %v1610_v26  ;;  %v2347_v44 = vunpack.c.h.s8.bf16 %v1539_v55  ;;  %v1714_v26 = vld [vmem:[%s7026_s14 + $0xa90] sm:$0xff] }
 0x2e1   : > { %3871 = vmatprep.subr.bf16.mxu1 %v2523_v22  ;;  %v2475_v22 = vunpack.c.h.s8.bf16 %v1603_v28 }
 0x2e3   : > { %3829 = vmatpush2.bf16.msra.mxu0 %v2394_v27  ;;  %v2346_v27 = vunpack.c.h.s8.bf16 %v1538_v1 }
 0x2e4   : > { %3872 = vmatpush2.bf16.msra.mxu1 %v2522_v12  ;;  %3830 = vmatprep.subr.bf16.mxu0 %v2387_v16  ;;  %v2474_v12 = vunpack.c.h.s8.bf16 %v1602_v47  ;;  %v2339_v16 = vunpack.c.l.s8.bf16 %v1539_v55  ;;  %v1643_v55 = vld [vmem:[%s7026_s14 + $0x858] sm:$0xff] }
 0x2e5   : > { %3873 = vmatprep.subr.bf16.mxu1 %v2515_v50  ;;  %v2467_v50 = vunpack.c.l.s8.bf16 %v1603_v28  ;;  %v7552_v28 = vpop.f32.mrf.mxu0 }
 0x2e7   : > { %3831 = vmatpush2.bf16.msra.mxu0 %v2386_v5  ;;  %v2338_v5 = vunpack.c.l.s8.bf16 %v1538_v1  ;;  %v2690_v1 = vunpack.c.l.s8.bf16 %v1714_v26 }
 0x2e8   : > { %3874 = vmatpush2.bf16.msra.mxu1 %v2514_v36  ;;  %3832 = vmatprep.subr.bf16.mxu0 %v2379_v32  ;;  %v2466_v36 = vunpack.c.l.s8.bf16 %v1602_v47  ;;  %v2587_v32 = vunpack.c.h.s8.bf16 %v1659_v45  ;;  %v1642_v47 = vld [vmem:[%s7026_s14 + $0x850] sm:$0xff] }
 0x2e9   : > { %3875 = vmatprep.subr.bf16.mxu1 %v2507_v0  ;;  %v2715_v0 = vunpack.c.h.s8.bf16 %v1723_v33 }
 0x2eb   : > { %3833 = vmatpush2.bf16.msra.mxu0 %v2378_v4  ;;  %v2586_v4 = vunpack.c.h.s8.bf16 %v1658_v51 }
 0x2ec   : > { %3876 = vmatpush2.bf16.msra.mxu1 %v2506_v59  ;;  %3834 = vmatprep.subr.bf16.mxu0 %v2371_v8  ;;  %v2714_v59 = vunpack.c.h.s8.bf16 %v1722_v7  ;;  %v2579_v8 = vunpack.c.l.s8.bf16 %v1659_v45  ;;  %v2554_v45 = vunpack.c.h.s8.bf16 %v1642_v47 }
 0x2ed   : > { %3877 = vmatprep.subr.bf16.mxu1 %v2499_v34  ;;  %v1651_v34 = vld [vmem:[%s7026_s14 + $0x898] sm:$0xff] }
 0x2ef   : > { %3835 = vmatpush2.bf16.msra.mxu0 %v2370_v52  ;;  %v2578_v52 = vunpack.c.l.s8.bf16 %v1658_v51 }
 0x2f0   : > { %3878 = vmatpush2.bf16.msra.mxu1 %v2498_v13  ;;  %3836 = vmatprep.subr.bf16.mxu0 %v2363_v10  ;;  %v2706_v13 = vunpack.c.l.s8.bf16 %v1722_v7  ;;  %v2571_v10 = vunpack.c.h.s8.bf16 %v1651_v34 }
 0x2f1   : > { %3879 = vmatprep.subr.bf16.mxu1 %v2491_v23  ;;  %v2699_v23 = vunpack.c.h.s8.bf16 %v1715_v49 }
 0x2f3   : > { %3837 = vmatpush2.bf16.msra.mxu0 %v2362_v41  ;;  %v2570_v41 = vunpack.c.h.s8.bf16 %v1650_v14 }
 0x2f4   : > { %3880 = vmatpush2.bf16.msra.mxu1 %v2490_v40  ;;  %3838 = vmatprep.subr.bf16.mxu0 %v2355_v46  ;;  %v2698_v40 = vunpack.c.h.s8.bf16 %v1714_v26  ;;  %v2563_v46 = vunpack.c.l.s8.bf16 %v1651_v34  ;;  %v1634_v34 = vld [vmem:[%s7026_s14 + $0x810] sm:$0xff] }
 0x2f5   : > { %3881 = vmatprep.subr.bf16.mxu1 %v2483_v48  ;;  %v2691_v48 = vunpack.c.l.s8.bf16 %v1715_v49  ;;  %v1698_v49 = vld [vmem:[%s7026_s14 + $0xa10] sm:$0xff] }
 0x2f7   : > { %3839 = vmatpush2.bf16.msra.mxu0 %v2354_v29  ;;  %v1707_v29 = vld [vmem:[%s7026_s14 + $0xa58] sm:$0xff] }
 0x2f8   : > { %3882 = vmatpush2.bf16.msra.mxu1 %v2482_v15  ;;  %3840 = vmatprep.subr.bf16.mxu0 %v2347_v44  ;;  %v7555_v15 = vpop.f32.mrf.mxu1  ;;  %v2562_v44 = vunpack.c.l.s8.bf16 %v1650_v14 }
 0x2f9   : > { %3883 = vmatprep.subr.bf16.mxu1 %v2475_v22  ;;  %v2555_v22 = vunpack.c.h.s8.bf16 %v1643_v55 }
 0x2fb   : > { %3841 = vmatpush2.bf16.msra.mxu0 %v2346_v27  ;;  %v2683_v27 = vunpack.c.h.s8.bf16 %v1707_v29 }
 0x2fc   : > { %3884 = vmatpush2.bf16.msra.mxu1 %v2474_v12  ;;  %3842 = vmatprep.subr.bf16.mxu0 %v2339_v16  ;;  %v1706_v12 = vld [vmem:[%s7026_s14 + $0xa50] sm:$0xff]  ;;  %v7559_v16 = vpop.f32.mrf.mxu0 }
 0x2fd   : > { %3885 = vmatprep.subr.bf16.mxu1 %v2467_v50  ;;  %v7561_v50 = vpop.f32.mrf.mxu1  ;;  %v2682_v33 = vunpack.c.h.s8.bf16 %v1706_v12 }
 0x2fe   : > { %v7564_v51 = vpop.f32.mrf.mxu0 }
 0x2ff   : > { %3843 = vmatpush2.bf16.msra.mxu0 %v2338_v5  ;;  %v2547_v5 = vunpack.c.l.s8.bf16 %v1643_v55  ;;  %v7567_v7 = vpop.f32.mrf.mxu1  ;;  %v2530_v55 = vunpack.c.l.s8.bf16 %v1634_v34 }
 0x300   : > { %3886 = vmatpush2.bf16.msra.mxu1 %v2466_v36  ;;  %3898 = vmatprep.subr.bf16.mxu0 %v2587_v32  ;;  %v2675_v36 = vunpack.c.l.s8.bf16 %v1707_v29  ;;  %v1635_v32 = vld [vmem:[%s7026_s14 + $0x818] sm:$0xff] }
 0x301   : > { %3941 = vmatprep.subr.bf16.mxu1 %v2715_v0  ;;  %v1699_v0 = vld [vmem:[%s7026_s14 + $0xa18] sm:$0xff]  ;;  %v2531_v26 = vunpack.c.l.s8.bf16 %v1635_v32 }
 0x302   : > { %3845 = vmatmul.mubr.bf16.vlgmr.msra.gmra.mxu0 %v7321_v24 }
 0x303   : > { %3888 = vmatmul.mubr.bf16.vlgmr.msra.gmra.mxu1 %v7323_v25  ;;  %3899 = vmatpush1.bf16.msra.mxu0 %v2586_v4  ;;  %v2546_v4 = vunpack.c.l.s8.bf16 %v1642_v47 }
 0x304   : > { %3930 = vmatprep.mubr.bf16.mxu0 %v7327_v21  ;;  %3942 = vmatpush1.bf16.msra.mxu1 %v2714_v59  ;;  %v2674_v59 = vunpack.c.l.s8.bf16 %v1706_v12  ;;  %v1754_v12 = vld [vmem:[%s7026_s14 + $0xbd0] sm:$0xff] }
 0x305   : > { %3973 = vmatprep.mubr.bf16.mxu1 %v7329_v37  ;;  %3900 = vmatprep.subr.bf16.mxu0 %v2579_v8  ;;  %v2539_v8 = vunpack.c.h.s8.bf16 %v1635_v32 }
 0x306   : > { %3943 = vmatprep.subr.bf16.mxu1 %v2707_v11  ;;  %v2667_v11 = vunpack.c.h.s8.bf16 %v1699_v0 }
 0x307   : > { %3901 = vmatpush1.bf16.msra.mxu0 %v2578_v52  ;;  %v7571_v52 = vpop.f32.mrf.mxu0 }
 0x308   : > { %3944 = vmatpush1.bf16.msra.mxu1 %v2706_v13  ;;  %3902 = vmatprep.subr.bf16.mxu0 %v2571_v10  ;;  %v7573_v13 = vpop.f32.mrf.mxu1  ;;  %v2538_v10 = vunpack.c.h.s8.bf16 %v1634_v34 }
 0x309   : > { %3945 = vmatprep.subr.bf16.mxu1 %v2699_v23  ;;  %v7575_v14 = vpop.f32.mrf.mxu0  ;;  %v2666_v23 = vunpack.c.h.s8.bf16 %v1698_v49 }
 0x30b   : > { %3903 = vmatpush1.bf16.msra.mxu0 %v2570_v41  ;;  %v7577_v41 = vpop.f32.mrf.mxu1  ;;  %v7581_v29 = vpop.f32.mrf.mxu0 }
 0x30c   : > { %3946 = vmatpush1.bf16.msra.mxu1 %v2698_v40  ;;  %3904 = vmatprep.subr.bf16.mxu0 %v2563_v46  ;;  %v2659_v40 = vunpack.c.l.s8.bf16 %v1699_v0  ;;  %v1691_v46 = vld [vmem:[%s7026_s14 + $0x9d8] sm:$0xff] }
 0x30d   : > { %3947 = vmatprep.subr.bf16.mxu1 %v2691_v48  ;;  %v1755_v48 = vld [vmem:[%s7026_s14 + $0xbd8] sm:$0xff]  ;;  %v7584_v47 = vpop.f32.mrf.mxu1 }
 0x30e   : > { %v2771_v0 = vunpack.c.l.s8.bf16 %v1755_v48 }
 0x30f   : > { %3905 = vmatpush1.bf16.msra.mxu0 %v2562_v44  ;;  %v2658_v44 = vunpack.c.l.s8.bf16 %v1698_v49  ;;  %v7589_v32 = vpop.f32.mrf.mxu1 }
 0x310   : > { %3948 = vmatpush1.bf16.msra.mxu1 %v2690_v1  ;;  %3906 = vmatprep.subr.bf16.mxu0 %v2555_v22  ;;  %v2651_v1 = vunpack.c.h.s8.bf16 %v1691_v46  ;;  %v1690_v22 = vld [vmem:[%s7026_s14 + $0x9d0] sm:$0xff] }
 0x311   : > { %3949 = vmatprep.subr.bf16.mxu1 %v2683_v27  ;;  %v2779_v27 = vunpack.c.h.s8.bf16 %v1755_v48 }
 0x313   : > { %3907 = vmatpush1.bf16.msra.mxu0 %v2554_v45  ;;  %v2650_v45 = vunpack.c.h.s8.bf16 %v1690_v22 }
 0x314   : > { %3950 = vmatpush1.bf16.msra.mxu1 %v2682_v33  ;;  %3908 = vmatprep.subr.bf16.mxu0 %v2547_v5  ;;  %v7587_v33 = vpop.f32.mrf.mxu0  ;;  %v2778_v5 = vunpack.c.h.s8.bf16 %v1754_v12 }
 0x315   : > { %3951 = vmatprep.subr.bf16.mxu1 %v2675_v36  ;;  %v2643_v36 = vunpack.c.l.s8.bf16 %v1691_v46 }
 0x316   : > { %v7593_v34 = vpop.f32.mrf.mxu0 }
 0x317   : > { %3909 = vmatpush1.bf16.msra.mxu0 %v2546_v4  ;;  %v1683_v4 = vld [vmem:[%s7026_s14 + $0x998] sm:$0xff] }
 0x318   : > { %3952 = vmatpush1.bf16.msra.mxu1 %v2674_v59  ;;  %3910 = vmatprep.subr.bf16.mxu0 %v2539_v8  ;;  %v1747_v59 = vld [vmem:[%s7026_s14 + $0xb98] sm:$0xff]  ;;  %v2642_v8 = vunpack.c.l.s8.bf16 %v1690_v22  ;;  %v2635_v49 = vunpack.c.h.s8.bf16 %v1683_v4  ;;  %v3502_v46 = vpop.f32.mrf.mxu0 }
 0x319   : > { %3953 = vmatprep.subr.bf16.mxu1 %v2667_v11  ;;  %v2770_v11 = vunpack.c.l.s8.bf16 %v1754_v12  ;;  %v2755_v22 = vunpack.c.l.s8.bf16 %v1747_v59 }
 0x31a   : > { %v3504_v12 = vpop.f32.mrf.mxu0 }
 0x31b   : > { %3911 = vmatpush1.bf16.msra.mxu0 %v2538_v10  ;;  %v1682_v10 = vld [vmem:[%s7026_s14 + $0x990] sm:$0xff] }
 0x31c   : > { %3954 = vmatpush1.bf16.msra.mxu1 %v2666_v23  ;;  %3912 = vmatprep.subr.bf16.mxu0 %v2531_v26  ;;  %v7596_v23 = vpop.f32.mrf.mxu1  ;;  %v2763_v26 = vunpack.c.h.s8.bf16 %v1747_v59  ;;  %v3374_v59 = vadd.f32 %v7555_v15, %v7552_v28  ;;  %v3378_v28 = vadd.f32 %v7567_v7, %v7564_v51  ;;  %v2731_v7 = vunpack.c.h.s8.bf16 %v1731_v30 }
 0x31d   : > { %3955 = vmatprep.subr.bf16.mxu1 %v2659_v40  ;;  %v1746_v40 = vld [vmem:[%s7026_s14 + $0xb90] sm:$0xff] }
 0x31e   : > { %v7599_v48 = vpop.f32.mrf.mxu1 }
 0x31f   : > { %3913 = vmatpush1.bf16.msra.mxu0 %v2530_v55  ;;  %v2634_v55 = vunpack.c.h.s8.bf16 %v1682_v10 }
 0x320   : > { %3956 = vmatpush1.bf16.msra.mxu1 %v2658_v44  ;;  %3914 = vmatprep.subr.bf16.mxu0 %v2651_v1  ;;  %v2762_v44 = vunpack.c.h.s8.bf16 %v1746_v40  ;;  %v2627_v1 = vunpack.c.l.s8.bf16 %v1683_v4  ;;  %v3506_v4 = vpop.f32.mrf.mxu0 }
 0x321   : > { %3957 = vmatprep.subr.bf16.mxu1 %v2779_v27  ;;  %v1675_v27 = vld [vmem:[%s7026_s14 + $0x958] sm:$0xff] }
 0x322   : > { %v3508_v31 = vpop.f32.mrf.mxu0 }
 0x323   : > { %3915 = vmatpush2.bf16.msra.mxu0 %v2650_v45  ;;  %v1739_v45 = vld [vmem:[%s7026_s14 + $0xb58] sm:$0xff] }
 0x324   : > { %3958 = vmatpush2.bf16.msra.mxu1 %v2778_v5  ;;  %3916 = vmatprep.subr.bf16.mxu0 %v2643_v36  ;;  %v7603_v5 = vpop.f32.mrf.mxu1  ;;  %v2626_v36 = vunpack.c.l.s8.bf16 %v1682_v10 }
 0x325   : > { %3959 = vmatprep.subr.bf16.mxu1 %v2771_v0  ;;  %v2754_v0 = vunpack.c.l.s8.bf16 %v1746_v40  ;;  %v3376_v40 = vadd.f32 %v7561_v50, %v7559_v16 }
 0x327   : > { %3917 = vmatpush2.bf16.msra.mxu0 %v2642_v8  ;;  %v2619_v8 = vunpack.c.h.s8.bf16 %v1675_v27  ;;  %v3419_v15 = vadd.f32 %v7581_v29, %v3376_v40  ;;  %v1730_v29 = vld [vmem:[%s7026_s14 + $0xb10] sm:$0xff]  ;;  %v2723_v40 = vunpack.c.l.s8.bf16 %v1731_v30 }
 0x328   : > { %3960 = vmatpush2.bf16.msra.mxu1 %v2770_v11  ;;  %3918 = vmatprep.subr.bf16.mxu0 %v2635_v49  ;;  %v2747_v11 = vunpack.c.h.s8.bf16 %v1739_v45  ;;  %v1738_v49 = vld [vmem:[%s7026_s14 + $0xb50] sm:$0xff] }
 0x329   : > { %3961 = vmatprep.subr.bf16.mxu1 %v2763_v26  ;;  %v7609_v26 = vpop.f32.mrf.mxu1  ;;  %v2746_v10 = vunpack.c.h.s8.bf16 %v1738_v49  ;;  %v2738_v16 = vunpack.c.l.s8.bf16 %v1738_v49 }
 0x32b   : > { %3919 = vmatpush2.bf16.msra.mxu0 %v2634_v55  ;;  %v2611_v55 = vunpack.c.l.s8.bf16 %v1675_v27  ;;  %v2610_v27 = vunpack.c.l.s8.bf16 %v1674_v43 }
 0x32c   : > { %3962 = vmatpush2.bf16.msra.mxu1 %v2762_v44  ;;  %3920 = vmatprep.subr.bf16.mxu0 %v2627_v1  ;;  %v3417_v44 = vadd.f32 %v7575_v14, %v3374_v59  ;;  %v2739_v1 = vunpack.c.l.s8.bf16 %v1739_v45  ;;  %v1666_v14 = vld [vmem:[%s7026_s14 + $0x910] sm:$0xff]  ;;  %v3380_v45 = vadd.f32 %v7573_v13, %v7571_v52  ;;  %v2730_v52 = vunpack.c.h.s8.bf16 %v1730_v29 }
 0x32d   : > { %3963 = vmatprep.subr.bf16.mxu1 %v2755_v22  ;;  %v1667_v22 = vld [vmem:[%s7026_s14 + $0x918] sm:$0xff]  ;;  %v2602_v59 = vunpack.c.h.s8.bf16 %v1666_v14 }
 0x32e   : > { %v2603_v50 = vunpack.c.h.s8.bf16 %v1667_v22  ;;  %v3423_v43 = vadd.f32 %v7593_v34, %v3380_v45  ;;  %v2595_v13 = vunpack.c.l.s8.bf16 %v1667_v22  ;;  %v2722_v22 = vunpack.c.l.s8.bf16 %v1730_v29 }
 0x32f   : > { %3921 = vmatpush2.bf16.msra.mxu0 %v2626_v36  ;;  %v3551_v36 = vpop.f32.mrf.mxu1 }
 0x330   : > { %3964 = vmatpush2.bf16.msra.mxu1 %v2754_v0  ;;  %3922 = vmatprep.subr.bf16.mxu0 %v2619_v8  ;;  %v3588_v0 = vpop.f32.mrf.mxu0  ;;  %v3460_v8 = vadd.f32 %v7577_v41, %v3417_v44  ;;  %v1787_v44 = vld [vmem:[%s7026_s14 + $0xcd8] sm:$0xff] }
 0x331   : > { %3965 = vmatprep.subr.bf16.mxu1 %v2747_v11  ;;  %v3421_v11 = vadd.f32 %v7587_v33, %v3378_v28  ;;  %v3631_v51 = vpop.f32.mrf.mxu1  ;;  %v2594_v28 = vunpack.c.l.s8.bf16 %v1666_v14 }
 0x332   : > { %v3503_v49 = vadd.f32 %v3502_v46, %v3460_v8 }
 0x333   : > { %3923 = vmatpush2.bf16.msra.mxu0 %v2618_v42  ;;  %v3462_v42 = vadd.f32 %v7584_v47, %v3419_v15  ;;  %v3464_v41 = vadd.f32 %v7589_v32, %v3421_v11  ;;  %v1851_v47 = vld [vmem:[%s7026_s14 + $0xed8] sm:$0xff]  ;;  %v2843_v32 = vunpack.c.h.s8.bf16 %v1787_v44 }
 0x334   : > { %3966 = vmatpush2.bf16.msra.mxu1 %v2746_v10  ;;  %3924 = vmatprep.subr.bf16.mxu0 %v2611_v55  ;;  %v3590_v10 = vpop.f32.mrf.mxu0  ;;  %v3633_v55 = vpop.f32.mrf.mxu1  ;;  %v3546_v34 = vadd.f32 %v7599_v48, %v3503_v49  ;;  %v2971_v45 = vunpack.c.h.s8.bf16 %v1851_v47  ;;  %v1843_v49 = vld [vmem:[%s7026_s14 + $0xe98] sm:$0xff] }
 0x335   : > { %3967 = vmatprep.subr.bf16.mxu1 %v2739_v1  ;;  %v3505_v33 = vadd.f32 %v3504_v12, %v3462_v42  ;;  %v3466_v1 = vadd.f32 %v7596_v23, %v3423_v43  ;;  %v3507_v46 = vadd.f32 %v3506_v4, %v3464_v41  ;;  %v1786_v12 = vld [vmem:[%s7026_s14 + $0xcd0] sm:$0xff]  ;;  %v1779_v42 = vld [vmem:[%s7026_s14 + $0xc98] sm:$0xff]  ;;  %v1340_v41 = vld [vmem:[#allocation2 + $0x30] sm:$0xff] }
 0x336   : > { %v3592_v15 = vpop.f32.mrf.mxu0  ;;  %v3589_v30 = vadd.f32 %v3588_v0, %v3546_v34  ;;  %v1850_v23 = vld [vmem:[%s7026_s14 + $0xed0] sm:$0xff]  ;;  %v2842_v14 = vunpack.c.h.s8.bf16 %v1786_v12  ;;  %v2835_v0 = vunpack.c.l.s8.bf16 %v1787_v44  ;;  %v2827_v44 = vunpack.c.h.s8.bf16 %v1779_v42 }
 0x337   : > { %3925 = vmatpush2.bf16.msra.mxu0 %v2610_v27  ;;  %v3548_v27 = vadd.f32 %v7603_v5, %v3505_v33  ;;  %v3550_v48 = vadd.f32 %v7609_v26, %v3507_v46  ;;  %v2970_v11 = vunpack.c.h.s8.bf16 %v1850_v23  ;;  %v2963_v26 = vunpack.c.l.s8.bf16 %v1851_v47 }
 0x338   : > { %3968 = vmatpush2.bf16.msra.mxu1 %v2738_v16  ;;  %3926 = vmatprep.subr.bf16.mxu0 %v2603_v50  ;;  %v3509_v16 = vadd.f32 %v3508_v31, %v3466_v1  ;;  %v3635_v50 = vpop.f32.mrf.mxu1  ;;  %v3594_v8 = vpop.f32.mrf.mxu0  ;;  %v3632_v29 = vadd.f32 %v3631_v51, %v3589_v30  ;;  %v1778_v51 = vld [vmem:[%s7026_s14 + $0xc90] sm:$0xff]  ;;  %v2955_v46 = vunpack.c.h.s8.bf16 %v1843_v49 }
 0x339   : > { %3969 = vmatprep.subr.bf16.mxu1 %v2731_v7  ;;  %v3591_v4 = vadd.f32 %v3590_v10, %v3548_v27  ;;  %v3593_v5 = vadd.f32 %v3592_v15, %v3550_v48  ;;  %v1341_v15 = vld [vmem:[#allocation2] sm:$0xff] }
 0x33a   : > { %v3552_v7 = vadd.f32 %v3551_v36, %v3509_v16  ;;  %v3637_v31 = vpop.f32.mrf.mxu1  ;;  %v2834_v36 = vunpack.c.l.s8.bf16 %v1786_v12 }
 0x33b   : > { %3927 = vmatpush2.bf16.msra.mxu0 %v2602_v59  ;;  %v3634_v59 = vadd.f32 %v3633_v55, %v3591_v4  ;;  %v3636_v1 = vadd.f32 %v3635_v50, %v3593_v5  ;;  %v1348_v50 = vld [vmem:[#allocation2 + $0x40] sm:$0xff]  ;;  %v2819_v4 = vunpack.c.l.s8.bf16 %v1779_v42 }
 0x33c   : > { %3970 = vmatpush2.bf16.msra.mxu1 %v2730_v52  ;;  %3928 = vmatprep.subr.bf16.mxu0 %v2595_v13  ;;  %v3595_v10 = vadd.f32 %v3594_v8, %v3552_v7  ;;  %v2947_v7 = vunpack.c.l.s8.bf16 %v1843_v49  ;;  %v1349_v5 = vld [vmem:[#allocation2 + $0x20] sm:$0xff] }
 0x33d   : > { %3971 = vmatprep.subr.bf16.mxu1 %v2723_v40  ;;  %v2962_v40 = vunpack.c.l.s8.bf16 %v1850_v23 }
 0x33e   : > { %v3638_v12 = vadd.f32 %v3637_v31, %v3595_v10 }
 0x33f   : > { %3929 = vmatpush2.bf16.msra.mxu0 %v2594_v28  ;;  %v1842_v28 = vld [vmem:[%s7026_s14 + $0xe90] sm:$0xff] }
 0x340   : > { %3972 = vmatpush2.bf16.msra.mxu1 %v2722_v22  ;;  %3984 = vmatprep.subr.bf16.mxu0 %v2843_v32  ;;  %v2826_v32 = vunpack.c.h.s8.bf16 %v1778_v51  ;;  %v2954_v48 = vunpack.c.h.s8.bf16 %v1842_v28  ;;  %v2946_v42 = vunpack.c.l.s8.bf16 %v1842_v28 }
 0x341   : > { %4027 = vmatprep.subr.bf16.mxu1 %v2971_v45 }
 0x342   : > { %v3674_v43 = vpop.f32.mrf.mxu0  ;;  %3931 = vmatmul.mubr.bf16.vlgmr.msra.gmra.mxu0 %v7383_v53 }
 0x343   : > { %v3675_v52 = vadd.f32 %v3674_v43, %v3632_v29  ;;  %v3717_v13 = vpop.f32.mrf.mxu1  ;;  %3974 = vmatmul.mubr.bf16.vlgmr.msra.gmra.mxu1 %v7385_v54  ;;  %3985 = vmatpush1.bf16.msra.mxu0 %v2842_v14  ;;  %v1771_v29 = vld [vmem:[%s7026_s14 + $0xc58] sm:$0xff] }
 0x344   : > { %4016 = vmatprep.mubr.bf16.mxu0 %v7381_v6  ;;  %4028 = vmatpush1.bf16.msra.mxu1 %v2970_v11  ;;  %v3676_v33 = vpop.f32.mrf.mxu0  ;;  %v2811_v10 = vunpack.c.h.s8.bf16 %v1771_v29 }
 0x345   : > { %v3718_v47 = vadd.f32 %v3717_v13, %v3675_v52  ;;  %4059 = vmatprep.mubr.bf16.mxu1 %v7387_v58  ;;  %v3677_v55 = vadd.f32 %v3676_v33, %v3634_v59  ;;  %v3719_v34 = vpop.f32.mrf.mxu1  ;;  %3986 = vmatprep.subr.bf16.mxu0 %v2835_v0  ;;  %v1835_v0 = vld [vmem:[%s7026_s14 + $0xe58] sm:$0xff]  ;;  %v2818_v59 = vunpack.c.l.s8.bf16 %v1778_v51  ;;  %v1770_v52 = vld [vmem:[%s7026_s14 + $0xc50] sm:$0xff]  ;;  %v2803_v33 = vunpack.c.l.s8.bf16 %v1771_v29 }
 0x346   : > { %v3678_v22 = vpop.f32.mrf.mxu0  ;;  %4029 = vmatprep.subr.bf16.mxu1 %v2963_v26  ;;  %v2939_v49 = vunpack.c.h.s8.bf16 %v1835_v0 }
 0x347   : > { %v5016_v27 = vadd.f32 %v3718_v47, %v1340_v41  ;;  %v3720_v16 = vadd.f32 %v3719_v34, %v3677_v55  ;;  %v3679_v30 = vadd.f32 %v3678_v22, %v3636_v1  ;;  %v3721_v45 = vpop.f32.mrf.mxu1  ;;  %3987 = vmatpush1.bf16.msra.mxu0 %v2834_v36  ;;  %v1834_v36 = vld [vmem:[%s7026_s14 + $0xe50] sm:$0xff]  ;;  %v2810_v41 = vunpack.c.h.s8.bf16 %v1770_v52  ;;  %v1827_v1 = vld [vmem:[%s7026_s14 + $0xe18] sm:$0xff] }
 0x348   : > { %4030 = vmatpush1.bf16.msra.mxu1 %v2962_v40  ;;  %v3680_v23 = vpop.f32.mrf.mxu0  ;;  %3988 = vmatprep.subr.bf16.mxu0 %v2827_v44  ;;  %v2938_v51 = vunpack.c.h.s8.bf16 %v1834_v36  ;;  %v2931_v40 = vunpack.c.l.s8.bf16 %v1835_v0  ;;  %v1763_v44 = vld [vmem:[%s7026_s14 + $0xc18] sm:$0xff]  ;;  %v2802_v47 = vunpack.c.l.s8.bf16 %v1770_v52  ;;  %v2930_v55 = vunpack.c.l.s8.bf16 %v1834_v36 }
 0x349   : > { %5032 = vst [vmem:[#allocation2 + $0x30] sm:$0xff] %v5016_v27  ;;  %v5017_v14 = vadd.f32 %v3720_v16, %v1341_v15  ;;  %v3722_v8 = vadd.f32 %v3721_v45, %v3679_v30  ;;  %v3681_v11 = vadd.f32 %v3680_v23, %v3638_v12  ;;  %4031 = vmatprep.subr.bf16.mxu1 %v2955_v46  ;;  %v3723_v31 = vpop.f32.mrf.mxu1  ;;  %v2795_v34 = vunpack.c.h.s8.bf16 %v1763_v44  ;;  %v1762_v46 = vld [vmem:[%s7026_s14 + $0xc10] sm:$0xff]  ;;  %v1819_v16 = vld [vmem:[%s7026_s14 + $0xdd8] sm:$0xff] }
 0x34a   : > { %v2923_v28 = vunpack.c.h.s8.bf16 %v1827_v1  ;;  %v1826_v15 = vld [vmem:[%s7026_s14 + $0xe10] sm:$0xff]  ;;  %v2794_v22 = vunpack.c.h.s8.bf16 %v1762_v46  ;;  %v2787_v12 = vunpack.c.l.s8.bf16 %v1763_v44  ;;  %v2915_v27 = vunpack.c.l.s8.bf16 %v1827_v1  ;;  %v1883_v30 = vld [vmem:[%s7026_s14 + $0xfd8] sm:$0xff] }
 0x34b   : > { %5033 = vst [vmem:[#allocation2] sm:$0xff] %v5017_v14  ;;  %v5024_v43 = vadd.f32 %v3722_v8, %v1348_v50  ;;  %v3724_v26 = vadd.f32 %v3723_v31, %v3681_v11  ;;  %3989 = vmatpush1.bf16.msra.mxu0 %v2826_v32  ;;  %v2922_v32 = vunpack.c.h.s8.bf16 %v1826_v15  ;;  %v2786_v45 = vunpack.c.l.s8.bf16 %v1762_v46  ;;  %v1882_v14 = vld [vmem:[%s7026_s14 + $0xfd0] sm:$0xff]  ;;  %v1875_v31 = vld [vmem:[%s7026_s14 + $0xf98] sm:$0xff] }
 0x34c   : > { %4032 = vmatpush1.bf16.msra.mxu1 %v2954_v48  ;;  %3990 = vmatprep.subr.bf16.mxu0 %v2819_v4  ;;  %v2914_v50 = vunpack.c.l.s8.bf16 %v1826_v15  ;;  %v2907_v23 = vunpack.c.h.s8.bf16 %v1819_v16  ;;  %v1818_v48 = vld [vmem:[%s7026_s14 + $0xdd0] sm:$0xff]  ;;  %v3035_v4 = vunpack.c.h.s8.bf16 %v1883_v30  ;;  %v3034_v11 = vunpack.c.h.s8.bf16 %v1882_v14 }
 0x34d   : > { %5040 = vst [vmem:[#allocation2 + $0x40] sm:$0xff] %v5024_v43  ;;  %v5025_v13 = vadd.f32 %v3724_v26, %v1349_v5  ;;  %4033 = vmatprep.subr.bf16.mxu1 %v2947_v7  ;;  %v2906_v8 = vunpack.c.h.s8.bf16 %v1818_v48  ;;  %v2899_v7 = vunpack.c.l.s8.bf16 %v1819_v16  ;;  %v3027_v29 = vunpack.c.l.s8.bf16 %v1883_v30  ;;  %v1811_v5 = vld [vmem:[%s7026_s14 + $0xd98] sm:$0xff]  ;;  %v1802_v1 = vld [vmem:[%s7026_s14 + $0xd50] sm:$0xff] }
 0x34e   : > { %v2898_v0 = vunpack.c.l.s8.bf16 %v1818_v48  ;;  %v3026_v43 = vunpack.c.l.s8.bf16 %v1882_v14  ;;  %v2891_v26 = vunpack.c.h.s8.bf16 %v1811_v5  ;;  %v3011_v36 = vunpack.c.l.s8.bf16 %v1875_v31  ;;  %v1794_v30 = vld [vmem:[%s7026_s14 + $0xd10] sm:$0xff] }
 0x34f   : > { %5041 = vst [vmem:[#allocation2 + $0x20] sm:$0xff] %v5025_v13  ;;  %3991 = vmatpush1.bf16.msra.mxu0 %v2818_v59  ;;  %v1810_v59 = vld [vmem:[%s7026_s14 + $0xd90] sm:$0xff] }
 0x350   : > { %4034 = vmatpush1.bf16.msra.mxu1 %v2946_v42  ;;  %3992 = vmatprep.subr.bf16.mxu0 %v2811_v10  ;;  %v3019_v42 = vunpack.c.h.s8.bf16 %v1875_v31  ;;  %v1874_v10 = vld [vmem:[%s7026_s14 + $0xf90] sm:$0xff]  ;;  %v2890_v52 = vunpack.c.h.s8.bf16 %v1810_v59 }
 0x351   : > { %4035 = vmatprep.subr.bf16.mxu1 %v2939_v49  ;;  %v3018_v13 = vunpack.c.h.s8.bf16 %v1874_v10  ;;  %v2883_v49 = vunpack.c.l.s8.bf16 %v1811_v5  ;;  %v1914_v31 = vld [vmem:[%s7026_s14 + $0x10d0] sm:$0xff] }
 0x353   : > { %3993 = vmatpush1.bf16.msra.mxu0 %v2810_v41  ;;  %v1803_v41 = vld [vmem:[%s7026_s14 + $0xd58] sm:$0xff] }
 0x354   : > { %4036 = vmatpush1.bf16.msra.mxu1 %v2938_v51  ;;  %3994 = vmatprep.subr.bf16.mxu0 %v2803_v33  ;;  %v1867_v51 = vld [vmem:[%s7026_s14 + $0xf58] sm:$0xff]  ;;  %v2882_v33 = vunpack.c.l.s8.bf16 %v1810_v59  ;;  %v2875_v44 = vunpack.c.h.s8.bf16 %v1803_v41 }
 0x355   : > { %4037 = vmatprep.subr.bf16.mxu1 %v2931_v40  ;;  %v3010_v40 = vunpack.c.l.s8.bf16 %v1874_v10  ;;  %v2995_v15 = vunpack.c.l.s8.bf16 %v1867_v51  ;;  %v1907_v10 = vld [vmem:[%s7026_s14 + $0x1098] sm:$0xff] }
 0x357   : > { %3995 = vmatpush1.bf16.msra.mxu0 %v2802_v47  ;;  %v3003_v47 = vunpack.c.h.s8.bf16 %v1867_v51  ;;  %v1906_v51 = vld [vmem:[%s7026_s14 + $0x1090] sm:$0xff] }
 0x358   : > { %4038 = vmatpush1.bf16.msra.mxu1 %v2930_v55  ;;  %3996 = vmatprep.subr.bf16.mxu0 %v2795_v34  ;;  %v1866_v55 = vld [vmem:[%s7026_s14 + $0xf50] sm:$0xff]  ;;  %v2874_v34 = vunpack.c.h.s8.bf16 %v1802_v1 }
 0x359   : > { %4039 = vmatprep.subr.bf16.mxu1 %v2923_v28  ;;  %v3002_v46 = vunpack.c.h.s8.bf16 %v1866_v55  ;;  %v2867_v28 = vunpack.c.l.s8.bf16 %v1803_v41  ;;  %v3083_v41 = vunpack.c.h.s8.bf16 %v1907_v10 }
 0x35b   : > { %3997 = vmatpush1.bf16.msra.mxu0 %v2794_v22  ;;  %v1795_v22 = vld [vmem:[%s7026_s14 + $0xd18] sm:$0xff] }
 0x35c   : > { %4040 = vmatpush1.bf16.msra.mxu1 %v2922_v32  ;;  %3998 = vmatprep.subr.bf16.mxu0 %v2787_v12  ;;  %v1859_v32 = vld [vmem:[%s7026_s14 + $0xf18] sm:$0xff]  ;;  %v2866_v12 = vunpack.c.l.s8.bf16 %v1802_v1  ;;  %v2859_v16 = vunpack.c.h.s8.bf16 %v1795_v22 }
 0x35d   : > { %4041 = vmatprep.subr.bf16.mxu1 %v2915_v27  ;;  %v2994_v27 = vunpack.c.l.s8.bf16 %v1866_v55  ;;  %v2979_v14 = vunpack.c.l.s8.bf16 %v1859_v32 }
 0x35f   : > { %3999 = vmatpush1.bf16.msra.mxu0 %v2786_v45  ;;  %v2987_v45 = vunpack.c.h.s8.bf16 %v1859_v32  ;;  %v1898_v32 = vld [vmem:[%s7026_s14 + $0x1050] sm:$0xff] }
 0x360   : > { %4042 = vmatpush1.bf16.msra.mxu1 %v2914_v50  ;;  %4000 = vmatprep.subr.bf16.mxu0 %v2907_v23  ;;  %v1858_v50 = vld [vmem:[%s7026_s14 + $0xf10] sm:$0xff]  ;;  %v2858_v23 = vunpack.c.h.s8.bf16 %v1794_v30 }
 0x361   : > { %4043 = vmatprep.subr.bf16.mxu1 %v3035_v4  ;;  %v2986_v48 = vunpack.c.h.s8.bf16 %v1858_v50  ;;  %v2851_v4 = vunpack.c.l.s8.bf16 %v1795_v22 }
 0x363   : > { %4001 = vmatpush2.bf16.msra.mxu0 %v2906_v8  ;;  %v1915_v8 = vld [vmem:[%s7026_s14 + $0x10d8] sm:$0xff] }
 0x364   : > { %4044 = vmatpush2.bf16.msra.mxu1 %v3034_v11  ;;  %4002 = vmatprep.subr.bf16.mxu0 %v2899_v7  ;;  %v1979_v11 = vld [vmem:[%s7026_s14 + $0x12d8] sm:$0xff]  ;;  %v2850_v7 = vunpack.c.l.s8.bf16 %v1794_v30  ;;  %v3099_v5 = vunpack.c.h.s8.bf16 %v1915_v8 }
 0x365   : > { %4045 = vmatprep.subr.bf16.mxu1 %v3027_v29  ;;  %v2978_v29 = vunpack.c.l.s8.bf16 %v1858_v50 }
 0x367   : > { %4003 = vmatpush2.bf16.msra.mxu0 %v2898_v0  ;;  %v3227_v0 = vunpack.c.h.s8.bf16 %v1979_v11 }
 0x368   : > { %4046 = vmatpush2.bf16.msra.mxu1 %v3026_v43  ;;  %4004 = vmatprep.subr.bf16.mxu0 %v2891_v26  ;;  %v1978_v43 = vld [vmem:[%s7026_s14 + $0x12d0] sm:$0xff]  ;;  %v3098_v26 = vunpack.c.h.s8.bf16 %v1914_v31 }
 0x369   : > { %4047 = vmatprep.subr.bf16.mxu1 %v3019_v42  ;;  %v3226_v59 = vunpack.c.h.s8.bf16 %v1978_v43  ;;  %v3091_v42 = vunpack.c.l.s8.bf16 %v1915_v8 }
 0x36b   : > { %4005 = vmatpush2.bf16.msra.mxu0 %v2890_v52  ;;  %v3219_v52 = vunpack.c.l.s8.bf16 %v1979_v11  ;;  %v1890_v11 = vld [vmem:[%s7026_s14 + $0x1010] sm:$0xff] }
 0x36c   : > { %4048 = vmatpush2.bf16.msra.mxu1 %v3018_v13  ;;  %4006 = vmatprep.subr.bf16.mxu0 %v2883_v49  ;;  %v1971_v13 = vld [vmem:[%s7026_s14 + $0x1298] sm:$0xff]  ;;  %v3090_v49 = vunpack.c.l.s8.bf16 %v1914_v31 }
 0x36d   : > { %4049 = vmatprep.subr.bf16.mxu1 %v3011_v36  ;;  %v3218_v36 = vunpack.c.l.s8.bf16 %v1978_v43  ;;  %v3203_v55 = vunpack.c.l.s8.bf16 %v1971_v13 }
 0x36f   : > { %4007 = vmatpush2.bf16.msra.mxu0 %v2882_v33  ;;  %v3211_v33 = vunpack.c.h.s8.bf16 %v1971_v13  ;;  %v1946_v13 = vld [vmem:[%s7026_s14 + $0x11d0] sm:$0xff] }
 0x370   : > { %4050 = vmatpush2.bf16.msra.mxu1 %v3010_v40  ;;  %4008 = vmatprep.subr.bf16.mxu0 %v2875_v44  ;;  %v1970_v40 = vld [vmem:[%s7026_s14 + $0x1290] sm:$0xff]  ;;  %v3082_v44 = vunpack.c.h.s8.bf16 %v1906_v51 }
 0x371   : > { %4051 = vmatprep.subr.bf16.mxu1 %v3003_v47  ;;  %v3210_v1 = vunpack.c.h.s8.bf16 %v1970_v40  ;;  %v3075_v47 = vunpack.c.l.s8.bf16 %v1907_v10 }
 0x373   : > { %4009 = vmatpush2.bf16.msra.mxu0 %v2874_v34  ;;  %v1899_v34 = vld [vmem:[%s7026_s14 + $0x1058] sm:$0xff] }
 0x374   : > { %4052 = vmatpush2.bf16.msra.mxu1 %v3002_v46  ;;  %4010 = vmatprep.subr.bf16.mxu0 %v2867_v28  ;;  %v1963_v46 = vld [vmem:[%s7026_s14 + $0x1258] sm:$0xff]  ;;  %v3074_v28 = vunpack.c.l.s8.bf16 %v1906_v51  ;;  %v3067_v22 = vunpack.c.h.s8.bf16 %v1899_v34 }
 0x375   : > { %4053 = vmatprep.subr.bf16.mxu1 %v2995_v15  ;;  %v3202_v15 = vunpack.c.l.s8.bf16 %v1970_v40  ;;  %v3187_v50 = vunpack.c.l.s8.bf16 %v1963_v46 }
 0x377   : > { %4011 = vmatpush2.bf16.msra.mxu0 %v2866_v12  ;;  %v3195_v12 = vunpack.c.h.s8.bf16 %v1963_v46  ;;  %v1938_v46 = vld [vmem:[%s7026_s14 + $0x1190] sm:$0xff] }
 0x378   : > { %4054 = vmatpush2.bf16.msra.mxu1 %v2994_v27  ;;  %4012 = vmatprep.subr.bf16.mxu0 %v2859_v16  ;;  %v1962_v27 = vld [vmem:[%s7026_s14 + $0x1250] sm:$0xff]  ;;  %v3066_v16 = vunpack.c.h.s8.bf16 %v1898_v32 }
 0x379   : > { %4055 = vmatprep.subr.bf16.mxu1 %v2987_v45  ;;  %v3194_v30 = vunpack.c.h.s8.bf16 %v1962_v27  ;;  %v3059_v45 = vunpack.c.l.s8.bf16 %v1899_v34 }
 0x37b   : > { %4013 = vmatpush2.bf16.msra.mxu0 %v2858_v23  ;;  %v1891_v23 = vld [vmem:[%s7026_s14 + $0x1018] sm:$0xff] }
 0x37c   : > { %4056 = vmatpush2.bf16.msra.mxu1 %v2986_v48  ;;  %4014 = vmatprep.subr.bf16.mxu0 %v2851_v4  ;;  %v1955_v48 = vld [vmem:[%s7026_s14 + $0x1218] sm:$0xff]  ;;  %v3058_v4 = vunpack.c.l.s8.bf16 %v1898_v32  ;;  %v3051_v8 = vunpack.c.h.s8.bf16 %v1891_v23 }
 0x37d   : > { %4057 = vmatprep.subr.bf16.mxu1 %v2979_v14  ;;  %v3186_v14 = vunpack.c.l.s8.bf16 %v1962_v27  ;;  %v3171_v43 = vunpack.c.l.s8.bf16 %v1955_v48 }
 0x37f   : > { %4015 = vmatpush2.bf16.msra.mxu0 %v2850_v7  ;;  %v3179_v7 = vunpack.c.h.s8.bf16 %v1955_v48  ;;  %v1930_v48 = vld [vmem:[%s7026_s14 + $0x1150] sm:$0xff] }
 0x380   : > { %4058 = vmatpush2.bf16.msra.mxu1 %v2978_v29  ;;  %4070 = vmatprep.subr.bf16.mxu0 %v3099_v5  ;;  %v1954_v29 = vld [vmem:[%s7026_s14 + $0x1210] sm:$0xff]  ;;  %v3050_v5 = vunpack.c.h.s8.bf16 %v1890_v11 }
 0x381   : > { %4113 = vmatprep.subr.bf16.mxu1 %v3227_v0  ;;  %v3178_v31 = vunpack.c.h.s8.bf16 %v1954_v29  ;;  %v3043_v0 = vunpack.c.l.s8.bf16 %v1891_v23  ;;  %v3170_v10 = vunpack.c.l.s8.bf16 %v1954_v29 }
 0x382   : > { %4017 = vmatmul.mubr.bf16.vlgmr.msra.gmra.mxu0 %v7273_v57 }
 0x383   : > { %4060 = vmatmul.mubr.bf16.vlgmr.msra.gmra.mxu1 %v7275_v60  ;;  %4071 = vmatpush1.bf16.msra.mxu0 %v3098_v26  ;;  %v1947_v26 = vld [vmem:[%s7026_s14 + $0x11d8] sm:$0xff] }
 0x384   : > { %4102 = vmatprep.mubr.bf16.mxu0 %v7432_v35  ;;  %4114 = vmatpush1.bf16.msra.mxu1 %v3226_v59  ;;  %v2011_v59 = vld [vmem:[%s7026_s14 + $0x13d8] sm:$0xff] }
 0x385   : > { %4145 = vmatprep.mubr.bf16.mxu1 %v7436_v9  ;;  %4072 = vmatprep.subr.bf16.mxu0 %v3091_v42  ;;  %v3042_v42 = vunpack.c.l.s8.bf16 %v1890_v11  ;;  %v3283_v40 = vunpack.c.l.s8.bf16 %v2011_v59 }
 0x386   : > { %4115 = vmatprep.subr.bf16.mxu1 %v3219_v52  ;;  %v3163_v52 = vunpack.c.h.s8.bf16 %v1947_v26 }
 0x387   : > { %4073 = vmatpush1.bf16.msra.mxu0 %v3090_v49  ;;  %v3291_v49 = vunpack.c.h.s8.bf16 %v2011_v59  ;;  %v1922_v59 = vld [vmem:[%s7026_s14 + $0x1110] sm:$0xff] }
 0x388   : > { %4116 = vmatpush1.bf16.msra.mxu1 %v3218_v36  ;;  %4074 = vmatprep.subr.bf16.mxu0 %v3083_v41  ;;  %v2010_v36 = vld [vmem:[%s7026_s14 + $0x13d0] sm:$0xff]  ;;  %v3162_v41 = vunpack.c.h.s8.bf16 %v1946_v13 }
 0x389   : > { %4117 = vmatprep.subr.bf16.mxu1 %v3211_v33  ;;  %v3290_v51 = vunpack.c.h.s8.bf16 %v2010_v36  ;;  %v3155_v33 = vunpack.c.l.s8.bf16 %v1947_v26 }
 0x38b   : > { %4075 = vmatpush1.bf16.msra.mxu0 %v3082_v44  ;;  %v1939_v44 = vld [vmem:[%s7026_s14 + $0x1198] sm:$0xff] }
 0x38c   : > { %4118 = vmatpush1.bf16.msra.mxu1 %v3210_v1  ;;  %4076 = vmatprep.subr.bf16.mxu0 %v3075_v47  ;;  %v2003_v1 = vld [vmem:[%s7026_s14 + $0x1398] sm:$0xff]  ;;  %v3154_v47 = vunpack.c.l.s8.bf16 %v1946_v13  ;;  %v3147_v34 = vunpack.c.h.s8.bf16 %v1939_v44 }
 0x38d   : > { %4119 = vmatprep.subr.bf16.mxu1 %v3203_v55  ;;  %v3282_v55 = vunpack.c.l.s8.bf16 %v2010_v36  ;;  %v3267_v27 = vunpack.c.l.s8.bf16 %v2003_v1 }
 0x38f   : > { %4077 = vmatpush1.bf16.msra.mxu0 %v3074_v28  ;;  %v3275_v28 = vunpack.c.h.s8.bf16 %v2003_v1  ;;  %v1404_v1 = vld [vmem:[%s7026_s14 + $0xe0] sm:$0xff] }
 0x390   : > { %4120 = vmatpush1.bf16.msra.mxu1 %v3202_v15  ;;  %4078 = vmatprep.subr.bf16.mxu0 %v3067_v22  ;;  %v2002_v15 = vld [vmem:[%s7026_s14 + $0x1390] sm:$0xff]  ;;  %v3146_v22 = vunpack.c.h.s8.bf16 %v1938_v46 }
 0x391   : > { %4121 = vmatprep.subr.bf16.mxu1 %v3195_v12  ;;  %v3274_v32 = vunpack.c.h.s8.bf16 %v2002_v15  ;;  %v3139_v12 = vunpack.c.l.s8.bf16 %v1939_v44 }
 0x393   : > { %4079 = vmatpush1.bf16.msra.mxu0 %v3066_v16  ;;  %v1931_v16 = vld [vmem:[%s7026_s14 + $0x1158] sm:$0xff] }
 0x394   : > { %4122 = vmatpush1.bf16.msra.mxu1 %v3194_v30  ;;  %4080 = vmatprep.subr.bf16.mxu0 %v3059_v45  ;;  %v1995_v30 = vld [vmem:[%s7026_s14 + $0x1358] sm:$0xff]  ;;  %v3138_v45 = vunpack.c.l.s8.bf16 %v1938_v46  ;;  %v3131_v23 = vunpack.c.h.s8.bf16 %v1931_v16 }
 0x395   : > { %4123 = vmatprep.subr.bf16.mxu1 %v3187_v50  ;;  %v3266_v50 = vunpack.c.l.s8.bf16 %v2002_v15  ;;  %v3251_v29 = vunpack.c.l.s8.bf16 %v1995_v30  ;;  %v1397_v15 = vld [vmem:[%s7026_s14 + $0xa8] sm:$0xff] }
 0x397   : > { %4081 = vmatpush1.bf16.msra.mxu0 %v3058_v4  ;;  %v3259_v4 = vunpack.c.h.s8.bf16 %v1995_v30  ;;  %v1396_v30 = vld [vmem:[%s7026_s14 + $0xa0] sm:$0xff] }
 0x398   : > { %4124 = vmatpush1.bf16.msra.mxu1 %v3186_v14  ;;  %4082 = vmatprep.subr.bf16.mxu0 %v3051_v8  ;;  %v1994_v14 = vld [vmem:[%s7026_s14 + $0x1350] sm:$0xff]  ;;  %v3130_v8 = vunpack.c.h.s8.bf16 %v1930_v48 }
 0x399   : > { %4125 = vmatprep.subr.bf16.mxu1 %v3179_v7  ;;  %v3258_v11 = vunpack.c.h.s8.bf16 %v1994_v14  ;;  %v3123_v7 = vunpack.c.l.s8.bf16 %v1931_v16  ;;  %v2061_v16 = vunpack.c.h.s8.bf16 %v1397_v15 }
 0x39b   : > { %4083 = vmatpush1.bf16.msra.mxu0 %v3050_v5  ;;  %v1923_v5 = vld [vmem:[%s7026_s14 + $0x1118] sm:$0xff] }
 0x39c   : > { %4126 = vmatpush1.bf16.msra.mxu1 %v3178_v31  ;;  %4084 = vmatprep.subr.bf16.mxu0 %v3043_v0  ;;  %v1987_v31 = vld [vmem:[%s7026_s14 + $0x1318] sm:$0xff]  ;;  %v3122_v0 = vunpack.c.l.s8.bf16 %v1930_v48  ;;  %v3115_v26 = vunpack.c.h.s8.bf16 %v1923_v5 }
 0x39d   : > { %4127 = vmatprep.subr.bf16.mxu1 %v3171_v43  ;;  %v3250_v43 = vunpack.c.l.s8.bf16 %v1994_v14  ;;  %v3235_v36 = vunpack.c.l.s8.bf16 %v1987_v31 }
 0x39f   : > { %4085 = vmatpush1.bf16.msra.mxu0 %v3042_v42  ;;  %v3243_v42 = vunpack.c.h.s8.bf16 %v1987_v31  ;;  %v1388_v31 = vld [vmem:[%s7026_s14 + $0x60] sm:$0xff] }
 0x3a0   : > { %4128 = vmatpush1.bf16.msra.mxu1 %v3170_v10  ;;  %4086 = vmatprep.subr.bf16.mxu0 %v3163_v52  ;;  %v1986_v10 = vld [vmem:[%s7026_s14 + $0x1310] sm:$0xff]  ;;  %v3114_v52 = vunpack.c.h.s8.bf16 %v1922_v59 }
 0x3a1   : > { %4129 = vmatprep.subr.bf16.mxu1 %v3291_v49  ;;  %v3242_v13 = vunpack.c.h.s8.bf16 %v1986_v10  ;;  %v3107_v49 = vunpack.c.l.s8.bf16 %v1923_v5 }
 0x3a3   : > { %4087 = vmatpush2.bf16.msra.mxu0 %v3162_v41  ;;  %v1405_v41 = vld [vmem:[%s7026_s14 + $0xe8] sm:$0xff] }
 0x3a4   : > { %4130 = vmatpush2.bf16.msra.mxu1 %v3290_v51  ;;  %4088 = vmatprep.subr.bf16.mxu0 %v3155_v33  ;;  %v1469_v51 = vld [vmem:[%s7026_s14 + $0x2e8] sm:$0xff]  ;;  %v3106_v33 = vunpack.c.l.s8.bf16 %v1922_v59  ;;  %v2077_v44 = vunpack.c.h.s8.bf16 %v1405_v41 }
 0x3a5   : > { %4131 = vmatprep.subr.bf16.mxu1 %v3283_v40  ;;  %v3234_v40 = vunpack.c.l.s8.bf16 %v1986_v10 }
 0x3a7   : > { %4089 = vmatpush2.bf16.msra.mxu0 %v3154_v47  ;;  %v2205_v47 = vunpack.c.h.s8.bf16 %v1469_v51 }
 0x3a8   : > { %4132 = vmatpush2.bf16.msra.mxu1 %v3282_v55  ;;  %4090 = vmatprep.subr.bf16.mxu0 %v3147_v34  ;;  %v1468_v55 = vld [vmem:[%s7026_s14 + $0x2e0] sm:$0xff]  ;;  %v2076_v34 = vunpack.c.h.s8.bf16 %v1404_v1 }
 0x3a9   : > { %4133 = vmatprep.subr.bf16.mxu1 %v3275_v28  ;;  %v2204_v46 = vunpack.c.h.s8.bf16 %v1468_v55  ;;  %v2069_v28 = vunpack.c.l.s8.bf16 %v1405_v41 }
 0x3ab   : > { %4091 = vmatpush2.bf16.msra.mxu0 %v3146_v22  ;;  %v2197_v22 = vunpack.c.l.s8.bf16 %v1469_v51  ;;  %v1380_v51 = vld [vmem:[%s7026_s14 + $0x20] sm:$0xff] }
 0x3ac   : > { %4134 = vmatpush2.bf16.msra.mxu1 %v3274_v32  ;;  %4092 = vmatprep.subr.bf16.mxu0 %v3139_v12  ;;  %v1461_v32 = vld [vmem:[%s7026_s14 + $0x2a8] sm:$0xff]  ;;  %v2068_v12 = vunpack.c.l.s8.bf16 %v1404_v1 }
 0x3ad   : > { %4135 = vmatprep.subr.bf16.mxu1 %v3267_v27  ;;  %v2196_v27 = vunpack.c.l.s8.bf16 %v1468_v55  ;;  %v2181_v14 = vunpack.c.l.s8.bf16 %v1461_v32 }
 0x3af   : > { %4093 = vmatpush2.bf16.msra.mxu0 %v3138_v45  ;;  %v2189_v45 = vunpack.c.h.s8.bf16 %v1461_v32  ;;  %v1436_v32 = vld [vmem:[%s7026_s14 + $0x1e0] sm:$0xff] }
 0x3b0   : > { %4136 = vmatpush2.bf16.msra.mxu1 %v3266_v50  ;;  %4094 = vmatprep.subr.bf16.mxu0 %v3131_v23  ;;  %v1460_v50 = vld [vmem:[%s7026_s14 + $0x2a0] sm:$0xff]  ;;  %v2060_v23 = vunpack.c.h.s8.bf16 %v1396_v30 }
 0x3b1   : > { %4137 = vmatprep.subr.bf16.mxu1 %v3259_v4  ;;  %v2188_v48 = vunpack.c.h.s8.bf16 %v1460_v50  ;;  %v2053_v4 = vunpack.c.l.s8.bf16 %v1397_v15 }
 0x3b3   : > { %4095 = vmatpush2.bf16.msra.mxu0 %v3130_v8  ;;  %v1389_v8 = vld [vmem:[%s7026_s14 + $0x68] sm:$0xff] }
 0x3b4   : > { %4138 = vmatpush2.bf16.msra.mxu1 %v3258_v11  ;;  %4096 = vmatprep.subr.bf16.mxu0 %v3123_v7  ;;  %v1453_v11 = vld [vmem:[%s7026_s14 + $0x268] sm:$0xff]  ;;  %v2052_v7 = vunpack.c.l.s8.bf16 %v1396_v30  ;;  %v2045_v5 = vunpack.c.h.s8.bf16 %v1389_v8 }
 0x3b5   : > { %4139 = vmatprep.subr.bf16.mxu1 %v3251_v29  ;;  %v2180_v29 = vunpack.c.l.s8.bf16 %v1460_v50  ;;  %v2165_v10 = vunpack.c.l.s8.bf16 %v1453_v11 }
 0x3b7   : > { %4097 = vmatpush2.bf16.msra.mxu0 %v3122_v0  ;;  %v2173_v0 = vunpack.c.h.s8.bf16 %v1453_v11  ;;  %v1428_v11 = vld [vmem:[%s7026_s14 + $0x1a0] sm:$0xff] }
 0x3b8   : > { %4140 = vmatpush2.bf16.msra.mxu1 %v3250_v43  ;;  %4098 = vmatprep.subr.bf16.mxu0 %v3115_v26  ;;  %v1452_v43 = vld [vmem:[%s7026_s14 + $0x260] sm:$0xff]  ;;  %v2044_v26 = vunpack.c.h.s8.bf16 %v1388_v31 }
 0x3b9   : > { %4141 = vmatprep.subr.bf16.mxu1 %v3243_v42  ;;  %v2172_v59 = vunpack.c.h.s8.bf16 %v1452_v43  ;;  %v2037_v42 = vunpack.c.l.s8.bf16 %v1389_v8 }
 0x3bb   : > { %4099 = vmatpush2.bf16.msra.mxu0 %v3114_v52  ;;  %v1381_v52 = vld [vmem:[%s7026_s14 + $0x28] sm:$0xff] }
 0x3bc   : > { %4142 = vmatpush2.bf16.msra.mxu1 %v3242_v13  ;;  %4100 = vmatprep.subr.bf16.mxu0 %v3107_v49  ;;  %v1445_v13 = vld [vmem:[%s7026_s14 + $0x228] sm:$0xff]  ;;  %v2036_v49 = vunpack.c.l.s8.bf16 %v1388_v31  ;;  %v2029_v41 = vunpack.c.h.s8.bf16 %v1381_v52 }
 0x3bd   : > { %4143 = vmatprep.subr.bf16.mxu1 %v3235_v36  ;;  %v2164_v36 = vunpack.c.l.s8.bf16 %v1452_v43  ;;  %v2149_v55 = vunpack.c.l.s8.bf16 %v1445_v13 }
 0x3bf   : > { %4101 = vmatpush2.bf16.msra.mxu0 %v3106_v33  ;;  %v2157_v33 = vunpack.c.h.s8.bf16 %v1445_v13  ;;  %v1420_v13 = vld [vmem:[%s7026_s14 + $0x160] sm:$0xff] }
 0x3c0   : > { %4144 = vmatpush2.bf16.msra.mxu1 %v3234_v40  ;;  %4156 = vmatprep.subr.bf16.mxu0 %v2077_v44  ;;  %v1444_v40 = vld [vmem:[%s7026_s14 + $0x220] sm:$0xff]  ;;  %v2028_v44 = vunpack.c.h.s8.bf16 %v1380_v51 }
 0x3c1   : > { %4199 = vmatprep.subr.bf16.mxu1 %v2205_v47  ;;  %v2156_v1 = vunpack.c.h.s8.bf16 %v1444_v40  ;;  %v2021_v47 = vunpack.c.l.s8.bf16 %v1381_v52  ;;  %v2148_v15 = vunpack.c.l.s8.bf16 %v1444_v40 }
 0x3c2   : > { %4103 = vmatmul.mubr.bf16.vlgmr.msra.gmra.mxu0 %v7285_v56 }
 0x3c3   : > { %4146 = vmatmul.mubr.bf16.vlgmr.msra.gmra.mxu1 %v7287_v61  ;;  %4157 = vmatpush1.bf16.msra.mxu0 %v2076_v34  ;;  %v1437_v34 = vld [vmem:[%s7026_s14 + $0x1e8] sm:$0xff] }
 0x3c4   : > { %4188 = vmatprep.mubr.bf16.mxu0 %v7193_v62  ;;  %4200 = vmatpush1.bf16.msra.mxu1 %v2204_v46  ;;  %v1501_v46 = vld [vmem:[%s7026_s14 + $0x3e8] sm:$0xff] }
 0x3c5   : > { %4231 = vmatprep.mubr.bf16.mxu1 %v7195_v63  ;;  %4158 = vmatprep.subr.bf16.mxu0 %v2069_v28  ;;  %v2020_v28 = vunpack.c.l.s8.bf16 %v1380_v51  ;;  %v2261_v50 = vunpack.c.l.s8.bf16 %v1501_v46 }
 0x3c6   : > { %4201 = vmatprep.subr.bf16.mxu1 %v2197_v22  ;;  %v2141_v22 = vunpack.c.h.s8.bf16 %v1437_v34 }
 0x3c7   : > { %4159 = vmatpush1.bf16.msra.mxu0 %v2068_v12  ;;  %v2269_v12 = vunpack.c.h.s8.bf16 %v1501_v46  ;;  %v1412_v46 = vld [vmem:[%s7026_s14 + $0x120] sm:$0xff] }
 0x3c8   : > { %4202 = vmatpush1.bf16.msra.mxu1 %v2196_v27  ;;  %4160 = vmatprep.subr.bf16.mxu0 %v2061_v16  ;;  %v1500_v27 = vld [vmem:[%s7026_s14 + $0x3e0] sm:$0xff]  ;;  %v2140_v16 = vunpack.c.h.s8.bf16 %v1436_v32 }
 0x3c9   : > { %4203 = vmatprep.subr.bf16.mxu1 %v2189_v45  ;;  %v2268_v30 = vunpack.c.h.s8.bf16 %v1500_v27  ;;  %v2133_v45 = vunpack.c.l.s8.bf16 %v1437_v34 }
 0x3cb   : > { %4161 = vmatpush1.bf16.msra.mxu0 %v2060_v23  ;;  %v1429_v23 = vld [vmem:[%s7026_s14 + $0x1a8] sm:$0xff] }
 0x3cc   : > { %4204 = vmatpush1.bf16.msra.mxu1 %v2188_v48  ;;  %4162 = vmatprep.subr.bf16.mxu0 %v2053_v4  ;;  %v1493_v48 = vld [vmem:[%s7026_s14 + $0x3a8] sm:$0xff]  ;;  %v2132_v4 = vunpack.c.l.s8.bf16 %v1436_v32  ;;  %v2125_v8 = vunpack.c.h.s8.bf16 %v1429_v23 }
 0x3cd   : > { %4205 = vmatprep.subr.bf16.mxu1 %v2181_v14  ;;  %v2260_v14 = vunpack.c.l.s8.bf16 %v1500_v27  ;;  %v2245_v43 = vunpack.c.l.s8.bf16 %v1493_v48 }
 0x3cf   : > { %4163 = vmatpush1.bf16.msra.mxu0 %v2052_v7  ;;  %v2253_v7 = vunpack.c.h.s8.bf16 %v1493_v48  ;;  %v1532_v48 = vld [vmem:[%s7026_s14 + $0x4e0] sm:$0xff] }
 0x3d0   : > { %4206 = vmatpush1.bf16.msra.mxu1 %v2180_v29  ;;  %4164 = vmatprep.subr.bf16.mxu0 %v2045_v5  ;;  %v1492_v29 = vld [vmem:[%s7026_s14 + $0x3a0] sm:$0xff]  ;;  %v2124_v5 = vunpack.c.h.s8.bf16 %v1428_v11 }
 0x3d1   : > { %4207 = vmatprep.subr.bf16.mxu1 %v2173_v0  ;;  %v2252_v31 = vunpack.c.h.s8.bf16 %v1492_v29  ;;  %v2117_v0 = vunpack.c.l.s8.bf16 %v1429_v23 }
 0x3d3   : > { %4165 = vmatpush1.bf16.msra.mxu0 %v2044_v26  ;;  %v1421_v26 = vld [vmem:[%s7026_s14 + $0x168] sm:$0xff] }
 0x3d4   : > { %4208 = vmatpush1.bf16.msra.mxu1 %v2172_v59  ;;  %4166 = vmatprep.subr.bf16.mxu0 %v2037_v42  ;;  %v1485_v59 = vld [vmem:[%s7026_s14 + $0x368] sm:$0xff]  ;;  %v2116_v42 = vunpack.c.l.s8.bf16 %v1428_v11  ;;  %v2109_v52 = vunpack.c.h.s8.bf16 %v1421_v26 }
 0x3d5   : > { %4209 = vmatprep.subr.bf16.mxu1 %v2165_v10  ;;  %v2244_v10 = vunpack.c.l.s8.bf16 %v1492_v29  ;;  %v2229_v40 = vunpack.c.l.s8.bf16 %v1485_v59  ;;  %v1525_v29 = vld [vmem:[%s7026_s14 + $0x4a8] sm:$0xff] }
 0x3d7   : > { %4167 = vmatpush1.bf16.msra.mxu0 %v2036_v49  ;;  %v2237_v49 = vunpack.c.h.s8.bf16 %v1485_v59  ;;  %v1524_v59 = vld [vmem:[%s7026_s14 + $0x4a0] sm:$0xff] }
 0x3d8   : > { %4210 = vmatpush1.bf16.msra.mxu1 %v2164_v36  ;;  %4168 = vmatprep.subr.bf16.mxu0 %v2029_v41  ;;  %v1484_v36 = vld [vmem:[%s7026_s14 + $0x360] sm:$0xff]  ;;  %v2108_v41 = vunpack.c.h.s8.bf16 %v1420_v13 }
 0x3d9   : > { %4211 = vmatprep.subr.bf16.mxu1 %v2157_v33  ;;  %v2236_v51 = vunpack.c.h.s8.bf16 %v1484_v36  ;;  %v2101_v33 = vunpack.c.l.s8.bf16 %v1421_v26  ;;  %v2317_v26 = vunpack.c.h.s8.bf16 %v1525_v29 }
 0x3db   : > { %4169 = vmatpush1.bf16.msra.mxu0 %v2028_v44  ;;  %v1413_v44 = vld [vmem:[%s7026_s14 + $0x128] sm:$0xff] }
 0x3dc   : > { %4212 = vmatpush1.bf16.msra.mxu1 %v2156_v1  ;;  %4170 = vmatprep.subr.bf16.mxu0 %v2021_v47  ;;  %v1477_v1 = vld [vmem:[%s7026_s14 + $0x328] sm:$0xff]  ;;  %v2100_v47 = vunpack.c.l.s8.bf16 %v1420_v13  ;;  %v2093_v34 = vunpack.c.h.s8.bf16 %v1413_v44 }
 0x3dd   : > { %4213 = vmatprep.subr.bf16.mxu1 %v2149_v55  ;;  %v2228_v55 = vunpack.c.l.s8.bf16 %v1484_v36  ;;  %v2213_v27 = vunpack.c.l.s8.bf16 %v1477_v1 }
 0x3df   : > { %4171 = vmatpush1.bf16.msra.mxu0 %v2020_v28  ;;  %v2221_v28 = vunpack.c.h.s8.bf16 %v1477_v1  ;;  %v1516_v1 = vld [vmem:[%s7026_s14 + $0x460] sm:$0xff] }
 0x3e0   : > { %4214 = vmatpush1.bf16.msra.mxu1 %v2148_v15  ;;  %4172 = vmatprep.subr.bf16.mxu0 %v2141_v22  ;;  %v1476_v15 = vld [vmem:[%s7026_s14 + $0x320] sm:$0xff]  ;;  %v2092_v22 = vunpack.c.h.s8.bf16 %v1412_v46 }
 0x3e1   : > { %4215 = vmatprep.subr.bf16.mxu1 %v2269_v12  ;;  %v2220_v32 = vunpack.c.h.s8.bf16 %v1476_v15  ;;  %v2085_v12 = vunpack.c.l.s8.bf16 %v1413_v44 }
 0x3e3   : > { %4173 = vmatpush2.bf16.msra.mxu0 %v2140_v16  ;;  %v1533_v16 = vld [vmem:[%s7026_s14 + $0x4e8] sm:$0xff] }
 0x3e4   : > { %4216 = vmatpush2.bf16.msra.mxu1 %v2268_v30  ;;  %4174 = vmatprep.subr.bf16.mxu0 %v2133_v45  ;;  %v1597_v30 = vld [vmem:[%s7026_s14 + $0x6e8] sm:$0xff]  ;;  %v2084_v45 = vunpack.c.l.s8.bf16 %v1412_v46  ;;  %v2333_v23 = vunpack.c.h.s8.bf16 %v1533_v16 }
 0x3e5   : > { %4217 = vmatprep.subr.bf16.mxu1 %v2261_v50  ;;  %v2212_v50 = vunpack.c.l.s8.bf16 %v1476_v15 }
 0x3e7   : > { %4175 = vmatpush2.bf16.msra.mxu0 %v2132_v4  ;;  %v2461_v4 = vunpack.c.h.s8.bf16 %v1597_v30 }
 0x3e8   : > { %4218 = vmatpush2.bf16.msra.mxu1 %v2260_v14  ;;  %4176 = vmatprep.subr.bf16.mxu0 %v2125_v8  ;;  %v1596_v14 = vld [vmem:[%s7026_s14 + $0x6e0] sm:$0xff]  ;;  %v2332_v8 = vunpack.c.h.s8.bf16 %v1532_v48 }
 0x3e9   : > { %4219 = vmatprep.subr.bf16.mxu1 %v2253_v7  ;;  %v2460_v11 = vunpack.c.h.s8.bf16 %v1596_v14  ;;  %v2325_v7 = vunpack.c.l.s8.bf16 %v1533_v16 }
 0x3eb   : > { %4177 = vmatpush2.bf16.msra.mxu0 %v2124_v5  ;;  %v2453_v5 = vunpack.c.l.s8.bf16 %v1597_v30  ;;  %v1508_v30 = vld [vmem:[%s7026_s14 + $0x420] sm:$0xff] }
 0x3ec   : > { %4220 = vmatpush2.bf16.msra.mxu1 %v2252_v31  ;;  %4178 = vmatprep.subr.bf16.mxu0 %v2117_v0  ;;  %v1589_v31 = vld [vmem:[%s7026_s14 + $0x6a8] sm:$0xff]  ;;  %v2324_v0 = vunpack.c.l.s8.bf16 %v1532_v48 }
 0x3ed   : > { %4221 = vmatprep.subr.bf16.mxu1 %v2245_v43  ;;  %v2452_v43 = vunpack.c.l.s8.bf16 %v1596_v14  ;;  %v2437_v36 = vunpack.c.l.s8.bf16 %v1589_v31 }
 0x3ef   : > { %4179 = vmatpush2.bf16.msra.mxu0 %v2116_v42  ;;  %v2445_v42 = vunpack.c.h.s8.bf16 %v1589_v31  ;;  %v1564_v31 = vld [vmem:[%s7026_s14 + $0x5e0] sm:$0xff] }
 0x3f0   : > { %4222 = vmatpush2.bf16.msra.mxu1 %v2244_v10  ;;  %4180 = vmatprep.subr.bf16.mxu0 %v2109_v52  ;;  %v1588_v10 = vld [vmem:[%s7026_s14 + $0x6a0] sm:$0xff]  ;;  %v2316_v52 = vunpack.c.h.s8.bf16 %v1524_v59 }
 0x3f1   : > { %4223 = vmatprep.subr.bf16.mxu1 %v2237_v49  ;;  %v2444_v13 = vunpack.c.h.s8.bf16 %v1588_v10  ;;  %v2309_v49 = vunpack.c.l.s8.bf16 %v1525_v29 }
 0x3f3   : > { %4181 = vmatpush2.bf16.msra.mxu0 %v2108_v41  ;;  %v1517_v41 = vld [vmem:[%s7026_s14 + $0x468] sm:$0xff] }
 0x3f4   : > { %4224 = vmatpush2.bf16.msra.mxu1 %v2236_v51  ;;  %4182 = vmatprep.subr.bf16.mxu0 %v2101_v33  ;;  %v1581_v51 = vld [vmem:[%s7026_s14 + $0x668] sm:$0xff]  ;;  %v2308_v33 = vunpack.c.l.s8.bf16 %v1524_v59  ;;  %v2301_v44 = vunpack.c.h.s8.bf16 %v1517_v41 }
 0x3f5   : > { %4225 = vmatprep.subr.bf16.mxu1 %v2229_v40  ;;  %v2436_v40 = vunpack.c.l.s8.bf16 %v1588_v10  ;;  %v2421_v15 = vunpack.c.l.s8.bf16 %v1581_v51 }
 0x3f7   : > { %4183 = vmatpush2.bf16.msra.mxu0 %v2100_v47  ;;  %v2429_v47 = vunpack.c.h.s8.bf16 %v1581_v51  ;;  %v1556_v51 = vld [vmem:[%s7026_s14 + $0x5a0] sm:$0xff] }
 0x3f8   : > { %4226 = vmatpush2.bf16.msra.mxu1 %v2228_v55  ;;  %4184 = vmatprep.subr.bf16.mxu0 %v2093_v34  ;;  %v1580_v55 = vld [vmem:[%s7026_s14 + $0x660] sm:$0xff]  ;;  %v2300_v34 = vunpack.c.h.s8.bf16 %v1516_v1 }
 0x3f9   : > { %4227 = vmatprep.subr.bf16.mxu1 %v2221_v28  ;;  %v2428_v46 = vunpack.c.h.s8.bf16 %v1580_v55  ;;  %v2293_v28 = vunpack.c.l.s8.bf16 %v1517_v41 }
 0x3fb   : > { %4185 = vmatpush2.bf16.msra.mxu0 %v2092_v22  ;;  %v1509_v22 = vld [vmem:[%s7026_s14 + $0x428] sm:$0xff] }
 0x3fc   : > { %4228 = vmatpush2.bf16.msra.mxu1 %v2220_v32  ;;  %4186 = vmatprep.subr.bf16.mxu0 %v2085_v12  ;;  %v1573_v32 = vld [vmem:[%s7026_s14 + $0x628] sm:$0xff]  ;;  %v2292_v12 = vunpack.c.l.s8.bf16 %v1516_v1  ;;  %v2285_v16 = vunpack.c.h.s8.bf16 %v1509_v22 }
 0x3fd   : > { %4229 = vmatprep.subr.bf16.mxu1 %v2213_v27  ;;  %v2420_v27 = vunpack.c.l.s8.bf16 %v1580_v55  ;;  %v2405_v14 = vunpack.c.l.s8.bf16 %v1573_v32 }
 0x3ff   : > { %4187 = vmatpush2.bf16.msra.mxu0 %v2084_v45  ;;  %v2413_v45 = vunpack.c.h.s8.bf16 %v1573_v32  ;;  %v1548_v32 = vld [vmem:[%s7026_s14 + $0x560] sm:$0xff] }
 0x400   : > { %4230 = vmatpush2.bf16.msra.mxu1 %v2212_v50  ;;  %4242 = vmatprep.subr.bf16.mxu0 %v2333_v23  ;;  %v1572_v50 = vld [vmem:[%s7026_s14 + $0x620] sm:$0xff]  ;;  %v2284_v23 = vunpack.c.h.s8.bf16 %v1508_v30 }
 0x401   : > { %4285 = vmatprep.subr.bf16.mxu1 %v2461_v4  ;;  %v2412_v48 = vunpack.c.h.s8.bf16 %v1572_v50  ;;  %v2277_v4 = vunpack.c.l.s8.bf16 %v1509_v22  ;;  %v2404_v29 = vunpack.c.l.s8.bf16 %v1572_v50 }
 0x402   : > { %4189 = vmatmul.mubr.bf16.vlgmr.msra.gmra.mxu0 %v7197_v2 }
 0x403   : > { %4232 = vmatmul.mubr.bf16.vlgmr.msra.gmra.mxu1 %v7199_v3  ;;  %4243 = vmatpush1.bf16.msra.mxu0 %v2332_v8  ;;  %v1565_v8 = vld [vmem:[%s7026_s14 + $0x5e8] sm:$0xff] }
 0x404   : > { %4274 = vmatprep.mubr.bf16.mxu0 %v7223_v38  ;;  %4286 = vmatpush1.bf16.msra.mxu1 %v2460_v11  ;;  %v1629_v11 = vld [vmem:[%s7026_s14 + $0x7e8] sm:$0xff] }
 0x405   : > { %4317 = vmatprep.mubr.bf16.mxu1 %v7225_v39  ;;  %4244 = vmatprep.subr.bf16.mxu0 %v2325_v7  ;;  %v2276_v7 = vunpack.c.l.s8.bf16 %v1508_v30  ;;  %v2517_v10 = vunpack.c.l.s8.bf16 %v1629_v11 }
 0x406   : > { %4287 = vmatprep.subr.bf16.mxu1 %v2453_v5  ;;  %v2397_v5 = vunpack.c.h.s8.bf16 %v1565_v8 }
 0x407   : > { %4245 = vmatpush1.bf16.msra.mxu0 %v2324_v0  ;;  %v2525_v0 = vunpack.c.h.s8.bf16 %v1629_v11  ;;  %v1540_v11 = vld [vmem:[%s7026_s14 + $0x520] sm:$0xff] }
 0x408   : > { %4288 = vmatpush1.bf16.msra.mxu1 %v2452_v43  ;;  %4246 = vmatprep.subr.bf16.mxu0 %v2317_v26  ;;  %v1628_v43 = vld [vmem:[%s7026_s14 + $0x7e0] sm:$0xff]  ;;  %v2396_v26 = vunpack.c.h.s8.bf16 %v1564_v31 }
 0x409   : > { %4289 = vmatprep.subr.bf16.mxu1 %v2445_v42  ;;  %v2524_v59 = vunpack.c.h.s8.bf16 %v1628_v43  ;;  %v2389_v42 = vunpack.c.l.s8.bf16 %v1565_v8 }
 0x40b   : > { %4247 = vmatpush1.bf16.msra.mxu0 %v2316_v52  ;;  %v1557_v52 = vld [vmem:[%s7026_s14 + $0x5a8] sm:$0xff] }
 0x40c   : > { %4290 = vmatpush1.bf16.msra.mxu1 %v2444_v13  ;;  %4248 = vmatprep.subr.bf16.mxu0 %v2309_v49  ;;  %v1621_v13 = vld [vmem:[%s7026_s14 + $0x7a8] sm:$0xff]  ;;  %v2388_v49 = vunpack.c.l.s8.bf16 %v1564_v31  ;;  %v2381_v41 = vunpack.c.h.s8.bf16 %v1557_v52 }
 0x40d   : > { %4291 = vmatprep.subr.bf16.mxu1 %v2437_v36  ;;  %v2516_v36 = vunpack.c.l.s8.bf16 %v1628_v43  ;;  %v2501_v55 = vunpack.c.l.s8.bf16 %v1621_v13 }
 0x40f   : > { %4249 = vmatpush1.bf16.msra.mxu0 %v2308_v33  ;;  %v2509_v33 = vunpack.c.h.s8.bf16 %v1621_v13  ;;  %v1660_v13 = vld [vmem:[%s7026_s14 + $0x8e0] sm:$0xff] }
 0x410   : > { %4292 = vmatpush1.bf16.msra.mxu1 %v2436_v40  ;;  %4250 = vmatprep.subr.bf16.mxu0 %v2301_v44  ;;  %v1620_v40 = vld [vmem:[%s7026_s14 + $0x7a0] sm:$0xff]  ;;  %v2380_v44 = vunpack.c.h.s8.bf16 %v1556_v51 }
 0x411   : > { %4293 = vmatprep.subr.bf16.mxu1 %v2429_v47  ;;  %v2508_v1 = vunpack.c.h.s8.bf16 %v1620_v40  ;;  %v2373_v47 = vunpack.c.l.s8.bf16 %v1557_v52 }
 0x413   : > { %4251 = vmatpush1.bf16.msra.mxu0 %v2300_v34  ;;  %v1549_v34 = vld [vmem:[%s7026_s14 + $0x568] sm:$0xff] }
 0x414   : > { %4294 = vmatpush1.bf16.msra.mxu1 %v2428_v46  ;;  %4252 = vmatprep.subr.bf16.mxu0 %v2293_v28  ;;  %v1613_v46 = vld [vmem:[%s7026_s14 + $0x768] sm:$0xff]  ;;  %v2372_v28 = vunpack.c.l.s8.bf16 %v1556_v51  ;;  %v2365_v22 = vunpack.c.h.s8.bf16 %v1549_v34 }
 0x415   : > { %4295 = vmatprep.subr.bf16.mxu1 %v2421_v15  ;;  %v2500_v15 = vunpack.c.l.s8.bf16 %v1620_v40  ;;  %v2485_v50 = vunpack.c.l.s8.bf16 %v1613_v46  ;;  %v1653_v40 = vld [vmem:[%s7026_s14 + $0x8a8] sm:$0xff] }
 0x417   : > { %4253 = vmatpush1.bf16.msra.mxu0 %v2292_v12  ;;  %v2493_v12 = vunpack.c.h.s8.bf16 %v1613_v46  ;;  %v1652_v46 = vld [vmem:[%s7026_s14 + $0x8a0] sm:$0xff] }
 0x418   : > { %4296 = vmatpush1.bf16.msra.mxu1 %v2420_v27  ;;  %4254 = vmatprep.subr.bf16.mxu0 %v2285_v16  ;;  %v1612_v27 = vld [vmem:[%s7026_s14 + $0x760] sm:$0xff]  ;;  %v2364_v16 = vunpack.c.h.s8.bf16 %v1548_v32 }
 0x419   : > { %4297 = vmatprep.subr.bf16.mxu1 %v2413_v45  ;;  %v2492_v30 = vunpack.c.h.s8.bf16 %v1612_v27  ;;  %v2357_v45 = vunpack.c.l.s8.bf16 %v1549_v34  ;;  %v2573_v34 = vunpack.c.h.s8.bf16 %v1653_v40 }
 0x41b   : > { %4255 = vmatpush1.bf16.msra.mxu0 %v2284_v23  ;;  %v1541_v23 = vld [vmem:[%s7026_s14 + $0x528] sm:$0xff] }
 0x41c   : > { %4298 = vmatpush1.bf16.msra.mxu1 %v2412_v48  ;;  %4256 = vmatprep.subr.bf16.mxu0 %v2277_v4  ;;  %v1605_v48 = vld [vmem:[%s7026_s14 + $0x728] sm:$0xff]  ;;  %v2356_v4 = vunpack.c.l.s8.bf16 %v1548_v32  ;;  %v2349_v8 = vunpack.c.h.s8.bf16 %v1541_v23 }
 0x41d   : > { %4299 = vmatprep.subr.bf16.mxu1 %v2405_v14  ;;  %v2484_v14 = vunpack.c.l.s8.bf16 %v1612_v27  ;;  %v2469_v43 = vunpack.c.l.s8.bf16 %v1605_v48 }
 0x41f   : > { %4257 = vmatpush1.bf16.msra.mxu0 %v2276_v7  ;;  %v2477_v7 = vunpack.c.h.s8.bf16 %v1605_v48 }
 0x420   : > { %4300 = vmatpush1.bf16.msra.mxu1 %v2404_v29  ;;  %4258 = vmatprep.subr.bf16.mxu0 %v2397_v5  ;;  %v1604_v29 = vld [vmem:[%s7026_s14 + $0x720] sm:$0xff]  ;;  %v2348_v5 = vunpack.c.h.s8.bf16 %v1540_v11 }
 0x421   : > { %4301 = vmatprep.subr.bf16.mxu1 %v2525_v0  ;;  %v2476_v31 = vunpack.c.h.s8.bf16 %v1604_v29  ;;  %v2341_v0 = vunpack.c.l.s8.bf16 %v1541_v23  ;;  %v2564_v23 = vunpack.c.l.s8.bf16 %v1652_v46 }
 0x423   : > { %4259 = vmatpush2.bf16.msra.mxu0 %v2396_v26  ;;  %v1661_v26 = vld [vmem:[%s7026_s14 + $0x8e8] sm:$0xff] }
 0x424   : > { %4302 = vmatpush2.bf16.msra.mxu1 %v2524_v59  ;;  %4260 = vmatprep.subr.bf16.mxu0 %v2389_v42  ;;  %v1725_v59 = vld [vmem:[%s7026_s14 + $0xae8] sm:$0xff]  ;;  %v2340_v42 = vunpack.c.l.s8.bf16 %v1540_v11  ;;  %v2589_v52 = vunpack.c.h.s8.bf16 %v1661_v26  ;;  %v1708_v11 = vld [vmem:[%s7026_s14 + $0xa60] sm:$0xff] }
 0x425   : > { %4303 = vmatprep.subr.bf16.mxu1 %v2517_v10  ;;  %v2468_v10 = vunpack.c.l.s8.bf16 %v1604_v29 }
 0x427   : > { %4261 = vmatpush2.bf16.msra.mxu0 %v2388_v49  ;;  %v2717_v49 = vunpack.c.h.s8.bf16 %v1725_v59 }
 0x428   : > { %4304 = vmatpush2.bf16.msra.mxu1 %v2516_v36  ;;  %4262 = vmatprep.subr.bf16.mxu0 %v2381_v41  ;;  %v1724_v36 = vld [vmem:[%s7026_s14 + $0xae0] sm:$0xff]  ;;  %v2588_v41 = vunpack.c.h.s8.bf16 %v1660_v13 }
 0x429   : > { %4305 = vmatprep.subr.bf16.mxu1 %v2509_v33  ;;  %v2716_v51 = vunpack.c.h.s8.bf16 %v1724_v36  ;;  %v2581_v33 = vunpack.c.l.s8.bf16 %v1661_v26  ;;  %v1637_v26 = vld [vmem:[%s7026_s14 + $0x828] sm:$0xff] }
 0x42b   : > { %4263 = vmatpush2.bf16.msra.mxu0 %v2380_v44  ;;  %v2709_v44 = vunpack.c.l.s8.bf16 %v1725_v59 }
 0x42c   : > { %4306 = vmatpush2.bf16.msra.mxu1 %v2508_v1  ;;  %4264 = vmatprep.subr.bf16.mxu0 %v2373_v47  ;;  %v1717_v1 = vld [vmem:[%s7026_s14 + $0xaa8] sm:$0xff]  ;;  %v2580_v47 = vunpack.c.l.s8.bf16 %v1660_v13  ;;  %v2676_v13 = vunpack.c.l.s8.bf16 %v1708_v11 }
 0x42d   : > { %4307 = vmatprep.subr.bf16.mxu1 %v2501_v55  ;;  %v2708_v55 = vunpack.c.l.s8.bf16 %v1724_v36  ;;  %v2693_v27 = vunpack.c.l.s8.bf16 %v1717_v1  ;;  %v1636_v36 = vld [vmem:[%s7026_s14 + $0x820] sm:$0xff] }
 0x42f   : > { %4265 = vmatpush2.bf16.msra.mxu0 %v2372_v28  ;;  %v2701_v28 = vunpack.c.h.s8.bf16 %v1717_v1 }
 0x430   : > { %4308 = vmatpush2.bf16.msra.mxu1 %v2500_v15  ;;  %4266 = vmatprep.subr.bf16.mxu0 %v2365_v22  ;;  %v1716_v15 = vld [vmem:[%s7026_s14 + $0xaa0] sm:$0xff]  ;;  %v2572_v22 = vunpack.c.h.s8.bf16 %v1652_v46 }
 0x431   : > { %4309 = vmatprep.subr.bf16.mxu1 %v2493_v12  ;;  %v2700_v32 = vunpack.c.h.s8.bf16 %v1716_v15  ;;  %v2565_v12 = vunpack.c.l.s8.bf16 %v1653_v40  ;;  %v2692_v48 = vunpack.c.l.s8.bf16 %v1716_v15  ;;  %v1757_v15 = vld [vmem:[%s7026_s14 + $0xbe8] sm:$0xff] }
 0x433   : > { %4267 = vmatpush2.bf16.msra.mxu0 %v2364_v16  ;;  %v1645_v16 = vld [vmem:[%s7026_s14 + $0x868] sm:$0xff] }
 0x434   : > { %4310 = vmatpush2.bf16.msra.mxu1 %v2492_v30  ;;  %4268 = vmatprep.subr.bf16.mxu0 %v2357_v45  ;;  %v7789_v30 = vpop.f32.mrf.mxu0  ;;  %v1709_v45 = vld [vmem:[%s7026_s14 + $0xa68] sm:$0xff] }
 0x435   : > { %4311 = vmatprep.subr.bf16.mxu1 %v2485_v50  ;;  %v7792_v50 = vpop.f32.mrf.mxu1 }
 0x437   : > { %4269 = vmatpush2.bf16.msra.mxu0 %v2356_v4  ;;  %v2557_v4 = vunpack.c.h.s8.bf16 %v1645_v16  ;;  %v7798_v29 = vpop.f32.mrf.mxu1 }
 0x438   : > { %4312 = vmatpush2.bf16.msra.mxu1 %v2484_v14  ;;  %4270 = vmatprep.subr.bf16.mxu0 %v2349_v8  ;;  %v1644_v14 = vld [vmem:[%s7026_s14 + $0x860] sm:$0xff]  ;;  %v2685_v8 = vunpack.c.h.s8.bf16 %v1709_v45 }
 0x439   : > { %4313 = vmatprep.subr.bf16.mxu1 %v2477_v7  ;;  %v7796_v7 = vpop.f32.mrf.mxu0 }
 0x43b   : > { %4271 = vmatpush2.bf16.msra.mxu0 %v2348_v5  ;;  %v2556_v5 = vunpack.c.h.s8.bf16 %v1644_v14  ;;  %v7801_v59 = vpop.f32.mrf.mxu0 }
 0x43c   : > { %4314 = vmatpush2.bf16.msra.mxu1 %v2476_v31  ;;  %4272 = vmatprep.subr.bf16.mxu0 %v2341_v0  ;;  %v2684_v31 = vunpack.c.h.s8.bf16 %v1708_v11  ;;  %v2549_v0 = vunpack.c.l.s8.bf16 %v1645_v16  ;;  %v1692_v16 = vld [vmem:[%s7026_s14 + $0x9e0] sm:$0xff] }
 0x43d   : > { %4315 = vmatprep.subr.bf16.mxu1 %v2469_v43  ;;  %v2677_v43 = vunpack.c.l.s8.bf16 %v1709_v45 }
 0x43f   : > { %4273 = vmatpush2.bf16.msra.mxu0 %v2340_v42  ;;  %v1701_v42 = vld [vmem:[%s7026_s14 + $0xa28] sm:$0xff] }
 0x440   : > { %4316 = vmatpush2.bf16.msra.mxu1 %v2468_v10  ;;  %4328 = vmatprep.subr.bf16.mxu0 %v2589_v52  ;;  %v7804_v10 = vpop.f32.mrf.mxu1  ;;  %v2548_v52 = vunpack.c.l.s8.bf16 %v1644_v14  ;;  %v2661_v46 = vunpack.c.l.s8.bf16 %v1701_v42 }
 0x441   : > { %4371 = vmatprep.subr.bf16.mxu1 %v2717_v49  ;;  %v2541_v49 = vunpack.c.h.s8.bf16 %v1637_v26 }
 0x442   : > { %4275 = vmatmul.mubr.bf16.vlgmr.msra.gmra.mxu0 %v7321_v24  ;;  %v7810_v40 = vpop.f32.mrf.mxu1 }
 0x443   : > { %4318 = vmatmul.mubr.bf16.vlgmr.msra.gmra.mxu1 %v7323_v25  ;;  %4329 = vmatpush1.bf16.msra.mxu0 %v2588_v41  ;;  %v2669_v41 = vunpack.c.h.s8.bf16 %v1701_v42 }
 0x444   : > { %4360 = vmatprep.mubr.bf16.mxu0 %v7327_v21  ;;  %4372 = vmatpush1.bf16.msra.mxu1 %v2716_v51  ;;  %v1700_v51 = vld [vmem:[%s7026_s14 + $0xa20] sm:$0xff] }
 0x445   : > { %4403 = vmatprep.mubr.bf16.mxu1 %v7329_v37  ;;  %4330 = vmatprep.subr.bf16.mxu0 %v2581_v33  ;;  %v7808_v33 = vpop.f32.mrf.mxu0 }
 0x446   : > { %4373 = vmatprep.subr.bf16.mxu1 %v2709_v44  ;;  %v2540_v44 = vunpack.c.h.s8.bf16 %v1636_v36 }
 0x447   : > { %4331 = vmatpush1.bf16.msra.mxu0 %v2580_v47  ;;  %v7812_v1 = vpop.f32.mrf.mxu0  ;;  %v2668_v47 = vunpack.c.h.s8.bf16 %v1700_v51 }
 0x448   : > { %4374 = vmatpush1.bf16.msra.mxu1 %v2708_v55  ;;  %4332 = vmatprep.subr.bf16.mxu0 %v2573_v34  ;;  %v2533_v55 = vunpack.c.l.s8.bf16 %v1637_v26  ;;  %v7814_v34 = vpop.f32.mrf.mxu1  ;;  %v2644_v26 = vunpack.c.l.s8.bf16 %v1692_v16 }
 0x449   : > { %4375 = vmatprep.subr.bf16.mxu1 %v2701_v28  ;;  %v1693_v28 = vld [vmem:[%s7026_s14 + $0x9e8] sm:$0xff] }
 0x44a   : > { %v7821_v45 = vpop.f32.mrf.mxu1  ;;  %v2645_v11 = vunpack.c.l.s8.bf16 %v1693_v28 }
 0x44b   : > { %4333 = vmatpush1.bf16.msra.mxu0 %v2572_v22  ;;  %v2532_v22 = vunpack.c.l.s8.bf16 %v1636_v36 }
 0x44c   : > { %4376 = vmatpush1.bf16.msra.mxu1 %v2700_v32  ;;  %4334 = vmatprep.subr.bf16.mxu0 %v2565_v12  ;;  %v7818_v32 = vpop.f32.mrf.mxu0  ;;  %v2660_v12 = vunpack.c.l.s8.bf16 %v1700_v51  ;;  %v1748_v51 = vld [vmem:[%s7026_s14 + $0xba0] sm:$0xff] }
 0x44d   : > { %4377 = vmatprep.subr.bf16.mxu1 %v2693_v27  ;;  %v2653_v27 = vunpack.c.h.s8.bf16 %v1693_v28 }
 0x44e   : > { %v7824_v14 = vpop.f32.mrf.mxu0 }
 0x44f   : > { %4335 = vmatpush1.bf16.msra.mxu0 %v2564_v23  ;;  %v2781_v23 = vunpack.c.h.s8.bf16 %v1757_v15 }
 0x450   : > { %4378 = vmatpush1.bf16.msra.mxu1 %v2692_v48  ;;  %4336 = vmatprep.subr.bf16.mxu0 %v2557_v4  ;;  %v1756_v48 = vld [vmem:[%s7026_s14 + $0xbe0] sm:$0xff]  ;;  %v2652_v4 = vunpack.c.h.s8.bf16 %v1692_v16  ;;  %v7830_v42 = vpop.f32.mrf.mxu0 }
 0x451   : > { %4379 = vmatprep.subr.bf16.mxu1 %v2685_v8  ;;  %v2780_v8 = vunpack.c.h.s8.bf16 %v1756_v48 }
 0x453   : > { %4337 = vmatpush1.bf16.msra.mxu0 %v2556_v5  ;;  %v7826_v5 = vpop.f32.mrf.mxu1 }
 0x454   : > { %4380 = vmatpush1.bf16.msra.mxu1 %v2684_v31  ;;  %4338 = vmatprep.subr.bf16.mxu0 %v2549_v0  ;;  %v2773_v31 = vunpack.c.l.s8.bf16 %v1757_v15  ;;  %v1685_v0 = vld [vmem:[%s7026_s14 + $0x9a8] sm:$0xff] }
 0x455   : > { %4381 = vmatprep.subr.bf16.mxu1 %v2677_v43  ;;  %v1749_v43 = vld [vmem:[%s7026_s14 + $0xba8] sm:$0xff]  ;;  %v7833_v36 = vpop.f32.mrf.mxu1  ;;  %v2629_v28 = vunpack.c.l.s8.bf16 %v1685_v0 }
 0x456   : > { %v2757_v15 = vunpack.c.l.s8.bf16 %v1749_v43 }
 0x457   : > { %4339 = vmatpush1.bf16.msra.mxu0 %v2548_v52  ;;  %v2772_v52 = vunpack.c.l.s8.bf16 %v1756_v48  ;;  %v2756_v48 = vunpack.c.l.s8.bf16 %v1748_v51 }
 0x458   : > { %4382 = vmatpush1.bf16.msra.mxu1 %v2676_v13  ;;  %4340 = vmatprep.subr.bf16.mxu0 %v2541_v49  ;;  %v2637_v13 = vunpack.c.h.s8.bf16 %v1685_v0  ;;  %v1684_v49 = vld [vmem:[%s7026_s14 + $0x9a0] sm:$0xff] }
 0x459   : > { %4383 = vmatprep.subr.bf16.mxu1 %v2669_v41  ;;  %v2765_v41 = vunpack.c.h.s8.bf16 %v1749_v43  ;;  %v3804_v43 = vadd.f32 %v7792_v50, %v7789_v30  ;;  %v3808_v30 = vadd.f32 %v7804_v10, %v7801_v59 }
 0x45b   : > { %4341 = vmatpush1.bf16.msra.mxu0 %v2540_v44  ;;  %v3932_v44 = vpop.f32.mrf.mxu0 }
 0x45c   : > { %4384 = vmatpush1.bf16.msra.mxu1 %v2668_v47  ;;  %4342 = vmatprep.subr.bf16.mxu0 %v2533_v55  ;;  %v7836_v47 = vpop.f32.mrf.mxu1  ;;  %v2636_v55 = vunpack.c.h.s8.bf16 %v1684_v49 }
 0x45d   : > { %4385 = vmatprep.subr.bf16.mxu1 %v2661_v46  ;;  %v2764_v46 = vunpack.c.h.s8.bf16 %v1748_v51  ;;  %v3847_v51 = vadd.f32 %v7812_v1, %v3804_v43  ;;  %v1668_v1 = vld [vmem:[%s7026_s14 + $0x920] sm:$0xff] }
 0x45e   : > { %v7840_v16 = vpop.f32.mrf.mxu1 }
 0x45f   : > { %4343 = vmatpush1.bf16.msra.mxu0 %v2532_v22  ;;  %v1677_v22 = vld [vmem:[%s7026_s14 + $0x968] sm:$0xff] }
 0x460   : > { %4386 = vmatpush1.bf16.msra.mxu1 %v2660_v12  ;;  %4344 = vmatprep.subr.bf16.mxu0 %v2653_v27  ;;  %v3934_v12 = vpop.f32.mrf.mxu0  ;;  %v1741_v27 = vld [vmem:[%s7026_s14 + $0xb68] sm:$0xff] }
 0x461   : > { %4387 = vmatprep.subr.bf16.mxu1 %v2781_v23  ;;  %v2628_v23 = vunpack.c.l.s8.bf16 %v1684_v49  ;;  %v2613_v49 = vunpack.c.l.s8.bf16 %v1677_v22 }
 0x462   : > { %v3936_v0 = vpop.f32.mrf.mxu0 }
 0x463   : > { %4345 = vmatpush2.bf16.msra.mxu0 %v2652_v4  ;;  %v2621_v4 = vunpack.c.h.s8.bf16 %v1677_v22 }
 0x464   : > { %4388 = vmatpush2.bf16.msra.mxu1 %v2780_v8  ;;  %4346 = vmatprep.subr.bf16.mxu0 %v2645_v11  ;;  %v1676_v8 = vld [vmem:[%s7026_s14 + $0x960] sm:$0xff]  ;;  %v2749_v11 = vunpack.c.h.s8.bf16 %v1741_v27 }
 0x465   : > { %4389 = vmatprep.subr.bf16.mxu1 %v2773_v31  ;;  %v1740_v31 = vld [vmem:[%s7026_s14 + $0xb60] sm:$0xff]  ;;  %v2612_v22 = vunpack.c.l.s8.bf16 %v1676_v8 }
 0x467   : > { %4347 = vmatpush2.bf16.msra.mxu0 %v2644_v26  ;;  %v7846_v26 = vpop.f32.mrf.mxu1 }
 0x468   : > { %4390 = vmatpush2.bf16.msra.mxu1 %v2772_v52  ;;  %4348 = vmatprep.subr.bf16.mxu0 %v2637_v13  ;;  %v2620_v52 = vunpack.c.h.s8.bf16 %v1676_v8  ;;  %v2748_v13 = vunpack.c.h.s8.bf16 %v1740_v31 }
 0x469   : > { %4391 = vmatprep.subr.bf16.mxu1 %v2765_v41  ;;  %v3806_v41 = vadd.f32 %v7798_v29, %v7796_v7  ;;  %v2740_v7 = vunpack.c.l.s8.bf16 %v1740_v31 }
 0x46b   : > { %4349 = vmatpush2.bf16.msra.mxu0 %v2636_v55  ;;  %v2741_v55 = vunpack.c.l.s8.bf16 %v1741_v27  ;;  %v3849_v50 = vadd.f32 %v7818_v32, %v3806_v41  ;;  %v3810_v27 = vadd.f32 %v7810_v40, %v7808_v33  ;;  %v1732_v32 = vld [vmem:[%s7026_s14 + $0xb20] sm:$0xff] }
 0x46c   : > { %4392 = vmatpush2.bf16.msra.mxu1 %v2764_v46  ;;  %4350 = vmatprep.subr.bf16.mxu0 %v2629_v28  ;;  %v1669_v46 = vld [vmem:[%s7026_s14 + $0x928] sm:$0xff]  ;;  %v3938_v28 = vpop.f32.mrf.mxu0  ;;  %v2732_v33 = vunpack.c.h.s8.bf16 %v1732_v32 }
 0x46d   : > { %4393 = vmatprep.subr.bf16.mxu1 %v2757_v15  ;;  %v1733_v15 = vld [vmem:[%s7026_s14 + $0xb28] sm:$0xff]  ;;  %v2605_v29 = vunpack.c.h.s8.bf16 %v1669_v46  ;;  %v3892_v8 = vadd.f32 %v7821_v45, %v3849_v50  ;;  %v3853_v43 = vadd.f32 %v7830_v42, %v3810_v27  ;;  %v2597_v40 = vunpack.c.l.s8.bf16 %v1669_v46 }
 0x46e   : > { %v2733_v10 = vunpack.c.h.s8.bf16 %v1733_v15  ;;  %v2725_v41 = vunpack.c.l.s8.bf16 %v1733_v15  ;;  %v1853_v45 = vld [vmem:[%s7026_s14 + $0xee8] sm:$0xff]  ;;  %v2724_v46 = vunpack.c.l.s8.bf16 %v1732_v32 }
 0x46f   : > { %4351 = vmatpush2.bf16.msra.mxu0 %v2628_v23  ;;  %v3981_v23 = vpop.f32.mrf.mxu1  ;;  %v2973_v27 = vunpack.c.h.s8.bf16 %v1853_v45 }
 0x470   : > { %4394 = vmatpush2.bf16.msra.mxu1 %v2756_v48  ;;  %4352 = vmatprep.subr.bf16.mxu0 %v2621_v4  ;;  %v4018_v48 = vpop.f32.mrf.mxu0  ;;  %v3890_v4 = vadd.f32 %v7814_v34, %v3847_v51  ;;  %v1789_v51 = vld [vmem:[%s7026_s14 + $0xce8] sm:$0xff] }
 0x471   : > { %4395 = vmatprep.subr.bf16.mxu1 %v2749_v11  ;;  %v3851_v11 = vadd.f32 %v7824_v14, %v3808_v30  ;;  %v4061_v59 = vpop.f32.mrf.mxu1  ;;  %v3935_v14 = vadd.f32 %v3934_v12, %v3892_v8  ;;  %v2596_v30 = vunpack.c.l.s8.bf16 %v1668_v1  ;;  %v1788_v12 = vld [vmem:[%s7026_s14 + $0xce0] sm:$0xff]  ;;  %v1781_v8 = vld [vmem:[%s7026_s14 + $0xca8] sm:$0xff] }
 0x472   : > { %v3933_v31 = vadd.f32 %v3932_v44, %v3890_v4 }
 0x473   : > { %4353 = vmatpush2.bf16.msra.mxu0 %v2620_v52  ;;  %v2604_v52 = vunpack.c.h.s8.bf16 %v1668_v1  ;;  %v3894_v34 = vadd.f32 %v7826_v5, %v3851_v11  ;;  %v2845_v5 = vunpack.c.h.s8.bf16 %v1789_v51  ;;  %v2844_v1 = vunpack.c.h.s8.bf16 %v1788_v12 }
 0x474   : > { %4396 = vmatpush2.bf16.msra.mxu1 %v2748_v13  ;;  %4354 = vmatprep.subr.bf16.mxu0 %v2613_v49  ;;  %v4020_v13 = vpop.f32.mrf.mxu0  ;;  %v4063_v49 = vpop.f32.mrf.mxu1  ;;  %v3976_v42 = vadd.f32 %v7836_v47, %v3933_v31  ;;  %v1845_v31 = vld [vmem:[%s7026_s14 + $0xea8] sm:$0xff] }
 0x475   : > { %4397 = vmatprep.subr.bf16.mxu1 %v2741_v55  ;;  %v3896_v55 = vadd.f32 %v7833_v36, %v3853_v43  ;;  %v3937_v44 = vadd.f32 %v3936_v0, %v3894_v34  ;;  %v1852_v36 = vld [vmem:[%s7026_s14 + $0xee0] sm:$0xff]  ;;  %v1342_v34 = vld [vmem:[#allocation2 + $0x58] sm:$0xff] }
 0x476   : > { %v4022_v50 = vpop.f32.mrf.mxu0  ;;  %v4019_v15 = vadd.f32 %v4018_v48, %v3976_v42  ;;  %v2972_v11 = vunpack.c.h.s8.bf16 %v1852_v36  ;;  %v2837_v48 = vunpack.c.l.s8.bf16 %v1789_v51  ;;  %v2829_v51 = vunpack.c.h.s8.bf16 %v1781_v8 }
 0x477   : > { %4355 = vmatpush2.bf16.msra.mxu0 %v2612_v22  ;;  %v3978_v22 = vadd.f32 %v7840_v16, %v3935_v14  ;;  %v3980_v47 = vadd.f32 %v7846_v26, %v3937_v44  ;;  %v2965_v26 = vunpack.c.l.s8.bf16 %v1853_v45  ;;  %v2957_v44 = vunpack.c.h.s8.bf16 %v1845_v31 }
 0x478   : > { %4398 = vmatpush2.bf16.msra.mxu1 %v2740_v7  ;;  %4356 = vmatprep.subr.bf16.mxu0 %v2605_v29  ;;  %v3939_v7 = vadd.f32 %v3938_v28, %v3896_v55  ;;  %v4065_v29 = vpop.f32.mrf.mxu1  ;;  %v4024_v4 = vpop.f32.mrf.mxu0  ;;  %v4062_v32 = vadd.f32 %v4061_v59, %v4019_v15  ;;  %v1780_v59 = vld [vmem:[%s7026_s14 + $0xca0] sm:$0xff] }
 0x479   : > { %4399 = vmatprep.subr.bf16.mxu1 %v2733_v10  ;;  %v4021_v0 = vadd.f32 %v4020_v13, %v3978_v22  ;;  %v4023_v16 = vadd.f32 %v4022_v50, %v3980_v47  ;;  %v1343_v50 = vld [vmem:[#allocation2 + $0x18] sm:$0xff] }
 0x47a   : > { %v3982_v10 = vadd.f32 %v3981_v23, %v3939_v7  ;;  %v4067_v28 = vpop.f32.mrf.mxu1  ;;  %v2836_v23 = vunpack.c.l.s8.bf16 %v1788_v12 }
 0x47b   : > { %4357 = vmatpush2.bf16.msra.mxu0 %v2604_v52  ;;  %v4064_v52 = vadd.f32 %v4063_v49, %v4021_v0  ;;  %v4066_v55 = vadd.f32 %v4065_v29, %v4023_v16  ;;  %v1350_v29 = vld [vmem:[#allocation2 + $0x10] sm:$0xff]  ;;  %v2821_v0 = vunpack.c.l.s8.bf16 %v1781_v8  ;;  %v1351_v16 = vld [vmem:[#allocation2 + $0x38] sm:$0xff] }
 0x47c   : > { %4400 = vmatpush2.bf16.msra.mxu1 %v2732_v33  ;;  %4358 = vmatprep.subr.bf16.mxu0 %v2597_v40  ;;  %v4025_v13 = vadd.f32 %v4024_v4, %v3982_v10  ;;  %v2949_v10 = vunpack.c.l.s8.bf16 %v1845_v31 }
 0x47d   : > { %4401 = vmatprep.subr.bf16.mxu1 %v2725_v41  ;;  %v2964_v41 = vunpack.c.l.s8.bf16 %v1852_v36 }
 0x47e   : > { %v4068_v12 = vadd.f32 %v4067_v28, %v4025_v13 }
 0x47f   : > { %4359 = vmatpush2.bf16.msra.mxu0 %v2596_v30  ;;  %v1844_v30 = vld [vmem:[%s7026_s14 + $0xea0] sm:$0xff] }
 0x480   : > { %4402 = vmatpush2.bf16.msra.mxu1 %v2724_v46  ;;  %4414 = vmatprep.subr.bf16.mxu0 %v2845_v5  ;;  %v2828_v5 = vunpack.c.h.s8.bf16 %v1780_v59  ;;  %v2956_v47 = vunpack.c.h.s8.bf16 %v1844_v30  ;;  %v2948_v8 = vunpack.c.l.s8.bf16 %v1844_v30 }
 0x481   : > { %4457 = vmatprep.subr.bf16.mxu1 %v2973_v27 }
 0x482   : > { %v4104_v43 = vpop.f32.mrf.mxu0  ;;  %4361 = vmatmul.mubr.bf16.vlgmr.msra.gmra.mxu0 %v7383_v53 }
 0x483   : > { %v4105_v33 = vadd.f32 %v4104_v43, %v4062_v32  ;;  %v4147_v40 = vpop.f32.mrf.mxu1  ;;  %4404 = vmatmul.mubr.bf16.vlgmr.msra.gmra.mxu1 %v7385_v54  ;;  %4415 = vmatpush1.bf16.msra.mxu0 %v2844_v1  ;;  %v1773_v32 = vld [vmem:[%s7026_s14 + $0xc68] sm:$0xff] }
 0x484   : > { %4446 = vmatprep.mubr.bf16.mxu0 %v7381_v6  ;;  %4458 = vmatpush1.bf16.msra.mxu1 %v2972_v11  ;;  %v4106_v14 = vpop.f32.mrf.mxu0  ;;  %v2813_v13 = vunpack.c.h.s8.bf16 %v1773_v32 }
 0x485   : > { %v4148_v45 = vadd.f32 %v4147_v40, %v4105_v33  ;;  %4489 = vmatprep.mubr.bf16.mxu1 %v7387_v58  ;;  %v4107_v49 = vadd.f32 %v4106_v14, %v4064_v52  ;;  %v4149_v42 = vpop.f32.mrf.mxu1  ;;  %4416 = vmatprep.subr.bf16.mxu0 %v2837_v48  ;;  %v1837_v48 = vld [vmem:[%s7026_s14 + $0xe68] sm:$0xff]  ;;  %v2820_v52 = vunpack.c.l.s8.bf16 %v1780_v59  ;;  %v1772_v33 = vld [vmem:[%s7026_s14 + $0xc60] sm:$0xff]  ;;  %v2805_v14 = vunpack.c.l.s8.bf16 %v1773_v32 }
 0x486   : > { %v4108_v46 = vpop.f32.mrf.mxu0  ;;  %4459 = vmatprep.subr.bf16.mxu1 %v2965_v26  ;;  %v2941_v31 = vunpack.c.h.s8.bf16 %v1837_v48 }
 0x487   : > { %v5018_v22 = vadd.f32 %v4148_v45, %v1342_v34  ;;  %v4150_v7 = vadd.f32 %v4149_v42, %v4107_v49  ;;  %v4109_v15 = vadd.f32 %v4108_v46, %v4066_v55  ;;  %v4151_v27 = vpop.f32.mrf.mxu1  ;;  %4417 = vmatpush1.bf16.msra.mxu0 %v2836_v23  ;;  %v1836_v23 = vld [vmem:[%s7026_s14 + $0xe60] sm:$0xff]  ;;  %v2812_v34 = vunpack.c.h.s8.bf16 %v1772_v33  ;;  %v1829_v55 = vld [vmem:[%s7026_s14 + $0xe28] sm:$0xff] }
 0x488   : > { %4460 = vmatpush1.bf16.msra.mxu1 %v2964_v41  ;;  %v4110_v36 = vpop.f32.mrf.mxu0  ;;  %4418 = vmatprep.subr.bf16.mxu0 %v2829_v51  ;;  %v2940_v59 = vunpack.c.h.s8.bf16 %v1836_v23  ;;  %v2933_v41 = vunpack.c.l.s8.bf16 %v1837_v48  ;;  %v1765_v51 = vld [vmem:[%s7026_s14 + $0xc28] sm:$0xff]  ;;  %v2804_v45 = vunpack.c.l.s8.bf16 %v1772_v33  ;;  %v2932_v49 = vunpack.c.l.s8.bf16 %v1836_v23 }
 0x489   : > { %5034 = vst [vmem:[#allocation2 + $0x58] sm:$0xff] %v5018_v22  ;;  %v5019_v1 = vadd.f32 %v4150_v7, %v1343_v50  ;;  %v4152_v4 = vadd.f32 %v4151_v27, %v4109_v15  ;;  %v4111_v11 = vadd.f32 %v4110_v36, %v4068_v12  ;;  %4461 = vmatprep.subr.bf16.mxu1 %v2957_v44  ;;  %v4153_v28 = vpop.f32.mrf.mxu1  ;;  %v2797_v42 = vunpack.c.h.s8.bf16 %v1765_v51  ;;  %v1764_v44 = vld [vmem:[%s7026_s14 + $0xc20] sm:$0xff]  ;;  %v1821_v7 = vld [vmem:[%s7026_s14 + $0xde8] sm:$0xff] }
 0x48a   : > { %v2925_v30 = vunpack.c.h.s8.bf16 %v1829_v55  ;;  %v1828_v50 = vld [vmem:[%s7026_s14 + $0xe20] sm:$0xff]  ;;  %v2796_v46 = vunpack.c.h.s8.bf16 %v1764_v44  ;;  %v2789_v12 = vunpack.c.l.s8.bf16 %v1765_v51  ;;  %v2917_v22 = vunpack.c.l.s8.bf16 %v1829_v55  ;;  %v1885_v15 = vld [vmem:[%s7026_s14 + $0xfe8] sm:$0xff] }
 0x48b   : > { %5035 = vst [vmem:[#allocation2 + $0x18] sm:$0xff] %v5019_v1  ;;  %v5026_v43 = vadd.f32 %v4152_v4, %v1350_v29  ;;  %v4154_v26 = vadd.f32 %v4153_v28, %v4111_v11  ;;  %4419 = vmatpush1.bf16.msra.mxu0 %v2828_v5  ;;  %v2924_v5 = vunpack.c.h.s8.bf16 %v1828_v50  ;;  %v2788_v27 = vunpack.c.l.s8.bf16 %v1764_v44  ;;  %v1884_v1 = vld [vmem:[%s7026_s14 + $0xfe0] sm:$0xff]  ;;  %v1877_v28 = vld [vmem:[%s7026_s14 + $0xfa8] sm:$0xff] }
 0x48c   : > { %4462 = vmatpush1.bf16.msra.mxu1 %v2956_v47  ;;  %4420 = vmatprep.subr.bf16.mxu0 %v2821_v0  ;;  %v2916_v29 = vunpack.c.l.s8.bf16 %v1828_v50  ;;  %v2909_v36 = vunpack.c.h.s8.bf16 %v1821_v7  ;;  %v1820_v47 = vld [vmem:[%s7026_s14 + $0xde0] sm:$0xff]  ;;  %v3037_v0 = vunpack.c.h.s8.bf16 %v1885_v15  ;;  %v3036_v11 = vunpack.c.h.s8.bf16 %v1884_v1 }
 0x48d   : > { %5042 = vst [vmem:[#allocation2 + $0x10] sm:$0xff] %v5026_v43  ;;  %v5027_v40 = vadd.f32 %v4154_v26, %v1351_v16  ;;  %4463 = vmatprep.subr.bf16.mxu1 %v2949_v10  ;;  %v2908_v4 = vunpack.c.h.s8.bf16 %v1820_v47  ;;  %v2901_v10 = vunpack.c.l.s8.bf16 %v1821_v7  ;;  %v3029_v32 = vunpack.c.l.s8.bf16 %v1885_v15  ;;  %v1813_v16 = vld [vmem:[%s7026_s14 + $0xda8] sm:$0xff]  ;;  %v1804_v55 = vld [vmem:[%s7026_s14 + $0xd60] sm:$0xff] }
 0x48e   : > { %v2900_v48 = vunpack.c.l.s8.bf16 %v1820_v47  ;;  %v3028_v43 = vunpack.c.l.s8.bf16 %v1884_v1  ;;  %v2893_v26 = vunpack.c.h.s8.bf16 %v1813_v16  ;;  %v3013_v23 = vunpack.c.l.s8.bf16 %v1877_v28  ;;  %v1796_v15 = vld [vmem:[%s7026_s14 + $0xd20] sm:$0xff] }
 0x48f   : > { %5043 = vst [vmem:[#allocation2 + $0x38] sm:$0xff] %v5027_v40  ;;  %4421 = vmatpush1.bf16.msra.mxu0 %v2820_v52  ;;  %v1812_v52 = vld [vmem:[%s7026_s14 + $0xda0] sm:$0xff] }
 0x490   : > { %4464 = vmatpush1.bf16.msra.mxu1 %v2948_v8  ;;  %4422 = vmatprep.subr.bf16.mxu0 %v2813_v13  ;;  %v3021_v8 = vunpack.c.h.s8.bf16 %v1877_v28  ;;  %v1876_v13 = vld [vmem:[%s7026_s14 + $0xfa0] sm:$0xff]  ;;  %v2892_v33 = vunpack.c.h.s8.bf16 %v1812_v52 }
 0x491   : > { %4465 = vmatprep.subr.bf16.mxu1 %v2941_v31  ;;  %v3020_v40 = vunpack.c.h.s8.bf16 %v1876_v13  ;;  %v2885_v31 = vunpack.c.l.s8.bf16 %v1813_v16  ;;  %v1916_v28 = vld [vmem:[%s7026_s14 + $0x10e0] sm:$0xff] }
 0x493   : > { %4423 = vmatpush1.bf16.msra.mxu0 %v2812_v34  ;;  %v1805_v34 = vld [vmem:[%s7026_s14 + $0xd68] sm:$0xff] }
 0x494   : > { %4466 = vmatpush1.bf16.msra.mxu1 %v2940_v59  ;;  %4424 = vmatprep.subr.bf16.mxu0 %v2805_v14  ;;  %v1869_v59 = vld [vmem:[%s7026_s14 + $0xf68] sm:$0xff]  ;;  %v2884_v14 = vunpack.c.l.s8.bf16 %v1812_v52  ;;  %v2877_v51 = vunpack.c.h.s8.bf16 %v1805_v34 }
 0x495   : > { %4467 = vmatprep.subr.bf16.mxu1 %v2933_v41  ;;  %v3012_v41 = vunpack.c.l.s8.bf16 %v1876_v13  ;;  %v2997_v50 = vunpack.c.l.s8.bf16 %v1869_v59  ;;  %v1909_v13 = vld [vmem:[%s7026_s14 + $0x10a8] sm:$0xff] }
 0x497   : > { %4425 = vmatpush1.bf16.msra.mxu0 %v2804_v45  ;;  %v3005_v45 = vunpack.c.h.s8.bf16 %v1869_v59  ;;  %v1908_v59 = vld [vmem:[%s7026_s14 + $0x10a0] sm:$0xff] }
 0x498   : > { %4468 = vmatpush1.bf16.msra.mxu1 %v2932_v49  ;;  %4426 = vmatprep.subr.bf16.mxu0 %v2797_v42  ;;  %v1868_v49 = vld [vmem:[%s7026_s14 + $0xf60] sm:$0xff]  ;;  %v2876_v42 = vunpack.c.h.s8.bf16 %v1804_v55 }
 0x499   : > { %4469 = vmatprep.subr.bf16.mxu1 %v2925_v30  ;;  %v3004_v44 = vunpack.c.h.s8.bf16 %v1868_v49  ;;  %v2869_v30 = vunpack.c.l.s8.bf16 %v1805_v34  ;;  %v3085_v34 = vunpack.c.h.s8.bf16 %v1909_v13 }
 0x49b   : > { %4427 = vmatpush1.bf16.msra.mxu0 %v2796_v46  ;;  %v1797_v46 = vld [vmem:[%s7026_s14 + $0xd28] sm:$0xff] }
 0x49c   : > { %4470 = vmatpush1.bf16.msra.mxu1 %v2924_v5  ;;  %4428 = vmatprep.subr.bf16.mxu0 %v2789_v12  ;;  %v1861_v5 = vld [vmem:[%s7026_s14 + $0xf28] sm:$0xff]  ;;  %v2868_v12 = vunpack.c.l.s8.bf16 %v1804_v55  ;;  %v2861_v7 = vunpack.c.h.s8.bf16 %v1797_v46 }
 0x49d   : > { %4471 = vmatprep.subr.bf16.mxu1 %v2917_v22  ;;  %v2996_v22 = vunpack.c.l.s8.bf16 %v1868_v49  ;;  %v2981_v1 = vunpack.c.l.s8.bf16 %v1861_v5 }
 0x49f   : > { %4429 = vmatpush1.bf16.msra.mxu0 %v2788_v27  ;;  %v2989_v27 = vunpack.c.h.s8.bf16 %v1861_v5  ;;  %v1900_v5 = vld [vmem:[%s7026_s14 + $0x1060] sm:$0xff] }
 0x4a0   : > { %4472 = vmatpush1.bf16.msra.mxu1 %v2916_v29  ;;  %4430 = vmatprep.subr.bf16.mxu0 %v2909_v36  ;;  %v1860_v29 = vld [vmem:[%s7026_s14 + $0xf20] sm:$0xff]  ;;  %v2860_v36 = vunpack.c.h.s8.bf16 %v1796_v15 }
 0x4a1   : > { %4473 = vmatprep.subr.bf16.mxu1 %v3037_v0  ;;  %v2988_v47 = vunpack.c.h.s8.bf16 %v1860_v29  ;;  %v2853_v0 = vunpack.c.l.s8.bf16 %v1797_v46 }
 0x4a3   : > { %4431 = vmatpush2.bf16.msra.mxu0 %v2908_v4  ;;  %v1917_v4 = vld [vmem:[%s7026_s14 + $0x10e8] sm:$0xff] }
 0x4a4   : > { %4474 = vmatpush2.bf16.msra.mxu1 %v3036_v11  ;;  %4432 = vmatprep.subr.bf16.mxu0 %v2901_v10  ;;  %v1981_v11 = vld [vmem:[%s7026_s14 + $0x12e8] sm:$0xff]  ;;  %v2852_v10 = vunpack.c.l.s8.bf16 %v1796_v15  ;;  %v3101_v16 = vunpack.c.h.s8.bf16 %v1917_v4 }
 0x4a5   : > { %4475 = vmatprep.subr.bf16.mxu1 %v3029_v32  ;;  %v2980_v32 = vunpack.c.l.s8.bf16 %v1860_v29 }
 0x4a7   : > { %4433 = vmatpush2.bf16.msra.mxu0 %v2900_v48  ;;  %v3229_v48 = vunpack.c.h.s8.bf16 %v1981_v11 }
 0x4a8   : > { %4476 = vmatpush2.bf16.msra.mxu1 %v3028_v43  ;;  %4434 = vmatprep.subr.bf16.mxu0 %v2893_v26  ;;  %v1980_v43 = vld [vmem:[%s7026_s14 + $0x12e0] sm:$0xff]  ;;  %v3100_v26 = vunpack.c.h.s8.bf16 %v1916_v28 }
 0x4a9   : > { %4477 = vmatprep.subr.bf16.mxu1 %v3021_v8  ;;  %v3228_v52 = vunpack.c.h.s8.bf16 %v1980_v43  ;;  %v3093_v8 = vunpack.c.l.s8.bf16 %v1917_v4 }
 0x4ab   : > { %4435 = vmatpush2.bf16.msra.mxu0 %v2892_v33  ;;  %v3221_v33 = vunpack.c.l.s8.bf16 %v1981_v11  ;;  %v1892_v11 = vld [vmem:[%s7026_s14 + $0x1020] sm:$0xff] }
 0x4ac   : > { %4478 = vmatpush2.bf16.msra.mxu1 %v3020_v40  ;;  %4436 = vmatprep.subr.bf16.mxu0 %v2885_v31  ;;  %v1973_v40 = vld [vmem:[%s7026_s14 + $0x12a8] sm:$0xff]  ;;  %v3092_v31 = vunpack.c.l.s8.bf16 %v1916_v28 }
 0x4ad   : > { %4479 = vmatprep.subr.bf16.mxu1 %v3013_v23  ;;  %v3220_v23 = vunpack.c.l.s8.bf16 %v1980_v43  ;;  %v3205_v49 = vunpack.c.l.s8.bf16 %v1973_v40 }
 0x4af   : > { %4437 = vmatpush2.bf16.msra.mxu0 %v2884_v14  ;;  %v3213_v14 = vunpack.c.h.s8.bf16 %v1973_v40  ;;  %v1948_v40 = vld [vmem:[%s7026_s14 + $0x11e0] sm:$0xff] }
 0x4b0   : > { %4480 = vmatpush2.bf16.msra.mxu1 %v3012_v41  ;;  %4438 = vmatprep.subr.bf16.mxu0 %v2877_v51  ;;  %v1972_v41 = vld [vmem:[%s7026_s14 + $0x12a0] sm:$0xff]  ;;  %v3084_v51 = vunpack.c.h.s8.bf16 %v1908_v59 }
 0x4b1   : > { %4481 = vmatprep.subr.bf16.mxu1 %v3005_v45  ;;  %v3212_v55 = vunpack.c.h.s8.bf16 %v1972_v41  ;;  %v3077_v45 = vunpack.c.l.s8.bf16 %v1909_v13 }
 0x4b3   : > { %4439 = vmatpush2.bf16.msra.mxu0 %v2876_v42  ;;  %v1901_v42 = vld [vmem:[%s7026_s14 + $0x1068] sm:$0xff] }
 0x4b4   : > { %4482 = vmatpush2.bf16.msra.mxu1 %v3004_v44  ;;  %4440 = vmatprep.subr.bf16.mxu0 %v2869_v30  ;;  %v1965_v44 = vld [vmem:[%s7026_s14 + $0x1268] sm:$0xff]  ;;  %v3076_v30 = vunpack.c.l.s8.bf16 %v1908_v59  ;;  %v3069_v46 = vunpack.c.h.s8.bf16 %v1901_v42 }
 0x4b5   : > { %4483 = vmatprep.subr.bf16.mxu1 %v2997_v50  ;;  %v3204_v50 = vunpack.c.l.s8.bf16 %v1972_v41  ;;  %v3189_v29 = vunpack.c.l.s8.bf16 %v1965_v44 }
 0x4b7   : > { %4441 = vmatpush2.bf16.msra.mxu0 %v2868_v12  ;;  %v3197_v12 = vunpack.c.h.s8.bf16 %v1965_v44  ;;  %v1940_v44 = vld [vmem:[%s7026_s14 + $0x11a0] sm:$0xff] }
 0x4b8   : > { %4484 = vmatpush2.bf16.msra.mxu1 %v2996_v22  ;;  %4442 = vmatprep.subr.bf16.mxu0 %v2861_v7  ;;  %v1964_v22 = vld [vmem:[%s7026_s14 + $0x1260] sm:$0xff]  ;;  %v3068_v7 = vunpack.c.h.s8.bf16 %v1900_v5 }
 0x4b9   : > { %4485 = vmatprep.subr.bf16.mxu1 %v2989_v27  ;;  %v3196_v15 = vunpack.c.h.s8.bf16 %v1964_v22  ;;  %v3061_v27 = vunpack.c.l.s8.bf16 %v1901_v42 }
 0x4bb   : > { %4443 = vmatpush2.bf16.msra.mxu0 %v2860_v36  ;;  %v1893_v36 = vld [vmem:[%s7026_s14 + $0x1028] sm:$0xff] }
 0x4bc   : > { %4486 = vmatpush2.bf16.msra.mxu1 %v2988_v47  ;;  %4444 = vmatprep.subr.bf16.mxu0 %v2853_v0  ;;  %v1957_v47 = vld [vmem:[%s7026_s14 + $0x1228] sm:$0xff]  ;;  %v3060_v0 = vunpack.c.l.s8.bf16 %v1900_v5  ;;  %v3053_v4 = vunpack.c.h.s8.bf16 %v1893_v36 }
 0x4bd   : > { %4487 = vmatprep.subr.bf16.mxu1 %v2981_v1  ;;  %v3188_v1 = vunpack.c.l.s8.bf16 %v1964_v22  ;;  %v3173_v43 = vunpack.c.l.s8.bf16 %v1957_v47 }
 0x4bf   : > { %4445 = vmatpush2.bf16.msra.mxu0 %v2852_v10  ;;  %v3181_v10 = vunpack.c.h.s8.bf16 %v1957_v47  ;;  %v1932_v47 = vld [vmem:[%s7026_s14 + $0x1160] sm:$0xff] }
 0x4c0   : > { %4488 = vmatpush2.bf16.msra.mxu1 %v2980_v32  ;;  %4500 = vmatprep.subr.bf16.mxu0 %v3101_v16  ;;  %v1956_v32 = vld [vmem:[%s7026_s14 + $0x1220] sm:$0xff]  ;;  %v3052_v16 = vunpack.c.h.s8.bf16 %v1892_v11 }
 0x4c1   : > { %4543 = vmatprep.subr.bf16.mxu1 %v3229_v48  ;;  %v3180_v28 = vunpack.c.h.s8.bf16 %v1956_v32  ;;  %v3045_v48 = vunpack.c.l.s8.bf16 %v1893_v36  ;;  %v3172_v13 = vunpack.c.l.s8.bf16 %v1956_v32 }
 0x4c2   : > { %4447 = vmatmul.mubr.bf16.vlgmr.msra.gmra.mxu0 %v7273_v57 }
 0x4c3   : > { %4490 = vmatmul.mubr.bf16.vlgmr.msra.gmra.mxu1 %v7275_v60  ;;  %4501 = vmatpush1.bf16.msra.mxu0 %v3100_v26  ;;  %v1949_v26 = vld [vmem:[%s7026_s14 + $0x11e8] sm:$0xff] }
 0x4c4   : > { %4532 = vmatprep.mubr.bf16.mxu0 %v7432_v35  ;;  %4544 = vmatpush1.bf16.msra.mxu1 %v3228_v52  ;;  %v2013_v52 = vld [vmem:[%s7026_s14 + $0x13e8] sm:$0xff] }
 0x4c5   : > { %4575 = vmatprep.mubr.bf16.mxu1 %v7436_v9  ;;  %4502 = vmatprep.subr.bf16.mxu0 %v3093_v8  ;;  %v3044_v8 = vunpack.c.l.s8.bf16 %v1892_v11  ;;  %v3285_v41 = vunpack.c.l.s8.bf16 %v2013_v52 }
 0x4c6   : > { %4545 = vmatprep.subr.bf16.mxu1 %v3221_v33  ;;  %v3165_v33 = vunpack.c.h.s8.bf16 %v1949_v26 }
 0x4c7   : > { %4503 = vmatpush1.bf16.msra.mxu0 %v3092_v31  ;;  %v3293_v31 = vunpack.c.h.s8.bf16 %v2013_v52  ;;  %v1924_v52 = vld [vmem:[%s7026_s14 + $0x1120] sm:$0xff] }
 0x4c8   : > { %4546 = vmatpush1.bf16.msra.mxu1 %v3220_v23  ;;  %4504 = vmatprep.subr.bf16.mxu0 %v3085_v34  ;;  %v2012_v23 = vld [vmem:[%s7026_s14 + $0x13e0] sm:$0xff]  ;;  %v3164_v34 = vunpack.c.h.s8.bf16 %v1948_v40 }
 0x4c9   : > { %4547 = vmatprep.subr.bf16.mxu1 %v3213_v14  ;;  %v3292_v59 = vunpack.c.h.s8.bf16 %v2012_v23  ;;  %v3157_v14 = vunpack.c.l.s8.bf16 %v1949_v26 }
 0x4cb   : > { %4505 = vmatpush1.bf16.msra.mxu0 %v3084_v51  ;;  %v1941_v51 = vld [vmem:[%s7026_s14 + $0x11a8] sm:$0xff] }
 0x4cc   : > { %4548 = vmatpush1.bf16.msra.mxu1 %v3212_v55  ;;  %4506 = vmatprep.subr.bf16.mxu0 %v3077_v45  ;;  %v2005_v55 = vld [vmem:[%s7026_s14 + $0x13a8] sm:$0xff]  ;;  %v3156_v45 = vunpack.c.l.s8.bf16 %v1948_v40  ;;  %v3149_v42 = vunpack.c.h.s8.bf16 %v1941_v51 }
 0x4cd   : > { %4549 = vmatprep.subr.bf16.mxu1 %v3205_v49  ;;  %v3284_v49 = vunpack.c.l.s8.bf16 %v2012_v23  ;;  %v3269_v22 = vunpack.c.l.s8.bf16 %v2005_v55 }
 0x4cf   : > { %4507 = vmatpush1.bf16.msra.mxu0 %v3076_v30  ;;  %v3277_v30 = vunpack.c.h.s8.bf16 %v2005_v55  ;;  %v1406_v55 = vld [vmem:[%s7026_s14 + $0xf0] sm:$0xff] }
 0x4d0   : > { %4550 = vmatpush1.bf16.msra.mxu1 %v3204_v50  ;;  %4508 = vmatprep.subr.bf16.mxu0 %v3069_v46  ;;  %v2004_v50 = vld [vmem:[%s7026_s14 + $0x13a0] sm:$0xff]  ;;  %v3148_v46 = vunpack.c.h.s8.bf16 %v1940_v44 }
 0x4d1   : > { %4551 = vmatprep.subr.bf16.mxu1 %v3197_v12  ;;  %v3276_v5 = vunpack.c.h.s8.bf16 %v2004_v50  ;;  %v3141_v12 = vunpack.c.l.s8.bf16 %v1941_v51 }
 0x4d3   : > { %4509 = vmatpush1.bf16.msra.mxu0 %v3068_v7  ;;  %v1933_v7 = vld [vmem:[%s7026_s14 + $0x1168] sm:$0xff] }
 0x4d4   : > { %4552 = vmatpush1.bf16.msra.mxu1 %v3196_v15  ;;  %4510 = vmatprep.subr.bf16.mxu0 %v3061_v27  ;;  %v1997_v15 = vld [vmem:[%s7026_s14 + $0x1368] sm:$0xff]  ;;  %v3140_v27 = vunpack.c.l.s8.bf16 %v1940_v44  ;;  %v3133_v36 = vunpack.c.h.s8.bf16 %v1933_v7 }
 0x4d5   : > { %4553 = vmatprep.subr.bf16.mxu1 %v3189_v29  ;;  %v3268_v29 = vunpack.c.l.s8.bf16 %v2004_v50  ;;  %v3253_v32 = vunpack.c.l.s8.bf16 %v1997_v15  ;;  %v1399_v50 = vld [vmem:[%s7026_s14 + $0xb8] sm:$0xff] }
 0x4d7   : > { %4511 = vmatpush1.bf16.msra.mxu0 %v3060_v0  ;;  %v3261_v0 = vunpack.c.h.s8.bf16 %v1997_v15  ;;  %v1398_v15 = vld [vmem:[%s7026_s14 + $0xb0] sm:$0xff] }
 0x4d8   : > { %4554 = vmatpush1.bf16.msra.mxu1 %v3188_v1  ;;  %4512 = vmatprep.subr.bf16.mxu0 %v3053_v4  ;;  %v1996_v1 = vld [vmem:[%s7026_s14 + $0x1360] sm:$0xff]  ;;  %v3132_v4 = vunpack.c.h.s8.bf16 %v1932_v47 }
 0x4d9   : > { %4555 = vmatprep.subr.bf16.mxu1 %v3181_v10  ;;  %v3260_v11 = vunpack.c.h.s8.bf16 %v1996_v1  ;;  %v3125_v10 = vunpack.c.l.s8.bf16 %v1933_v7  ;;  %v2063_v7 = vunpack.c.h.s8.bf16 %v1399_v50 }
 0x4db   : > { %4513 = vmatpush1.bf16.msra.mxu0 %v3052_v16  ;;  %v1925_v16 = vld [vmem:[%s7026_s14 + $0x1128] sm:$0xff] }
 0x4dc   : > { %4556 = vmatpush1.bf16.msra.mxu1 %v3180_v28  ;;  %4514 = vmatprep.subr.bf16.mxu0 %v3045_v48  ;;  %v1989_v28 = vld [vmem:[%s7026_s14 + $0x1328] sm:$0xff]  ;;  %v3124_v48 = vunpack.c.l.s8.bf16 %v1932_v47  ;;  %v3117_v26 = vunpack.c.h.s8.bf16 %v1925_v16 }
 0x4dd   : > { %4557 = vmatprep.subr.bf16.mxu1 %v3173_v43  ;;  %v3252_v43 = vunpack.c.l.s8.bf16 %v1996_v1  ;;  %v3237_v23 = vunpack.c.l.s8.bf16 %v1989_v28  ;;  %v1391_v1 = vld [vmem:[%s7026_s14 + $0x78] sm:$0xff] }
 0x4df   : > { %4515 = vmatpush1.bf16.msra.mxu0 %v3044_v8  ;;  %v3245_v8 = vunpack.c.h.s8.bf16 %v1989_v28  ;;  %v1454_v28 = vld [vmem:[%s7026_s14 + $0x270] sm:$0xff] }
 0x4e0   : > { %4558 = vmatpush1.bf16.msra.mxu1 %v3172_v13  ;;  %4516 = vmatprep.subr.bf16.mxu0 %v3165_v33  ;;  %v1988_v13 = vld [vmem:[%s7026_s14 + $0x1320] sm:$0xff]  ;;  %v3116_v33 = vunpack.c.h.s8.bf16 %v1924_v52 }
 0x4e1   : > { %4559 = vmatprep.subr.bf16.mxu1 %v3293_v31  ;;  %v3244_v40 = vunpack.c.h.s8.bf16 %v1988_v13  ;;  %v3109_v31 = vunpack.c.l.s8.bf16 %v1925_v16 }
 0x4e3   : > { %4517 = vmatpush2.bf16.msra.mxu0 %v3164_v34  ;;  %v1407_v34 = vld [vmem:[%s7026_s14 + $0xf8] sm:$0xff] }
 0x4e4   : > { %4560 = vmatpush2.bf16.msra.mxu1 %v3292_v59  ;;  %4518 = vmatprep.subr.bf16.mxu0 %v3157_v14  ;;  %v1471_v59 = vld [vmem:[%s7026_s14 + $0x2f8] sm:$0xff]  ;;  %v3108_v14 = vunpack.c.l.s8.bf16 %v1924_v52  ;;  %v2079_v51 = vunpack.c.h.s8.bf16 %v1407_v34 }
 0x4e5   : > { %4561 = vmatprep.subr.bf16.mxu1 %v3285_v41  ;;  %v3236_v41 = vunpack.c.l.s8.bf16 %v1988_v13  ;;  %v1447_v13 = vld [vmem:[%s7026_s14 + $0x238] sm:$0xff] }
 0x4e7   : > { %4519 = vmatpush2.bf16.msra.mxu0 %v3156_v45  ;;  %v2207_v45 = vunpack.c.h.s8.bf16 %v1471_v59 }
 0x4e8   : > { %4562 = vmatpush2.bf16.msra.mxu1 %v3284_v49  ;;  %4520 = vmatprep.subr.bf16.mxu0 %v3149_v42  ;;  %v1470_v49 = vld [vmem:[%s7026_s14 + $0x2f0] sm:$0xff]  ;;  %v2078_v42 = vunpack.c.h.s8.bf16 %v1406_v55 }
 0x4e9   : > { %4563 = vmatprep.subr.bf16.mxu1 %v3277_v30  ;;  %v2206_v44 = vunpack.c.h.s8.bf16 %v1470_v49  ;;  %v2071_v30 = vunpack.c.l.s8.bf16 %v1407_v34  ;;  %v2159_v34 = vunpack.c.h.s8.bf16 %v1447_v13 }
 0x4eb   : > { %4521 = vmatpush2.bf16.msra.mxu0 %v3148_v46  ;;  %v2199_v46 = vunpack.c.l.s8.bf16 %v1471_v59  ;;  %v1446_v59 = vld [vmem:[%s7026_s14 + $0x230] sm:$0xff] }
 0x4ec   : > { %4564 = vmatpush2.bf16.msra.mxu1 %v3276_v5  ;;  %4522 = vmatprep.subr.bf16.mxu0 %v3141_v12  ;;  %v1463_v5 = vld [vmem:[%s7026_s14 + $0x2b8] sm:$0xff]  ;;  %v2070_v12 = vunpack.c.l.s8.bf16 %v1406_v55  ;;  %v2151_v55 = vunpack.c.l.s8.bf16 %v1447_v13  ;;  %v1486_v13 = vld [vmem:[%s7026_s14 + $0x370] sm:$0xff] }
 0x4ed   : > { %4565 = vmatprep.subr.bf16.mxu1 %v3269_v22  ;;  %v2198_v22 = vunpack.c.l.s8.bf16 %v1470_v49  ;;  %v1503_v49 = vld [vmem:[%s7026_s14 + $0x3f8] sm:$0xff] }
 0x4ef   : > { %4523 = vmatpush2.bf16.msra.mxu0 %v3140_v27  ;;  %v2191_v27 = vunpack.c.h.s8.bf16 %v1463_v5 }
 0x4f0   : > { %4566 = vmatpush2.bf16.msra.mxu1 %v3268_v29  ;;  %4524 = vmatprep.subr.bf16.mxu0 %v3133_v36  ;;  %v1462_v29 = vld [vmem:[%s7026_s14 + $0x2b0] sm:$0xff]  ;;  %v2062_v36 = vunpack.c.h.s8.bf16 %v1398_v15 }
 0x4f1   : > { %4567 = vmatprep.subr.bf16.mxu1 %v3261_v0  ;;  %v2190_v47 = vunpack.c.h.s8.bf16 %v1462_v29  ;;  %v2183_v0 = vunpack.c.l.s8.bf16 %v1463_v5  ;;  %v1502_v5 = vld [vmem:[%s7026_s14 + $0x3f0] sm:$0xff] }
 0x4f3   : > { %4525 = vmatpush2.bf16.msra.mxu0 %v3132_v4  ;;  %v1455_v4 = vld [vmem:[%s7026_s14 + $0x278] sm:$0xff] }
 0x4f4   : > { %4568 = vmatpush2.bf16.msra.mxu1 %v3260_v11  ;;  %4526 = vmatprep.subr.bf16.mxu0 %v3125_v10  ;;  %v2054_v11 = vunpack.c.l.s8.bf16 %v1398_v15  ;;  %v2047_v10 = vunpack.c.h.s8.bf16 %v1391_v1  ;;  %v2175_v16 = vunpack.c.h.s8.bf16 %v1455_v4  ;;  %v2167_v52 = vunpack.c.l.s8.bf16 %v1455_v4  ;;  %v1494_v4 = vld [vmem:[%s7026_s14 + $0x3b0] sm:$0xff] }
 0x4f5   : > { %4569 = vmatprep.subr.bf16.mxu1 %v3253_v32  ;;  %v1390_v32 = vld [vmem:[%s7026_s14 + $0x70] sm:$0xff]  ;;  %v2263_v15 = vunpack.c.l.s8.bf16 %v1503_v49 }
 0x4f7   : > { %4527 = vmatpush2.bf16.msra.mxu0 %v3124_v48  ;;  %v2046_v48 = vunpack.c.h.s8.bf16 %v1390_v32 }
 0x4f8   : > { %4570 = vmatpush2.bf16.msra.mxu1 %v3252_v43  ;;  %4528 = vmatprep.subr.bf16.mxu0 %v3117_v26  ;;  %v2174_v43 = vunpack.c.h.s8.bf16 %v1454_v28  ;;  %v2039_v26 = vunpack.c.l.s8.bf16 %v1391_v1 }
 0x4f9   : > { %4571 = vmatprep.subr.bf16.mxu1 %v3245_v8  ;;  %v1383_v8 = vld [vmem:[%s7026_s14 + $0x38] sm:$0xff] }
 0x4fb   : > { %4529 = vmatpush2.bf16.msra.mxu0 %v3116_v33  ;;  %v2038_v33 = vunpack.c.l.s8.bf16 %v1390_v32 }
 0x4fc   : > { %4572 = vmatpush2.bf16.msra.mxu1 %v3244_v40  ;;  %4530 = vmatprep.subr.bf16.mxu0 %v3109_v31  ;;  %v2166_v40 = vunpack.c.l.s8.bf16 %v1454_v28  ;;  %v2031_v31 = vunpack.c.h.s8.bf16 %v1383_v8  ;;  %v1487_v28 = vld [vmem:[%s7026_s14 + $0x378] sm:$0xff] }
 0x4fd   : > { %4573 = vmatprep.subr.bf16.mxu1 %v3237_v23  ;;  %v1382_v23 = vld [vmem:[%s7026_s14 + $0x30] sm:$0xff] }
 0x4ff   : > { %4531 = vmatpush2.bf16.msra.mxu0 %v3108_v14  ;;  %v2030_v14 = vunpack.c.h.s8.bf16 %v1382_v23 }
 0x500   : > { %4574 = vmatpush2.bf16.msra.mxu1 %v3236_v41  ;;  %4586 = vmatprep.subr.bf16.mxu0 %v2079_v51  ;;  %v2158_v41 = vunpack.c.h.s8.bf16 %v1446_v59  ;;  %v2023_v51 = vunpack.c.l.s8.bf16 %v1383_v8  ;;  %v2239_v8 = vunpack.c.h.s8.bf16 %v1487_v28 }
 0x501   : > { %4629 = vmatprep.subr.bf16.mxu1 %v2207_v45  ;;  %v1439_v45 = vld [vmem:[%s7026_s14 + $0x1f8] sm:$0xff] }
 0x502   : > { %4533 = vmatmul.mubr.bf16.vlgmr.msra.gmra.mxu0 %v7285_v56 }
 0x503   : > { %4576 = vmatmul.mubr.bf16.vlgmr.msra.gmra.mxu1 %v7287_v61  ;;  %4587 = vmatpush1.bf16.msra.mxu0 %v2078_v42  ;;  %v2022_v42 = vunpack.c.l.s8.bf16 %v1382_v23  ;;  %v2231_v23 = vunpack.c.l.s8.bf16 %v1487_v28  ;;  %v1590_v28 = vld [vmem:[%s7026_s14 + $0x6b0] sm:$0xff] }
 0x504   : > { %4618 = vmatprep.mubr.bf16.mxu0 %v7193_v62  ;;  %4630 = vmatpush1.bf16.msra.mxu1 %v2206_v44  ;;  %v2055_v62 = vunpack.c.l.s8.bf16 %v1399_v50  ;;  %v2150_v44 = vunpack.c.l.s8.bf16 %v1446_v59  ;;  %v1438_v50 = vld [vmem:[%s7026_s14 + $0x1f0] sm:$0xff]  ;;  %v1479_v59 = vld [vmem:[%s7026_s14 + $0x338] sm:$0xff] }
 0x505   : > { %4661 = vmatprep.mubr.bf16.mxu1 %v7195_v63  ;;  %4588 = vmatprep.subr.bf16.mxu0 %v2071_v30  ;;  %v2182_v63 = vunpack.c.l.s8.bf16 %v1462_v29  ;;  %v2143_v30 = vunpack.c.h.s8.bf16 %v1439_v45  ;;  %v1495_v29 = vld [vmem:[%s7026_s14 + $0x3b8] sm:$0xff] }
 0x506   : > { %4631 = vmatprep.subr.bf16.mxu1 %v2199_v46  ;;  %v2271_v46 = vunpack.c.h.s8.bf16 %v1503_v49  ;;  %v2255_v1 = vunpack.c.h.s8.bf16 %v1495_v29  ;;  %v2247_v32 = vunpack.c.l.s8.bf16 %v1495_v29  ;;  %v1478_v49 = vld [vmem:[%s7026_s14 + $0x330] sm:$0xff] }
 0x507   : > { %4589 = vmatpush1.bf16.msra.mxu0 %v2070_v12  ;;  %v2142_v12 = vunpack.c.h.s8.bf16 %v1438_v50  ;;  %v1598_v29 = vld [vmem:[%s7026_s14 + $0x6f0] sm:$0xff] }
 0x508   : > { %4632 = vmatpush1.bf16.msra.mxu1 %v2198_v22  ;;  %4590 = vmatprep.subr.bf16.mxu0 %v2063_v7  ;;  %v2270_v22 = vunpack.c.h.s8.bf16 %v1502_v5  ;;  %v2135_v7 = vunpack.c.l.s8.bf16 %v1439_v45  ;;  %v2223_v45 = vunpack.c.h.s8.bf16 %v1479_v59 }
 0x509   : > { %4633 = vmatprep.subr.bf16.mxu1 %v2191_v27  ;;  %v1431_v27 = vld [vmem:[%s7026_s14 + $0x1b8] sm:$0xff] }
 0x50b   : > { %4591 = vmatpush1.bf16.msra.mxu0 %v2062_v36  ;;  %v2134_v36 = vunpack.c.l.s8.bf16 %v1438_v50  ;;  %v2215_v50 = vunpack.c.l.s8.bf16 %v1479_v59 }
 0x50c   : > { %4634 = vmatpush1.bf16.msra.mxu1 %v2190_v47  ;;  %4592 = vmatprep.subr.bf16.mxu0 %v2055_v62  ;;  %v2262_v47 = vunpack.c.l.s8.bf16 %v1502_v5  ;;  %v2127_v62 = vunpack.c.h.s8.bf16 %v1431_v27  ;;  %v1599_v5 = vld [vmem:[%s7026_s14 + $0x6f8] sm:$0xff] }
 0x50d   : > { %4635 = vmatprep.subr.bf16.mxu1 %v2183_v0  ;;  %v1430_v0 = vld [vmem:[%s7026_s14 + $0x1b0] sm:$0xff] }
 0x50f   : > { %4593 = vmatpush1.bf16.msra.mxu0 %v2054_v11  ;;  %v2126_v11 = vunpack.c.h.s8.bf16 %v1430_v0 }
 0x510   : > { %4636 = vmatpush1.bf16.msra.mxu1 %v2182_v63  ;;  %4594 = vmatprep.subr.bf16.mxu0 %v2047_v10  ;;  %v2254_v63 = vunpack.c.h.s8.bf16 %v1494_v4  ;;  %v2119_v10 = vunpack.c.l.s8.bf16 %v1431_v27  ;;  %v2463_v27 = vunpack.c.h.s8.bf16 %v1599_v5 }
 0x511   : > { %4637 = vmatprep.subr.bf16.mxu1 %v2175_v16  ;;  %v1423_v16 = vld [vmem:[%s7026_s14 + $0x178] sm:$0xff] }
 0x513   : > { %4595 = vmatpush1.bf16.msra.mxu0 %v2046_v48  ;;  %v2118_v48 = vunpack.c.l.s8.bf16 %v1430_v0  ;;  %v1527_v0 = vld [vmem:[%s7026_s14 + $0x4b8] sm:$0xff] }
 0x514   : > { %4638 = vmatpush1.bf16.msra.mxu1 %v2174_v43  ;;  %4596 = vmatprep.subr.bf16.mxu0 %v2039_v26  ;;  %v2246_v43 = vunpack.c.l.s8.bf16 %v1494_v4  ;;  %v2111_v26 = vunpack.c.h.s8.bf16 %v1423_v16  ;;  %v1591_v4 = vld [vmem:[%s7026_s14 + $0x6b8] sm:$0xff] }
 0x515   : > { %4639 = vmatprep.subr.bf16.mxu1 %v2167_v52  ;;  %v1422_v52 = vld [vmem:[%s7026_s14 + $0x170] sm:$0xff] }
 0x517   : > { %4597 = vmatpush1.bf16.msra.mxu0 %v2038_v33  ;;  %v2110_v33 = vunpack.c.h.s8.bf16 %v1422_v52 }
 0x518   : > { %4640 = vmatpush1.bf16.msra.mxu1 %v2166_v40  ;;  %4598 = vmatprep.subr.bf16.mxu0 %v2031_v31  ;;  %v2238_v40 = vunpack.c.h.s8.bf16 %v1486_v13  ;;  %v2103_v31 = vunpack.c.l.s8.bf16 %v1423_v16  ;;  %v2447_v16 = vunpack.c.h.s8.bf16 %v1591_v4 }
 0x519   : > { %4641 = vmatprep.subr.bf16.mxu1 %v2159_v34  ;;  %v1415_v34 = vld [vmem:[%s7026_s14 + $0x138] sm:$0xff] }
 0x51b   : > { %4599 = vmatpush1.bf16.msra.mxu0 %v2030_v14  ;;  %v2102_v14 = vunpack.c.l.s8.bf16 %v1422_v52 }
 0x51c   : > { %4642 = vmatpush1.bf16.msra.mxu1 %v2158_v41  ;;  %4600 = vmatprep.subr.bf16.mxu0 %v2023_v51  ;;  %v2230_v41 = vunpack.c.l.s8.bf16 %v1486_v13  ;;  %v2095_v51 = vunpack.c.h.s8.bf16 %v1415_v34  ;;  %v1518_v13 = vld [vmem:[%s7026_s14 + $0x470] sm:$0xff] }
 0x51d   : > { %4643 = vmatprep.subr.bf16.mxu1 %v2151_v55  ;;  %v1414_v55 = vld [vmem:[%s7026_s14 + $0x130] sm:$0xff] }
 0x51f   : > { %4601 = vmatpush1.bf16.msra.mxu0 %v2022_v42  ;;  %v2094_v42 = vunpack.c.h.s8.bf16 %v1414_v55 }
 0x520   : > { %4644 = vmatpush1.bf16.msra.mxu1 %v2150_v44  ;;  %4602 = vmatprep.subr.bf16.mxu0 %v2143_v30  ;;  %v2222_v44 = vunpack.c.h.s8.bf16 %v1478_v49  ;;  %v2087_v30 = vunpack.c.l.s8.bf16 %v1415_v34 }
 0x521   : > { %4645 = vmatprep.subr.bf16.mxu1 %v2271_v46  ;;  %v1535_v46 = vld [vmem:[%s7026_s14 + $0x4f8] sm:$0xff] }
 0x523   : > { %4603 = vmatpush2.bf16.msra.mxu0 %v2142_v12  ;;  %v2086_v12 = vunpack.c.l.s8.bf16 %v1414_v55 }
 0x524   : > { %4646 = vmatpush2.bf16.msra.mxu1 %v2270_v22  ;;  %4604 = vmatprep.subr.bf16.mxu0 %v2135_v7  ;;  %v2214_v22 = vunpack.c.l.s8.bf16 %v1478_v49  ;;  %v2335_v7 = vunpack.c.h.s8.bf16 %v1535_v46  ;;  %v1510_v49 = vld [vmem:[%s7026_s14 + $0x430] sm:$0xff] }
 0x525   : > { %4647 = vmatprep.subr.bf16.mxu1 %v2263_v15  ;;  %v1534_v15 = vld [vmem:[%s7026_s14 + $0x4f0] sm:$0xff] }
 0x527   : > { %4605 = vmatpush2.bf16.msra.mxu0 %v2134_v36  ;;  %v2334_v36 = vunpack.c.h.s8.bf16 %v1534_v15 }
 0x528   : > { %4648 = vmatpush2.bf16.msra.mxu1 %v2262_v47  ;;  %4606 = vmatprep.subr.bf16.mxu0 %v2127_v62  ;;  %v2462_v47 = vunpack.c.h.s8.bf16 %v1598_v29  ;;  %v2327_v62 = vunpack.c.l.s8.bf16 %v1535_v46 }
 0x529   : > { %4649 = vmatprep.subr.bf16.mxu1 %v2255_v1  ;;  %v2455_v1 = vunpack.c.l.s8.bf16 %v1599_v5 }
 0x52b   : > { %4607 = vmatpush2.bf16.msra.mxu0 %v2126_v11  ;;  %v2326_v11 = vunpack.c.l.s8.bf16 %v1534_v15 }
 0x52c   : > { %4650 = vmatpush2.bf16.msra.mxu1 %v2254_v63  ;;  %4608 = vmatprep.subr.bf16.mxu0 %v2119_v10  ;;  %v2454_v63 = vunpack.c.l.s8.bf16 %v1598_v29  ;;  %v2319_v10 = vunpack.c.h.s8.bf16 %v1527_v0  ;;  %v1566_v29 = vld [vmem:[%s7026_s14 + $0x5f0] sm:$0xff] }
 0x52d   : > { %4651 = vmatprep.subr.bf16.mxu1 %v2247_v32  ;;  %v1526_v32 = vld [vmem:[%s7026_s14 + $0x4b0] sm:$0xff] }
 0x52e   : > { %v2310_v52 = vunpack.c.l.s8.bf16 %v1526_v32 }
 0x52f   : > { %4609 = vmatpush2.bf16.msra.mxu0 %v2118_v48  ;;  %v2439_v48 = vunpack.c.l.s8.bf16 %v1591_v4 }
 0x530   : > { %4652 = vmatpush2.bf16.msra.mxu1 %v2246_v43  ;;  %4610 = vmatprep.subr.bf16.mxu0 %v2111_v26  ;;  %v1519_v43 = vld [vmem:[%s7026_s14 + $0x478] sm:$0xff] }
 0x531   : > { %4653 = vmatprep.subr.bf16.mxu1 %v2239_v8  ;;  %v1583_v26 = vld [vmem:[%s7026_s14 + $0x678] sm:$0xff]  ;;  %v2303_v8 = vunpack.c.h.s8.bf16 %v1519_v43  ;;  %v2295_v34 = vunpack.c.l.s8.bf16 %v1519_v43 }
 0x532   : > { %v2423_v59 = vunpack.c.l.s8.bf16 %v1583_v26 }
 0x533   : > { %4611 = vmatpush2.bf16.msra.mxu0 %v2110_v33  ;;  %v2431_v33 = vunpack.c.h.s8.bf16 %v1583_v26 }
 0x534   : > { %4654 = vmatpush2.bf16.msra.mxu1 %v2238_v40  ;;  %4612 = vmatprep.subr.bf16.mxu0 %v2103_v31  ;;  %v1582_v40 = vld [vmem:[%s7026_s14 + $0x670] sm:$0xff]  ;;  %v2302_v31 = vunpack.c.h.s8.bf16 %v1518_v13 }
 0x535   : > { %4655 = vmatprep.subr.bf16.mxu1 %v2231_v23  ;;  %v2430_v23 = vunpack.c.h.s8.bf16 %v1582_v40  ;;  %v2422_v55 = vunpack.c.l.s8.bf16 %v1582_v40  ;;  %v1550_v40 = vld [vmem:[%s7026_s14 + $0x570] sm:$0xff] }
 0x537   : > { %4613 = vmatpush2.bf16.msra.mxu0 %v2102_v14  ;;  %v1511_v14 = vld [vmem:[%s7026_s14 + $0x438] sm:$0xff] }
 0x538   : > { %4656 = vmatpush2.bf16.msra.mxu1 %v2230_v41  ;;  %4614 = vmatprep.subr.bf16.mxu0 %v2095_v51  ;;  %v1575_v41 = vld [vmem:[%s7026_s14 + $0x638] sm:$0xff]  ;;  %v2294_v51 = vunpack.c.l.s8.bf16 %v1518_v13  ;;  %v2279_v46 = vunpack.c.l.s8.bf16 %v1511_v14 }
 0x539   : > { %4657 = vmatprep.subr.bf16.mxu1 %v2223_v45  ;;  %v2287_v45 = vunpack.c.h.s8.bf16 %v1511_v14  ;;  %v2407_v5 = vunpack.c.l.s8.bf16 %v1575_v41 }
 0x53b   : > { %4615 = vmatpush2.bf16.msra.mxu0 %v2094_v42  ;;  %v2415_v42 = vunpack.c.h.s8.bf16 %v1575_v41 }
 0x53c   : > { %4658 = vmatpush2.bf16.msra.mxu1 %v2222_v44  ;;  %4616 = vmatprep.subr.bf16.mxu0 %v2087_v30  ;;  %v1574_v44 = vld [vmem:[%s7026_s14 + $0x630] sm:$0xff]  ;;  %v2286_v30 = vunpack.c.h.s8.bf16 %v1510_v49 }
 0x53d   : > { %4659 = vmatprep.subr.bf16.mxu1 %v2215_v50  ;;  %v2414_v50 = vunpack.c.h.s8.bf16 %v1574_v44  ;;  %v2406_v15 = vunpack.c.l.s8.bf16 %v1574_v44  ;;  %v1542_v44 = vld [vmem:[%s7026_s14 + $0x530] sm:$0xff] }
 0x53f   : > { %4617 = vmatpush2.bf16.msra.mxu0 %v2086_v12  ;;  %v1567_v12 = vld [vmem:[%s7026_s14 + $0x5f8] sm:$0xff] }
 0x540   : > { %4660 = vmatpush2.bf16.msra.mxu1 %v2214_v22  ;;  %4672 = vmatprep.subr.bf16.mxu0 %v2335_v7  ;;  %v1631_v22 = vld [vmem:[%s7026_s14 + $0x7f8] sm:$0xff]  ;;  %v2278_v7 = vunpack.c.l.s8.bf16 %v1510_v49 }
 0x541   : > { %4715 = vmatprep.subr.bf16.mxu1 %v2463_v27  ;;  %v2399_v27 = vunpack.c.h.s8.bf16 %v1567_v12  ;;  %v2519_v4 = vunpack.c.l.s8.bf16 %v1631_v22 }
 0x542   : > { %4619 = vmatmul.mubr.bf16.vlgmr.msra.gmra.mxu0 %v7197_v2  ;;  %v2318_v2 = vunpack.c.h.s8.bf16 %v1526_v32 }
 0x543   : > { %4662 = vmatmul.mubr.bf16.vlgmr.msra.gmra.mxu1 %v7199_v3  ;;  %4673 = vmatpush1.bf16.msra.mxu0 %v2334_v36  ;;  %v2446_v3 = vunpack.c.h.s8.bf16 %v1590_v28  ;;  %v2527_v36 = vunpack.c.h.s8.bf16 %v1631_v22 }
 0x544   : > { %4704 = vmatprep.mubr.bf16.mxu0 %v7223_v38  ;;  %4716 = vmatpush1.bf16.msra.mxu1 %v2462_v47  ;;  %v2311_v38 = vunpack.c.l.s8.bf16 %v1527_v0  ;;  %v1630_v47 = vld [vmem:[%s7026_s14 + $0x7f0] sm:$0xff] }
 0x545   : > { %4747 = vmatprep.mubr.bf16.mxu1 %v7225_v39  ;;  %4674 = vmatprep.subr.bf16.mxu0 %v2327_v62  ;;  %v2438_v39 = vunpack.c.l.s8.bf16 %v1590_v28  ;;  %v2398_v62 = vunpack.c.h.s8.bf16 %v1566_v29  ;;  %v2526_v0 = vunpack.c.h.s8.bf16 %v1630_v47  ;;  %v2518_v32 = vunpack.c.l.s8.bf16 %v1630_v47  ;;  %v1558_v28 = vld [vmem:[%s7026_s14 + $0x5b0] sm:$0xff] }
 0x546   : > { %4717 = vmatprep.subr.bf16.mxu1 %v2455_v1  ;;  %v2391_v1 = vunpack.c.l.s8.bf16 %v1567_v12  ;;  %v1662_v47 = vld [vmem:[%s7026_s14 + $0x8f0] sm:$0xff] }
 0x547   : > { %4675 = vmatpush1.bf16.msra.mxu0 %v2326_v11  ;;  %v1559_v11 = vld [vmem:[%s7026_s14 + $0x5b8] sm:$0xff] }
 0x548   : > { %4718 = vmatpush1.bf16.msra.mxu1 %v2454_v63  ;;  %4676 = vmatprep.subr.bf16.mxu0 %v2319_v10  ;;  %v1623_v63 = vld [vmem:[%s7026_s14 + $0x7b8] sm:$0xff]  ;;  %v2390_v10 = vunpack.c.l.s8.bf16 %v1566_v29  ;;  %v2375_v43 = vunpack.c.l.s8.bf16 %v1559_v11 }
 0x549   : > { %4719 = vmatprep.subr.bf16.mxu1 %v2447_v16  ;;  %v2383_v16 = vunpack.c.h.s8.bf16 %v1559_v11  ;;  %v2503_v26 = vunpack.c.l.s8.bf16 %v1623_v63 }
 0x54b   : > { %4677 = vmatpush1.bf16.msra.mxu0 %v2318_v2  ;;  %v2511_v2 = vunpack.c.h.s8.bf16 %v1623_v63  ;;  %v1655_v63 = vld [vmem:[%s7026_s14 + $0x8b8] sm:$0xff] }
 0x54c   : > { %4720 = vmatpush1.bf16.msra.mxu1 %v2446_v3  ;;  %4678 = vmatprep.subr.bf16.mxu0 %v2311_v38  ;;  %v1622_v3 = vld [vmem:[%s7026_s14 + $0x7b0] sm:$0xff]  ;;  %v2382_v38 = vunpack.c.h.s8.bf16 %v1558_v28 }
 0x54d   : > { %4721 = vmatprep.subr.bf16.mxu1 %v2439_v48  ;;  %v2510_v48 = vunpack.c.h.s8.bf16 %v1622_v3  ;;  %v2502_v13 = vunpack.c.l.s8.bf16 %v1622_v3  ;;  %v1654_v3 = vld [vmem:[%s7026_s14 + $0x8b0] sm:$0xff] }
 0x54f   : > { %4679 = vmatpush1.bf16.msra.mxu0 %v2310_v52  ;;  %v1551_v52 = vld [vmem:[%s7026_s14 + $0x578] sm:$0xff] }
 0x550   : > { %4722 = vmatpush1.bf16.msra.mxu1 %v2438_v39  ;;  %4680 = vmatprep.subr.bf16.mxu0 %v2303_v8  ;;  %v1615_v39 = vld [vmem:[%s7026_s14 + $0x778] sm:$0xff]  ;;  %v2374_v8 = vunpack.c.l.s8.bf16 %v1558_v28  ;;  %v2359_v14 = vunpack.c.l.s8.bf16 %v1551_v52 }
 0x551   : > { %4723 = vmatprep.subr.bf16.mxu1 %v2431_v33  ;;  %v2367_v33 = vunpack.c.h.s8.bf16 %v1551_v52  ;;  %v2487_v41 = vunpack.c.l.s8.bf16 %v1615_v39  ;;  %v8026_v52 = vpop.f32.mrf.mxu0 }
 0x553   : > { %4681 = vmatpush1.bf16.msra.mxu0 %v2302_v31  ;;  %v2495_v31 = vunpack.c.h.s8.bf16 %v1615_v39  ;;  %v1711_v39 = vld [vmem:[%s7026_s14 + $0xa78] sm:$0xff] }
 0x554   : > { %4724 = vmatpush1.bf16.msra.mxu1 %v2430_v23  ;;  %4682 = vmatprep.subr.bf16.mxu0 %v2295_v34  ;;  %v1614_v23 = vld [vmem:[%s7026_s14 + $0x770] sm:$0xff]  ;;  %v2366_v34 = vunpack.c.h.s8.bf16 %v1550_v40 }
 0x555   : > { %4725 = vmatprep.subr.bf16.mxu1 %v2423_v59  ;;  %v2494_v59 = vunpack.c.h.s8.bf16 %v1614_v23  ;;  %v2486_v49 = vunpack.c.l.s8.bf16 %v1614_v23  ;;  %v1710_v23 = vld [vmem:[%s7026_s14 + $0xa70] sm:$0xff] }
 0x557   : > { %4683 = vmatpush1.bf16.msra.mxu0 %v2294_v51  ;;  %v1543_v51 = vld [vmem:[%s7026_s14 + $0x538] sm:$0xff] }
 0x558   : > { %4726 = vmatpush1.bf16.msra.mxu1 %v2422_v55  ;;  %4684 = vmatprep.subr.bf16.mxu0 %v2287_v45  ;;  %v1607_v55 = vld [vmem:[%s7026_s14 + $0x738] sm:$0xff]  ;;  %v2358_v45 = vunpack.c.l.s8.bf16 %v1550_v40  ;;  %v2343_v12 = vunpack.c.l.s8.bf16 %v1543_v51  ;;  %v1646_v40 = vld [vmem:[%s7026_s14 + $0x870] sm:$0xff] }
 0x559   : > { %4727 = vmatprep.subr.bf16.mxu1 %v2415_v42  ;;  %v2351_v42 = vunpack.c.h.s8.bf16 %v1543_v51  ;;  %v2471_v22 = vunpack.c.l.s8.bf16 %v1607_v55 }
 0x55b   : > { %4685 = vmatpush1.bf16.msra.mxu0 %v2286_v30  ;;  %v2479_v30 = vunpack.c.h.s8.bf16 %v1607_v55  ;;  %v2679_v55 = vunpack.c.l.s8.bf16 %v1711_v39 }
 0x55c   : > { %4728 = vmatpush1.bf16.msra.mxu1 %v2414_v50  ;;  %4686 = vmatprep.subr.bf16.mxu0 %v2279_v46  ;;  %v1606_v50 = vld [vmem:[%s7026_s14 + $0x730] sm:$0xff]  ;;  %v2350_v46 = vunpack.c.h.s8.bf16 %v1542_v44 }
 0x55d   : > { %4729 = vmatprep.subr.bf16.mxu1 %v2407_v5  ;;  %v2478_v5 = vunpack.c.h.s8.bf16 %v1606_v50  ;;  %v2470_v29 = vunpack.c.l.s8.bf16 %v1606_v50  ;;  %v2678_v50 = vunpack.c.l.s8.bf16 %v1710_v23 }
 0x55f   : > { %4687 = vmatpush1.bf16.msra.mxu0 %v2278_v7  ;;  %v1663_v7 = vld [vmem:[%s7026_s14 + $0x8f8] sm:$0xff] }
 0x560   : > { %4730 = vmatpush1.bf16.msra.mxu1 %v2406_v15  ;;  %4688 = vmatprep.subr.bf16.mxu0 %v2399_v27  ;;  %v1727_v15 = vld [vmem:[%s7026_s14 + $0xaf8] sm:$0xff]  ;;  %v2342_v27 = vunpack.c.l.s8.bf16 %v1542_v44  ;;  %v2583_v11 = vunpack.c.l.s8.bf16 %v1663_v7 }
 0x561   : > { %4731 = vmatprep.subr.bf16.mxu1 %v2527_v36  ;;  %v2591_v36 = vunpack.c.h.s8.bf16 %v1663_v7 }
 0x563   : > { %4689 = vmatpush2.bf16.msra.mxu0 %v2398_v62  ;;  %v2719_v62 = vunpack.c.h.s8.bf16 %v1727_v15 }
 0x564   : > { %4732 = vmatpush2.bf16.msra.mxu1 %v2526_v0  ;;  %4690 = vmatprep.subr.bf16.mxu0 %v2391_v1  ;;  %v1726_v0 = vld [vmem:[%s7026_s14 + $0xaf0] sm:$0xff]  ;;  %v2590_v1 = vunpack.c.h.s8.bf16 %v1662_v47 }
 0x565   : > { %4733 = vmatprep.subr.bf16.mxu1 %v2519_v4  ;;  %v2718_v4 = vunpack.c.h.s8.bf16 %v1726_v0  ;;  %v2710_v28 = vunpack.c.l.s8.bf16 %v1726_v0 }
 0x567   : > { %4691 = vmatpush2.bf16.msra.mxu0 %v2390_v10  ;;  %v2711_v10 = vunpack.c.l.s8.bf16 %v1727_v15 }
 0x568   : > { %4734 = vmatpush2.bf16.msra.mxu1 %v2518_v32  ;;  %4692 = vmatprep.subr.bf16.mxu0 %v2383_v16  ;;  %v1719_v32 = vld [vmem:[%s7026_s14 + $0xab8] sm:$0xff]  ;;  %v2582_v16 = vunpack.c.l.s8.bf16 %v1662_v47 }
 0x569   : > { %4735 = vmatprep.subr.bf16.mxu1 %v2511_v2  ;;  %v2575_v2 = vunpack.c.h.s8.bf16 %v1655_v63 }
 0x56b   : > { %4693 = vmatpush2.bf16.msra.mxu0 %v2382_v38  ;;  %v2703_v38 = vunpack.c.h.s8.bf16 %v1719_v32 }
 0x56c   : > { %4736 = vmatpush2.bf16.msra.mxu1 %v2510_v48  ;;  %4694 = vmatprep.subr.bf16.mxu0 %v2375_v43  ;;  %v1718_v48 = vld [vmem:[%s7026_s14 + $0xab0] sm:$0xff]  ;;  %v2567_v43 = vunpack.c.l.s8.bf16 %v1655_v63 }
 0x56d   : > { %4737 = vmatprep.subr.bf16.mxu1 %v2503_v26  ;;  %v1647_v26 = vld [vmem:[%s7026_s14 + $0x878] sm:$0xff] }
 0x56e   : > { %v2551_v51 = vunpack.c.l.s8.bf16 %v1647_v26 }
 0x56f   : > { %4695 = vmatpush2.bf16.msra.mxu0 %v2374_v8  ;;  %v8029_v8 = vpop.f32.mrf.mxu1 }
 0x570   : > { %4738 = vmatpush2.bf16.msra.mxu1 %v2502_v13  ;;  %4696 = vmatprep.subr.bf16.mxu0 %v2367_v33  ;;  %v2694_v13 = vunpack.c.l.s8.bf16 %v1718_v48  ;;  %v2559_v33 = vunpack.c.h.s8.bf16 %v1647_v26  ;;  %v1687_v26 = vld [vmem:[%s7026_s14 + $0x9b8] sm:$0xff] }
 0x571   : > { %4739 = vmatprep.subr.bf16.mxu1 %v2495_v31  ;;  %v2687_v31 = vunpack.c.h.s8.bf16 %v1711_v39  ;;  %v1751_v39 = vld [vmem:[%s7026_s14 + $0xbb8] sm:$0xff] }
 0x573   : > { %4697 = vmatpush2.bf16.msra.mxu0 %v2366_v34  ;;  %v8033_v34 = vpop.f32.mrf.mxu0 }
 0x574   : > { %4740 = vmatpush2.bf16.msra.mxu1 %v2494_v59  ;;  %4698 = vmatprep.subr.bf16.mxu0 %v2359_v14  ;;  %v8035_v59 = vpop.f32.mrf.mxu1  ;;  %v2558_v14 = vunpack.c.h.s8.bf16 %v1646_v40 }
 0x575   : > { %4741 = vmatprep.subr.bf16.mxu1 %v2487_v41  ;;  %v2686_v41 = vunpack.c.h.s8.bf16 %v1710_v23 }
 0x576   : > { %v8041_v44 = vpop.f32.mrf.mxu1 }
 0x577   : > { %4699 = vmatpush2.bf16.msra.mxu0 %v2358_v45  ;;  %v1639_v45 = vld [vmem:[%s7026_s14 + $0x838] sm:$0xff] }
 0x578   : > { %4742 = vmatpush2.bf16.msra.mxu1 %v2486_v49  ;;  %4700 = vmatprep.subr.bf16.mxu0 %v2351_v42  ;;  %v8038_v49 = vpop.f32.mrf.mxu0  ;;  %v1703_v42 = vld [vmem:[%s7026_s14 + $0xa38] sm:$0xff]  ;;  %v8047_v15 = vpop.f32.mrf.mxu1  ;;  %v2535_v47 = vunpack.c.l.s8.bf16 %v1639_v45 }
 0x579   : > { %4743 = vmatprep.subr.bf16.mxu1 %v2479_v30  ;;  %v2550_v30 = vunpack.c.l.s8.bf16 %v1646_v40  ;;  %v2663_v0 = vunpack.c.l.s8.bf16 %v1703_v42  ;;  %v2639_v40 = vunpack.c.h.s8.bf16 %v1687_v26 }
 0x57a   : > { %v8045_v7 = vpop.f32.mrf.mxu0 }
 0x57b   : > { %4701 = vmatpush2.bf16.msra.mxu0 %v2350_v46  ;;  %v2543_v46 = vunpack.c.h.s8.bf16 %v1639_v45 }
 0x57c   : > { %4744 = vmatpush2.bf16.msra.mxu1 %v2478_v5  ;;  %4702 = vmatprep.subr.bf16.mxu0 %v2343_v12  ;;  %v1638_v5 = vld [vmem:[%s7026_s14 + $0x830] sm:$0xff]  ;;  %v2671_v12 = vunpack.c.h.s8.bf16 %v1703_v42 }
 0x57d   : > { %4745 = vmatprep.subr.bf16.mxu1 %v2471_v22  ;;  %v1702_v22 = vld [vmem:[%s7026_s14 + $0xa30] sm:$0xff] }
 0x57f   : > { %4703 = vmatpush2.bf16.msra.mxu0 %v2342_v27  ;;  %v2542_v27 = vunpack.c.h.s8.bf16 %v1638_v5 }
 0x580   : > { %4746 = vmatpush2.bf16.msra.mxu1 %v2470_v29  ;;  %4758 = vmatprep.subr.bf16.mxu0 %v2591_v36  ;;  %v8049_v29 = vpop.f32.mrf.mxu0  ;;  %v2670_v36 = vunpack.c.h.s8.bf16 %v1702_v22 }
 0x581   : > { %4801 = vmatprep.subr.bf16.mxu1 %v2719_v62  ;;  %v8051_v62 = vpop.f32.mrf.mxu1 }
 0x582   : > { %4705 = vmatmul.mubr.bf16.vlgmr.msra.gmra.mxu0 %v7321_v24  ;;  %v2574_v24 = vunpack.c.h.s8.bf16 %v1654_v3  ;;  %v8055_v63 = vpop.f32.mrf.mxu0 }
 0x583   : > { %4748 = vmatmul.mubr.bf16.vlgmr.msra.gmra.mxu1 %v7323_v25  ;;  %4759 = vmatpush1.bf16.msra.mxu0 %v2590_v1  ;;  %v2702_v25 = vunpack.c.h.s8.bf16 %v1718_v48  ;;  %v1695_v1 = vld [vmem:[%s7026_s14 + $0x9f8] sm:$0xff] }
 0x584   : > { %4790 = vmatprep.mubr.bf16.mxu0 %v7327_v21  ;;  %4802 = vmatpush1.bf16.msra.mxu1 %v2718_v4  ;;  %v2695_v21 = vunpack.c.l.s8.bf16 %v1719_v32  ;;  %v1759_v4 = vld [vmem:[%s7026_s14 + $0xbf8] sm:$0xff]  ;;  %v2655_v32 = vunpack.c.h.s8.bf16 %v1695_v1  ;;  %v8061_v48 = vpop.f32.mrf.mxu0 }
 0x585   : > { %4833 = vmatprep.mubr.bf16.mxu1 %v7329_v37  ;;  %4760 = vmatprep.subr.bf16.mxu0 %v2583_v11  ;;  %v2566_v37 = vunpack.c.l.s8.bf16 %v1654_v3  ;;  %v2534_v11 = vunpack.c.l.s8.bf16 %v1638_v5  ;;  %v1758_v3 = vld [vmem:[%s7026_s14 + $0xbf0] sm:$0xff] }
 0x586   : > { %4803 = vmatprep.subr.bf16.mxu1 %v2711_v10  ;;  %v2662_v10 = vunpack.c.l.s8.bf16 %v1702_v22 }
 0x587   : > { %4761 = vmatpush1.bf16.msra.mxu0 %v2582_v16  ;;  %v1694_v16 = vld [vmem:[%s7026_s14 + $0x9f0] sm:$0xff] }
 0x588   : > { %4804 = vmatpush1.bf16.msra.mxu1 %v2710_v28  ;;  %4762 = vmatprep.subr.bf16.mxu0 %v2575_v2  ;;  %v8058_v28 = vpop.f32.mrf.mxu1  ;;  %v2783_v2 = vunpack.c.h.s8.bf16 %v1759_v4 }
 0x589   : > { %4805 = vmatprep.subr.bf16.mxu1 %v2703_v38  ;;  %v2654_v38 = vunpack.c.h.s8.bf16 %v1694_v16 }
 0x58b   : > { %4763 = vmatpush1.bf16.msra.mxu0 %v2574_v24  ;;  %v2782_v24 = vunpack.c.h.s8.bf16 %v1758_v3 }
 0x58c   : > { %4806 = vmatpush1.bf16.msra.mxu1 %v2702_v25  ;;  %4764 = vmatprep.subr.bf16.mxu0 %v2567_v43  ;;  %v2647_v25 = vunpack.c.l.s8.bf16 %v1695_v1  ;;  %v8063_v43 = vpop.f32.mrf.mxu1 }
 0x58d   : > { %4807 = vmatprep.subr.bf16.mxu1 %v2695_v21  ;;  %v2775_v21 = vunpack.c.l.s8.bf16 %v1759_v4  ;;  %v1742_v4 = vld [vmem:[%s7026_s14 + $0xb70] sm:$0xff] }
 0x58e   : > { %v8070_v23 = vpop.f32.mrf.mxu1 }
 0x58f   : > { %4765 = vmatpush1.bf16.msra.mxu0 %v2566_v37  ;;  %v2646_v37 = vunpack.c.l.s8.bf16 %v1694_v16 }
 0x590   : > { %4808 = vmatpush1.bf16.msra.mxu1 %v2694_v13  ;;  %4766 = vmatprep.subr.bf16.mxu0 %v2559_v33  ;;  %v8067_v13 = vpop.f32.mrf.mxu0  ;;  %v2774_v33 = vunpack.c.l.s8.bf16 %v1758_v3 }
 0x591   : > { %4809 = vmatprep.subr.bf16.mxu1 %v2687_v31  ;;  %v1686_v31 = vld [vmem:[%s7026_s14 + $0x9b0] sm:$0xff] }
 0x592   : > { %v2638_v45 = vunpack.c.h.s8.bf16 %v1686_v31 }
 0x593   : > { %4767 = vmatpush1.bf16.msra.mxu0 %v2558_v14  ;;  %v2767_v14 = vunpack.c.h.s8.bf16 %v1751_v39 }
 0x594   : > { %4810 = vmatpush1.bf16.msra.mxu1 %v2686_v41  ;;  %4768 = vmatprep.subr.bf16.mxu0 %v2551_v51  ;;  %v1750_v41 = vld [vmem:[%s7026_s14 + $0xbb0] sm:$0xff]  ;;  %v4362_v51 = vpop.f32.mrf.mxu0 }
 0x595   : > { %4811 = vmatprep.subr.bf16.mxu1 %v2679_v55  ;;  %v8073_v55 = vpop.f32.mrf.mxu1  ;;  %v2766_v42 = vunpack.c.h.s8.bf16 %v1750_v41 }
 0x596   : > { %v4364_v5 = vpop.f32.mrf.mxu0 }
 0x597   : > { %4769 = vmatpush1.bf16.msra.mxu0 %v2550_v30  ;;  %v2631_v30 = vunpack.c.l.s8.bf16 %v1687_v26  ;;  %v8077_v22 = vpop.f32.mrf.mxu1 }
 0x598   : > { %4812 = vmatpush1.bf16.msra.mxu1 %v2678_v50  ;;  %4770 = vmatprep.subr.bf16.mxu0 %v2543_v46  ;;  %v2759_v50 = vunpack.c.l.s8.bf16 %v1751_v39  ;;  %v1679_v46 = vld [vmem:[%s7026_s14 + $0x978] sm:$0xff] }
 0x599   : > { %4813 = vmatprep.subr.bf16.mxu1 %v2671_v12  ;;  %v1743_v12 = vld [vmem:[%s7026_s14 + $0xb78] sm:$0xff]  ;;  %v2615_v3 = vunpack.c.l.s8.bf16 %v1679_v46 }
 0x59a   : > { %v2751_v1 = vunpack.c.h.s8.bf16 %v1743_v12  ;;  %v1735_v39 = vld [vmem:[%s7026_s14 + $0xb38] sm:$0xff] }
 0x59b   : > { %4771 = vmatpush1.bf16.msra.mxu0 %v2542_v27  ;;  %v2630_v27 = vunpack.c.l.s8.bf16 %v1686_v31  ;;  %v4240_v31 = vadd.f32 %v8047_v15, %v8045_v7 }
 0x59c   : > { %4814 = vmatpush1.bf16.msra.mxu1 %v2670_v36  ;;  %4772 = vmatprep.subr.bf16.mxu0 %v2535_v47  ;;  %v2758_v36 = vunpack.c.l.s8.bf16 %v1750_v41  ;;  %v2623_v47 = vunpack.c.h.s8.bf16 %v1679_v46 }
 0x59d   : > { %4815 = vmatprep.subr.bf16.mxu1 %v2663_v0  ;;  %v1678_v0 = vld [vmem:[%s7026_s14 + $0x970] sm:$0xff] }
 0x59e   : > { %v2622_v16 = vunpack.c.h.s8.bf16 %v1678_v0 }
 0x59f   : > { %4773 = vmatpush1.bf16.msra.mxu0 %v2534_v11  ;;  %v4366_v11 = vpop.f32.mrf.mxu0 }
 0x5a0   : > { %4816 = vmatpush1.bf16.msra.mxu1 %v2662_v10  ;;  %4774 = vmatprep.subr.bf16.mxu0 %v2655_v32  ;;  %v4234_v10 = vadd.f32 %v8029_v8, %v8026_v52  ;;  %v8083_v32 = vpop.f32.mrf.mxu1  ;;  %v4238_v52 = vadd.f32 %v8041_v44, %v8038_v49  ;;  %v2735_v44 = vunpack.c.h.s8.bf16 %v1735_v39 }
 0x5a1   : > { %4817 = vmatprep.subr.bf16.mxu1 %v2783_v2  ;;  %v2750_v2 = vunpack.c.h.s8.bf16 %v1742_v4  ;;  %v4368_v26 = vpop.f32.mrf.mxu0 }
 0x5a2   : > { %v4281_v41 = vadd.f32 %v8061_v48, %v4238_v52 }
 0x5a3   : > { %4775 = vmatpush2.bf16.msra.mxu0 %v2654_v38  ;;  %v4236_v38 = vadd.f32 %v8035_v59, %v8033_v34  ;;  %v2742_v34 = vunpack.c.l.s8.bf16 %v1742_v4 }
 0x5a4   : > { %4818 = vmatpush2.bf16.msra.mxu1 %v2782_v24  ;;  %4776 = vmatprep.subr.bf16.mxu0 %v2647_v25  ;;  %v4277_v24 = vadd.f32 %v8049_v29, %v4234_v10  ;;  %v2743_v25 = vunpack.c.l.s8.bf16 %v1743_v12  ;;  %v1670_v29 = vld [vmem:[%s7026_s14 + $0x930] sm:$0xff] }
 0x5a5   : > { %4819 = vmatprep.subr.bf16.mxu1 %v2775_v21  ;;  %v1671_v21 = vld [vmem:[%s7026_s14 + $0x938] sm:$0xff]  ;;  %v4279_v8 = vadd.f32 %v8055_v63, %v4236_v38  ;;  %v1734_v63 = vld [vmem:[%s7026_s14 + $0xb30] sm:$0xff] }
 0x5a6   : > { %v2607_v59 = vunpack.c.h.s8.bf16 %v1671_v21  ;;  %v2734_v7 = vunpack.c.h.s8.bf16 %v1734_v63  ;;  %v2599_v15 = vunpack.c.l.s8.bf16 %v1671_v21  ;;  %v2726_v4 = vunpack.c.l.s8.bf16 %v1734_v63 }
 0x5a7   : > { %4777 = vmatpush2.bf16.msra.mxu0 %v2646_v37  ;;  %v4411_v37 = vpop.f32.mrf.mxu1 }
 0x5a8   : > { %4820 = vmatpush2.bf16.msra.mxu1 %v2774_v33  ;;  %4778 = vmatprep.subr.bf16.mxu0 %v2639_v40  ;;  %v2614_v33 = vunpack.c.l.s8.bf16 %v1678_v0  ;;  %v4448_v40 = vpop.f32.mrf.mxu0  ;;  %v2598_v0 = vunpack.c.l.s8.bf16 %v1670_v29 }
 0x5a9   : > { %4821 = vmatprep.subr.bf16.mxu1 %v2767_v14  ;;  %v4320_v14 = vadd.f32 %v8051_v62, %v4277_v24  ;;  %v4491_v49 = vpop.f32.mrf.mxu1  ;;  %v4324_v62 = vadd.f32 %v8063_v43, %v4281_v41  ;;  %v1782_v41 = vld [vmem:[%s7026_s14 + $0xcb0] sm:$0xff] }
 0x5aa   : > { %v4450_v46 = vpop.f32.mrf.mxu0 }
 0x5ab   : > { %4779 = vmatpush2.bf16.msra.mxu0 %v2638_v45  ;;  %v4322_v45 = vadd.f32 %v8058_v28, %v4279_v8  ;;  %v4493_v12 = vpop.f32.mrf.mxu1  ;;  %v1855_v28 = vld [vmem:[%s7026_s14 + $0xef8] sm:$0xff] }
 0x5ac   : > { %4822 = vmatpush2.bf16.msra.mxu1 %v2766_v42  ;;  %4780 = vmatprep.subr.bf16.mxu0 %v2631_v30  ;;  %v4283_v42 = vadd.f32 %v8067_v13, %v4240_v31  ;;  %v4363_v30 = vadd.f32 %v4362_v51, %v4320_v14  ;;  %v4367_v51 = vadd.f32 %v4366_v11, %v4324_v62  ;;  %v2975_v38 = vunpack.c.h.s8.bf16 %v1855_v28 }
 0x5ad   : > { %4823 = vmatprep.subr.bf16.mxu1 %v2759_v50  ;;  %v2606_v50 = vunpack.c.h.s8.bf16 %v1670_v29  ;;  %v4365_v48 = vadd.f32 %v4364_v5, %v4322_v45  ;;  %v1790_v5 = vld [vmem:[%s7026_s14 + $0xcf0] sm:$0xff]  ;;  %v2830_v62 = vunpack.c.h.s8.bf16 %v1782_v41 }
 0x5ae   : > { %v4406_v13 = vadd.f32 %v8073_v55, %v4363_v30  ;;  %v4410_v55 = vadd.f32 %v8083_v32, %v4367_v51  ;;  %v2846_v24 = vunpack.c.h.s8.bf16 %v1790_v5  ;;  %v2967_v32 = vunpack.c.l.s8.bf16 %v1855_v28  ;;  %v1352_v28 = vld [vmem:[#allocation2 + $0x60] sm:$0xff] }
 0x5af   : > { %4781 = vmatpush2.bf16.msra.mxu0 %v2630_v27  ;;  %v2727_v27 = vunpack.c.l.s8.bf16 %v1735_v39  ;;  %v4408_v10 = vadd.f32 %v8077_v22, %v4365_v48 }
 0x5b0   : > { %4824 = vmatpush2.bf16.msra.mxu1 %v2758_v36  ;;  %4782 = vmatprep.subr.bf16.mxu0 %v2623_v47  ;;  %v1791_v36 = vld [vmem:[%s7026_s14 + $0xcf8] sm:$0xff]  ;;  %v4326_v47 = vadd.f32 %v8070_v23, %v4283_v42  ;;  %v1854_v23 = vld [vmem:[%s7026_s14 + $0xef0] sm:$0xff] }
 0x5b1   : > { %4825 = vmatprep.subr.bf16.mxu1 %v2751_v1  ;;  %v4452_v1 = vpop.f32.mrf.mxu0  ;;  %v2847_v43 = vunpack.c.h.s8.bf16 %v1791_v36  ;;  %v4451_v11 = vadd.f32 %v4450_v46, %v4408_v10  ;;  %v2974_v21 = vunpack.c.h.s8.bf16 %v1854_v23  ;;  %v2839_v8 = vunpack.c.l.s8.bf16 %v1791_v36 }
 0x5b2   : > { %v4453_v22 = vadd.f32 %v4452_v1, %v4410_v55  ;;  %v2966_v63 = vunpack.c.l.s8.bf16 %v1854_v23 }
 0x5b3   : > { %4783 = vmatpush2.bf16.msra.mxu0 %v2622_v16  ;;  %v4369_v16 = vadd.f32 %v4368_v26, %v4326_v47 }
 0x5b4   : > { %4826 = vmatpush2.bf16.msra.mxu1 %v2750_v2  ;;  %4784 = vmatprep.subr.bf16.mxu0 %v2615_v3  ;;  %v4449_v2 = vadd.f32 %v4448_v40, %v4406_v13  ;;  %v4495_v3 = vpop.f32.mrf.mxu1 }
 0x5b5   : > { %4827 = vmatprep.subr.bf16.mxu1 %v2743_v25  ;;  %v4454_v25 = vpop.f32.mrf.mxu0  ;;  %v4412_v39 = vadd.f32 %v4411_v37, %v4369_v16  ;;  %v2838_v37 = vunpack.c.l.s8.bf16 %v1790_v5  ;;  %v1353_v5 = vld [vmem:[#allocation2 + $0x70] sm:$0xff]  ;;  %v1839_v16 = vld [vmem:[%s7026_s14 + $0xe78] sm:$0xff] }
 0x5b6   : > { %v4492_v52 = vadd.f32 %v4491_v49, %v4449_v2  ;;  %v4497_v26 = vpop.f32.mrf.mxu1  ;;  %v1344_v49 = vld [vmem:[#allocation2 + $0x50] sm:$0xff] }
 0x5b7   : > { %4785 = vmatpush2.bf16.msra.mxu0 %v2614_v33  ;;  %v1783_v33 = vld [vmem:[%s7026_s14 + $0xcb8] sm:$0xff]  ;;  %v4455_v29 = vadd.f32 %v4454_v25, %v4412_v39  ;;  %v2943_v25 = vunpack.c.h.s8.bf16 %v1839_v16 }
 0x5b8   : > { %4828 = vmatpush2.bf16.msra.mxu1 %v2742_v34  ;;  %4786 = vmatprep.subr.bf16.mxu0 %v2607_v59  ;;  %v1847_v34 = vld [vmem:[%s7026_s14 + $0xeb8] sm:$0xff]  ;;  %v4494_v59 = vadd.f32 %v4493_v12, %v4451_v11  ;;  %v2831_v45 = vunpack.c.h.s8.bf16 %v1783_v33  ;;  %v2823_v13 = vunpack.c.l.s8.bf16 %v1783_v33  ;;  %v1774_v11 = vld [vmem:[%s7026_s14 + $0xc70] sm:$0xff] }
 0x5b9   : > { %4829 = vmatprep.subr.bf16.mxu1 %v2735_v44  ;;  %v2959_v46 = vunpack.c.h.s8.bf16 %v1847_v34  ;;  %v4498_v48 = vadd.f32 %v4497_v26, %v4455_v29  ;;  %v2814_v39 = vunpack.c.h.s8.bf16 %v1774_v11  ;;  %v2935_v26 = vunpack.c.l.s8.bf16 %v1839_v16  ;;  %v1831_v33 = vld [vmem:[%s7026_s14 + $0xe38] sm:$0xff] }
 0x5ba   : > { %v2927_v29 = vunpack.c.h.s8.bf16 %v1831_v33 }
 0x5bb   : > { %4787 = vmatpush2.bf16.msra.mxu0 %v2606_v50 }
 0x5bc   : > { %4830 = vmatpush2.bf16.msra.mxu1 %v2734_v7  ;;  %4788 = vmatprep.subr.bf16.mxu0 %v2599_v15  ;;  %v1345_v7 = vld [vmem:[#allocation2 + $0x68] sm:$0xff] }
 0x5bd   : > { %4831 = vmatprep.subr.bf16.mxu1 %v2727_v27 }
 0x5bf   : > { %4789 = vmatpush2.bf16.msra.mxu0 %v2598_v0 }
 0x5c0   : > { %4832 = vmatpush2.bf16.msra.mxu1 %v2726_v4  ;;  %4844 = vmatprep.subr.bf16.mxu0 %v2847_v43  ;;  %v2951_v4 = vunpack.c.l.s8.bf16 %v1847_v34  ;;  %v1775_v43 = vld [vmem:[%s7026_s14 + $0xc78] sm:$0xff] }
 0x5c1   : > { %4887 = vmatprep.subr.bf16.mxu1 %v2975_v38  ;;  %v2822_v38 = vunpack.c.l.s8.bf16 %v1782_v41  ;;  %v2815_v55 = vunpack.c.h.s8.bf16 %v1775_v43 }
 0x5c2   : > { %v4534_v40 = vpop.f32.mrf.mxu0  ;;  %4791 = vmatmul.mubr.bf16.vlgmr.msra.gmra.mxu0 %v7383_v53  ;;  %v4496_v53 = vadd.f32 %v4495_v3, %v4453_v22  ;;  %v2807_v22 = vunpack.c.l.s8.bf16 %v1775_v43  ;;  %v1871_v43 = vld [vmem:[%s7026_s14 + $0xf78] sm:$0xff] }
 0x5c3   : > { %v4535_v31 = vadd.f32 %v4534_v40, %v4492_v52  ;;  %v4577_v14 = vpop.f32.mrf.mxu1  ;;  %4834 = vmatmul.mubr.bf16.vlgmr.msra.gmra.mxu1 %v7385_v54  ;;  %4845 = vmatpush1.bf16.msra.mxu0 %v2846_v24  ;;  %v1846_v54 = vld [vmem:[%s7026_s14 + $0xeb0] sm:$0xff]  ;;  %v2806_v40 = vunpack.c.l.s8.bf16 %v1774_v11 }
 0x5c4   : > { %4876 = vmatprep.mubr.bf16.mxu0 %v7381_v6  ;;  %4888 = vmatpush1.bf16.msra.mxu1 %v2974_v21  ;;  %v4536_v44 = vpop.f32.mrf.mxu0  ;;  %v2958_v47 = vunpack.c.h.s8.bf16 %v1846_v54  ;;  %v2950_v23 = vunpack.c.l.s8.bf16 %v1846_v54  ;;  %v1838_v21 = vld [vmem:[%s7026_s14 + $0xe70] sm:$0xff] }
 0x5c5   : > { %v4578_v42 = vadd.f32 %v4577_v14, %v4535_v31  ;;  %4919 = vmatprep.mubr.bf16.mxu1 %v7387_v58  ;;  %v4537_v30 = vadd.f32 %v4536_v44, %v4494_v59  ;;  %v4579_v50 = vpop.f32.mrf.mxu1  ;;  %4846 = vmatprep.subr.bf16.mxu0 %v2839_v8  ;;  %v2942_v52 = vunpack.c.h.s8.bf16 %v1838_v21  ;;  %v1767_v8 = vld [vmem:[%s7026_s14 + $0xc38] sm:$0xff]  ;;  %v1766_v59 = vld [vmem:[%s7026_s14 + $0xc30] sm:$0xff] }
 0x5c6   : > { %v4538_v15 = vpop.f32.mrf.mxu0  ;;  %4889 = vmatprep.subr.bf16.mxu1 %v2967_v32  ;;  %v2934_v32 = vunpack.c.l.s8.bf16 %v1838_v21  ;;  %v2799_v34 = vunpack.c.h.s8.bf16 %v1767_v8  ;;  %v1830_v31 = vld [vmem:[%s7026_s14 + $0xe30] sm:$0xff]  ;;  %v2798_v14 = vunpack.c.h.s8.bf16 %v1766_v59  ;;  %v2791_v41 = vunpack.c.l.s8.bf16 %v1767_v8  ;;  %v1823_v44 = vld [vmem:[%s7026_s14 + $0xdf8] sm:$0xff] }
 0x5c7   : > { %v5020_v12 = vadd.f32 %v4578_v42, %v1344_v49  ;;  %v4580_v6 = vadd.f32 %v4579_v50, %v4537_v30  ;;  %v4539_v27 = vadd.f32 %v4538_v15, %v4496_v53  ;;  %v4581_v36 = vpop.f32.mrf.mxu1  ;;  %4847 = vmatpush1.bf16.msra.mxu0 %v2838_v37  ;;  %v2926_v37 = vunpack.c.h.s8.bf16 %v1830_v31  ;;  %v1822_v30 = vld [vmem:[%s7026_s14 + $0xdf0] sm:$0xff]  ;;  %v1863_v21 = vld [vmem:[%s7026_s14 + $0xf38] sm:$0xff] }
 0x5c8   : > { %4890 = vmatpush1.bf16.msra.mxu1 %v2966_v63  ;;  %v4540_v58 = vpop.f32.mrf.mxu0  ;;  %4848 = vmatprep.subr.bf16.mxu0 %v2831_v45  ;;  %v2919_v49 = vunpack.c.l.s8.bf16 %v1831_v33  ;;  %v1887_v63 = vld [vmem:[%s7026_s14 + $0xff8] sm:$0xff]  ;;  %v2790_v45 = vunpack.c.l.s8.bf16 %v1766_v59  ;;  %v2918_v53 = vunpack.c.l.s8.bf16 %v1830_v31  ;;  %v2911_v42 = vunpack.c.h.s8.bf16 %v1823_v44  ;;  %v1862_v33 = vld [vmem:[%s7026_s14 + $0xf30] sm:$0xff] }
 0x5c9   : > { %5036 = vst [vmem:[#allocation2 + $0x50] sm:$0xff] %v5020_v12  ;;  %v5021_v51 = vadd.f32 %v4580_v6, %v1345_v7  ;;  %v4582_v0 = vadd.f32 %v4581_v36, %v4539_v27  ;;  %v4541_v1 = vadd.f32 %v4540_v58, %v4498_v48  ;;  %4891 = vmatprep.subr.bf16.mxu1 %v2959_v46  ;;  %v4583_v10 = vpop.f32.mrf.mxu1  ;;  %v3039_v50 = vunpack.c.h.s8.bf16 %v1887_v63  ;;  %v1886_v46 = vld [vmem:[%s7026_s14 + $0xff0] sm:$0xff]  ;;  %v1815_v48 = vld [vmem:[%s7026_s14 + $0xdb8] sm:$0xff] }
 0x5ca   : > { %v2910_v54 = vunpack.c.h.s8.bf16 %v1822_v30  ;;  %v3038_v7 = vunpack.c.h.s8.bf16 %v1886_v46  ;;  %v2903_v15 = vunpack.c.l.s8.bf16 %v1823_v44  ;;  %v1879_v12 = vld [vmem:[%s7026_s14 + $0xfb8] sm:$0xff]  ;;  %v2902_v6 = vunpack.c.l.s8.bf16 %v1822_v30 }
 0x5cb   : > { %5037 = vst [vmem:[#allocation2 + $0x68] sm:$0xff] %v5021_v51  ;;  %v5028_v2 = vadd.f32 %v4582_v0, %v1352_v28  ;;  %v4584_v3 = vadd.f32 %v4583_v10, %v4541_v1  ;;  %4849 = vmatpush1.bf16.msra.mxu0 %v2830_v62  ;;  %v3031_v62 = vunpack.c.l.s8.bf16 %v1887_v63  ;;  %v3030_v27 = vunpack.c.l.s8.bf16 %v1886_v46  ;;  %v1814_v28 = vld [vmem:[%s7026_s14 + $0xdb0] sm:$0xff]  ;;  %v1983_v31 = vld [vmem:[%s7026_s14 + $0x12f8] sm:$0xff] }
 0x5cc   : > { %4892 = vmatpush1.bf16.msra.mxu1 %v2958_v47  ;;  %4850 = vmatprep.subr.bf16.mxu0 %v2823_v13  ;;  %v2895_v36 = vunpack.c.h.s8.bf16 %v1815_v48  ;;  %v3023_v58 = vunpack.c.h.s8.bf16 %v1879_v12  ;;  %v1878_v47 = vld [vmem:[%s7026_s14 + $0xfb0] sm:$0xff]  ;;  %v2894_v13 = vunpack.c.h.s8.bf16 %v1814_v28  ;;  %v2887_v0 = vunpack.c.l.s8.bf16 %v1815_v48  ;;  %v1911_v30 = vld [vmem:[%s7026_s14 + $0x10b8] sm:$0xff] }
 0x5cd   : > { %5044 = vst [vmem:[#allocation2 + $0x60] sm:$0xff] %v5028_v2  ;;  %v5029_v24 = vadd.f32 %v4584_v3, %v1353_v5  ;;  %4893 = vmatprep.subr.bf16.mxu1 %v2951_v4  ;;  %v3022_v51 = vunpack.c.h.s8.bf16 %v1878_v47  ;;  %v3015_v1 = vunpack.c.l.s8.bf16 %v1879_v12  ;;  %v1807_v4 = vld [vmem:[%s7026_s14 + $0xd78] sm:$0xff]  ;;  %v2886_v5 = vunpack.c.l.s8.bf16 %v1814_v28  ;;  %v1806_v2 = vld [vmem:[%s7026_s14 + $0xd70] sm:$0xff] }
 0x5ce   : > { %v3014_v10 = vunpack.c.l.s8.bf16 %v1878_v47  ;;  %v2879_v16 = vunpack.c.h.s8.bf16 %v1807_v4  ;;  %v3007_v3 = vunpack.c.h.s8.bf16 %v1871_v43  ;;  %v2871_v11 = vunpack.c.l.s8.bf16 %v1807_v4  ;;  %v1982_v63 = vld [vmem:[%s7026_s14 + $0x12f0] sm:$0xff]  ;;  %v1975_v46 = vld [vmem:[%s7026_s14 + $0x12b8] sm:$0xff] }
 0x5cf   : > { %5045 = vst [vmem:[#allocation2 + $0x70] sm:$0xff] %v5029_v24  ;;  %4851 = vmatpush1.bf16.msra.mxu0 %v2822_v38  ;;  %v1870_v38 = vld [vmem:[%s7026_s14 + $0xf70] sm:$0xff]  ;;  %v2999_v24 = vunpack.c.l.s8.bf16 %v1871_v43  ;;  %v2991_v8 = vunpack.c.h.s8.bf16 %v1863_v21  ;;  %v2983_v59 = vunpack.c.l.s8.bf16 %v1863_v21  ;;  %v3231_v44 = vunpack.c.h.s8.bf16 %v1983_v31 }
 0x5d0   : > { %4894 = vmatpush1.bf16.msra.mxu1 %v2950_v23  ;;  %4852 = vmatprep.subr.bf16.mxu0 %v2815_v55  ;;  %v2878_v23 = vunpack.c.h.s8.bf16 %v1806_v2  ;;  %v3006_v55 = vunpack.c.h.s8.bf16 %v1870_v38  ;;  %v3215_v48 = vunpack.c.h.s8.bf16 %v1975_v46  ;;  %v1974_v12 = vld [vmem:[%s7026_s14 + $0x12b0] sm:$0xff] }
 0x5d1   : > { %4895 = vmatprep.subr.bf16.mxu1 %v2943_v25  ;;  %v1799_v25 = vld [vmem:[%s7026_s14 + $0xd38] sm:$0xff]  ;;  %v1902_v47 = vld [vmem:[%s7026_s14 + $0x1070] sm:$0xff] }
 0x5d3   : > { %4853 = vmatpush1.bf16.msra.mxu0 %v2814_v39  ;;  %v2870_v39 = vunpack.c.l.s8.bf16 %v1806_v2 }
 0x5d4   : > { %4896 = vmatpush1.bf16.msra.mxu1 %v2942_v52  ;;  %4854 = vmatprep.subr.bf16.mxu0 %v2807_v22  ;;  %v2998_v52 = vunpack.c.l.s8.bf16 %v1870_v38  ;;  %v2863_v22 = vunpack.c.h.s8.bf16 %v1799_v25  ;;  %v1894_v38 = vld [vmem:[%s7026_s14 + $0x1030] sm:$0xff] }
 0x5d5   : > { %4897 = vmatprep.subr.bf16.mxu1 %v2935_v26  ;;  %v1798_v26 = vld [vmem:[%s7026_s14 + $0xd30] sm:$0xff] }
 0x5d7   : > { %4855 = vmatpush1.bf16.msra.mxu0 %v2806_v40  ;;  %v2862_v40 = vunpack.c.h.s8.bf16 %v1798_v26 }
 0x5d8   : > { %4898 = vmatpush1.bf16.msra.mxu1 %v2934_v32  ;;  %4856 = vmatprep.subr.bf16.mxu0 %v2799_v34  ;;  %v2990_v32 = vunpack.c.h.s8.bf16 %v1862_v33  ;;  %v2855_v34 = vunpack.c.l.s8.bf16 %v1799_v25 }
 0x5d9   : > { %4899 = vmatprep.subr.bf16.mxu1 %v2927_v29  ;;  %v1919_v29 = vld [vmem:[%s7026_s14 + $0x10f8] sm:$0xff] }
 0x5db   : > { %4857 = vmatpush1.bf16.msra.mxu0 %v2798_v14  ;;  %v2854_v14 = vunpack.c.l.s8.bf16 %v1798_v26 }
 0x5dc   : > { %4900 = vmatpush1.bf16.msra.mxu1 %v2926_v37  ;;  %4858 = vmatprep.subr.bf16.mxu0 %v2791_v41  ;;  %v2982_v37 = vunpack.c.l.s8.bf16 %v1862_v33  ;;  %v3103_v41 = vunpack.c.h.s8.bf16 %v1919_v29  ;;  %v1950_v33 = vld [vmem:[%s7026_s14 + $0x11f0] sm:$0xff] }
 0x5dd   : > { %4901 = vmatprep.subr.bf16.mxu1 %v2919_v49  ;;  %v1918_v49 = vld [vmem:[%s7026_s14 + $0x10f0] sm:$0xff] }
 0x5df   : > { %4859 = vmatpush1.bf16.msra.mxu0 %v2790_v45  ;;  %v3102_v45 = vunpack.c.h.s8.bf16 %v1918_v49 }
 0x5e0   : > { %4902 = vmatpush1.bf16.msra.mxu1 %v2918_v53  ;;  %4860 = vmatprep.subr.bf16.mxu0 %v2911_v42  ;;  %v3230_v53 = vunpack.c.h.s8.bf16 %v1982_v63  ;;  %v3095_v42 = vunpack.c.l.s8.bf16 %v1919_v29 }
 0x5e1   : > { %4903 = vmatprep.subr.bf16.mxu1 %v3039_v50  ;;  %v3223_v50 = vunpack.c.l.s8.bf16 %v1983_v31 }
 0x5e3   : > { %4861 = vmatpush2.bf16.msra.mxu0 %v2910_v54  ;;  %v3094_v54 = vunpack.c.l.s8.bf16 %v1918_v49 }
 0x5e4   : > { %4904 = vmatpush2.bf16.msra.mxu1 %v3038_v7  ;;  %4862 = vmatprep.subr.bf16.mxu0 %v2903_v15  ;;  %v3222_v7 = vunpack.c.l.s8.bf16 %v1982_v63  ;;  %v3087_v15 = vunpack.c.h.s8.bf16 %v1911_v30  ;;  %v1942_v63 = vld [vmem:[%s7026_s14 + $0x11b0] sm:$0xff] }
 0x5e5   : > { %4905 = vmatprep.subr.bf16.mxu1 %v3031_v62  ;;  %v1910_v62 = vld [vmem:[%s7026_s14 + $0x10b0] sm:$0xff] }
 0x5e6   : > { %v3078_v28 = vunpack.c.l.s8.bf16 %v1910_v62 }
 0x5e7   : > { %4863 = vmatpush2.bf16.msra.mxu0 %v2902_v6  ;;  %v3207_v6 = vunpack.c.l.s8.bf16 %v1975_v46 }
 0x5e8   : > { %4906 = vmatpush2.bf16.msra.mxu1 %v3030_v27  ;;  %4864 = vmatprep.subr.bf16.mxu0 %v2895_v36  ;;  %v1903_v27 = vld [vmem:[%s7026_s14 + $0x1078] sm:$0xff] }
 0x5e9   : > { %4907 = vmatprep.subr.bf16.mxu1 %v3023_v58  ;;  %v1967_v36 = vld [vmem:[%s7026_s14 + $0x1278] sm:$0xff]  ;;  %v3071_v58 = vunpack.c.h.s8.bf16 %v1903_v27  ;;  %v3063_v4 = vunpack.c.l.s8.bf16 %v1903_v27 }
 0x5ea   : > { %v3191_v43 = vunpack.c.l.s8.bf16 %v1967_v36 }
 0x5eb   : > { %4865 = vmatpush2.bf16.msra.mxu0 %v2894_v13  ;;  %v3199_v13 = vunpack.c.h.s8.bf16 %v1967_v36 }
 0x5ec   : > { %4908 = vmatpush2.bf16.msra.mxu1 %v3022_v51  ;;  %4866 = vmatprep.subr.bf16.mxu0 %v2887_v0  ;;  %v1966_v51 = vld [vmem:[%s7026_s14 + $0x1270] sm:$0xff]  ;;  %v3070_v0 = vunpack.c.h.s8.bf16 %v1902_v47 }
 0x5ed   : > { %4909 = vmatprep.subr.bf16.mxu1 %v3015_v1  ;;  %v3198_v1 = vunpack.c.h.s8.bf16 %v1966_v51  ;;  %v3190_v2 = vunpack.c.l.s8.bf16 %v1966_v51  ;;  %v1926_v51 = vld [vmem:[%s7026_s14 + $0x1130] sm:$0xff] }
 0x5ef   : > { %4867 = vmatpush2.bf16.msra.mxu0 %v2886_v5  ;;  %v1895_v5 = vld [vmem:[%s7026_s14 + $0x1038] sm:$0xff] }
 0x5f0   : > { %4910 = vmatpush2.bf16.msra.mxu1 %v3014_v10  ;;  %4868 = vmatprep.subr.bf16.mxu0 %v2879_v16  ;;  %v1959_v10 = vld [vmem:[%s7026_s14 + $0x1238] sm:$0xff]  ;;  %v3062_v16 = vunpack.c.l.s8.bf16 %v1902_v47  ;;  %v3047_v25 = vunpack.c.l.s8.bf16 %v1895_v5 }
 0x5f1   : > { %4911 = vmatprep.subr.bf16.mxu1 %v3007_v3  ;;  %v3055_v3 = vunpack.c.h.s8.bf16 %v1895_v5  ;;  %v3175_v21 = vunpack.c.l.s8.bf16 %v1959_v10 }
 0x5f3   : > { %4869 = vmatpush2.bf16.msra.mxu0 %v2878_v23  ;;  %v3183_v23 = vunpack.c.h.s8.bf16 %v1959_v10 }
 0x5f4   : > { %4912 = vmatpush2.bf16.msra.mxu1 %v3006_v55  ;;  %4870 = vmatprep.subr.bf16.mxu0 %v2871_v11  ;;  %v1958_v55 = vld [vmem:[%s7026_s14 + $0x1230] sm:$0xff]  ;;  %v3054_v11 = vunpack.c.h.s8.bf16 %v1894_v38 }
 0x5f5   : > { %4913 = vmatprep.subr.bf16.mxu1 %v2999_v24  ;;  %v3182_v24 = vunpack.c.h.s8.bf16 %v1958_v55  ;;  %v3174_v26 = vunpack.c.l.s8.bf16 %v1958_v55 }
 0x5f7   : > { %4871 = vmatpush2.bf16.msra.mxu0 %v2870_v39  ;;  %v1951_v39 = vld [vmem:[%s7026_s14 + $0x11f8] sm:$0xff] }
 0x5f8   : > { %4914 = vmatpush2.bf16.msra.mxu1 %v2998_v52  ;;  %4872 = vmatprep.subr.bf16.mxu0 %v2863_v22  ;;  %v2015_v52 = vld [vmem:[%s7026_s14 + $0x13f8] sm:$0xff]  ;;  %v3046_v22 = vunpack.c.l.s8.bf16 %v1894_v38  ;;  %v3159_v29 = vunpack.c.l.s8.bf16 %v1951_v39 }
 0x5f9   : > { %4915 = vmatprep.subr.bf16.mxu1 %v2991_v8  ;;  %v3167_v8 = vunpack.c.h.s8.bf16 %v1951_v39  ;;  %v3287_v31 = vunpack.c.l.s8.bf16 %v2015_v52 }
 0x5fb   : > { %4873 = vmatpush2.bf16.msra.mxu0 %v2862_v40  ;;  %v3295_v40 = vunpack.c.h.s8.bf16 %v2015_v52 }
 0x5fc   : > { %4916 = vmatpush2.bf16.msra.mxu1 %v2990_v32  ;;  %4874 = vmatprep.subr.bf16.mxu0 %v2855_v34  ;;  %v2014_v32 = vld [vmem:[%s7026_s14 + $0x13f0] sm:$0xff]  ;;  %v3166_v34 = vunpack.c.h.s8.bf16 %v1950_v33 }
 0x5fd   : > { %4917 = vmatprep.subr.bf16.mxu1 %v2983_v59  ;;  %v3294_v59 = vunpack.c.h.s8.bf16 %v2014_v32  ;;  %v3286_v49 = vunpack.c.l.s8.bf16 %v2014_v32 }
 0x5ff   : > { %4875 = vmatpush2.bf16.msra.mxu0 %v2854_v14  ;;  %v1943_v14 = vld [vmem:[%s7026_s14 + $0x11b8] sm:$0xff] }
 0x600   : > { %4918 = vmatpush2.bf16.msra.mxu1 %v2982_v37  ;;  %4930 = vmatprep.subr.bf16.mxu0 %v3103_v41  ;;  %v2007_v37 = vld [vmem:[%s7026_s14 + $0x13b8] sm:$0xff]  ;;  %v3158_v41 = vunpack.c.l.s8.bf16 %v1950_v33 }
 0x601   : > { %4973 = vmatprep.subr.bf16.mxu1 %v3231_v44  ;;  %v3151_v44 = vunpack.c.h.s8.bf16 %v1943_v14  ;;  %v3271_v46 = vunpack.c.l.s8.bf16 %v2007_v37 }
 0x602   : > { %4877 = vmatmul.mubr.bf16.vlgmr.msra.gmra.mxu0 %v7273_v57  ;;  %v3086_v57 = vunpack.c.h.s8.bf16 %v1910_v62 }
 0x603   : > { %4920 = vmatmul.mubr.bf16.vlgmr.msra.gmra.mxu1 %v7275_v60  ;;  %4931 = vmatpush1.bf16.msra.mxu0 %v3102_v45  ;;  %v3214_v60 = vunpack.c.h.s8.bf16 %v1974_v12  ;;  %v3279_v45 = vunpack.c.h.s8.bf16 %v2007_v37  ;;  %v4663_v38 = vpop.f32.mrf.mxu1 }
 0x604   : > { %4962 = vmatprep.mubr.bf16.mxu0 %v7432_v35  ;;  %4974 = vmatpush1.bf16.msra.mxu1 %v3230_v53  ;;  %v3079_v35 = vunpack.c.l.s8.bf16 %v1911_v30  ;;  %v2006_v53 = vld [vmem:[%s7026_s14 + $0x13b0] sm:$0xff] }
 0x605   : > { %5005 = vmatprep.mubr.bf16.mxu1 %v7436_v9  ;;  %4932 = vmatprep.subr.bf16.mxu0 %v3095_v42  ;;  %v3206_v9 = vunpack.c.l.s8.bf16 %v1974_v12  ;;  %v3150_v42 = vunpack.c.h.s8.bf16 %v1942_v63  ;;  %v3278_v30 = vunpack.c.h.s8.bf16 %v2006_v53  ;;  %v3270_v62 = vunpack.c.l.s8.bf16 %v2006_v53  ;;  %v1934_v12 = vld [vmem:[%s7026_s14 + $0x1170] sm:$0xff]  ;;  %v4665_v55 = vpop.f32.mrf.mxu1 }
 0x606   : > { %4975 = vmatprep.subr.bf16.mxu1 %v3223_v50  ;;  %v3143_v50 = vunpack.c.l.s8.bf16 %v1943_v14 }
 0x607   : > { %4933 = vmatpush1.bf16.msra.mxu0 %v3094_v54  ;;  %v1935_v54 = vld [vmem:[%s7026_s14 + $0x1178] sm:$0xff] }
 0x608   : > { %4976 = vmatpush1.bf16.msra.mxu1 %v3222_v7  ;;  %4934 = vmatprep.subr.bf16.mxu0 %v3087_v15  ;;  %v1999_v7 = vld [vmem:[%s7026_s14 + $0x1378] sm:$0xff]  ;;  %v3142_v15 = vunpack.c.l.s8.bf16 %v1942_v63  ;;  %v3127_v27 = vunpack.c.l.s8.bf16 %v1935_v54 }
 0x609   : > { %4977 = vmatprep.subr.bf16.mxu1 %v3215_v48  ;;  %v3135_v48 = vunpack.c.h.s8.bf16 %v1935_v54  ;;  %v3255_v36 = vunpack.c.l.s8.bf16 %v1999_v7 }
 0x60b   : > { %4935 = vmatpush1.bf16.msra.mxu0 %v3086_v57  ;;  %v3263_v57 = vunpack.c.h.s8.bf16 %v1999_v7 }
 0x60c   : > { %4978 = vmatpush1.bf16.msra.mxu1 %v3214_v60  ;;  %4936 = vmatprep.subr.bf16.mxu0 %v3079_v35  ;;  %v1998_v60 = vld [vmem:[%s7026_s14 + $0x1370] sm:$0xff]  ;;  %v3134_v35 = vunpack.c.h.s8.bf16 %v1934_v12 }
 0x60d   : > { %4979 = vmatprep.subr.bf16.mxu1 %v3207_v6  ;;  %v3262_v6 = vunpack.c.h.s8.bf16 %v1998_v60  ;;  %v3254_v47 = vunpack.c.l.s8.bf16 %v1998_v60 }
 0x60f   : > { %4937 = vmatpush1.bf16.msra.mxu0 %v3078_v28  ;;  %v1927_v28 = vld [vmem:[%s7026_s14 + $0x1138] sm:$0xff] }
 0x610   : > { %4980 = vmatpush1.bf16.msra.mxu1 %v3206_v9  ;;  %4938 = vmatprep.subr.bf16.mxu0 %v3071_v58  ;;  %v1991_v9 = vld [vmem:[%s7026_s14 + $0x1338] sm:$0xff]  ;;  %v3126_v58 = vunpack.c.l.s8.bf16 %v1934_v12  ;;  %v3111_v5 = vunpack.c.l.s8.bf16 %v1927_v28 }
 0x611   : > { %4981 = vmatprep.subr.bf16.mxu1 %v3199_v13  ;;  %v3119_v13 = vunpack.c.h.s8.bf16 %v1927_v28  ;;  %v3239_v10 = vunpack.c.l.s8.bf16 %v1991_v9 }
 0x613   : > { %4939 = vmatpush1.bf16.msra.mxu0 %v3070_v0  ;;  %v3247_v0 = vunpack.c.h.s8.bf16 %v1991_v9 }
 0x614   : > { %4982 = vmatpush1.bf16.msra.mxu1 %v3198_v1  ;;  %4940 = vmatprep.subr.bf16.mxu0 %v3063_v4  ;;  %v1990_v1 = vld [vmem:[%s7026_s14 + $0x1330] sm:$0xff]  ;;  %v3118_v4 = vunpack.c.h.s8.bf16 %v1926_v51 }
 0x615   : > { %4983 = vmatprep.subr.bf16.mxu1 %v3191_v43  ;;  %v3246_v43 = vunpack.c.h.s8.bf16 %v1990_v1 }
 0x617   : > { %4941 = vmatpush1.bf16.msra.mxu0 %v3062_v16  ;;  %v3110_v16 = vunpack.c.l.s8.bf16 %v1926_v51 }
 0x618   : > { %4984 = vmatpush1.bf16.msra.mxu1 %v3190_v2  ;;  %4942 = vmatprep.subr.bf16.mxu0 %v3055_v3  ;;  %v3238_v2 = vunpack.c.l.s8.bf16 %v1990_v1  ;;  %v4620_v3 = vpop.f32.mrf.mxu0 }
 0x619   : > { %4985 = vmatprep.subr.bf16.mxu1 %v3183_v23 }
 0x61a   : > { %v4622_v23 = vpop.f32.mrf.mxu0 }
 0x61b   : > { %4943 = vmatpush1.bf16.msra.mxu0 %v3054_v11  ;;  %v4666_v37 = vadd.f32 %v4665_v55, %v4622_v23 }
 0x61c   : > { %4986 = vmatpush1.bf16.msra.mxu1 %v3182_v24  ;;  %4944 = vmatprep.subr.bf16.mxu0 %v3047_v25  ;;  %v4624_v11 = vpop.f32.mrf.mxu0  ;;  %v4667_v24 = vpop.f32.mrf.mxu1 }
 0x61d   : > { %4987 = vmatprep.subr.bf16.mxu1 %v3175_v21 }
 0x61e   : > { %v4626_v25 = vpop.f32.mrf.mxu0  ;;  %v4669_v21 = vpop.f32.mrf.mxu1 }
 0x61f   : > { %4945 = vmatpush1.bf16.msra.mxu0 %v3046_v22 }
 0x620   : > { %4988 = vmatpush1.bf16.msra.mxu1 %v3174_v26  ;;  %4946 = vmatprep.subr.bf16.mxu0 %v3167_v8 }
 0x621   : > { %4989 = vmatprep.subr.bf16.mxu1 %v3295_v40 }
 0x623   : > { %4947 = vmatpush2.bf16.msra.mxu0 %v3166_v34 }
 0x624   : > { %4990 = vmatpush2.bf16.msra.mxu1 %v3294_v59  ;;  %4948 = vmatprep.subr.bf16.mxu0 %v3159_v29 }
 0x625   : > { %4991 = vmatprep.subr.bf16.mxu1 %v3287_v31  ;;  %v4664_v31 = vadd.f32 %v4663_v38, %v4620_v3  ;;  %v1346_v38 = vld [vmem:[#allocation2 + $0x8] sm:$0xff] }
 0x627   : > { %4949 = vmatpush2.bf16.msra.mxu0 %v3158_v41 }
 0x628   : > { %4992 = vmatpush2.bf16.msra.mxu1 %v3286_v49  ;;  %4950 = vmatprep.subr.bf16.mxu0 %v3151_v44  ;;  %v4668_v44 = vadd.f32 %v4667_v24, %v4624_v11 }
 0x629   : > { %4993 = vmatprep.subr.bf16.mxu1 %v3279_v45 }
 0x62b   : > { %4951 = vmatpush2.bf16.msra.mxu0 %v3150_v42  ;;  %v4670_v42 = vadd.f32 %v4669_v21, %v4626_v25  ;;  %v1347_v21 = vld [vmem:[#allocation2 + $0x48] sm:$0xff] }
 0x62c   : > { %4994 = vmatpush2.bf16.msra.mxu1 %v3278_v30  ;;  %4952 = vmatprep.subr.bf16.mxu0 %v3143_v50 }
 0x62d   : > { %4995 = vmatprep.subr.bf16.mxu1 %v3271_v46 }
 0x62f   : > { %4953 = vmatpush2.bf16.msra.mxu0 %v3142_v15 }
 0x630   : > { %4996 = vmatpush2.bf16.msra.mxu1 %v3270_v62  ;;  %4954 = vmatprep.subr.bf16.mxu0 %v3135_v48 }
 0x631   : > { %4997 = vmatprep.subr.bf16.mxu1 %v3263_v57 }
 0x633   : > { %4955 = vmatpush2.bf16.msra.mxu0 %v3134_v35 }
 0x634   : > { %4998 = vmatpush2.bf16.msra.mxu1 %v3262_v6  ;;  %4956 = vmatprep.subr.bf16.mxu0 %v3127_v27 }
 0x635   : > { %4999 = vmatprep.subr.bf16.mxu1 %v3255_v36 }
 0x637   : > { %4957 = vmatpush2.bf16.msra.mxu0 %v3126_v58 }
 0x638   : > { %5000 = vmatpush2.bf16.msra.mxu1 %v3254_v47  ;;  %4958 = vmatprep.subr.bf16.mxu0 %v3119_v13 }
 0x639   : > { %5001 = vmatprep.subr.bf16.mxu1 %v3247_v0 }
 0x63b   : > { %4959 = vmatpush2.bf16.msra.mxu0 %v3118_v4 }
 0x63c   : > { %5002 = vmatpush2.bf16.msra.mxu1 %v3246_v43  ;;  %4960 = vmatprep.subr.bf16.mxu0 %v3111_v5 }
 0x63d   : > { %5003 = vmatprep.subr.bf16.mxu1 %v3239_v10 }
 0x63f   : > { %4961 = vmatpush2.bf16.msra.mxu0 %v3110_v16 }
 0x640   : > { %5004 = vmatpush2.bf16.msra.mxu1 %v3238_v2 }
 0x642   : > { %4963 = vmatmul.mubr.bf16.vlgmr.msra.gmra.mxu0 %v7285_v56  ;;  %v4706_v39 = vpop.f32.mrf.mxu0 }
 0x643   : > { %5006 = vmatmul.mubr.bf16.vlgmr.msra.gmra.mxu1 %v7287_v61  ;;  %v4749_v52 = vpop.f32.mrf.mxu1  ;;  %v4707_v41 = vadd.f32 %v4706_v39, %v4664_v31 }
 0x644   : > { %v4708_v22 = vpop.f32.mrf.mxu0 }
 0x645   : > { %v4751_v26 = vpop.f32.mrf.mxu1  ;;  %v4709_v63 = vadd.f32 %v4708_v22, %v4666_v37  ;;  %v4750_v30 = vadd.f32 %v4749_v52, %v4707_v41 }
 0x646   : > { %v4710_v8 = vpop.f32.mrf.mxu0 }
 0x647   : > { %v4753_v33 = vpop.f32.mrf.mxu1  ;;  %v4711_v50 = vadd.f32 %v4710_v8, %v4668_v44  ;;  %v4752_v54 = vadd.f32 %v4751_v26, %v4709_v63 }
 0x648   : > { %v4712_v40 = vpop.f32.mrf.mxu0 }
 0x649   : > { %v4755_v32 = vpop.f32.mrf.mxu1  ;;  %v4713_v7 = vadd.f32 %v4712_v40, %v4670_v42  ;;  %v4754_v48 = vadd.f32 %v4753_v33, %v4711_v50  ;;  %v1354_v40 = vld [vmem:[#allocation2 + $0x78] sm:$0xff] }
 0x64b   : > { %v4756_v60 = vadd.f32 %v4755_v32, %v4713_v7 }
 0x682   : > { %v4792_v34 = vpop.f32.mrf.mxu0 }
 0x683   : > { %v4835_v56 = vpop.f32.mrf.mxu1  ;;  %v4793_v15 = vadd.f32 %v4792_v34, %v4750_v30 }
 0x684   : > { %v4794_v59 = vpop.f32.mrf.mxu0 }
 0x685   : > { %v4837_v61 = vpop.f32.mrf.mxu1  ;;  %v4795_v12 = vadd.f32 %v4794_v59, %v4752_v54  ;;  %v4836_v35 = vadd.f32 %v4835_v56, %v4793_v15 }
 0x686   : > { %v4796_v29 = vpop.f32.mrf.mxu0 }
 0x687   : > { %v4839_v14 = vpop.f32.mrf.mxu1  ;;  %v4797_v6 = vadd.f32 %v4796_v29, %v4754_v48  ;;  %v4838_v36 = vadd.f32 %v4837_v61, %v4795_v12  ;;  %v1355_v61 = vld [vmem:[#allocation2 + $0x28] sm:$0xff] }
 0x688   : > { %v4798_v49 = vpop.f32.mrf.mxu0 }
 0x689   : > { %v4841_v45 = vpop.f32.mrf.mxu1  ;;  %v4799_v28 = vadd.f32 %v4798_v49, %v4756_v60  ;;  %v4840_v47 = vadd.f32 %v4839_v14, %v4797_v6 }
 0x68b   : > { %v4842_v0 = vadd.f32 %v4841_v45, %v4799_v28 }
 0x6c2   : > { %v4878_v53 = vpop.f32.mrf.mxu0 }
 0x6c3   : > { %v4921_v46 = vpop.f32.mrf.mxu1  ;;  %v4879_v9 = vadd.f32 %v4878_v53, %v4836_v35 }
 0x6c4   : > { %v4880_v62 = vpop.f32.mrf.mxu0 }
 0x6c5   : > { %v4923_v57 = vpop.f32.mrf.mxu1  ;;  %v4881_v13 = vadd.f32 %v4880_v62, %v4838_v36  ;;  %v4922_v1 = vadd.f32 %v4921_v46, %v4879_v9 }
 0x6c6   : > { %v4882_v27 = vpop.f32.mrf.mxu0 }
 0x6c7   : > { %v4925_v58 = vpop.f32.mrf.mxu1  ;;  %v4883_v4 = vadd.f32 %v4882_v27, %v4840_v47  ;;  %v4924_v10 = vadd.f32 %v4923_v57, %v4881_v13 }
 0x6c8   : > { %v4884_v51 = vpop.f32.mrf.mxu0 }
 0x6c9   : > { %v4927_v43 = vpop.f32.mrf.mxu1  ;;  %v4885_v16 = vadd.f32 %v4884_v51, %v4842_v0  ;;  %v4926_v55 = vadd.f32 %v4925_v58, %v4883_v4 }
 0x6cb   : > { %v4928_v52 = vadd.f32 %v4927_v43, %v4885_v16 }
 0x702   : > { %v4964_v5 = vpop.f32.mrf.mxu0 }
 0x703   : > { %v4965_v2 = vadd.f32 %v4964_v5, %v4922_v1  ;;  %v5007_v3 = vpop.f32.mrf.mxu1 }
 0x704   : > { %v4966_v23 = vpop.f32.mrf.mxu0 }
 0x705   : > { %v5008_v11 = vadd.f32 %v5007_v3, %v4965_v2  ;;  %v4967_v24 = vadd.f32 %v4966_v23, %v4924_v10  ;;  %v5009_v25 = vpop.f32.mrf.mxu1 }
 0x706   : > { %v4968_v39 = vpop.f32.mrf.mxu0 }
 0x707   : > { %v5022_v22 = vadd.f32 %v5008_v11, %v1346_v38  ;;  %v5010_v26 = vadd.f32 %v5009_v25, %v4967_v24  ;;  %v4969_v8 = vadd.f32 %v4968_v39, %v4926_v55  ;;  %v5011_v33 = vpop.f32.mrf.mxu1 }
 0x708   : > { %v4970_v32 = vpop.f32.mrf.mxu0 }
 0x709   : > { %5038 = vst [vmem:[#allocation2 + $0x8] sm:$0xff] %v5022_v22  ;;  %v5023_v34 = vadd.f32 %v5010_v26, %v1347_v21  ;;  %v5012_v56 = vadd.f32 %v5011_v33, %v4969_v8  ;;  %v4971_v59 = vadd.f32 %v4970_v32, %v4928_v52  ;;  %v5013_v29 = vpop.f32.mrf.mxu1 }
 0x70b   : > { %5039 = vst [vmem:[#allocation2 + $0x48] sm:$0xff] %v5023_v34  ;;  %v5030_v31 = vadd.f32 %v5012_v56, %v1354_v40  ;;  %v5014_v14 = vadd.f32 %v5013_v29, %v4971_v59  ;;  %5051 = sbr.rel (%p6131_p3) target bundleno = 2080 (0x820), region = 88 }
 0x70d   : > { %5046 = vst [vmem:[#allocation2 + $0x78] sm:$0xff] %v5030_v31  ;;  %v5031_v37 = vadd.f32 %v5014_v14, %v1355_v61 }
 0x70f   : > { %5047 = vst [vmem:[#allocation2 + $0x28] sm:$0xff] %v5031_v37 }
 0x710   : > { %v6475_v41 = vld [vmem:[#allocation11 + $0x78] sm:$0xff]   ;;  %v6479_v45 = vld [vmem:[#allocation11 + $0x70] sm:$0xff]   ;;  %v6483_v50 = vld [vmem:[#allocation11 + $0x68] sm:$0xff]  }
 0x711   : > { %v6476_v49 = vld [vmem:[#allocation11 + $0xf8] sm:$0xff]   ;;  %6206 = vmatprep.subr.bf16.mxu0 %v6475_v41  ;;  %v6480_v53 = vld [vmem:[#allocation11 + $0xf0] sm:$0xff]   ;;  %v6484_v46 = vld [vmem:[#allocation11 + $0xe8] sm:$0xff]  }
 0x712   : > { %v6477_v44 = vld [vmem:[#allocation11 + $0x38] sm:$0xff]   ;;  %6228 = vmatprep.subr.bf16.mxu1 %v6476_v49  ;;  %v6481_v42 = vld [vmem:[#allocation11 + $0x30] sm:$0xff]   ;;  %v6485_v54 = vld [vmem:[#allocation11 + $0x28] sm:$0xff]  }
 0x713   : > { %v6478_v63 = vld [vmem:[#allocation11 + $0xb8] sm:$0xff]   ;;  %6207 = vmatpush3.bf16.msra.mxu0 %v6477_v44  ;;  %v6482_v30 = vld [vmem:[#allocation11 + $0xb0] sm:$0xff]   ;;  %v6486_v7 = vld [vmem:[#allocation11 + $0xa8] sm:$0xff]  }
 0x714   : > { %6229 = vmatpush3.bf16.msra.mxu1 %v6478_v63  ;;  %6208 = vmatprep.subr.bf16.mxu0 %v6479_v45  ;;  %v6487_v15 = vld [vmem:[#allocation11 + $0x60] sm:$0xff]   ;;  %v6491_v57 = vld [vmem:[#allocation11 + $0x58] sm:$0xff]   ;;  %v6495_v27 = vld [vmem:[#allocation11 + $0x50] sm:$0xff]  }
 0x715   : > { %6230 = vmatprep.subr.bf16.mxu1 %v6480_v53  ;;  %v6488_v62 = vld [vmem:[#allocation11 + $0xe0] sm:$0xff]   ;;  %v6492_v60 = vld [vmem:[#allocation11 + $0xd8] sm:$0xff]   ;;  %v6496_v36 = vld [vmem:[#allocation11 + $0xd0] sm:$0xff]  }
 0x716   : > { %v6489_v48 = vld [vmem:[#allocation11 + $0x20] sm:$0xff]   ;;  %v6493_v35 = vld [vmem:[#allocation11 + $0x18] sm:$0xff]   ;;  %v6497_v28 = vld [vmem:[#allocation11 + $0x10] sm:$0xff]  }
 0x717   : > { %6209 = vmatpush3.bf16.msra.mxu0 %v6481_v42  ;;  %v6490_v12 = vld [vmem:[#allocation11 + $0xa0] sm:$0xff]   ;;  %v6494_v6 = vld [vmem:[#allocation11 + $0x98] sm:$0xff]   ;;  %v6498_v9 = vld [vmem:[#allocation11 + $0x90] sm:$0xff]  }
 0x718   : > { %6231 = vmatpush3.bf16.msra.mxu1 %v6482_v30  ;;  %6210 = vmatprep.subr.bf16.mxu0 %v6483_v50  ;;  %v6499_v58 = vld [vmem:[#allocation11 + $0x48] sm:$0xff]   ;;  %v6503_v0 = vld [vmem:[#allocation11 + $0x40] sm:$0xff]   ;;  %v8181_v16 = vld [vmem:[#allocation8] sm:$0xff] }
 0x719   : > { %6232 = vmatprep.subr.bf16.mxu1 %v6484_v46  ;;  %v6500_v47 = vld [vmem:[#allocation11 + $0xc8] sm:$0xff]   ;;  %v6504_v1 = vld [vmem:[#allocation11 + $0xc0] sm:$0xff]   ;;  %v5077_v2 = vrot.slane %v8181_v16, %v7155_v17  ;;  %v8185_v3 = vld [vmem:[#allocation10] sm:$0xff]  ;;  %v5085_v55 = vrot.slane %v8181_v16, %v7158_v18  ;;  %v5073_v11 = vrot.slane %v8181_v16, %v7161_v19  ;;  %v5081_v24 = vrot.slane %v8181_v16, %v7164_v20 }
 0x71a   : > { %v6501_v13 = vld [vmem:[#allocation11 + $0x8] sm:$0xff]   ;;  %v6505_v4 = vld [vmem:[#allocation11] sm:$0xff]   ;;  %v5135_v25 = vrot.slane %v8185_v3, %v7155_v17  ;;  %v5143_v21 = vrot.slane %v8185_v3, %v7158_v18  ;;  %v5052_v39 = vld [vmem:[#allocation2 + $0x30] sm:$0xff]  ;;  %v5131_v22 = vrot.slane %v8185_v3, %v7161_v19  ;;  %v5139_v8 = vrot.slane %v8185_v3, %v7164_v20 }
 0x71b   : > { %6211 = vmatpush3.bf16.msra.mxu0 %v6485_v54  ;;  %v6502_v51 = vld [vmem:[#allocation11 + $0x88] sm:$0xff]   ;;  %v6506_v43 = vld [vmem:[#allocation11 + $0x80] sm:$0xff]   ;;  %v5062_v56 = vld [vmem:[#allocation2 + $0x10] sm:$0xff]  ;;  %v5110_v59 = vmul.f32 %v5073_v11, %v5052_v39 }
 0x71c   : > { %6233 = vmatpush3.bf16.msra.mxu1 %v6486_v7  ;;  %6212 = vmatprep.subr.bf16.mxu0 %v6487_v15  ;;  %v5053_v5 = vld [vmem:[#allocation2] sm:$0xff]  ;;  %v5055_v38 = vld [vmem:[#allocation2 + $0x18] sm:$0xff]  ;;  %v5120_v29 = vmul.f32 %v5081_v24, %v5062_v56  ;;  %v6507_v31 = vld [vmem:[#allocation11 + $0x178] sm:$0xff]  }
 0x71d   : > { %6234 = vmatprep.subr.bf16.mxu1 %v6488_v62  ;;  %v5061_v10 = vld [vmem:[#allocation2 + $0x20] sm:$0xff]  ;;  %v5063_v23 = vld [vmem:[#allocation2 + $0x38] sm:$0xff]  ;;  %v5111_v33 = vmul.f32 %v5077_v2, %v5053_v5  ;;  %v5113_v32 = vmul.f32 %v5085_v55, %v5055_v38  ;;  %v6508_v49 = vld [vmem:[#allocation11 + $0x1f8] sm:$0xff]   ;;  %v5168_v19 = vadd.f32 %v5131_v22, %v5110_v59 }
 0x71e   : > { %v5060_v52 = vld [vmem:[#allocation2 + $0x40] sm:$0xff]  ;;  %v5054_v26 = vld [vmem:[#allocation2 + $0x58] sm:$0xff]  ;;  %v5119_v40 = vmul.f32 %v5077_v2, %v5061_v10  ;;  %v5121_v34 = vmul.f32 %v5085_v55, %v5063_v23  ;;  %v5178_v45 = vadd.f32 %v5139_v8, %v5120_v29  ;;  %v6509_v50 = vld [vmem:[#allocation11 + $0x138] sm:$0xff]  }
 0x71f   : > { %6213 = vmatpush3.bf16.msra.mxu0 %v6489_v48  ;;  %v5118_v61 = vmul.f32 %v5073_v11, %v5060_v52  ;;  %v5112_v17 = vmul.f32 %v5081_v24, %v5054_v26  ;;  %v5169_v18 = vadd.f32 %v5135_v25, %v5111_v33  ;;  %v5171_v37 = vadd.f32 %v5143_v21, %v5113_v32  ;;  %v6510_v46 = vld [vmem:[#allocation11 + $0x1b8] sm:$0xff]   ;;  %v6511_v48 = vld [vmem:[#allocation11 + $0x170] sm:$0xff]   ;;  %v6531_v11 = vld [vmem:[#allocation11 + $0x148] sm:$0xff]  }
 0x720   : > { %6235 = vmatpush3.bf16.msra.mxu1 %v6490_v12  ;;  %6214 = vmatprep.subr.bf16.mxu0 %v6491_v57  ;;  %v5177_v14 = vadd.f32 %v5135_v25, %v5119_v40  ;;  %v5179_v41 = vadd.f32 %v5143_v21, %v5121_v34  ;;  %v5184_v54 = vmax.f32 %v5168_v19, 0.0  ;;  %v5194_v62 = vmax.f32 %v5178_v45, 0.0  ;;  %v6525_v5 = vld [vmem:[#allocation11 + $0x118] sm:$0xff]   ;;  %v6527_v2 = vld [vmem:[#allocation11 + $0x150] sm:$0xff]   ;;  %v6532_v24 = vld [vmem:[#allocation11 + $0x1c8] sm:$0xff]  }
 0x721   : > { %6236 = vmatprep.subr.bf16.mxu1 %v6492_v60  ;;  %v5176_v44 = vadd.f32 %v5131_v22, %v5118_v61  ;;  %v5170_v63 = vadd.f32 %v5139_v8, %v5112_v17  ;;  %v5185_v20 = vmax.f32 %v5169_v18, 0.0  ;;  %v5187_v42 = vmax.f32 %v5171_v37, 0.0  ;;  %v6526_v10 = vld [vmem:[#allocation11 + $0x198] sm:$0xff]   ;;  %v6528_v38 = vld [vmem:[#allocation11 + $0x1d0] sm:$0xff]   ;;  %v6533_v25 = vld [vmem:[#allocation11 + $0x108] sm:$0xff]  }
 0x722   : > { %v5193_v53 = vmax.f32 %v5177_v14, 0.0  ;;  %v5195_v30 = vmax.f32 %v5179_v41, 0.0  ;;  %v6529_v23 = vld [vmem:[#allocation11 + $0x110] sm:$0xff]   ;;  %v6534_v21 = vld [vmem:[#allocation11 + $0x188] sm:$0xff]   ;;  %v6535_v39 = vld [vmem:[#allocation11 + $0x140] sm:$0xff]  }
 0x723   : > { %6215 = vmatpush3.bf16.msra.mxu0 %v6493_v35  ;;  %v5192_v7 = vmax.f32 %v5176_v44, 0.0  ;;  %v5186_v15 = vmax.f32 %v5170_v63, 0.0  ;;  %v6530_v55 = vld [vmem:[#allocation11 + $0x190] sm:$0xff]   ;;  %v8300_v52 = vld [vmem:[#allocation19_spill] sm:$0xff]  ;;  %v8303_v59 = vld [vmem:[#allocation22_spill] sm:$0xff] }
 0x724   : > { %6237 = vmatpush3.bf16.msra.mxu1 %v6494_v6  ;;  %6216 = vmatprep.subr.bf16.mxu0 %v6495_v27  ;;  %v5201_v12 = vpack.c.bf16 %v5193_v53, %v5185_v20  ;;  %v5203_v57 = vpack.c.bf16 %v5195_v30, %v5187_v42  ;;  %v6512_v6 = vld [vmem:[#allocation11 + $0x1f0] sm:$0xff]   ;;  %v5093_v22 = vrot.slane %v8181_v16, %v8300_v52  ;;  %v6536_v26 = vld [vmem:[#allocation11 + $0x1c0] sm:$0xff]   ;;  %v5056_v44 = vld [vmem:[#allocation2 + $0x50] sm:$0xff] }
 0x725   : > { %6238 = vmatprep.subr.bf16.mxu1 %v6496_v36  ;;  %v5200_v60 = vpack.c.bf16 %v5192_v7, %v5184_v54  ;;  %v5202_v35 = vpack.c.bf16 %v5194_v62, %v5186_v15  ;;  %v6513_v27 = vld [vmem:[#allocation11 + $0x130] sm:$0xff]   ;;  %v6537_v34 = vld [vmem:[#allocation11 + $0x100] sm:$0xff]   ;;  %v5151_v56 = vrot.slane %v8185_v3, %v8300_v52  ;;  %v5097_v61 = vrot.slane %v8181_v16, %v8303_v59  ;;  %v5064_v20 = vld [vmem:[#allocation2 + $0x60] sm:$0xff] }
 0x726   : > { %5759 = vmatprep.mubr.bf16.mxu0 %v5201_v12  ;;  %5800 = vmatprep.mubr.bf16.mxu1 %v5203_v57  ;;  %v6514_v36 = vld [vmem:[#allocation11 + $0x1b0] sm:$0xff]   ;;  %v6538_v17 = vld [vmem:[#allocation11 + $0x180] sm:$0xff]   ;;  %v5155_v63 = vrot.slane %v8185_v3, %v8303_v59 }
 0x727   : > { %6217 = vmatpush3.bf16.msra.mxu0 %v6497_v28  ;;  %v6515_v28 = vld [vmem:[#allocation11 + $0x168] sm:$0xff]   ;;  %v8302_v40 = vld [vmem:[#allocation21_spill] sm:$0xff]  ;;  %v5066_v30 = vld [vmem:[#allocation2 + $0x78] sm:$0xff] }
 0x728   : > { %6239 = vmatpush3.bf16.msra.mxu1 %v6498_v9  ;;  %6218 = vmatprep.subr.bf16.mxu0 %v6499_v58  ;;  %v6516_v9 = vld [vmem:[#allocation11 + $0x1e8] sm:$0xff]   ;;  %v5089_v32 = vrot.slane %v8181_v16, %v8302_v40  ;;  %v5057_v29 = vld [vmem:[#allocation2 + $0x68] sm:$0xff]  ;;  %v5147_v14 = vrot.slane %v8185_v3, %v8302_v40  ;;  %v5124_v12 = vmul.f32 %v5097_v61, %v5066_v30 }
 0x729   : > { %6240 = vmatprep.subr.bf16.mxu1 %v6500_v47  ;;  %v6517_v58 = vld [vmem:[#allocation11 + $0x128] sm:$0xff]   ;;  %v5115_v37 = vmul.f32 %v5093_v22, %v5057_v29  ;;  %v5067_v19 = vld [vmem:[#allocation2 + $0x28] sm:$0xff] }
 0x72a   : > { %v6518_v47 = vld [vmem:[#allocation11 + $0x1a8] sm:$0xff]   ;;  %v5114_v53 = vmul.f32 %v5089_v32, %v5056_v44  ;;  %v5058_v42 = vld [vmem:[#allocation2 + $0x8] sm:$0xff]  ;;  %v5122_v54 = vmul.f32 %v5089_v32, %v5064_v20 }
 0x72b   : > { %6219 = vmatpush3.bf16.msra.mxu0 %v6501_v13  ;;  %v6519_v13 = vld [vmem:[#allocation11 + $0x160] sm:$0xff]   ;;  %v8301_v8 = vld [vmem:[#allocation20_spill] sm:$0xff]  ;;  %v5116_v7 = vmul.f32 %v5097_v61, %v5058_v42 }
 0x72c   : > { %6241 = vmatpush3.bf16.msra.mxu1 %v6502_v51  ;;  %6220 = vmatprep.subr.bf16.mxu0 %v6503_v0  ;;  %v6520_v51 = vld [vmem:[#allocation11 + $0x1e0] sm:$0xff]   ;;  %v5101_v33 = vrot.slane %v8181_v16, %v8301_v8  ;;  %v5159_v18 = vrot.slane %v8185_v3, %v8301_v8 }
 0x72d   : > { %6242 = vmatprep.subr.bf16.mxu1 %v6504_v1  ;;  %v6521_v0 = vld [vmem:[#allocation11 + $0x120] sm:$0xff]  }
 0x72e   : > { %v6522_v1 = vld [vmem:[#allocation11 + $0x1a0] sm:$0xff]   ;;  %v5125_v45 = vmul.f32 %v5101_v33, %v5067_v19 }
 0x72f   : > { %6221 = vmatpush3.bf16.msra.mxu0 %v6505_v4  ;;  %v6523_v4 = vld [vmem:[#allocation11 + $0x158] sm:$0xff]  }
 0x730   : > { %6243 = vmatpush3.bf16.msra.mxu1 %v6506_v43  ;;  %6250 = vmatprep.subr.bf16.mxu0 %v6507_v31  ;;  %v6524_v43 = vld [vmem:[#allocation11 + $0x1d8] sm:$0xff]   ;;  %v5183_v62 = vadd.f32 %v5159_v18, %v5125_v45 }
 0x731   : > { %6272 = vmatprep.subr.bf16.mxu1 %v6508_v49  ;;  %v5065_v31 = vld [vmem:[#allocation2 + $0x70] sm:$0xff]  ;;  %v5059_v49 = vld [vmem:[#allocation2 + $0x48] sm:$0xff] }
 0x732   : > { %5760 = vmatmul.mubr.bf16.vlgmr.msra.gmra.mxu0 %v5200_v60  ;;  %v5123_v41 = vmul.f32 %v5093_v22, %v5065_v31  ;;  %v5117_v16 = vmul.f32 %v5101_v33, %v5059_v49  ;;  %v5180_v60 = vadd.f32 %v5147_v14, %v5122_v54 }
 0x733   : > { %5801 = vmatmul.mubr.bf16.vlgmr.msra.gmra.mxu1 %v5202_v35  ;;  %6251 = vmatpush3.bf16.msra.mxu0 %v6509_v50  ;;  %v5173_v50 = vadd.f32 %v5151_v56, %v5115_v37  ;;  %v5174_v35 = vadd.f32 %v5155_v63, %v5116_v7 }
 0x734   : > { %6273 = vmatpush3.bf16.msra.mxu1 %v6510_v46  ;;  %6252 = vmatprep.subr.bf16.mxu0 %v6511_v48  ;;  %v5181_v46 = vadd.f32 %v5151_v56, %v5123_v41  ;;  %v5175_v15 = vadd.f32 %v5159_v18, %v5117_v16  ;;  %v5172_v48 = vadd.f32 %v5147_v14, %v5114_v53 }
 0x735   : > { %6274 = vmatprep.subr.bf16.mxu1 %v6512_v6  ;;  %v5189_v57 = vmax.f32 %v5173_v50, 0.0 }
 0x736   : > { %v5197_v3 = vmax.f32 %v5181_v46, 0.0  ;;  %v5191_v6 = vmax.f32 %v5175_v15, 0.0 }
 0x737   : > { %6253 = vmatpush3.bf16.msra.mxu0 %v6513_v27  ;;  %v5199_v27 = vmax.f32 %v5183_v62, 0.0 }
 0x738   : > { %6275 = vmatpush3.bf16.msra.mxu1 %v6514_v36  ;;  %6254 = vmatprep.subr.bf16.mxu0 %v6515_v28  ;;  %v5188_v36 = vmax.f32 %v5172_v48, 0.0  ;;  %v5182_v28 = vadd.f32 %v5155_v63, %v5124_v12 }
 0x739   : > { %6276 = vmatprep.subr.bf16.mxu1 %v6516_v9  ;;  %v5205_v9 = vpack.c.bf16 %v5197_v3, %v5189_v57 }
 0x73b   : > { %6255 = vmatpush3.bf16.msra.mxu0 %v6517_v58  ;;  %v5196_v58 = vmax.f32 %v5180_v60, 0.0  ;;  %5841 = vmatprep.mubr.bf16.mxu0 %v5205_v9 }
 0x73c   : > { %6277 = vmatpush3.bf16.msra.mxu1 %v6518_v47  ;;  %6256 = vmatprep.subr.bf16.mxu0 %v6519_v13  ;;  %v5190_v47 = vmax.f32 %v5174_v35, 0.0  ;;  %v5207_v13 = vpack.c.bf16 %v5199_v27, %v5191_v6 }
 0x73d   : > { %6278 = vmatprep.subr.bf16.mxu1 %v6520_v51  ;;  %v5198_v51 = vmax.f32 %v5182_v28, 0.0 }
 0x73e   : > { %5882 = vmatprep.mubr.bf16.mxu1 %v5207_v13 }
 0x73f   : > { %6257 = vmatpush3.bf16.msra.mxu0 %v6521_v0  ;;  %v5204_v0 = vpack.c.bf16 %v5196_v58, %v5188_v36 }
 0x740   : > { %6279 = vmatpush3.bf16.msra.mxu1 %v6522_v1  ;;  %6258 = vmatprep.subr.bf16.mxu0 %v6523_v4  ;;  %v5206_v1 = vpack.c.bf16 %v5198_v51, %v5190_v47 }
 0x741   : > { %6280 = vmatprep.subr.bf16.mxu1 %v6524_v43 }
 0x743   : > { %6259 = vmatpush3.bf16.msra.mxu0 %v6525_v5 }
 0x744   : > { %6281 = vmatpush3.bf16.msra.mxu1 %v6526_v10  ;;  %6260 = vmatprep.subr.bf16.mxu0 %v6527_v2 }
 0x745   : > { %6282 = vmatprep.subr.bf16.mxu1 %v6528_v38 }
 0x747   : > { %6261 = vmatpush3.bf16.msra.mxu0 %v6529_v23 }
 0x748   : > { %6283 = vmatpush3.bf16.msra.mxu1 %v6530_v55  ;;  %6262 = vmatprep.subr.bf16.mxu0 %v6531_v11  ;;  %v6132_v55 = vld [vmem:[#allocation13] ss:$0 sm:$0xff] }
 0x749   : > { %6284 = vmatprep.subr.bf16.mxu1 %v6532_v24 }
 0x74b   : > { %6263 = vmatpush3.bf16.msra.mxu0 %v6533_v25 }
 0x74c   : > { %6285 = vmatpush3.bf16.msra.mxu1 %v6534_v21  ;;  %6264 = vmatprep.subr.bf16.mxu0 %v6535_v39 }
 0x74d   : > { %6286 = vmatprep.subr.bf16.mxu1 %v6536_v26 }
 0x74f   : > { %6265 = vmatpush3.bf16.msra.mxu0 %v6537_v34 }
 0x750   : > { %6287 = vmatpush3.bf16.msra.mxu1 %v6538_v17 }
 0x752   : > { %5842 = vmatmul.mubr.bf16.vlgmr.msra.gmra.mxu0 %v5204_v0 }
 0x753   : > { %5883 = vmatmul.mubr.bf16.vlgmr.msra.gmra.mxu1 %v5206_v1 }
 0x7f2   : > { %v6222_v4 = vpop.f32.mrf.mxu0 }
 0x7f3   : > { %v6244_v43 = vpop.f32.mrf.mxu1 }
 0x7f4   : > { %v6223_v5 = vpop.f32.mrf.mxu0 }
 0x7f5   : > { %v6245_v10 = vpop.f32.mrf.mxu1  ;;  %v6224_v38 = vadd.f32 %v6223_v5, %v6222_v4 }
 0x7f6   : > { %v6225_v2 = vpop.f32.mrf.mxu0  ;;  %v6246_v25 = vadd.f32 %v6245_v10, %v6244_v43 }
 0x7f7   : > { %v6247_v23 = vpop.f32.mrf.mxu1  ;;  %v5762_v24 = vadd.f32 %v6224_v38, %v6132_v55 }
 0x7f8   : > { %v6226_v11 = vpop.f32.mrf.mxu0 }
 0x7f9   : > { %v6227_v21 = vadd.f32 %v6226_v11, %v6225_v2  ;;  %v6248_v39 = vpop.f32.mrf.mxu1  ;;  %v5803_v8 = vadd.f32 %v6246_v25, %v5762_v24 }
 0x7fa   : > { %v6249_v56 = vadd.f32 %v6248_v39, %v6247_v23 }
 0x7fb   : > { %v5765_v33 = vadd.f32 %v6227_v21, %v6132_v55 }
 0x7fd   : > { %v5806_v31 = vadd.f32 %v6249_v56, %v5765_v33 }
 0x812   : > { %v6266_v52 = vpop.f32.mrf.mxu0 }
 0x813   : > { %v6288_v22 = vpop.f32.mrf.mxu1 }
 0x814   : > { %v6267_v26 = vpop.f32.mrf.mxu0 }
 0x815   : > { %v6268_v40 = vadd.f32 %v6267_v26, %v6266_v52  ;;  %v6289_v32 = vpop.f32.mrf.mxu1 }
 0x816   : > { %v6269_v34 = vpop.f32.mrf.mxu0  ;;  %v6290_v61 = vadd.f32 %v6289_v32, %v6288_v22 }
 0x817   : > { %v5844_v59 = vadd.f32 %v6268_v40, %v5803_v8  ;;  %v6291_v17 = vpop.f32.mrf.mxu1 }
 0x818   : > { %v6270_v29 = vpop.f32.mrf.mxu0 }
 0x819   : > { %v5885_v18 = vadd.f32 %v6290_v61, %v5844_v59  ;;  %v6271_v14 = vadd.f32 %v6270_v29, %v6269_v34  ;;  %v6292_v37 = vpop.f32.mrf.mxu1 }
 0x81a   : > { %v6293_v49 = vadd.f32 %v6292_v37, %v6291_v17 }
 0x81b   : > { %5891 = vst [vmem:[%s8304_s4] sm:$0xff] %v5885_v18  ;;  %v5847_v41 = vadd.f32 %v6271_v14, %v5806_v31 }
 0x81d   : > { %v5888_v19 = vadd.f32 %v6293_v49, %v5847_v41 }
 0x81f   : > { %5892 = vst [vmem:[%s8304_s4 + $0x8] sm:$0xff] %v5888_v19 }
 0x820 PF: > { %s26_s10 = sadd.s32 1, %s6789_s10   ;;  %s8305_s24 = sld [smem:[#allocation18_spill]] }
 0x821   : > { %p23_p10 = scmp.ge.s32.totalorder %s26_s10, 6   ;;  %s8306_s27 = smov %s6773_s28 }
 0x822   : > { %s8307_s28 = smov %s6777_s29  ;;  %s8308_s29 = smov %s6949_s21 }
 0x823   : > { %s8309_s30 = smov %s6785_s9  ;;  %25 = sbr.rel (!%p23_p10) target bundleno = 16 (0x10), region = 143 }
 0x826   : > { %s8310_s9 = smov %s8305_s24 }
 0x828   :  { %5915 = vsyncpa [#allocation4], 1 }
 0x829   :  { %5917 = vsyncpa [#allocation4 + $0x1], 1 }
 0x82a   :  { %5918 = vsyncpa [#allocation6], 1 }
 0x82b   :  { %5920 = vsyncpa [#allocation6 + $0x1], 1 }
 0x82c   :  { %5921 = vsyncpa [#allocation9], 1 }
 0x82d   :  { %5922 = vsyncpa [#allocation12], 1 }

</bundles_post_ra>
